<compile_context>
chip_gen: v5e
topology: v5e:2x2
jax: 0.10.0
libtpu: 0.0.40
codegen_flags: <defaults>
</compile_context>

<pallas_src>
import functools

import jax
import jax.numpy as jnp
from jax.experimental import pallas as pl
from jax.experimental.pallas import tpu as pltpu

# ----------------------------- model config ---------------------------------
INPUT_SIZE = 3
HIDDEN_SIZE = 64
LATENT_SIZE = 50
OUTPUT_SIZE = 1
NUM_LAYERS = 4


# ----------------------------- Pallas kernel ---------------------------------
def rnn_vae_kernel(x_ref, mask_ref,
                   e_wih0_ref, e_wih_ref, e_whh_ref, e_bgi_ref, e_bhn_ref,
                   fc2_w_ref, fc2_b_ref, fc3_w_ref, fc3_b_ref,
                   d_wih0_ref, d_wih_ref, d_whh_ref, d_bgi_ref, d_bhn_ref,
                   dfc_w_ref, dfc_b_ref,
                   xhat_ref, mulogvar_ref,
                   *, seq_len, batch, hidden, latent, num_layers):
    """Whole RNN_VAE forward in one kernel invocation (no grid, no scratch).

    Time-major flat layout: row index = t * batch + b.
      x_ref:     (S*B, I)          input sequence
      mask_ref:  (S*B, 1)          1.0 where t < lengths[b]
      *_wih0:    (K0, 3H)          layer-0 input weights, gate columns [r|z|n]
      *_wih:     (L-1, H, 3H)      layers 1.. input weights
      *_whh:     (L, H, 3H)        hidden weights
      *_bgi:     (L, 1, 3H)        [b_ir+b_hr | b_iz+b_hz | b_in]  (folded into gi)
      *_bhn:     (L, 1, H)         b_hn (stays inside the r*(...) term)
      fc2_w/b:   (H, 2*lat), (1, 2*lat)   fused fc21|fc22
      fc3_w/b:   (lat, H), (1, H)
      dfc_w/b:   (1, H), (1, 1)    final fc as a row vector (multiply+lane-reduce)
    Outputs: xhat (B, S) [exp already applied], mu|logvar fused (B, 2*lat).
    """
    f32 = jnp.float32
    H2 = 2 * hidden

    def mm(a, b):
        # Operands already arrive in the MXU dtype (f32 here); no in-kernel casts.
        return jnp.dot(a, b, preferred_element_type=f32)

    def run_stack(in_seq, wih0_ref, wih_ref, whh_ref, bgi_ref, bhn_ref,
                  h0, masks, keep_output_seq):
        """num_layers GRU stack. in_seq: (S*B, K) value, h0: (B, H) value.
        Returns (list of per-timestep last-layer hiddens or None, final hidden)."""
        seq = in_seq
        hs = None
        h = None
        for l in range(num_layers):
            w_i = wih0_ref[...] if l == 0 else wih_ref[l - 1]       # (K, 3H)
            u = whh_ref[l]                                          # (H, 3H)
            b_i = bgi_ref[l]                                        # (1, 3H)
            # Hoisted, loop-invariant broadcast (JAX does not CSE broadcasts).
            b_hn = jnp.broadcast_to(bhn_ref[l], (batch, hidden))    # (B, H)

            # Hoisted input projection: ONE matmul per layer for all gates.
            gi = mm(seq, w_i) + b_i                                 # (S*B, 3H)

            h = h0
            hs = []
            for t in range(seq_len):        # unrolled: S is small and static
                lo = t * batch
                gi_t = gi[lo:lo + batch]                            # (B, 3H)
                # ONE fused recurrent matmul per timestep (serial critical path).
                gh = mm(h, u)                                       # (B, 3H)
                # [r|z] live in one 128-lane block -> single sigmoid pass.
                rz = jax.nn.sigmoid(gi_t[:, :H2] + gh[:, :H2])      # (B, 2H)
                r = rz[:, :hidden]
                zg = rz[:, hidden:]
                n = jnp.tanh(gi_t[:, H2:] + r * (gh[:, H2:] + b_hn))
                h_new = (1.0 - zg) * n + zg * h
                # packed-sequence emulation: freeze hidden past lengths[b]
                h = jnp.where(masks[t], h_new, h) if masks is not None else h_new
                hs.append(h)
            if l < num_layers - 1:
                # Feed next layer: one dense concat, stays in vregs (no scratch).
                seq = jnp.concatenate(hs, axis=0)                   # (S*B, H)
        return (hs if keep_output_seq else None), h

    # ---------------- encoder (packed-sequence semantics via mask) ----------
    x_all = x_ref[...]
    mask_all = mask_ref[...]
    # Pre-broadcast masks once; shared by all encoder layers.
    masks = [jnp.broadcast_to(mask_all[t * batch:(t + 1) * batch] > 0.0,
                              (batch, hidden)) for t in range(seq_len)]
    h0_enc = jnp.zeros((batch, hidden), f32)
    _, enc_h = run_stack(x_all, e_wih0_ref, e_wih_ref, e_whh_ref,
                         e_bgi_ref, e_bhn_ref, h0_enc, masks,
                         keep_output_seq=False)

    # ---------------- latent heads: fc21 | fc22 fused into one matmul -------
    ml = mm(enc_h, fc2_w_ref[...]) + fc2_b_ref[...]     # (B, 2*latent)
    mulogvar_ref[...] = ml                              # one dense store; split in wrapper
    mu = ml[:, :latent]

    # TODO(synk): training-mode reparameterize (z = mu + eps*exp(0.5*logvar))
    # would need pltpu.prng_seed/prng_random_bits in-kernel; eval-mode z = mu.
    z = mu
    h_dec = mm(z, fc3_w_ref[...]) + fc3_b_ref[...]      # (B, H), initial hidden of ALL dec layers

    # decoder input sequence: torch z.repeat(1,S,1).view(B,S,L) quirk, i.e.
    # time-major row (t,b) reads z[(b*S + t) % B].  Static permutation -> static
    # slices + one concat (no one-hot matmul, no O(B^2) HBM input).
    # (For large B, gather the (B,3H) input projection instead of z rows.)
    rows = []
    for t in range(seq_len):
        for b in range(batch):
            src = (b * seq_len + t) % batch
            rows.append(z[src:src + 1, :])
    z_seq = jnp.concatenate(rows, axis=0)               # (S*B, latent)

    # ---------------- decoder (full length, no mask) -------------------------
    dec_hs, _ = run_stack(z_seq, d_wih0_ref, d_wih_ref, d_whh_ref,
                          d_bgi_ref, d_bhn_ref, h_dec, None,
                          keep_output_seq=True)

    # Final fc (H -> 1) as broadcast-multiply + lane reduction (no N=1 matmul),
    # assembled into one dense (B, S) store.
    w_row = dfc_w_ref[...]                              # (1, H)
    ys = [jnp.sum(h_t * w_row, axis=-1, keepdims=True) for h_t in dec_hs]  # (B,1) each
    y = jnp.concatenate(ys, axis=1) + dfc_b_ref[...]    # (B, S)
    xhat_ref[...] = jnp.exp(y)


# ----------------------------- wrapper ----------------------------------------
def rnn_vae_forward(params, x, lengths):
    """x: (B, S, INPUT_SIZE) batch-first, lengths: (B,) int32."""
    B, S, I = x.shape
    assert OUTPUT_SIZE == 1

    # time-major flat layout (row = t*B + b)
    x_flat = jnp.transpose(x, (1, 0, 2)).reshape(S * B, I).astype(jnp.float32)
    t_idx = jnp.arange(S)
    mask_flat = (t_idx[:, None] < lengths[None, :]).astype(jnp.float32).reshape(S * B, 1)

    kernel = functools.partial(
        rnn_vae_kernel, seq_len=S, batch=B, hidden=HIDDEN_SIZE,
        latent=LATENT_SIZE, num_layers=NUM_LAYERS)

    # No grid: whole problem fits comfortably in VMEM at these sizes.
    # For realistic batch sizes (esp. v7x: 64 MiB VMEM, 2 TCs) add a batch-tile
    # grid with dimension_semantics=("parallel",) and per-tile BlockSpecs.
    xhat_bs, mulogvar = pl.pallas_call(
        kernel,
        out_shape=(jax.ShapeDtypeStruct((B, S), jnp.float32),
                   jax.ShapeDtypeStruct((B, 2 * LATENT_SIZE), jnp.float32)),
        compiler_params=pltpu.CompilerParams(vmem_limit_bytes=32 * 1024 * 1024),
    )(x_flat, mask_flat,
      params['enc']['wih0'], params['enc']['wih'], params['enc']['whh'],
      params['enc']['bgi'], params['enc']['bhn'],
      params['fc2_w'], params['fc2_b'], params['fc3_w'], params['fc3_b'],
      params['dec']['wih0'], params['dec']['wih'], params['dec']['whh'],
      params['dec']['bgi'], params['dec']['bhn'],
      params['dec_fc_w'], params['dec_fc_b'])

    x_hat = xhat_bs[..., None]                      # (B, S, 1)
    mu = mulogvar[:, :LATENT_SIZE]
    logvar = mulogvar[:, LATENT_SIZE:]
    return x_hat, mu, logvar


# ----------------------------- parameters ------------------------------------
def _uniform(key, shape, k):
    return jax.random.uniform(key, shape, jnp.float32, minval=-k, maxval=k)


def init_gru_stack(key, input_size, hidden_size, num_layers):
    """PyTorch GRU init U(-1/sqrt(H), 1/sqrt(H)), packed per the kernel layout:
       wih0: (in0, 3H); wih: (L-1, H, 3H); whh: (L, H, 3H);
       bgi:  (L, 1, 3H) = [b_ir+b_hr | b_iz+b_hz | b_in]; bhn: (L, 1, H).
       Gate column order is [r | z | n]."""
    H = hidden_size
    k = 1.0 / float(H) ** 0.5
    wih0 = None
    wih_list, whh_list, bgi_list, bhn_list = [], [], [], []
    for l in range(num_layers):
        in_sz = input_size if l == 0 else H
        key, k1, k2, k3, k4 = jax.random.split(key, 5)
        w_ih = _uniform(k1, (in_sz, 3 * H), k)   # columns already [r|z|n]
        w_hh = _uniform(k2, (H, 3 * H), k)
        b_ih = _uniform(k3, (3 * H,), k)
        b_hh = _uniform(k4, (3 * H,), k)
        bgi = jnp.concatenate([b_ih[:2 * H] + b_hh[:2 * H], b_ih[2 * H:]]).reshape(1, 3 * H)
        bhn = b_hh[2 * H:].reshape(1, H)
        if l == 0:
            wih0 = w_ih
        else:
            wih_list.append(w_ih)
        whh_list.append(w_hh)
        bgi_list.append(bgi)
        bhn_list.append(bhn)
    stack = dict(wih0=wih0,
                 wih=jnp.stack(wih_list, 0),
                 whh=jnp.stack(whh_list, 0),
                 bgi=jnp.stack(bgi_list, 0),
                 bhn=jnp.stack(bhn_list, 0))
    return stack, key


def init_linear(key, in_features, out_features):
    k = 1.0 / float(in_features) ** 0.5
    key, k1, k2 = jax.random.split(key, 3)
    return _uniform(k1, (in_features, out_features), k), _uniform(k2, (1, out_features), k), key


def init_params(seed=0):
    key = jax.random.PRNGKey(seed)
    enc, key = init_gru_stack(key, INPUT_SIZE, HIDDEN_SIZE, NUM_LAYERS)
    dec, key = init_gru_stack(key, LATENT_SIZE, HIDDEN_SIZE, NUM_LAYERS)
    fc21_w, fc21_b, key = init_linear(key, HIDDEN_SIZE, LATENT_SIZE)
    fc22_w, fc22_b, key = init_linear(key, HIDDEN_SIZE, LATENT_SIZE)
    fc3_w, fc3_b, key = init_linear(key, LATENT_SIZE, HIDDEN_SIZE)
    dfc_w, dfc_b, key = init_linear(key, HIDDEN_SIZE, OUTPUT_SIZE)
    return dict(enc=enc, dec=dec,
                fc2_w=jnp.concatenate([fc21_w, fc22_w], axis=1),   # fused fc21 | fc22
                fc2_b=jnp.concatenate([fc21_b, fc22_b], axis=1),
                fc3_w=fc3_w, fc3_b=fc3_b,
                dec_fc_w=jnp.transpose(dfc_w),                     # (1, H) row vector
                dec_fc_b=dfc_b)                                    # (1, 1)


# ----------------------------- main -------------------------------------------
if __name__ == "__main__":
    B, S = 2, 8
    key = jax.random.PRNGKey(0)
    x = jax.random.normal(key, (B, S, INPUT_SIZE), jnp.float32)
    lengths = jnp.array([8, 5], dtype=jnp.int32)

    params = init_params(seed=0)

    x_hat, mu, logvar = jax.jit(rnn_vae_forward)(params, x, lengths)
    jax.block_until_ready((x_hat, mu, logvar))

    assert x_hat.shape == (B, S, OUTPUT_SIZE)
    assert mu.shape == (B, LATENT_SIZE)
    assert logvar.shape == (B, LATENT_SIZE)
    assert bool(jnp.all(jnp.isfinite(x_hat))) and bool(jnp.all(x_hat > 0))
    assert bool(jnp.all(jnp.isfinite(mu))) and bool(jnp.all(jnp.isfinite(logvar)))
    print("KERNEL_OK")
</pallas_src>

<mosaic_0001>
module attributes {stable_mosaic.version = 11 : i64} {
  func.func @rnn_vae_kernel(%arg0: memref<16x3xf32, #tpu.memory_space<vmem>>, %arg1: memref<16x1xf32, #tpu.memory_space<vmem>>, %arg2: memref<3x192xf32, #tpu.memory_space<vmem>>, %arg3: memref<3x64x192xf32, #tpu.memory_space<vmem>>, %arg4: memref<4x64x192xf32, #tpu.memory_space<vmem>>, %arg5: memref<4x1x192xf32, #tpu.memory_space<vmem>>, %arg6: memref<4x1x64xf32, #tpu.memory_space<vmem>>, %arg7: memref<64x100xf32, #tpu.memory_space<vmem>>, %arg8: memref<1x100xf32, #tpu.memory_space<vmem>>, %arg9: memref<50x64xf32, #tpu.memory_space<vmem>>, %arg10: memref<1x64xf32, #tpu.memory_space<vmem>>, %arg11: memref<50x192xf32, #tpu.memory_space<vmem>>, %arg12: memref<3x64x192xf32, #tpu.memory_space<vmem>>, %arg13: memref<4x64x192xf32, #tpu.memory_space<vmem>>, %arg14: memref<4x1x192xf32, #tpu.memory_space<vmem>>, %arg15: memref<4x1x64xf32, #tpu.memory_space<vmem>>, %arg16: memref<1x64xf32, #tpu.memory_space<vmem>>, %arg17: memref<1x1xf32, #tpu.memory_space<vmem>>, %arg18: memref<2x8xf32, #tpu.memory_space<vmem>>, %arg19: memref<2x100xf32, #tpu.memory_space<vmem>>) attributes {dimension_semantics = [], scalar_prefetch = 0 : i64, scratch_operands = 0 : i64, tpu.core_type = #tpu.core_type<tc>} {
    %c0 = arith.constant 0 : index
    %c0_0 = arith.constant 0 : index
    %0 = vector.load %arg0[%c0, %c0_0] : memref<16x3xf32, #tpu.memory_space<vmem>>, vector<16x3xf32>
    %c0_1 = arith.constant 0 : index
    %c0_2 = arith.constant 0 : index
    %1 = vector.load %arg1[%c0_1, %c0_2] : memref<16x1xf32, #tpu.memory_space<vmem>>, vector<16x1xf32>
    %2 = vector.extract_strided_slice %1 {offsets = [0, 0], sizes = [2, 1], strides = [1, 1]} : vector<16x1xf32> to vector<2x1xf32>
    %cst = arith.constant 0.000000e+00 : f32
    %3 = vector.broadcast %cst : f32 to vector<2x1xf32>
    %4 = arith.cmpf ogt, %2, %3 : vector<2x1xf32>
    %5 = vector.shape_cast %4 : vector<2x1xi1> to vector<2x1xi1>
    %6 = vector.broadcast %5 : vector<2x1xi1> to vector<2x64xi1>
    %7 = vector.extract_strided_slice %1 {offsets = [2, 0], sizes = [2, 1], strides = [1, 1]} : vector<16x1xf32> to vector<2x1xf32>
    %cst_3 = arith.constant 0.000000e+00 : f32
    %8 = vector.broadcast %cst_3 : f32 to vector<2x1xf32>
    %9 = arith.cmpf ogt, %7, %8 : vector<2x1xf32>
    %10 = vector.shape_cast %9 : vector<2x1xi1> to vector<2x1xi1>
    %11 = vector.broadcast %10 : vector<2x1xi1> to vector<2x64xi1>
    %12 = vector.extract_strided_slice %1 {offsets = [4, 0], sizes = [2, 1], strides = [1, 1]} : vector<16x1xf32> to vector<2x1xf32>
    %cst_4 = arith.constant 0.000000e+00 : f32
    %13 = vector.broadcast %cst_4 : f32 to vector<2x1xf32>
    %14 = arith.cmpf ogt, %12, %13 : vector<2x1xf32>
    %15 = vector.shape_cast %14 : vector<2x1xi1> to vector<2x1xi1>
    %16 = vector.broadcast %15 : vector<2x1xi1> to vector<2x64xi1>
    %17 = vector.extract_strided_slice %1 {offsets = [6, 0], sizes = [2, 1], strides = [1, 1]} : vector<16x1xf32> to vector<2x1xf32>
    %cst_5 = arith.constant 0.000000e+00 : f32
    %18 = vector.broadcast %cst_5 : f32 to vector<2x1xf32>
    %19 = arith.cmpf ogt, %17, %18 : vector<2x1xf32>
    %20 = vector.shape_cast %19 : vector<2x1xi1> to vector<2x1xi1>
    %21 = vector.broadcast %20 : vector<2x1xi1> to vector<2x64xi1>
    %22 = vector.extract_strided_slice %1 {offsets = [8, 0], sizes = [2, 1], strides = [1, 1]} : vector<16x1xf32> to vector<2x1xf32>
    %cst_6 = arith.constant 0.000000e+00 : f32
    %23 = vector.broadcast %cst_6 : f32 to vector<2x1xf32>
    %24 = arith.cmpf ogt, %22, %23 : vector<2x1xf32>
    %25 = vector.shape_cast %24 : vector<2x1xi1> to vector<2x1xi1>
    %26 = vector.broadcast %25 : vector<2x1xi1> to vector<2x64xi1>
    %27 = vector.extract_strided_slice %1 {offsets = [10, 0], sizes = [2, 1], strides = [1, 1]} : vector<16x1xf32> to vector<2x1xf32>
    %cst_7 = arith.constant 0.000000e+00 : f32
    %28 = vector.broadcast %cst_7 : f32 to vector<2x1xf32>
    %29 = arith.cmpf ogt, %27, %28 : vector<2x1xf32>
    %30 = vector.shape_cast %29 : vector<2x1xi1> to vector<2x1xi1>
    %31 = vector.broadcast %30 : vector<2x1xi1> to vector<2x64xi1>
    %32 = vector.extract_strided_slice %1 {offsets = [12, 0], sizes = [2, 1], strides = [1, 1]} : vector<16x1xf32> to vector<2x1xf32>
    %cst_8 = arith.constant 0.000000e+00 : f32
    %33 = vector.broadcast %cst_8 : f32 to vector<2x1xf32>
    %34 = arith.cmpf ogt, %32, %33 : vector<2x1xf32>
    %35 = vector.shape_cast %34 : vector<2x1xi1> to vector<2x1xi1>
    %36 = vector.broadcast %35 : vector<2x1xi1> to vector<2x64xi1>
    %37 = vector.extract_strided_slice %1 {offsets = [14, 0], sizes = [2, 1], strides = [1, 1]} : vector<16x1xf32> to vector<2x1xf32>
    %cst_9 = arith.constant 0.000000e+00 : f32
    %38 = vector.broadcast %cst_9 : f32 to vector<2x1xf32>
    %39 = arith.cmpf ogt, %37, %38 : vector<2x1xf32>
    %40 = vector.shape_cast %39 : vector<2x1xi1> to vector<2x1xi1>
    %41 = vector.broadcast %40 : vector<2x1xi1> to vector<2x64xi1>
    %cst_10 = arith.constant 0.000000e+00 : f32
    %42 = vector.broadcast %cst_10 : f32 to vector<2x64xf32>
    %c0_11 = arith.constant 0 : index
    %c0_12 = arith.constant 0 : index
    %43 = vector.load %arg2[%c0_11, %c0_12] : memref<3x192xf32, #tpu.memory_space<vmem>>, vector<3x192xf32>
    %c0_13 = arith.constant 0 : index
    %c0_14 = arith.constant 0 : index
    %c0_15 = arith.constant 0 : index
    %44 = vector.load %arg4[%c0_13, %c0_14, %c0_15] : memref<4x64x192xf32, #tpu.memory_space<vmem>>, vector<1x64x192xf32>
    %45 = vector.shape_cast %44 : vector<1x64x192xf32> to vector<64x192xf32>
    %c0_16 = arith.constant 0 : index
    %c0_17 = arith.constant 0 : index
    %c0_18 = arith.constant 0 : index
    %46 = vector.load %arg5[%c0_16, %c0_17, %c0_18] : memref<4x1x192xf32, #tpu.memory_space<vmem>>, vector<1x1x192xf32>
    %47 = vector.shape_cast %46 : vector<1x1x192xf32> to vector<1x192xf32>
    %c0_19 = arith.constant 0 : index
    %c0_20 = arith.constant 0 : index
    %c0_21 = arith.constant 0 : index
    %48 = vector.load %arg6[%c0_19, %c0_20, %c0_21] : memref<4x1x64xf32, #tpu.memory_space<vmem>>, vector<1x1x64xf32>
    %49 = vector.shape_cast %48 : vector<1x1x64xf32> to vector<1x64xf32>
    %50 = vector.shape_cast %49 : vector<1x64xf32> to vector<1x64xf32>
    %51 = vector.broadcast %50 : vector<1x64xf32> to vector<2x64xf32>
    %cst_22 = arith.constant dense<0.000000e+00> : vector<16x192xf32>
    %52 = tpu.matmul %0, %43, %cst_22 {dimension_numbers = #tpu.dot_dimension_numbers<[1], [0], [0], [1], [0, 0, 1, 1], [], []>} : vector<16x3xf32>, vector<3x192xf32>, vector<16x192xf32> -> vector<16x192xf32>
    %53 = vector.broadcast %47 : vector<1x192xf32> to vector<16x192xf32>
    %54 = arith.addf %52, %53 : vector<16x192xf32>
    %55 = vector.extract_strided_slice %54 {offsets = [0, 0], sizes = [2, 192], strides = [1, 1]} : vector<16x192xf32> to vector<2x192xf32>
    %cst_23 = arith.constant dense<0.000000e+00> : vector<2x192xf32>
    %56 = tpu.matmul %42, %45, %cst_23 {dimension_numbers = #tpu.dot_dimension_numbers<[1], [0], [0], [1], [0, 0, 1, 1], [], []>} : vector<2x64xf32>, vector<64x192xf32>, vector<2x192xf32> -> vector<2x192xf32>
    %57 = vector.extract_strided_slice %55 {offsets = [0, 0], sizes = [2, 128], strides = [1, 1]} : vector<2x192xf32> to vector<2x128xf32>
    %58 = vector.extract_strided_slice %56 {offsets = [0, 0], sizes = [2, 128], strides = [1, 1]} : vector<2x192xf32> to vector<2x128xf32>
    %59 = arith.addf %57, %58 : vector<2x128xf32>
    %60 = arith.negf %59 : vector<2x128xf32>
    %61 = math.exp %60 : vector<2x128xf32>
    %cst_24 = arith.constant 1.000000e+00 : f32
    %62 = vector.broadcast %cst_24 : f32 to vector<2x128xf32>
    %63 = arith.addf %62, %61 : vector<2x128xf32>
    %64 = arith.divf %62, %63 : vector<2x128xf32>
    %65 = vector.extract_strided_slice %64 {offsets = [0, 0], sizes = [2, 64], strides = [1, 1]} : vector<2x128xf32> to vector<2x64xf32>
    %66 = vector.extract_strided_slice %64 {offsets = [0, 64], sizes = [2, 64], strides = [1, 1]} : vector<2x128xf32> to vector<2x64xf32>
    %67 = vector.extract_strided_slice %55 {offsets = [0, 128], sizes = [2, 64], strides = [1, 1]} : vector<2x192xf32> to vector<2x64xf32>
    %68 = vector.extract_strided_slice %56 {offsets = [0, 128], sizes = [2, 64], strides = [1, 1]} : vector<2x192xf32> to vector<2x64xf32>
    %69 = arith.addf %68, %51 : vector<2x64xf32>
    %70 = arith.mulf %65, %69 : vector<2x64xf32>
    %71 = arith.addf %67, %70 : vector<2x64xf32>
    %72 = math.tanh %71 : vector<2x64xf32>
    %cst_25 = arith.constant 1.000000e+00 : f32
    %73 = vector.broadcast %cst_25 : f32 to vector<2x64xf32>
    %74 = arith.subf %73, %66 : vector<2x64xf32>
    %75 = arith.mulf %74, %72 : vector<2x64xf32>
    %76 = arith.mulf %66, %42 : vector<2x64xf32>
    %77 = arith.addf %75, %76 : vector<2x64xf32>
    %78 = arith.select %6, %77, %42 : vector<2x64xi1>, vector<2x64xf32>
    %79 = vector.extract_strided_slice %54 {offsets = [2, 0], sizes = [2, 192], strides = [1, 1]} : vector<16x192xf32> to vector<2x192xf32>
    %cst_26 = arith.constant dense<0.000000e+00> : vector<2x192xf32>
    %80 = tpu.matmul %78, %45, %cst_26 {dimension_numbers = #tpu.dot_dimension_numbers<[1], [0], [0], [1], [0, 0, 1, 1], [], []>} : vector<2x64xf32>, vector<64x192xf32>, vector<2x192xf32> -> vector<2x192xf32>
    %81 = vector.extract_strided_slice %79 {offsets = [0, 0], sizes = [2, 128], strides = [1, 1]} : vector<2x192xf32> to vector<2x128xf32>
    %82 = vector.extract_strided_slice %80 {offsets = [0, 0], sizes = [2, 128], strides = [1, 1]} : vector<2x192xf32> to vector<2x128xf32>
    %83 = arith.addf %81, %82 : vector<2x128xf32>
    %84 = arith.negf %83 : vector<2x128xf32>
    %85 = math.exp %84 : vector<2x128xf32>
    %cst_27 = arith.constant 1.000000e+00 : f32
    %86 = vector.broadcast %cst_27 : f32 to vector<2x128xf32>
    %87 = arith.addf %86, %85 : vector<2x128xf32>
    %88 = arith.divf %86, %87 : vector<2x128xf32>
    %89 = vector.extract_strided_slice %88 {offsets = [0, 0], sizes = [2, 64], strides = [1, 1]} : vector<2x128xf32> to vector<2x64xf32>
    %90 = vector.extract_strided_slice %88 {offsets = [0, 64], sizes = [2, 64], strides = [1, 1]} : vector<2x128xf32> to vector<2x64xf32>
    %91 = vector.extract_strided_slice %79 {offsets = [0, 128], sizes = [2, 64], strides = [1, 1]} : vector<2x192xf32> to vector<2x64xf32>
    %92 = vector.extract_strided_slice %80 {offsets = [0, 128], sizes = [2, 64], strides = [1, 1]} : vector<2x192xf32> to vector<2x64xf32>
    %93 = arith.addf %92, %51 : vector<2x64xf32>
    %94 = arith.mulf %89, %93 : vector<2x64xf32>
    %95 = arith.addf %91, %94 : vector<2x64xf32>
    %96 = math.tanh %95 : vector<2x64xf32>
    %cst_28 = arith.constant 1.000000e+00 : f32
    %97 = vector.broadcast %cst_28 : f32 to vector<2x64xf32>
    %98 = arith.subf %97, %90 : vector<2x64xf32>
    %99 = arith.mulf %98, %96 : vector<2x64xf32>
    %100 = arith.mulf %90, %78 : vector<2x64xf32>
    %101 = arith.addf %99, %100 : vector<2x64xf32>
    %102 = arith.select %11, %101, %78 : vector<2x64xi1>, vector<2x64xf32>
    %103 = vector.extract_strided_slice %54 {offsets = [4, 0], sizes = [2, 192], strides = [1, 1]} : vector<16x192xf32> to vector<2x192xf32>
    %cst_29 = arith.constant dense<0.000000e+00> : vector<2x192xf32>
    %104 = tpu.matmul %102, %45, %cst_29 {dimension_numbers = #tpu.dot_dimension_numbers<[1], [0], [0], [1], [0, 0, 1, 1], [], []>} : vector<2x64xf32>, vector<64x192xf32>, vector<2x192xf32> -> vector<2x192xf32>
    %105 = vector.extract_strided_slice %103 {offsets = [0, 0], sizes = [2, 128], strides = [1, 1]} : vector<2x192xf32> to vector<2x128xf32>
    %106 = vector.extract_strided_slice %104 {offsets = [0, 0], sizes = [2, 128], strides = [1, 1]} : vector<2x192xf32> to vector<2x128xf32>
    %107 = arith.addf %105, %106 : vector<2x128xf32>
    %108 = arith.negf %107 : vector<2x128xf32>
    %109 = math.exp %108 : vector<2x128xf32>
    %cst_30 = arith.constant 1.000000e+00 : f32
    %110 = vector.broadcast %cst_30 : f32 to vector<2x128xf32>
    %111 = arith.addf %110, %109 : vector<2x128xf32>
    %112 = arith.divf %110, %111 : vector<2x128xf32>
    %113 = vector.extract_strided_slice %112 {offsets = [0, 0], sizes = [2, 64], strides = [1, 1]} : vector<2x128xf32> to vector<2x64xf32>
    %114 = vector.extract_strided_slice %112 {offsets = [0, 64], sizes = [2, 64], strides = [1, 1]} : vector<2x128xf32> to vector<2x64xf32>
    %115 = vector.extract_strided_slice %103 {offsets = [0, 128], sizes = [2, 64], strides = [1, 1]} : vector<2x192xf32> to vector<2x64xf32>
    %116 = vector.extract_strided_slice %104 {offsets = [0, 128], sizes = [2, 64], strides = [1, 1]} : vector<2x192xf32> to vector<2x64xf32>
    %117 = arith.addf %116, %51 : vector<2x64xf32>
    %118 = arith.mulf %113, %117 : vector<2x64xf32>
    %119 = arith.addf %115, %118 : vector<2x64xf32>
    %120 = math.tanh %119 : vector<2x64xf32>
    %cst_31 = arith.constant 1.000000e+00 : f32
    %121 = vector.broadcast %cst_31 : f32 to vector<2x64xf32>
    %122 = arith.subf %121, %114 : vector<2x64xf32>
    %123 = arith.mulf %122, %120 : vector<2x64xf32>
    %124 = arith.mulf %114, %102 : vector<2x64xf32>
    %125 = arith.addf %123, %124 : vector<2x64xf32>
    %126 = arith.select %16, %125, %102 : vector<2x64xi1>, vector<2x64xf32>
    %127 = vector.extract_strided_slice %54 {offsets = [6, 0], sizes = [2, 192], strides = [1, 1]} : vector<16x192xf32> to vector<2x192xf32>
    %cst_32 = arith.constant dense<0.000000e+00> : vector<2x192xf32>
    %128 = tpu.matmul %126, %45, %cst_32 {dimension_numbers = #tpu.dot_dimension_numbers<[1], [0], [0], [1], [0, 0, 1, 1], [], []>} : vector<2x64xf32>, vector<64x192xf32>, vector<2x192xf32> -> vector<2x192xf32>
    %129 = vector.extract_strided_slice %127 {offsets = [0, 0], sizes = [2, 128], strides = [1, 1]} : vector<2x192xf32> to vector<2x128xf32>
    %130 = vector.extract_strided_slice %128 {offsets = [0, 0], sizes = [2, 128], strides = [1, 1]} : vector<2x192xf32> to vector<2x128xf32>
    %131 = arith.addf %129, %130 : vector<2x128xf32>
    %132 = arith.negf %131 : vector<2x128xf32>
    %133 = math.exp %132 : vector<2x128xf32>
    %cst_33 = arith.constant 1.000000e+00 : f32
    %134 = vector.broadcast %cst_33 : f32 to vector<2x128xf32>
    %135 = arith.addf %134, %133 : vector<2x128xf32>
    %136 = arith.divf %134, %135 : vector<2x128xf32>
    %137 = vector.extract_strided_slice %136 {offsets = [0, 0], sizes = [2, 64], strides = [1, 1]} : vector<2x128xf32> to vector<2x64xf32>
    %138 = vector.extract_strided_slice %136 {offsets = [0, 64], sizes = [2, 64], strides = [1, 1]} : vector<2x128xf32> to vector<2x64xf32>
    %139 = vector.extract_strided_slice %127 {offsets = [0, 128], sizes = [2, 64], strides = [1, 1]} : vector<2x192xf32> to vector<2x64xf32>
    %140 = vector.extract_strided_slice %128 {offsets = [0, 128], sizes = [2, 64], strides = [1, 1]} : vector<2x192xf32> to vector<2x64xf32>
    %141 = arith.addf %140, %51 : vector<2x64xf32>
    %142 = arith.mulf %137, %141 : vector<2x64xf32>
    %143 = arith.addf %139, %142 : vector<2x64xf32>
    %144 = math.tanh %143 : vector<2x64xf32>
    %cst_34 = arith.constant 1.000000e+00 : f32
    %145 = vector.broadcast %cst_34 : f32 to vector<2x64xf32>
    %146 = arith.subf %145, %138 : vector<2x64xf32>
    %147 = arith.mulf %146, %144 : vector<2x64xf32>
    %148 = arith.mulf %138, %126 : vector<2x64xf32>
    %149 = arith.addf %147, %148 : vector<2x64xf32>
    %150 = arith.select %21, %149, %126 : vector<2x64xi1>, vector<2x64xf32>
    %151 = vector.extract_strided_slice %54 {offsets = [8, 0], sizes = [2, 192], strides = [1, 1]} : vector<16x192xf32> to vector<2x192xf32>
    %cst_35 = arith.constant dense<0.000000e+00> : vector<2x192xf32>
    %152 = tpu.matmul %150, %45, %cst_35 {dimension_numbers = #tpu.dot_dimension_numbers<[1], [0], [0], [1], [0, 0, 1, 1], [], []>} : vector<2x64xf32>, vector<64x192xf32>, vector<2x192xf32> -> vector<2x192xf32>
    %153 = vector.extract_strided_slice %151 {offsets = [0, 0], sizes = [2, 128], strides = [1, 1]} : vector<2x192xf32> to vector<2x128xf32>
    %154 = vector.extract_strided_slice %152 {offsets = [0, 0], sizes = [2, 128], strides = [1, 1]} : vector<2x192xf32> to vector<2x128xf32>
    %155 = arith.addf %153, %154 : vector<2x128xf32>
    %156 = arith.negf %155 : vector<2x128xf32>
    %157 = math.exp %156 : vector<2x128xf32>
    %cst_36 = arith.constant 1.000000e+00 : f32
    %158 = vector.broadcast %cst_36 : f32 to vector<2x128xf32>
    %159 = arith.addf %158, %157 : vector<2x128xf32>
    %160 = arith.divf %158, %159 : vector<2x128xf32>
    %161 = vector.extract_strided_slice %160 {offsets = [0, 0], sizes = [2, 64], strides = [1, 1]} : vector<2x128xf32> to vector<2x64xf32>
    %162 = vector.extract_strided_slice %160 {offsets = [0, 64], sizes = [2, 64], strides = [1, 1]} : vector<2x128xf32> to vector<2x64xf32>
    %163 = vector.extract_strided_slice %151 {offsets = [0, 128], sizes = [2, 64], strides = [1, 1]} : vector<2x192xf32> to vector<2x64xf32>
    %164 = vector.extract_strided_slice %152 {offsets = [0, 128], sizes = [2, 64], strides = [1, 1]} : vector<2x192xf32> to vector<2x64xf32>
    %165 = arith.addf %164, %51 : vector<2x64xf32>
    %166 = arith.mulf %161, %165 : vector<2x64xf32>
    %167 = arith.addf %163, %166 : vector<2x64xf32>
    %168 = math.tanh %167 : vector<2x64xf32>
    %cst_37 = arith.constant 1.000000e+00 : f32
    %169 = vector.broadcast %cst_37 : f32 to vector<2x64xf32>
    %170 = arith.subf %169, %162 : vector<2x64xf32>
    %171 = arith.mulf %170, %168 : vector<2x64xf32>
    %172 = arith.mulf %162, %150 : vector<2x64xf32>
    %173 = arith.addf %171, %172 : vector<2x64xf32>
    %174 = arith.select %26, %173, %150 : vector<2x64xi1>, vector<2x64xf32>
    %175 = vector.extract_strided_slice %54 {offsets = [10, 0], sizes = [2, 192], strides = [1, 1]} : vector<16x192xf32> to vector<2x192xf32>
    %cst_38 = arith.constant dense<0.000000e+00> : vector<2x192xf32>
    %176 = tpu.matmul %174, %45, %cst_38 {dimension_numbers = #tpu.dot_dimension_numbers<[1], [0], [0], [1], [0, 0, 1, 1], [], []>} : vector<2x64xf32>, vector<64x192xf32>, vector<2x192xf32> -> vector<2x192xf32>
    %177 = vector.extract_strided_slice %175 {offsets = [0, 0], sizes = [2, 128], strides = [1, 1]} : vector<2x192xf32> to vector<2x128xf32>
    %178 = vector.extract_strided_slice %176 {offsets = [0, 0], sizes = [2, 128], strides = [1, 1]} : vector<2x192xf32> to vector<2x128xf32>
    %179 = arith.addf %177, %178 : vector<2x128xf32>
    %180 = arith.negf %179 : vector<2x128xf32>
    %181 = math.exp %180 : vector<2x128xf32>
    %cst_39 = arith.constant 1.000000e+00 : f32
    %182 = vector.broadcast %cst_39 : f32 to vector<2x128xf32>
    %183 = arith.addf %182, %181 : vector<2x128xf32>
    %184 = arith.divf %182, %183 : vector<2x128xf32>
    %185 = vector.extract_strided_slice %184 {offsets = [0, 0], sizes = [2, 64], strides = [1, 1]} : vector<2x128xf32> to vector<2x64xf32>
    %186 = vector.extract_strided_slice %184 {offsets = [0, 64], sizes = [2, 64], strides = [1, 1]} : vector<2x128xf32> to vector<2x64xf32>
    %187 = vector.extract_strided_slice %175 {offsets = [0, 128], sizes = [2, 64], strides = [1, 1]} : vector<2x192xf32> to vector<2x64xf32>
    %188 = vector.extract_strided_slice %176 {offsets = [0, 128], sizes = [2, 64], strides = [1, 1]} : vector<2x192xf32> to vector<2x64xf32>
    %189 = arith.addf %188, %51 : vector<2x64xf32>
    %190 = arith.mulf %185, %189 : vector<2x64xf32>
    %191 = arith.addf %187, %190 : vector<2x64xf32>
    %192 = math.tanh %191 : vector<2x64xf32>
    %cst_40 = arith.constant 1.000000e+00 : f32
    %193 = vector.broadcast %cst_40 : f32 to vector<2x64xf32>
    %194 = arith.subf %193, %186 : vector<2x64xf32>
    %195 = arith.mulf %194, %192 : vector<2x64xf32>
    %196 = arith.mulf %186, %174 : vector<2x64xf32>
    %197 = arith.addf %195, %196 : vector<2x64xf32>
    %198 = arith.select %31, %197, %174 : vector<2x64xi1>, vector<2x64xf32>
    %199 = vector.extract_strided_slice %54 {offsets = [12, 0], sizes = [2, 192], strides = [1, 1]} : vector<16x192xf32> to vector<2x192xf32>
    %cst_41 = arith.constant dense<0.000000e+00> : vector<2x192xf32>
    %200 = tpu.matmul %198, %45, %cst_41 {dimension_numbers = #tpu.dot_dimension_numbers<[1], [0], [0], [1], [0, 0, 1, 1], [], []>} : vector<2x64xf32>, vector<64x192xf32>, vector<2x192xf32> -> vector<2x192xf32>
    %201 = vector.extract_strided_slice %199 {offsets = [0, 0], sizes = [2, 128], strides = [1, 1]} : vector<2x192xf32> to vector<2x128xf32>
    %202 = vector.extract_strided_slice %200 {offsets = [0, 0], sizes = [2, 128], strides = [1, 1]} : vector<2x192xf32> to vector<2x128xf32>
    %203 = arith.addf %201, %202 : vector<2x128xf32>
    %204 = arith.negf %203 : vector<2x128xf32>
    %205 = math.exp %204 : vector<2x128xf32>
    %cst_42 = arith.constant 1.000000e+00 : f32
    %206 = vector.broadcast %cst_42 : f32 to vector<2x128xf32>
    %207 = arith.addf %206, %205 : vector<2x128xf32>
    %208 = arith.divf %206, %207 : vector<2x128xf32>
    %209 = vector.extract_strided_slice %208 {offsets = [0, 0], sizes = [2, 64], strides = [1, 1]} : vector<2x128xf32> to vector<2x64xf32>
    %210 = vector.extract_strided_slice %208 {offsets = [0, 64], sizes = [2, 64], strides = [1, 1]} : vector<2x128xf32> to vector<2x64xf32>
    %211 = vector.extract_strided_slice %199 {offsets = [0, 128], sizes = [2, 64], strides = [1, 1]} : vector<2x192xf32> to vector<2x64xf32>
    %212 = vector.extract_strided_slice %200 {offsets = [0, 128], sizes = [2, 64], strides = [1, 1]} : vector<2x192xf32> to vector<2x64xf32>
    %213 = arith.addf %212, %51 : vector<2x64xf32>
    %214 = arith.mulf %209, %213 : vector<2x64xf32>
    %215 = arith.addf %211, %214 : vector<2x64xf32>
    %216 = math.tanh %215 : vector<2x64xf32>
    %cst_43 = arith.constant 1.000000e+00 : f32
    %217 = vector.broadcast %cst_43 : f32 to vector<2x64xf32>
    %218 = arith.subf %217, %210 : vector<2x64xf32>
    %219 = arith.mulf %218, %216 : vector<2x64xf32>
    %220 = arith.mulf %210, %198 : vector<2x64xf32>
    %221 = arith.addf %219, %220 : vector<2x64xf32>
    %222 = arith.select %36, %221, %198 : vector<2x64xi1>, vector<2x64xf32>
    %223 = vector.extract_strided_slice %54 {offsets = [14, 0], sizes = [2, 192], strides = [1, 1]} : vector<16x192xf32> to vector<2x192xf32>
    %cst_44 = arith.constant dense<0.000000e+00> : vector<2x192xf32>
    %224 = tpu.matmul %222, %45, %cst_44 {dimension_numbers = #tpu.dot_dimension_numbers<[1], [0], [0], [1], [0, 0, 1, 1], [], []>} : vector<2x64xf32>, vector<64x192xf32>, vector<2x192xf32> -> vector<2x192xf32>
    %225 = vector.extract_strided_slice %223 {offsets = [0, 0], sizes = [2, 128], strides = [1, 1]} : vector<2x192xf32> to vector<2x128xf32>
    %226 = vector.extract_strided_slice %224 {offsets = [0, 0], sizes = [2, 128], strides = [1, 1]} : vector<2x192xf32> to vector<2x128xf32>
    %227 = arith.addf %225, %226 : vector<2x128xf32>
    %228 = arith.negf %227 : vector<2x128xf32>
    %229 = math.exp %228 : vector<2x128xf32>
    %cst_45 = arith.constant 1.000000e+00 : f32
    %230 = vector.broadcast %cst_45 : f32 to vector<2x128xf32>
    %231 = arith.addf %230, %229 : vector<2x128xf32>
    %232 = arith.divf %230, %231 : vector<2x128xf32>
    %233 = vector.extract_strided_slice %232 {offsets = [0, 0], sizes = [2, 64], strides = [1, 1]} : vector<2x128xf32> to vector<2x64xf32>
    %234 = vector.extract_strided_slice %232 {offsets = [0, 64], sizes = [2, 64], strides = [1, 1]} : vector<2x128xf32> to vector<2x64xf32>
    %235 = vector.extract_strided_slice %223 {offsets = [0, 128], sizes = [2, 64], strides = [1, 1]} : vector<2x192xf32> to vector<2x64xf32>
    %236 = vector.extract_strided_slice %224 {offsets = [0, 128], sizes = [2, 64], strides = [1, 1]} : vector<2x192xf32> to vector<2x64xf32>
    %237 = arith.addf %236, %51 : vector<2x64xf32>
    %238 = arith.mulf %233, %237 : vector<2x64xf32>
    %239 = arith.addf %235, %238 : vector<2x64xf32>
    %240 = math.tanh %239 : vector<2x64xf32>
    %cst_46 = arith.constant 1.000000e+00 : f32
    %241 = vector.broadcast %cst_46 : f32 to vector<2x64xf32>
    %242 = arith.subf %241, %234 : vector<2x64xf32>
    %243 = arith.mulf %242, %240 : vector<2x64xf32>
    %244 = arith.mulf %234, %222 : vector<2x64xf32>
    %245 = arith.addf %243, %244 : vector<2x64xf32>
    %246 = arith.select %41, %245, %222 : vector<2x64xi1>, vector<2x64xf32>
    %247 = tpu.concatenate %78, %102, %126, %150, %174, %198, %222, %246 in 0 : vector<2x64xf32>, vector<2x64xf32>, vector<2x64xf32>, vector<2x64xf32>, vector<2x64xf32>, vector<2x64xf32>, vector<2x64xf32>, vector<2x64xf32> -> vector<16x64xf32>
    %c0_47 = arith.constant 0 : index
    %c0_48 = arith.constant 0 : index
    %c0_49 = arith.constant 0 : index
    %248 = vector.load %arg3[%c0_47, %c0_48, %c0_49] : memref<3x64x192xf32, #tpu.memory_space<vmem>>, vector<1x64x192xf32>
    %249 = vector.shape_cast %248 : vector<1x64x192xf32> to vector<64x192xf32>
    %c1 = arith.constant 1 : index
    %c0_50 = arith.constant 0 : index
    %c0_51 = arith.constant 0 : index
    %250 = vector.load %arg4[%c1, %c0_50, %c0_51] : memref<4x64x192xf32, #tpu.memory_space<vmem>>, vector<1x64x192xf32>
    %251 = vector.shape_cast %250 : vector<1x64x192xf32> to vector<64x192xf32>
    %c1_52 = arith.constant 1 : index
    %c0_53 = arith.constant 0 : index
    %c0_54 = arith.constant 0 : index
    %252 = vector.load %arg5[%c1_52, %c0_53, %c0_54] : memref<4x1x192xf32, #tpu.memory_space<vmem>>, vector<1x1x192xf32>
    %253 = vector.shape_cast %252 : vector<1x1x192xf32> to vector<1x192xf32>
    %c1_55 = arith.constant 1 : index
    %c0_56 = arith.constant 0 : index
    %c0_57 = arith.constant 0 : index
    %254 = vector.load %arg6[%c1_55, %c0_56, %c0_57] : memref<4x1x64xf32, #tpu.memory_space<vmem>>, vector<1x1x64xf32>
    %255 = vector.shape_cast %254 : vector<1x1x64xf32> to vector<1x64xf32>
    %256 = vector.shape_cast %255 : vector<1x64xf32> to vector<1x64xf32>
    %257 = vector.broadcast %256 : vector<1x64xf32> to vector<2x64xf32>
    %cst_58 = arith.constant dense<0.000000e+00> : vector<16x192xf32>
    %258 = tpu.matmul %247, %249, %cst_58 {dimension_numbers = #tpu.dot_dimension_numbers<[1], [0], [0], [1], [0, 0, 1, 1], [], []>} : vector<16x64xf32>, vector<64x192xf32>, vector<16x192xf32> -> vector<16x192xf32>
    %259 = vector.broadcast %253 : vector<1x192xf32> to vector<16x192xf32>
    %260 = arith.addf %258, %259 : vector<16x192xf32>
    %261 = vector.extract_strided_slice %260 {offsets = [0, 0], sizes = [2, 192], strides = [1, 1]} : vector<16x192xf32> to vector<2x192xf32>
    %cst_59 = arith.constant dense<0.000000e+00> : vector<2x192xf32>
    %262 = tpu.matmul %42, %251, %cst_59 {dimension_numbers = #tpu.dot_dimension_numbers<[1], [0], [0], [1], [0, 0, 1, 1], [], []>} : vector<2x64xf32>, vector<64x192xf32>, vector<2x192xf32> -> vector<2x192xf32>
    %263 = vector.extract_strided_slice %261 {offsets = [0, 0], sizes = [2, 128], strides = [1, 1]} : vector<2x192xf32> to vector<2x128xf32>
    %264 = vector.extract_strided_slice %262 {offsets = [0, 0], sizes = [2, 128], strides = [1, 1]} : vector<2x192xf32> to vector<2x128xf32>
    %265 = arith.addf %263, %264 : vector<2x128xf32>
    %266 = arith.negf %265 : vector<2x128xf32>
    %267 = math.exp %266 : vector<2x128xf32>
    %cst_60 = arith.constant 1.000000e+00 : f32
    %268 = vector.broadcast %cst_60 : f32 to vector<2x128xf32>
    %269 = arith.addf %268, %267 : vector<2x128xf32>
    %270 = arith.divf %268, %269 : vector<2x128xf32>
    %271 = vector.extract_strided_slice %270 {offsets = [0, 0], sizes = [2, 64], strides = [1, 1]} : vector<2x128xf32> to vector<2x64xf32>
    %272 = vector.extract_strided_slice %270 {offsets = [0, 64], sizes = [2, 64], strides = [1, 1]} : vector<2x128xf32> to vector<2x64xf32>
    %273 = vector.extract_strided_slice %261 {offsets = [0, 128], sizes = [2, 64], strides = [1, 1]} : vector<2x192xf32> to vector<2x64xf32>
    %274 = vector.extract_strided_slice %262 {offsets = [0, 128], sizes = [2, 64], strides = [1, 1]} : vector<2x192xf32> to vector<2x64xf32>
    %275 = arith.addf %274, %257 : vector<2x64xf32>
    %276 = arith.mulf %271, %275 : vector<2x64xf32>
    %277 = arith.addf %273, %276 : vector<2x64xf32>
    %278 = math.tanh %277 : vector<2x64xf32>
    %cst_61 = arith.constant 1.000000e+00 : f32
    %279 = vector.broadcast %cst_61 : f32 to vector<2x64xf32>
    %280 = arith.subf %279, %272 : vector<2x64xf32>
    %281 = arith.mulf %280, %278 : vector<2x64xf32>
    %282 = arith.mulf %272, %42 : vector<2x64xf32>
    %283 = arith.addf %281, %282 : vector<2x64xf32>
    %284 = arith.select %6, %283, %42 : vector<2x64xi1>, vector<2x64xf32>
    %285 = vector.extract_strided_slice %260 {offsets = [2, 0], sizes = [2, 192], strides = [1, 1]} : vector<16x192xf32> to vector<2x192xf32>
    %cst_62 = arith.constant dense<0.000000e+00> : vector<2x192xf32>
    %286 = tpu.matmul %284, %251, %cst_62 {dimension_numbers = #tpu.dot_dimension_numbers<[1], [0], [0], [1], [0, 0, 1, 1], [], []>} : vector<2x64xf32>, vector<64x192xf32>, vector<2x192xf32> -> vector<2x192xf32>
    %287 = vector.extract_strided_slice %285 {offsets = [0, 0], sizes = [2, 128], strides = [1, 1]} : vector<2x192xf32> to vector<2x128xf32>
    %288 = vector.extract_strided_slice %286 {offsets = [0, 0], sizes = [2, 128], strides = [1, 1]} : vector<2x192xf32> to vector<2x128xf32>
    %289 = arith.addf %287, %288 : vector<2x128xf32>
    %290 = arith.negf %289 : vector<2x128xf32>
    %291 = math.exp %290 : vector<2x128xf32>
    %cst_63 = arith.constant 1.000000e+00 : f32
    %292 = vector.broadcast %cst_63 : f32 to vector<2x128xf32>
    %293 = arith.addf %292, %291 : vector<2x128xf32>
    %294 = arith.divf %292, %293 : vector<2x128xf32>
    %295 = vector.extract_strided_slice %294 {offsets = [0, 0], sizes = [2, 64], strides = [1, 1]} : vector<2x128xf32> to vector<2x64xf32>
    %296 = vector.extract_strided_slice %294 {offsets = [0, 64], sizes = [2, 64], strides = [1, 1]} : vector<2x128xf32> to vector<2x64xf32>
    %297 = vector.extract_strided_slice %285 {offsets = [0, 128], sizes = [2, 64], strides = [1, 1]} : vector<2x192xf32> to vector<2x64xf32>
    %298 = vector.extract_strided_slice %286 {offsets = [0, 128], sizes = [2, 64], strides = [1, 1]} : vector<2x192xf32> to vector<2x64xf32>
    %299 = arith.addf %298, %257 : vector<2x64xf32>
    %300 = arith.mulf %295, %299 : vector<2x64xf32>
    %301 = arith.addf %297, %300 : vector<2x64xf32>
    %302 = math.tanh %301 : vector<2x64xf32>
    %cst_64 = arith.constant 1.000000e+00 : f32
    %303 = vector.broadcast %cst_64 : f32 to vector<2x64xf32>
    %304 = arith.subf %303, %296 : vector<2x64xf32>
    %305 = arith.mulf %304, %302 : vector<2x64xf32>
    %306 = arith.mulf %296, %284 : vector<2x64xf32>
    %307 = arith.addf %305, %306 : vector<2x64xf32>
    %308 = arith.select %11, %307, %284 : vector<2x64xi1>, vector<2x64xf32>
    %309 = vector.extract_strided_slice %260 {offsets = [4, 0], sizes = [2, 192], strides = [1, 1]} : vector<16x192xf32> to vector<2x192xf32>
    %cst_65 = arith.constant dense<0.000000e+00> : vector<2x192xf32>
    %310 = tpu.matmul %308, %251, %cst_65 {dimension_numbers = #tpu.dot_dimension_numbers<[1], [0], [0], [1], [0, 0, 1, 1], [], []>} : vector<2x64xf32>, vector<64x192xf32>, vector<2x192xf32> -> vector<2x192xf32>
    %311 = vector.extract_strided_slice %309 {offsets = [0, 0], sizes = [2, 128], strides = [1, 1]} : vector<2x192xf32> to vector<2x128xf32>
    %312 = vector.extract_strided_slice %310 {offsets = [0, 0], sizes = [2, 128], strides = [1, 1]} : vector<2x192xf32> to vector<2x128xf32>
    %313 = arith.addf %311, %312 : vector<2x128xf32>
    %314 = arith.negf %313 : vector<2x128xf32>
    %315 = math.exp %314 : vector<2x128xf32>
    %cst_66 = arith.constant 1.000000e+00 : f32
    %316 = vector.broadcast %cst_66 : f32 to vector<2x128xf32>
    %317 = arith.addf %316, %315 : vector<2x128xf32>
    %318 = arith.divf %316, %317 : vector<2x128xf32>
    %319 = vector.extract_strided_slice %318 {offsets = [0, 0], sizes = [2, 64], strides = [1, 1]} : vector<2x128xf32> to vector<2x64xf32>
    %320 = vector.extract_strided_slice %318 {offsets = [0, 64], sizes = [2, 64], strides = [1, 1]} : vector<2x128xf32> to vector<2x64xf32>
    %321 = vector.extract_strided_slice %309 {offsets = [0, 128], sizes = [2, 64], strides = [1, 1]} : vector<2x192xf32> to vector<2x64xf32>
    %322 = vector.extract_strided_slice %310 {offsets = [0, 128], sizes = [2, 64], strides = [1, 1]} : vector<2x192xf32> to vector<2x64xf32>
    %323 = arith.addf %322, %257 : vector<2x64xf32>
    %324 = arith.mulf %319, %323 : vector<2x64xf32>
    %325 = arith.addf %321, %324 : vector<2x64xf32>
    %326 = math.tanh %325 : vector<2x64xf32>
    %cst_67 = arith.constant 1.000000e+00 : f32
    %327 = vector.broadcast %cst_67 : f32 to vector<2x64xf32>
    %328 = arith.subf %327, %320 : vector<2x64xf32>
    %329 = arith.mulf %328, %326 : vector<2x64xf32>
    %330 = arith.mulf %320, %308 : vector<2x64xf32>
    %331 = arith.addf %329, %330 : vector<2x64xf32>
    %332 = arith.select %16, %331, %308 : vector<2x64xi1>, vector<2x64xf32>
    %333 = vector.extract_strided_slice %260 {offsets = [6, 0], sizes = [2, 192], strides = [1, 1]} : vector<16x192xf32> to vector<2x192xf32>
    %cst_68 = arith.constant dense<0.000000e+00> : vector<2x192xf32>
    %334 = tpu.matmul %332, %251, %cst_68 {dimension_numbers = #tpu.dot_dimension_numbers<[1], [0], [0], [1], [0, 0, 1, 1], [], []>} : vector<2x64xf32>, vector<64x192xf32>, vector<2x192xf32> -> vector<2x192xf32>
    %335 = vector.extract_strided_slice %333 {offsets = [0, 0], sizes = [2, 128], strides = [1, 1]} : vector<2x192xf32> to vector<2x128xf32>
    %336 = vector.extract_strided_slice %334 {offsets = [0, 0], sizes = [2, 128], strides = [1, 1]} : vector<2x192xf32> to vector<2x128xf32>
    %337 = arith.addf %335, %336 : vector<2x128xf32>
    %338 = arith.negf %337 : vector<2x128xf32>
    %339 = math.exp %338 : vector<2x128xf32>
    %cst_69 = arith.constant 1.000000e+00 : f32
    %340 = vector.broadcast %cst_69 : f32 to vector<2x128xf32>
    %341 = arith.addf %340, %339 : vector<2x128xf32>
    %342 = arith.divf %340, %341 : vector<2x128xf32>
    %343 = vector.extract_strided_slice %342 {offsets = [0, 0], sizes = [2, 64], strides = [1, 1]} : vector<2x128xf32> to vector<2x64xf32>
    %344 = vector.extract_strided_slice %342 {offsets = [0, 64], sizes = [2, 64], strides = [1, 1]} : vector<2x128xf32> to vector<2x64xf32>
    %345 = vector.extract_strided_slice %333 {offsets = [0, 128], sizes = [2, 64], strides = [1, 1]} : vector<2x192xf32> to vector<2x64xf32>
    %346 = vector.extract_strided_slice %334 {offsets = [0, 128], sizes = [2, 64], strides = [1, 1]} : vector<2x192xf32> to vector<2x64xf32>
    %347 = arith.addf %346, %257 : vector<2x64xf32>
    %348 = arith.mulf %343, %347 : vector<2x64xf32>
    %349 = arith.addf %345, %348 : vector<2x64xf32>
    %350 = math.tanh %349 : vector<2x64xf32>
    %cst_70 = arith.constant 1.000000e+00 : f32
    %351 = vector.broadcast %cst_70 : f32 to vector<2x64xf32>
    %352 = arith.subf %351, %344 : vector<2x64xf32>
    %353 = arith.mulf %352, %350 : vector<2x64xf32>
    %354 = arith.mulf %344, %332 : vector<2x64xf32>
    %355 = arith.addf %353, %354 : vector<2x64xf32>
    %356 = arith.select %21, %355, %332 : vector<2x64xi1>, vector<2x64xf32>
    %357 = vector.extract_strided_slice %260 {offsets = [8, 0], sizes = [2, 192], strides = [1, 1]} : vector<16x192xf32> to vector<2x192xf32>
    %cst_71 = arith.constant dense<0.000000e+00> : vector<2x192xf32>
    %358 = tpu.matmul %356, %251, %cst_71 {dimension_numbers = #tpu.dot_dimension_numbers<[1], [0], [0], [1], [0, 0, 1, 1], [], []>} : vector<2x64xf32>, vector<64x192xf32>, vector<2x192xf32> -> vector<2x192xf32>
    %359 = vector.extract_strided_slice %357 {offsets = [0, 0], sizes = [2, 128], strides = [1, 1]} : vector<2x192xf32> to vector<2x128xf32>
    %360 = vector.extract_strided_slice %358 {offsets = [0, 0], sizes = [2, 128], strides = [1, 1]} : vector<2x192xf32> to vector<2x128xf32>
    %361 = arith.addf %359, %360 : vector<2x128xf32>
    %362 = arith.negf %361 : vector<2x128xf32>
    %363 = math.exp %362 : vector<2x128xf32>
    %cst_72 = arith.constant 1.000000e+00 : f32
    %364 = vector.broadcast %cst_72 : f32 to vector<2x128xf32>
    %365 = arith.addf %364, %363 : vector<2x128xf32>
    %366 = arith.divf %364, %365 : vector<2x128xf32>
    %367 = vector.extract_strided_slice %366 {offsets = [0, 0], sizes = [2, 64], strides = [1, 1]} : vector<2x128xf32> to vector<2x64xf32>
    %368 = vector.extract_strided_slice %366 {offsets = [0, 64], sizes = [2, 64], strides = [1, 1]} : vector<2x128xf32> to vector<2x64xf32>
    %369 = vector.extract_strided_slice %357 {offsets = [0, 128], sizes = [2, 64], strides = [1, 1]} : vector<2x192xf32> to vector<2x64xf32>
    %370 = vector.extract_strided_slice %358 {offsets = [0, 128], sizes = [2, 64], strides = [1, 1]} : vector<2x192xf32> to vector<2x64xf32>
    %371 = arith.addf %370, %257 : vector<2x64xf32>
    %372 = arith.mulf %367, %371 : vector<2x64xf32>
    %373 = arith.addf %369, %372 : vector<2x64xf32>
    %374 = math.tanh %373 : vector<2x64xf32>
    %cst_73 = arith.constant 1.000000e+00 : f32
    %375 = vector.broadcast %cst_73 : f32 to vector<2x64xf32>
    %376 = arith.subf %375, %368 : vector<2x64xf32>
    %377 = arith.mulf %376, %374 : vector<2x64xf32>
    %378 = arith.mulf %368, %356 : vector<2x64xf32>
    %379 = arith.addf %377, %378 : vector<2x64xf32>
    %380 = arith.select %26, %379, %356 : vector<2x64xi1>, vector<2x64xf32>
    %381 = vector.extract_strided_slice %260 {offsets = [10, 0], sizes = [2, 192], strides = [1, 1]} : vector<16x192xf32> to vector<2x192xf32>
    %cst_74 = arith.constant dense<0.000000e+00> : vector<2x192xf32>
    %382 = tpu.matmul %380, %251, %cst_74 {dimension_numbers = #tpu.dot_dimension_numbers<[1], [0], [0], [1], [0, 0, 1, 1], [], []>} : vector<2x64xf32>, vector<64x192xf32>, vector<2x192xf32> -> vector<2x192xf32>
    %383 = vector.extract_strided_slice %381 {offsets = [0, 0], sizes = [2, 128], strides = [1, 1]} : vector<2x192xf32> to vector<2x128xf32>
    %384 = vector.extract_strided_slice %382 {offsets = [0, 0], sizes = [2, 128], strides = [1, 1]} : vector<2x192xf32> to vector<2x128xf32>
    %385 = arith.addf %383, %384 : vector<2x128xf32>
    %386 = arith.negf %385 : vector<2x128xf32>
    %387 = math.exp %386 : vector<2x128xf32>
    %cst_75 = arith.constant 1.000000e+00 : f32
    %388 = vector.broadcast %cst_75 : f32 to vector<2x128xf32>
    %389 = arith.addf %388, %387 : vector<2x128xf32>
    %390 = arith.divf %388, %389 : vector<2x128xf32>
    %391 = vector.extract_strided_slice %390 {offsets = [0, 0], sizes = [2, 64], strides = [1, 1]} : vector<2x128xf32> to vector<2x64xf32>
    %392 = vector.extract_strided_slice %390 {offsets = [0, 64], sizes = [2, 64], strides = [1, 1]} : vector<2x128xf32> to vector<2x64xf32>
    %393 = vector.extract_strided_slice %381 {offsets = [0, 128], sizes = [2, 64], strides = [1, 1]} : vector<2x192xf32> to vector<2x64xf32>
    %394 = vector.extract_strided_slice %382 {offsets = [0, 128], sizes = [2, 64], strides = [1, 1]} : vector<2x192xf32> to vector<2x64xf32>
    %395 = arith.addf %394, %257 : vector<2x64xf32>
    %396 = arith.mulf %391, %395 : vector<2x64xf32>
    %397 = arith.addf %393, %396 : vector<2x64xf32>
    %398 = math.tanh %397 : vector<2x64xf32>
    %cst_76 = arith.constant 1.000000e+00 : f32
    %399 = vector.broadcast %cst_76 : f32 to vector<2x64xf32>
    %400 = arith.subf %399, %392 : vector<2x64xf32>
    %401 = arith.mulf %400, %398 : vector<2x64xf32>
    %402 = arith.mulf %392, %380 : vector<2x64xf32>
    %403 = arith.addf %401, %402 : vector<2x64xf32>
    %404 = arith.select %31, %403, %380 : vector<2x64xi1>, vector<2x64xf32>
    %405 = vector.extract_strided_slice %260 {offsets = [12, 0], sizes = [2, 192], strides = [1, 1]} : vector<16x192xf32> to vector<2x192xf32>
    %cst_77 = arith.constant dense<0.000000e+00> : vector<2x192xf32>
    %406 = tpu.matmul %404, %251, %cst_77 {dimension_numbers = #tpu.dot_dimension_numbers<[1], [0], [0], [1], [0, 0, 1, 1], [], []>} : vector<2x64xf32>, vector<64x192xf32>, vector<2x192xf32> -> vector<2x192xf32>
    %407 = vector.extract_strided_slice %405 {offsets = [0, 0], sizes = [2, 128], strides = [1, 1]} : vector<2x192xf32> to vector<2x128xf32>
    %408 = vector.extract_strided_slice %406 {offsets = [0, 0], sizes = [2, 128], strides = [1, 1]} : vector<2x192xf32> to vector<2x128xf32>
    %409 = arith.addf %407, %408 : vector<2x128xf32>
    %410 = arith.negf %409 : vector<2x128xf32>
    %411 = math.exp %410 : vector<2x128xf32>
    %cst_78 = arith.constant 1.000000e+00 : f32
    %412 = vector.broadcast %cst_78 : f32 to vector<2x128xf32>
    %413 = arith.addf %412, %411 : vector<2x128xf32>
    %414 = arith.divf %412, %413 : vector<2x128xf32>
    %415 = vector.extract_strided_slice %414 {offsets = [0, 0], sizes = [2, 64], strides = [1, 1]} : vector<2x128xf32> to vector<2x64xf32>
    %416 = vector.extract_strided_slice %414 {offsets = [0, 64], sizes = [2, 64], strides = [1, 1]} : vector<2x128xf32> to vector<2x64xf32>
    %417 = vector.extract_strided_slice %405 {offsets = [0, 128], sizes = [2, 64], strides = [1, 1]} : vector<2x192xf32> to vector<2x64xf32>
    %418 = vector.extract_strided_slice %406 {offsets = [0, 128], sizes = [2, 64], strides = [1, 1]} : vector<2x192xf32> to vector<2x64xf32>
    %419 = arith.addf %418, %257 : vector<2x64xf32>
    %420 = arith.mulf %415, %419 : vector<2x64xf32>
    %421 = arith.addf %417, %420 : vector<2x64xf32>
    %422 = math.tanh %421 : vector<2x64xf32>
    %cst_79 = arith.constant 1.000000e+00 : f32
    %423 = vector.broadcast %cst_79 : f32 to vector<2x64xf32>
    %424 = arith.subf %423, %416 : vector<2x64xf32>
    %425 = arith.mulf %424, %422 : vector<2x64xf32>
    %426 = arith.mulf %416, %404 : vector<2x64xf32>
    %427 = arith.addf %425, %426 : vector<2x64xf32>
    %428 = arith.select %36, %427, %404 : vector<2x64xi1>, vector<2x64xf32>
    %429 = vector.extract_strided_slice %260 {offsets = [14, 0], sizes = [2, 192], strides = [1, 1]} : vector<16x192xf32> to vector<2x192xf32>
    %cst_80 = arith.constant dense<0.000000e+00> : vector<2x192xf32>
    %430 = tpu.matmul %428, %251, %cst_80 {dimension_numbers = #tpu.dot_dimension_numbers<[1], [0], [0], [1], [0, 0, 1, 1], [], []>} : vector<2x64xf32>, vector<64x192xf32>, vector<2x192xf32> -> vector<2x192xf32>
    %431 = vector.extract_strided_slice %429 {offsets = [0, 0], sizes = [2, 128], strides = [1, 1]} : vector<2x192xf32> to vector<2x128xf32>
    %432 = vector.extract_strided_slice %430 {offsets = [0, 0], sizes = [2, 128], strides = [1, 1]} : vector<2x192xf32> to vector<2x128xf32>
    %433 = arith.addf %431, %432 : vector<2x128xf32>
    %434 = arith.negf %433 : vector<2x128xf32>
    %435 = math.exp %434 : vector<2x128xf32>
    %cst_81 = arith.constant 1.000000e+00 : f32
    %436 = vector.broadcast %cst_81 : f32 to vector<2x128xf32>
    %437 = arith.addf %436, %435 : vector<2x128xf32>
    %438 = arith.divf %436, %437 : vector<2x128xf32>
    %439 = vector.extract_strided_slice %438 {offsets = [0, 0], sizes = [2, 64], strides = [1, 1]} : vector<2x128xf32> to vector<2x64xf32>
    %440 = vector.extract_strided_slice %438 {offsets = [0, 64], sizes = [2, 64], strides = [1, 1]} : vector<2x128xf32> to vector<2x64xf32>
    %441 = vector.extract_strided_slice %429 {offsets = [0, 128], sizes = [2, 64], strides = [1, 1]} : vector<2x192xf32> to vector<2x64xf32>
    %442 = vector.extract_strided_slice %430 {offsets = [0, 128], sizes = [2, 64], strides = [1, 1]} : vector<2x192xf32> to vector<2x64xf32>
    %443 = arith.addf %442, %257 : vector<2x64xf32>
    %444 = arith.mulf %439, %443 : vector<2x64xf32>
    %445 = arith.addf %441, %444 : vector<2x64xf32>
    %446 = math.tanh %445 : vector<2x64xf32>
    %cst_82 = arith.constant 1.000000e+00 : f32
    %447 = vector.broadcast %cst_82 : f32 to vector<2x64xf32>
    %448 = arith.subf %447, %440 : vector<2x64xf32>
    %449 = arith.mulf %448, %446 : vector<2x64xf32>
    %450 = arith.mulf %440, %428 : vector<2x64xf32>
    %451 = arith.addf %449, %450 : vector<2x64xf32>
    %452 = arith.select %41, %451, %428 : vector<2x64xi1>, vector<2x64xf32>
    %453 = tpu.concatenate %284, %308, %332, %356, %380, %404, %428, %452 in 0 : vector<2x64xf32>, vector<2x64xf32>, vector<2x64xf32>, vector<2x64xf32>, vector<2x64xf32>, vector<2x64xf32>, vector<2x64xf32>, vector<2x64xf32> -> vector<16x64xf32>
    %c1_83 = arith.constant 1 : index
    %c0_84 = arith.constant 0 : index
    %c0_85 = arith.constant 0 : index
    %454 = vector.load %arg3[%c1_83, %c0_84, %c0_85] : memref<3x64x192xf32, #tpu.memory_space<vmem>>, vector<1x64x192xf32>
    %455 = vector.shape_cast %454 : vector<1x64x192xf32> to vector<64x192xf32>
    %c2 = arith.constant 2 : index
    %c0_86 = arith.constant 0 : index
    %c0_87 = arith.constant 0 : index
    %456 = vector.load %arg4[%c2, %c0_86, %c0_87] : memref<4x64x192xf32, #tpu.memory_space<vmem>>, vector<1x64x192xf32>
    %457 = vector.shape_cast %456 : vector<1x64x192xf32> to vector<64x192xf32>
    %c2_88 = arith.constant 2 : index
    %c0_89 = arith.constant 0 : index
    %c0_90 = arith.constant 0 : index
    %458 = vector.load %arg5[%c2_88, %c0_89, %c0_90] : memref<4x1x192xf32, #tpu.memory_space<vmem>>, vector<1x1x192xf32>
    %459 = vector.shape_cast %458 : vector<1x1x192xf32> to vector<1x192xf32>
    %c2_91 = arith.constant 2 : index
    %c0_92 = arith.constant 0 : index
    %c0_93 = arith.constant 0 : index
    %460 = vector.load %arg6[%c2_91, %c0_92, %c0_93] : memref<4x1x64xf32, #tpu.memory_space<vmem>>, vector<1x1x64xf32>
    %461 = vector.shape_cast %460 : vector<1x1x64xf32> to vector<1x64xf32>
    %462 = vector.shape_cast %461 : vector<1x64xf32> to vector<1x64xf32>
    %463 = vector.broadcast %462 : vector<1x64xf32> to vector<2x64xf32>
    %cst_94 = arith.constant dense<0.000000e+00> : vector<16x192xf32>
    %464 = tpu.matmul %453, %455, %cst_94 {dimension_numbers = #tpu.dot_dimension_numbers<[1], [0], [0], [1], [0, 0, 1, 1], [], []>} : vector<16x64xf32>, vector<64x192xf32>, vector<16x192xf32> -> vector<16x192xf32>
    %465 = vector.broadcast %459 : vector<1x192xf32> to vector<16x192xf32>
    %466 = arith.addf %464, %465 : vector<16x192xf32>
    %467 = vector.extract_strided_slice %466 {offsets = [0, 0], sizes = [2, 192], strides = [1, 1]} : vector<16x192xf32> to vector<2x192xf32>
    %cst_95 = arith.constant dense<0.000000e+00> : vector<2x192xf32>
    %468 = tpu.matmul %42, %457, %cst_95 {dimension_numbers = #tpu.dot_dimension_numbers<[1], [0], [0], [1], [0, 0, 1, 1], [], []>} : vector<2x64xf32>, vector<64x192xf32>, vector<2x192xf32> -> vector<2x192xf32>
    %469 = vector.extract_strided_slice %467 {offsets = [0, 0], sizes = [2, 128], strides = [1, 1]} : vector<2x192xf32> to vector<2x128xf32>
    %470 = vector.extract_strided_slice %468 {offsets = [0, 0], sizes = [2, 128], strides = [1, 1]} : vector<2x192xf32> to vector<2x128xf32>
    %471 = arith.addf %469, %470 : vector<2x128xf32>
    %472 = arith.negf %471 : vector<2x128xf32>
    %473 = math.exp %472 : vector<2x128xf32>
    %cst_96 = arith.constant 1.000000e+00 : f32
    %474 = vector.broadcast %cst_96 : f32 to vector<2x128xf32>
    %475 = arith.addf %474, %473 : vector<2x128xf32>
    %476 = arith.divf %474, %475 : vector<2x128xf32>
    %477 = vector.extract_strided_slice %476 {offsets = [0, 0], sizes = [2, 64], strides = [1, 1]} : vector<2x128xf32> to vector<2x64xf32>
    %478 = vector.extract_strided_slice %476 {offsets = [0, 64], sizes = [2, 64], strides = [1, 1]} : vector<2x128xf32> to vector<2x64xf32>
    %479 = vector.extract_strided_slice %467 {offsets = [0, 128], sizes = [2, 64], strides = [1, 1]} : vector<2x192xf32> to vector<2x64xf32>
    %480 = vector.extract_strided_slice %468 {offsets = [0, 128], sizes = [2, 64], strides = [1, 1]} : vector<2x192xf32> to vector<2x64xf32>
    %481 = arith.addf %480, %463 : vector<2x64xf32>
    %482 = arith.mulf %477, %481 : vector<2x64xf32>
    %483 = arith.addf %479, %482 : vector<2x64xf32>
    %484 = math.tanh %483 : vector<2x64xf32>
    %cst_97 = arith.constant 1.000000e+00 : f32
    %485 = vector.broadcast %cst_97 : f32 to vector<2x64xf32>
    %486 = arith.subf %485, %478 : vector<2x64xf32>
    %487 = arith.mulf %486, %484 : vector<2x64xf32>
    %488 = arith.mulf %478, %42 : vector<2x64xf32>
    %489 = arith.addf %487, %488 : vector<2x64xf32>
    %490 = arith.select %6, %489, %42 : vector<2x64xi1>, vector<2x64xf32>
    %491 = vector.extract_strided_slice %466 {offsets = [2, 0], sizes = [2, 192], strides = [1, 1]} : vector<16x192xf32> to vector<2x192xf32>
    %cst_98 = arith.constant dense<0.000000e+00> : vector<2x192xf32>
    %492 = tpu.matmul %490, %457, %cst_98 {dimension_numbers = #tpu.dot_dimension_numbers<[1], [0], [0], [1], [0, 0, 1, 1], [], []>} : vector<2x64xf32>, vector<64x192xf32>, vector<2x192xf32> -> vector<2x192xf32>
    %493 = vector.extract_strided_slice %491 {offsets = [0, 0], sizes = [2, 128], strides = [1, 1]} : vector<2x192xf32> to vector<2x128xf32>
    %494 = vector.extract_strided_slice %492 {offsets = [0, 0], sizes = [2, 128], strides = [1, 1]} : vector<2x192xf32> to vector<2x128xf32>
    %495 = arith.addf %493, %494 : vector<2x128xf32>
    %496 = arith.negf %495 : vector<2x128xf32>
    %497 = math.exp %496 : vector<2x128xf32>
    %cst_99 = arith.constant 1.000000e+00 : f32
    %498 = vector.broadcast %cst_99 : f32 to vector<2x128xf32>
    %499 = arith.addf %498, %497 : vector<2x128xf32>
    %500 = arith.divf %498, %499 : vector<2x128xf32>
    %501 = vector.extract_strided_slice %500 {offsets = [0, 0], sizes = [2, 64], strides = [1, 1]} : vector<2x128xf32> to vector<2x64xf32>
    %502 = vector.extract_strided_slice %500 {offsets = [0, 64], sizes = [2, 64], strides = [1, 1]} : vector<2x128xf32> to vector<2x64xf32>
    %503 = vector.extract_strided_slice %491 {offsets = [0, 128], sizes = [2, 64], strides = [1, 1]} : vector<2x192xf32> to vector<2x64xf32>
    %504 = vector.extract_strided_slice %492 {offsets = [0, 128], sizes = [2, 64], strides = [1, 1]} : vector<2x192xf32> to vector<2x64xf32>
    %505 = arith.addf %504, %463 : vector<2x64xf32>
    %506 = arith.mulf %501, %505 : vector<2x64xf32>
    %507 = arith.addf %503, %506 : vector<2x64xf32>
    %508 = math.tanh %507 : vector<2x64xf32>
    %cst_100 = arith.constant 1.000000e+00 : f32
    %509 = vector.broadcast %cst_100 : f32 to vector<2x64xf32>
    %510 = arith.subf %509, %502 : vector<2x64xf32>
    %511 = arith.mulf %510, %508 : vector<2x64xf32>
    %512 = arith.mulf %502, %490 : vector<2x64xf32>
    %513 = arith.addf %511, %512 : vector<2x64xf32>
    %514 = arith.select %11, %513, %490 : vector<2x64xi1>, vector<2x64xf32>
    %515 = vector.extract_strided_slice %466 {offsets = [4, 0], sizes = [2, 192], strides = [1, 1]} : vector<16x192xf32> to vector<2x192xf32>
    %cst_101 = arith.constant dense<0.000000e+00> : vector<2x192xf32>
    %516 = tpu.matmul %514, %457, %cst_101 {dimension_numbers = #tpu.dot_dimension_numbers<[1], [0], [0], [1], [0, 0, 1, 1], [], []>} : vector<2x64xf32>, vector<64x192xf32>, vector<2x192xf32> -> vector<2x192xf32>
    %517 = vector.extract_strided_slice %515 {offsets = [0, 0], sizes = [2, 128], strides = [1, 1]} : vector<2x192xf32> to vector<2x128xf32>
    %518 = vector.extract_strided_slice %516 {offsets = [0, 0], sizes = [2, 128], strides = [1, 1]} : vector<2x192xf32> to vector<2x128xf32>
    %519 = arith.addf %517, %518 : vector<2x128xf32>
    %520 = arith.negf %519 : vector<2x128xf32>
    %521 = math.exp %520 : vector<2x128xf32>
    %cst_102 = arith.constant 1.000000e+00 : f32
    %522 = vector.broadcast %cst_102 : f32 to vector<2x128xf32>
    %523 = arith.addf %522, %521 : vector<2x128xf32>
    %524 = arith.divf %522, %523 : vector<2x128xf32>
    %525 = vector.extract_strided_slice %524 {offsets = [0, 0], sizes = [2, 64], strides = [1, 1]} : vector<2x128xf32> to vector<2x64xf32>
    %526 = vector.extract_strided_slice %524 {offsets = [0, 64], sizes = [2, 64], strides = [1, 1]} : vector<2x128xf32> to vector<2x64xf32>
    %527 = vector.extract_strided_slice %515 {offsets = [0, 128], sizes = [2, 64], strides = [1, 1]} : vector<2x192xf32> to vector<2x64xf32>
    %528 = vector.extract_strided_slice %516 {offsets = [0, 128], sizes = [2, 64], strides = [1, 1]} : vector<2x192xf32> to vector<2x64xf32>
    %529 = arith.addf %528, %463 : vector<2x64xf32>
    %530 = arith.mulf %525, %529 : vector<2x64xf32>
    %531 = arith.addf %527, %530 : vector<2x64xf32>
    %532 = math.tanh %531 : vector<2x64xf32>
    %cst_103 = arith.constant 1.000000e+00 : f32
    %533 = vector.broadcast %cst_103 : f32 to vector<2x64xf32>
    %534 = arith.subf %533, %526 : vector<2x64xf32>
    %535 = arith.mulf %534, %532 : vector<2x64xf32>
    %536 = arith.mulf %526, %514 : vector<2x64xf32>
    %537 = arith.addf %535, %536 : vector<2x64xf32>
    %538 = arith.select %16, %537, %514 : vector<2x64xi1>, vector<2x64xf32>
    %539 = vector.extract_strided_slice %466 {offsets = [6, 0], sizes = [2, 192], strides = [1, 1]} : vector<16x192xf32> to vector<2x192xf32>
    %cst_104 = arith.constant dense<0.000000e+00> : vector<2x192xf32>
    %540 = tpu.matmul %538, %457, %cst_104 {dimension_numbers = #tpu.dot_dimension_numbers<[1], [0], [0], [1], [0, 0, 1, 1], [], []>} : vector<2x64xf32>, vector<64x192xf32>, vector<2x192xf32> -> vector<2x192xf32>
    %541 = vector.extract_strided_slice %539 {offsets = [0, 0], sizes = [2, 128], strides = [1, 1]} : vector<2x192xf32> to vector<2x128xf32>
    %542 = vector.extract_strided_slice %540 {offsets = [0, 0], sizes = [2, 128], strides = [1, 1]} : vector<2x192xf32> to vector<2x128xf32>
    %543 = arith.addf %541, %542 : vector<2x128xf32>
    %544 = arith.negf %543 : vector<2x128xf32>
    %545 = math.exp %544 : vector<2x128xf32>
    %cst_105 = arith.constant 1.000000e+00 : f32
    %546 = vector.broadcast %cst_105 : f32 to vector<2x128xf32>
    %547 = arith.addf %546, %545 : vector<2x128xf32>
    %548 = arith.divf %546, %547 : vector<2x128xf32>
    %549 = vector.extract_strided_slice %548 {offsets = [0, 0], sizes = [2, 64], strides = [1, 1]} : vector<2x128xf32> to vector<2x64xf32>
    %550 = vector.extract_strided_slice %548 {offsets = [0, 64], sizes = [2, 64], strides = [1, 1]} : vector<2x128xf32> to vector<2x64xf32>
    %551 = vector.extract_strided_slice %539 {offsets = [0, 128], sizes = [2, 64], strides = [1, 1]} : vector<2x192xf32> to vector<2x64xf32>
    %552 = vector.extract_strided_slice %540 {offsets = [0, 128], sizes = [2, 64], strides = [1, 1]} : vector<2x192xf32> to vector<2x64xf32>
    %553 = arith.addf %552, %463 : vector<2x64xf32>
    %554 = arith.mulf %549, %553 : vector<2x64xf32>
    %555 = arith.addf %551, %554 : vector<2x64xf32>
    %556 = math.tanh %555 : vector<2x64xf32>
    %cst_106 = arith.constant 1.000000e+00 : f32
    %557 = vector.broadcast %cst_106 : f32 to vector<2x64xf32>
    %558 = arith.subf %557, %550 : vector<2x64xf32>
    %559 = arith.mulf %558, %556 : vector<2x64xf32>
    %560 = arith.mulf %550, %538 : vector<2x64xf32>
    %561 = arith.addf %559, %560 : vector<2x64xf32>
    %562 = arith.select %21, %561, %538 : vector<2x64xi1>, vector<2x64xf32>
    %563 = vector.extract_strided_slice %466 {offsets = [8, 0], sizes = [2, 192], strides = [1, 1]} : vector<16x192xf32> to vector<2x192xf32>
    %cst_107 = arith.constant dense<0.000000e+00> : vector<2x192xf32>
    %564 = tpu.matmul %562, %457, %cst_107 {dimension_numbers = #tpu.dot_dimension_numbers<[1], [0], [0], [1], [0, 0, 1, 1], [], []>} : vector<2x64xf32>, vector<64x192xf32>, vector<2x192xf32> -> vector<2x192xf32>
    %565 = vector.extract_strided_slice %563 {offsets = [0, 0], sizes = [2, 128], strides = [1, 1]} : vector<2x192xf32> to vector<2x128xf32>
    %566 = vector.extract_strided_slice %564 {offsets = [0, 0], sizes = [2, 128], strides = [1, 1]} : vector<2x192xf32> to vector<2x128xf32>
    %567 = arith.addf %565, %566 : vector<2x128xf32>
    %568 = arith.negf %567 : vector<2x128xf32>
    %569 = math.exp %568 : vector<2x128xf32>
    %cst_108 = arith.constant 1.000000e+00 : f32
    %570 = vector.broadcast %cst_108 : f32 to vector<2x128xf32>
    %571 = arith.addf %570, %569 : vector<2x128xf32>
    %572 = arith.divf %570, %571 : vector<2x128xf32>
    %573 = vector.extract_strided_slice %572 {offsets = [0, 0], sizes = [2, 64], strides = [1, 1]} : vector<2x128xf32> to vector<2x64xf32>
    %574 = vector.extract_strided_slice %572 {offsets = [0, 64], sizes = [2, 64], strides = [1, 1]} : vector<2x128xf32> to vector<2x64xf32>
    %575 = vector.extract_strided_slice %563 {offsets = [0, 128], sizes = [2, 64], strides = [1, 1]} : vector<2x192xf32> to vector<2x64xf32>
    %576 = vector.extract_strided_slice %564 {offsets = [0, 128], sizes = [2, 64], strides = [1, 1]} : vector<2x192xf32> to vector<2x64xf32>
    %577 = arith.addf %576, %463 : vector<2x64xf32>
    %578 = arith.mulf %573, %577 : vector<2x64xf32>
    %579 = arith.addf %575, %578 : vector<2x64xf32>
    %580 = math.tanh %579 : vector<2x64xf32>
    %cst_109 = arith.constant 1.000000e+00 : f32
    %581 = vector.broadcast %cst_109 : f32 to vector<2x64xf32>
    %582 = arith.subf %581, %574 : vector<2x64xf32>
    %583 = arith.mulf %582, %580 : vector<2x64xf32>
    %584 = arith.mulf %574, %562 : vector<2x64xf32>
    %585 = arith.addf %583, %584 : vector<2x64xf32>
    %586 = arith.select %26, %585, %562 : vector<2x64xi1>, vector<2x64xf32>
    %587 = vector.extract_strided_slice %466 {offsets = [10, 0], sizes = [2, 192], strides = [1, 1]} : vector<16x192xf32> to vector<2x192xf32>
    %cst_110 = arith.constant dense<0.000000e+00> : vector<2x192xf32>
    %588 = tpu.matmul %586, %457, %cst_110 {dimension_numbers = #tpu.dot_dimension_numbers<[1], [0], [0], [1], [0, 0, 1, 1], [], []>} : vector<2x64xf32>, vector<64x192xf32>, vector<2x192xf32> -> vector<2x192xf32>
    %589 = vector.extract_strided_slice %587 {offsets = [0, 0], sizes = [2, 128], strides = [1, 1]} : vector<2x192xf32> to vector<2x128xf32>
    %590 = vector.extract_strided_slice %588 {offsets = [0, 0], sizes = [2, 128], strides = [1, 1]} : vector<2x192xf32> to vector<2x128xf32>
    %591 = arith.addf %589, %590 : vector<2x128xf32>
    %592 = arith.negf %591 : vector<2x128xf32>
    %593 = math.exp %592 : vector<2x128xf32>
    %cst_111 = arith.constant 1.000000e+00 : f32
    %594 = vector.broadcast %cst_111 : f32 to vector<2x128xf32>
    %595 = arith.addf %594, %593 : vector<2x128xf32>
    %596 = arith.divf %594, %595 : vector<2x128xf32>
    %597 = vector.extract_strided_slice %596 {offsets = [0, 0], sizes = [2, 64], strides = [1, 1]} : vector<2x128xf32> to vector<2x64xf32>
    %598 = vector.extract_strided_slice %596 {offsets = [0, 64], sizes = [2, 64], strides = [1, 1]} : vector<2x128xf32> to vector<2x64xf32>
    %599 = vector.extract_strided_slice %587 {offsets = [0, 128], sizes = [2, 64], strides = [1, 1]} : vector<2x192xf32> to vector<2x64xf32>
    %600 = vector.extract_strided_slice %588 {offsets = [0, 128], sizes = [2, 64], strides = [1, 1]} : vector<2x192xf32> to vector<2x64xf32>
    %601 = arith.addf %600, %463 : vector<2x64xf32>
    %602 = arith.mulf %597, %601 : vector<2x64xf32>
    %603 = arith.addf %599, %602 : vector<2x64xf32>
    %604 = math.tanh %603 : vector<2x64xf32>
    %cst_112 = arith.constant 1.000000e+00 : f32
    %605 = vector.broadcast %cst_112 : f32 to vector<2x64xf32>
    %606 = arith.subf %605, %598 : vector<2x64xf32>
    %607 = arith.mulf %606, %604 : vector<2x64xf32>
    %608 = arith.mulf %598, %586 : vector<2x64xf32>
    %609 = arith.addf %607, %608 : vector<2x64xf32>
    %610 = arith.select %31, %609, %586 : vector<2x64xi1>, vector<2x64xf32>
    %611 = vector.extract_strided_slice %466 {offsets = [12, 0], sizes = [2, 192], strides = [1, 1]} : vector<16x192xf32> to vector<2x192xf32>
    %cst_113 = arith.constant dense<0.000000e+00> : vector<2x192xf32>
    %612 = tpu.matmul %610, %457, %cst_113 {dimension_numbers = #tpu.dot_dimension_numbers<[1], [0], [0], [1], [0, 0, 1, 1], [], []>} : vector<2x64xf32>, vector<64x192xf32>, vector<2x192xf32> -> vector<2x192xf32>
    %613 = vector.extract_strided_slice %611 {offsets = [0, 0], sizes = [2, 128], strides = [1, 1]} : vector<2x192xf32> to vector<2x128xf32>
    %614 = vector.extract_strided_slice %612 {offsets = [0, 0], sizes = [2, 128], strides = [1, 1]} : vector<2x192xf32> to vector<2x128xf32>
    %615 = arith.addf %613, %614 : vector<2x128xf32>
    %616 = arith.negf %615 : vector<2x128xf32>
    %617 = math.exp %616 : vector<2x128xf32>
    %cst_114 = arith.constant 1.000000e+00 : f32
    %618 = vector.broadcast %cst_114 : f32 to vector<2x128xf32>
    %619 = arith.addf %618, %617 : vector<2x128xf32>
    %620 = arith.divf %618, %619 : vector<2x128xf32>
    %621 = vector.extract_strided_slice %620 {offsets = [0, 0], sizes = [2, 64], strides = [1, 1]} : vector<2x128xf32> to vector<2x64xf32>
    %622 = vector.extract_strided_slice %620 {offsets = [0, 64], sizes = [2, 64], strides = [1, 1]} : vector<2x128xf32> to vector<2x64xf32>
    %623 = vector.extract_strided_slice %611 {offsets = [0, 128], sizes = [2, 64], strides = [1, 1]} : vector<2x192xf32> to vector<2x64xf32>
    %624 = vector.extract_strided_slice %612 {offsets = [0, 128], sizes = [2, 64], strides = [1, 1]} : vector<2x192xf32> to vector<2x64xf32>
    %625 = arith.addf %624, %463 : vector<2x64xf32>
    %626 = arith.mulf %621, %625 : vector<2x64xf32>
    %627 = arith.addf %623, %626 : vector<2x64xf32>
    %628 = math.tanh %627 : vector<2x64xf32>
    %cst_115 = arith.constant 1.000000e+00 : f32
    %629 = vector.broadcast %cst_115 : f32 to vector<2x64xf32>
    %630 = arith.subf %629, %622 : vector<2x64xf32>
    %631 = arith.mulf %630, %628 : vector<2x64xf32>
    %632 = arith.mulf %622, %610 : vector<2x64xf32>
    %633 = arith.addf %631, %632 : vector<2x64xf32>
    %634 = arith.select %36, %633, %610 : vector<2x64xi1>, vector<2x64xf32>
    %635 = vector.extract_strided_slice %466 {offsets = [14, 0], sizes = [2, 192], strides = [1, 1]} : vector<16x192xf32> to vector<2x192xf32>
    %cst_116 = arith.constant dense<0.000000e+00> : vector<2x192xf32>
    %636 = tpu.matmul %634, %457, %cst_116 {dimension_numbers = #tpu.dot_dimension_numbers<[1], [0], [0], [1], [0, 0, 1, 1], [], []>} : vector<2x64xf32>, vector<64x192xf32>, vector<2x192xf32> -> vector<2x192xf32>
    %637 = vector.extract_strided_slice %635 {offsets = [0, 0], sizes = [2, 128], strides = [1, 1]} : vector<2x192xf32> to vector<2x128xf32>
    %638 = vector.extract_strided_slice %636 {offsets = [0, 0], sizes = [2, 128], strides = [1, 1]} : vector<2x192xf32> to vector<2x128xf32>
    %639 = arith.addf %637, %638 : vector<2x128xf32>
    %640 = arith.negf %639 : vector<2x128xf32>
    %641 = math.exp %640 : vector<2x128xf32>
    %cst_117 = arith.constant 1.000000e+00 : f32
    %642 = vector.broadcast %cst_117 : f32 to vector<2x128xf32>
    %643 = arith.addf %642, %641 : vector<2x128xf32>
    %644 = arith.divf %642, %643 : vector<2x128xf32>
    %645 = vector.extract_strided_slice %644 {offsets = [0, 0], sizes = [2, 64], strides = [1, 1]} : vector<2x128xf32> to vector<2x64xf32>
    %646 = vector.extract_strided_slice %644 {offsets = [0, 64], sizes = [2, 64], strides = [1, 1]} : vector<2x128xf32> to vector<2x64xf32>
    %647 = vector.extract_strided_slice %635 {offsets = [0, 128], sizes = [2, 64], strides = [1, 1]} : vector<2x192xf32> to vector<2x64xf32>
    %648 = vector.extract_strided_slice %636 {offsets = [0, 128], sizes = [2, 64], strides = [1, 1]} : vector<2x192xf32> to vector<2x64xf32>
    %649 = arith.addf %648, %463 : vector<2x64xf32>
    %650 = arith.mulf %645, %649 : vector<2x64xf32>
    %651 = arith.addf %647, %650 : vector<2x64xf32>
    %652 = math.tanh %651 : vector<2x64xf32>
    %cst_118 = arith.constant 1.000000e+00 : f32
    %653 = vector.broadcast %cst_118 : f32 to vector<2x64xf32>
    %654 = arith.subf %653, %646 : vector<2x64xf32>
    %655 = arith.mulf %654, %652 : vector<2x64xf32>
    %656 = arith.mulf %646, %634 : vector<2x64xf32>
    %657 = arith.addf %655, %656 : vector<2x64xf32>
    %658 = arith.select %41, %657, %634 : vector<2x64xi1>, vector<2x64xf32>
    %659 = tpu.concatenate %490, %514, %538, %562, %586, %610, %634, %658 in 0 : vector<2x64xf32>, vector<2x64xf32>, vector<2x64xf32>, vector<2x64xf32>, vector<2x64xf32>, vector<2x64xf32>, vector<2x64xf32>, vector<2x64xf32> -> vector<16x64xf32>
    %c2_119 = arith.constant 2 : index
    %c0_120 = arith.constant 0 : index
    %c0_121 = arith.constant 0 : index
    %660 = vector.load %arg3[%c2_119, %c0_120, %c0_121] : memref<3x64x192xf32, #tpu.memory_space<vmem>>, vector<1x64x192xf32>
    %661 = vector.shape_cast %660 : vector<1x64x192xf32> to vector<64x192xf32>
    %c3 = arith.constant 3 : index
    %c0_122 = arith.constant 0 : index
    %c0_123 = arith.constant 0 : index
    %662 = vector.load %arg4[%c3, %c0_122, %c0_123] : memref<4x64x192xf32, #tpu.memory_space<vmem>>, vector<1x64x192xf32>
    %663 = vector.shape_cast %662 : vector<1x64x192xf32> to vector<64x192xf32>
    %c3_124 = arith.constant 3 : index
    %c0_125 = arith.constant 0 : index
    %c0_126 = arith.constant 0 : index
    %664 = vector.load %arg5[%c3_124, %c0_125, %c0_126] : memref<4x1x192xf32, #tpu.memory_space<vmem>>, vector<1x1x192xf32>
    %665 = vector.shape_cast %664 : vector<1x1x192xf32> to vector<1x192xf32>
    %c3_127 = arith.constant 3 : index
    %c0_128 = arith.constant 0 : index
    %c0_129 = arith.constant 0 : index
    %666 = vector.load %arg6[%c3_127, %c0_128, %c0_129] : memref<4x1x64xf32, #tpu.memory_space<vmem>>, vector<1x1x64xf32>
    %667 = vector.shape_cast %666 : vector<1x1x64xf32> to vector<1x64xf32>
    %668 = vector.shape_cast %667 : vector<1x64xf32> to vector<1x64xf32>
    %669 = vector.broadcast %668 : vector<1x64xf32> to vector<2x64xf32>
    %cst_130 = arith.constant dense<0.000000e+00> : vector<16x192xf32>
    %670 = tpu.matmul %659, %661, %cst_130 {dimension_numbers = #tpu.dot_dimension_numbers<[1], [0], [0], [1], [0, 0, 1, 1], [], []>} : vector<16x64xf32>, vector<64x192xf32>, vector<16x192xf32> -> vector<16x192xf32>
    %671 = vector.broadcast %665 : vector<1x192xf32> to vector<16x192xf32>
    %672 = arith.addf %670, %671 : vector<16x192xf32>
    %673 = vector.extract_strided_slice %672 {offsets = [0, 0], sizes = [2, 192], strides = [1, 1]} : vector<16x192xf32> to vector<2x192xf32>
    %cst_131 = arith.constant dense<0.000000e+00> : vector<2x192xf32>
    %674 = tpu.matmul %42, %663, %cst_131 {dimension_numbers = #tpu.dot_dimension_numbers<[1], [0], [0], [1], [0, 0, 1, 1], [], []>} : vector<2x64xf32>, vector<64x192xf32>, vector<2x192xf32> -> vector<2x192xf32>
    %675 = vector.extract_strided_slice %673 {offsets = [0, 0], sizes = [2, 128], strides = [1, 1]} : vector<2x192xf32> to vector<2x128xf32>
    %676 = vector.extract_strided_slice %674 {offsets = [0, 0], sizes = [2, 128], strides = [1, 1]} : vector<2x192xf32> to vector<2x128xf32>
    %677 = arith.addf %675, %676 : vector<2x128xf32>
    %678 = arith.negf %677 : vector<2x128xf32>
    %679 = math.exp %678 : vector<2x128xf32>
    %cst_132 = arith.constant 1.000000e+00 : f32
    %680 = vector.broadcast %cst_132 : f32 to vector<2x128xf32>
    %681 = arith.addf %680, %679 : vector<2x128xf32>
    %682 = arith.divf %680, %681 : vector<2x128xf32>
    %683 = vector.extract_strided_slice %682 {offsets = [0, 0], sizes = [2, 64], strides = [1, 1]} : vector<2x128xf32> to vector<2x64xf32>
    %684 = vector.extract_strided_slice %682 {offsets = [0, 64], sizes = [2, 64], strides = [1, 1]} : vector<2x128xf32> to vector<2x64xf32>
    %685 = vector.extract_strided_slice %673 {offsets = [0, 128], sizes = [2, 64], strides = [1, 1]} : vector<2x192xf32> to vector<2x64xf32>
    %686 = vector.extract_strided_slice %674 {offsets = [0, 128], sizes = [2, 64], strides = [1, 1]} : vector<2x192xf32> to vector<2x64xf32>
    %687 = arith.addf %686, %669 : vector<2x64xf32>
    %688 = arith.mulf %683, %687 : vector<2x64xf32>
    %689 = arith.addf %685, %688 : vector<2x64xf32>
    %690 = math.tanh %689 : vector<2x64xf32>
    %cst_133 = arith.constant 1.000000e+00 : f32
    %691 = vector.broadcast %cst_133 : f32 to vector<2x64xf32>
    %692 = arith.subf %691, %684 : vector<2x64xf32>
    %693 = arith.mulf %692, %690 : vector<2x64xf32>
    %694 = arith.mulf %684, %42 : vector<2x64xf32>
    %695 = arith.addf %693, %694 : vector<2x64xf32>
    %696 = arith.select %6, %695, %42 : vector<2x64xi1>, vector<2x64xf32>
    %697 = vector.extract_strided_slice %672 {offsets = [2, 0], sizes = [2, 192], strides = [1, 1]} : vector<16x192xf32> to vector<2x192xf32>
    %cst_134 = arith.constant dense<0.000000e+00> : vector<2x192xf32>
    %698 = tpu.matmul %696, %663, %cst_134 {dimension_numbers = #tpu.dot_dimension_numbers<[1], [0], [0], [1], [0, 0, 1, 1], [], []>} : vector<2x64xf32>, vector<64x192xf32>, vector<2x192xf32> -> vector<2x192xf32>
    %699 = vector.extract_strided_slice %697 {offsets = [0, 0], sizes = [2, 128], strides = [1, 1]} : vector<2x192xf32> to vector<2x128xf32>
    %700 = vector.extract_strided_slice %698 {offsets = [0, 0], sizes = [2, 128], strides = [1, 1]} : vector<2x192xf32> to vector<2x128xf32>
    %701 = arith.addf %699, %700 : vector<2x128xf32>
    %702 = arith.negf %701 : vector<2x128xf32>
    %703 = math.exp %702 : vector<2x128xf32>
    %cst_135 = arith.constant 1.000000e+00 : f32
    %704 = vector.broadcast %cst_135 : f32 to vector<2x128xf32>
    %705 = arith.addf %704, %703 : vector<2x128xf32>
    %706 = arith.divf %704, %705 : vector<2x128xf32>
    %707 = vector.extract_strided_slice %706 {offsets = [0, 0], sizes = [2, 64], strides = [1, 1]} : vector<2x128xf32> to vector<2x64xf32>
    %708 = vector.extract_strided_slice %706 {offsets = [0, 64], sizes = [2, 64], strides = [1, 1]} : vector<2x128xf32> to vector<2x64xf32>
    %709 = vector.extract_strided_slice %697 {offsets = [0, 128], sizes = [2, 64], strides = [1, 1]} : vector<2x192xf32> to vector<2x64xf32>
    %710 = vector.extract_strided_slice %698 {offsets = [0, 128], sizes = [2, 64], strides = [1, 1]} : vector<2x192xf32> to vector<2x64xf32>
    %711 = arith.addf %710, %669 : vector<2x64xf32>
    %712 = arith.mulf %707, %711 : vector<2x64xf32>
    %713 = arith.addf %709, %712 : vector<2x64xf32>
    %714 = math.tanh %713 : vector<2x64xf32>
    %cst_136 = arith.constant 1.000000e+00 : f32
    %715 = vector.broadcast %cst_136 : f32 to vector<2x64xf32>
    %716 = arith.subf %715, %708 : vector<2x64xf32>
    %717 = arith.mulf %716, %714 : vector<2x64xf32>
    %718 = arith.mulf %708, %696 : vector<2x64xf32>
    %719 = arith.addf %717, %718 : vector<2x64xf32>
    %720 = arith.select %11, %719, %696 : vector<2x64xi1>, vector<2x64xf32>
    %721 = vector.extract_strided_slice %672 {offsets = [4, 0], sizes = [2, 192], strides = [1, 1]} : vector<16x192xf32> to vector<2x192xf32>
    %cst_137 = arith.constant dense<0.000000e+00> : vector<2x192xf32>
    %722 = tpu.matmul %720, %663, %cst_137 {dimension_numbers = #tpu.dot_dimension_numbers<[1], [0], [0], [1], [0, 0, 1, 1], [], []>} : vector<2x64xf32>, vector<64x192xf32>, vector<2x192xf32> -> vector<2x192xf32>
    %723 = vector.extract_strided_slice %721 {offsets = [0, 0], sizes = [2, 128], strides = [1, 1]} : vector<2x192xf32> to vector<2x128xf32>
    %724 = vector.extract_strided_slice %722 {offsets = [0, 0], sizes = [2, 128], strides = [1, 1]} : vector<2x192xf32> to vector<2x128xf32>
    %725 = arith.addf %723, %724 : vector<2x128xf32>
    %726 = arith.negf %725 : vector<2x128xf32>
    %727 = math.exp %726 : vector<2x128xf32>
    %cst_138 = arith.constant 1.000000e+00 : f32
    %728 = vector.broadcast %cst_138 : f32 to vector<2x128xf32>
    %729 = arith.addf %728, %727 : vector<2x128xf32>
    %730 = arith.divf %728, %729 : vector<2x128xf32>
    %731 = vector.extract_strided_slice %730 {offsets = [0, 0], sizes = [2, 64], strides = [1, 1]} : vector<2x128xf32> to vector<2x64xf32>
    %732 = vector.extract_strided_slice %730 {offsets = [0, 64], sizes = [2, 64], strides = [1, 1]} : vector<2x128xf32> to vector<2x64xf32>
    %733 = vector.extract_strided_slice %721 {offsets = [0, 128], sizes = [2, 64], strides = [1, 1]} : vector<2x192xf32> to vector<2x64xf32>
    %734 = vector.extract_strided_slice %722 {offsets = [0, 128], sizes = [2, 64], strides = [1, 1]} : vector<2x192xf32> to vector<2x64xf32>
    %735 = arith.addf %734, %669 : vector<2x64xf32>
    %736 = arith.mulf %731, %735 : vector<2x64xf32>
    %737 = arith.addf %733, %736 : vector<2x64xf32>
    %738 = math.tanh %737 : vector<2x64xf32>
    %cst_139 = arith.constant 1.000000e+00 : f32
    %739 = vector.broadcast %cst_139 : f32 to vector<2x64xf32>
    %740 = arith.subf %739, %732 : vector<2x64xf32>
    %741 = arith.mulf %740, %738 : vector<2x64xf32>
    %742 = arith.mulf %732, %720 : vector<2x64xf32>
    %743 = arith.addf %741, %742 : vector<2x64xf32>
    %744 = arith.select %16, %743, %720 : vector<2x64xi1>, vector<2x64xf32>
    %745 = vector.extract_strided_slice %672 {offsets = [6, 0], sizes = [2, 192], strides = [1, 1]} : vector<16x192xf32> to vector<2x192xf32>
    %cst_140 = arith.constant dense<0.000000e+00> : vector<2x192xf32>
    %746 = tpu.matmul %744, %663, %cst_140 {dimension_numbers = #tpu.dot_dimension_numbers<[1], [0], [0], [1], [0, 0, 1, 1], [], []>} : vector<2x64xf32>, vector<64x192xf32>, vector<2x192xf32> -> vector<2x192xf32>
    %747 = vector.extract_strided_slice %745 {offsets = [0, 0], sizes = [2, 128], strides = [1, 1]} : vector<2x192xf32> to vector<2x128xf32>
    %748 = vector.extract_strided_slice %746 {offsets = [0, 0], sizes = [2, 128], strides = [1, 1]} : vector<2x192xf32> to vector<2x128xf32>
    %749 = arith.addf %747, %748 : vector<2x128xf32>
    %750 = arith.negf %749 : vector<2x128xf32>
    %751 = math.exp %750 : vector<2x128xf32>
    %cst_141 = arith.constant 1.000000e+00 : f32
    %752 = vector.broadcast %cst_141 : f32 to vector<2x128xf32>
    %753 = arith.addf %752, %751 : vector<2x128xf32>
    %754 = arith.divf %752, %753 : vector<2x128xf32>
    %755 = vector.extract_strided_slice %754 {offsets = [0, 0], sizes = [2, 64], strides = [1, 1]} : vector<2x128xf32> to vector<2x64xf32>
    %756 = vector.extract_strided_slice %754 {offsets = [0, 64], sizes = [2, 64], strides = [1, 1]} : vector<2x128xf32> to vector<2x64xf32>
    %757 = vector.extract_strided_slice %745 {offsets = [0, 128], sizes = [2, 64], strides = [1, 1]} : vector<2x192xf32> to vector<2x64xf32>
    %758 = vector.extract_strided_slice %746 {offsets = [0, 128], sizes = [2, 64], strides = [1, 1]} : vector<2x192xf32> to vector<2x64xf32>
    %759 = arith.addf %758, %669 : vector<2x64xf32>
    %760 = arith.mulf %755, %759 : vector<2x64xf32>
    %761 = arith.addf %757, %760 : vector<2x64xf32>
    %762 = math.tanh %761 : vector<2x64xf32>
    %cst_142 = arith.constant 1.000000e+00 : f32
    %763 = vector.broadcast %cst_142 : f32 to vector<2x64xf32>
    %764 = arith.subf %763, %756 : vector<2x64xf32>
    %765 = arith.mulf %764, %762 : vector<2x64xf32>
    %766 = arith.mulf %756, %744 : vector<2x64xf32>
    %767 = arith.addf %765, %766 : vector<2x64xf32>
    %768 = arith.select %21, %767, %744 : vector<2x64xi1>, vector<2x64xf32>
    %769 = vector.extract_strided_slice %672 {offsets = [8, 0], sizes = [2, 192], strides = [1, 1]} : vector<16x192xf32> to vector<2x192xf32>
    %cst_143 = arith.constant dense<0.000000e+00> : vector<2x192xf32>
    %770 = tpu.matmul %768, %663, %cst_143 {dimension_numbers = #tpu.dot_dimension_numbers<[1], [0], [0], [1], [0, 0, 1, 1], [], []>} : vector<2x64xf32>, vector<64x192xf32>, vector<2x192xf32> -> vector<2x192xf32>
    %771 = vector.extract_strided_slice %769 {offsets = [0, 0], sizes = [2, 128], strides = [1, 1]} : vector<2x192xf32> to vector<2x128xf32>
    %772 = vector.extract_strided_slice %770 {offsets = [0, 0], sizes = [2, 128], strides = [1, 1]} : vector<2x192xf32> to vector<2x128xf32>
    %773 = arith.addf %771, %772 : vector<2x128xf32>
    %774 = arith.negf %773 : vector<2x128xf32>
    %775 = math.exp %774 : vector<2x128xf32>
    %cst_144 = arith.constant 1.000000e+00 : f32
    %776 = vector.broadcast %cst_144 : f32 to vector<2x128xf32>
    %777 = arith.addf %776, %775 : vector<2x128xf32>
    %778 = arith.divf %776, %777 : vector<2x128xf32>
    %779 = vector.extract_strided_slice %778 {offsets = [0, 0], sizes = [2, 64], strides = [1, 1]} : vector<2x128xf32> to vector<2x64xf32>
    %780 = vector.extract_strided_slice %778 {offsets = [0, 64], sizes = [2, 64], strides = [1, 1]} : vector<2x128xf32> to vector<2x64xf32>
    %781 = vector.extract_strided_slice %769 {offsets = [0, 128], sizes = [2, 64], strides = [1, 1]} : vector<2x192xf32> to vector<2x64xf32>
    %782 = vector.extract_strided_slice %770 {offsets = [0, 128], sizes = [2, 64], strides = [1, 1]} : vector<2x192xf32> to vector<2x64xf32>
    %783 = arith.addf %782, %669 : vector<2x64xf32>
    %784 = arith.mulf %779, %783 : vector<2x64xf32>
    %785 = arith.addf %781, %784 : vector<2x64xf32>
    %786 = math.tanh %785 : vector<2x64xf32>
    %cst_145 = arith.constant 1.000000e+00 : f32
    %787 = vector.broadcast %cst_145 : f32 to vector<2x64xf32>
    %788 = arith.subf %787, %780 : vector<2x64xf32>
    %789 = arith.mulf %788, %786 : vector<2x64xf32>
    %790 = arith.mulf %780, %768 : vector<2x64xf32>
    %791 = arith.addf %789, %790 : vector<2x64xf32>
    %792 = arith.select %26, %791, %768 : vector<2x64xi1>, vector<2x64xf32>
    %793 = vector.extract_strided_slice %672 {offsets = [10, 0], sizes = [2, 192], strides = [1, 1]} : vector<16x192xf32> to vector<2x192xf32>
    %cst_146 = arith.constant dense<0.000000e+00> : vector<2x192xf32>
    %794 = tpu.matmul %792, %663, %cst_146 {dimension_numbers = #tpu.dot_dimension_numbers<[1], [0], [0], [1], [0, 0, 1, 1], [], []>} : vector<2x64xf32>, vector<64x192xf32>, vector<2x192xf32> -> vector<2x192xf32>
    %795 = vector.extract_strided_slice %793 {offsets = [0, 0], sizes = [2, 128], strides = [1, 1]} : vector<2x192xf32> to vector<2x128xf32>
    %796 = vector.extract_strided_slice %794 {offsets = [0, 0], sizes = [2, 128], strides = [1, 1]} : vector<2x192xf32> to vector<2x128xf32>
    %797 = arith.addf %795, %796 : vector<2x128xf32>
    %798 = arith.negf %797 : vector<2x128xf32>
    %799 = math.exp %798 : vector<2x128xf32>
    %cst_147 = arith.constant 1.000000e+00 : f32
    %800 = vector.broadcast %cst_147 : f32 to vector<2x128xf32>
    %801 = arith.addf %800, %799 : vector<2x128xf32>
    %802 = arith.divf %800, %801 : vector<2x128xf32>
    %803 = vector.extract_strided_slice %802 {offsets = [0, 0], sizes = [2, 64], strides = [1, 1]} : vector<2x128xf32> to vector<2x64xf32>
    %804 = vector.extract_strided_slice %802 {offsets = [0, 64], sizes = [2, 64], strides = [1, 1]} : vector<2x128xf32> to vector<2x64xf32>
    %805 = vector.extract_strided_slice %793 {offsets = [0, 128], sizes = [2, 64], strides = [1, 1]} : vector<2x192xf32> to vector<2x64xf32>
    %806 = vector.extract_strided_slice %794 {offsets = [0, 128], sizes = [2, 64], strides = [1, 1]} : vector<2x192xf32> to vector<2x64xf32>
    %807 = arith.addf %806, %669 : vector<2x64xf32>
    %808 = arith.mulf %803, %807 : vector<2x64xf32>
    %809 = arith.addf %805, %808 : vector<2x64xf32>
    %810 = math.tanh %809 : vector<2x64xf32>
    %cst_148 = arith.constant 1.000000e+00 : f32
    %811 = vector.broadcast %cst_148 : f32 to vector<2x64xf32>
    %812 = arith.subf %811, %804 : vector<2x64xf32>
    %813 = arith.mulf %812, %810 : vector<2x64xf32>
    %814 = arith.mulf %804, %792 : vector<2x64xf32>
    %815 = arith.addf %813, %814 : vector<2x64xf32>
    %816 = arith.select %31, %815, %792 : vector<2x64xi1>, vector<2x64xf32>
    %817 = vector.extract_strided_slice %672 {offsets = [12, 0], sizes = [2, 192], strides = [1, 1]} : vector<16x192xf32> to vector<2x192xf32>
    %cst_149 = arith.constant dense<0.000000e+00> : vector<2x192xf32>
    %818 = tpu.matmul %816, %663, %cst_149 {dimension_numbers = #tpu.dot_dimension_numbers<[1], [0], [0], [1], [0, 0, 1, 1], [], []>} : vector<2x64xf32>, vector<64x192xf32>, vector<2x192xf32> -> vector<2x192xf32>
    %819 = vector.extract_strided_slice %817 {offsets = [0, 0], sizes = [2, 128], strides = [1, 1]} : vector<2x192xf32> to vector<2x128xf32>
    %820 = vector.extract_strided_slice %818 {offsets = [0, 0], sizes = [2, 128], strides = [1, 1]} : vector<2x192xf32> to vector<2x128xf32>
    %821 = arith.addf %819, %820 : vector<2x128xf32>
    %822 = arith.negf %821 : vector<2x128xf32>
    %823 = math.exp %822 : vector<2x128xf32>
    %cst_150 = arith.constant 1.000000e+00 : f32
    %824 = vector.broadcast %cst_150 : f32 to vector<2x128xf32>
    %825 = arith.addf %824, %823 : vector<2x128xf32>
    %826 = arith.divf %824, %825 : vector<2x128xf32>
    %827 = vector.extract_strided_slice %826 {offsets = [0, 0], sizes = [2, 64], strides = [1, 1]} : vector<2x128xf32> to vector<2x64xf32>
    %828 = vector.extract_strided_slice %826 {offsets = [0, 64], sizes = [2, 64], strides = [1, 1]} : vector<2x128xf32> to vector<2x64xf32>
    %829 = vector.extract_strided_slice %817 {offsets = [0, 128], sizes = [2, 64], strides = [1, 1]} : vector<2x192xf32> to vector<2x64xf32>
    %830 = vector.extract_strided_slice %818 {offsets = [0, 128], sizes = [2, 64], strides = [1, 1]} : vector<2x192xf32> to vector<2x64xf32>
    %831 = arith.addf %830, %669 : vector<2x64xf32>
    %832 = arith.mulf %827, %831 : vector<2x64xf32>
    %833 = arith.addf %829, %832 : vector<2x64xf32>
    %834 = math.tanh %833 : vector<2x64xf32>
    %cst_151 = arith.constant 1.000000e+00 : f32
    %835 = vector.broadcast %cst_151 : f32 to vector<2x64xf32>
    %836 = arith.subf %835, %828 : vector<2x64xf32>
    %837 = arith.mulf %836, %834 : vector<2x64xf32>
    %838 = arith.mulf %828, %816 : vector<2x64xf32>
    %839 = arith.addf %837, %838 : vector<2x64xf32>
    %840 = arith.select %36, %839, %816 : vector<2x64xi1>, vector<2x64xf32>
    %841 = vector.extract_strided_slice %672 {offsets = [14, 0], sizes = [2, 192], strides = [1, 1]} : vector<16x192xf32> to vector<2x192xf32>
    %cst_152 = arith.constant dense<0.000000e+00> : vector<2x192xf32>
    %842 = tpu.matmul %840, %663, %cst_152 {dimension_numbers = #tpu.dot_dimension_numbers<[1], [0], [0], [1], [0, 0, 1, 1], [], []>} : vector<2x64xf32>, vector<64x192xf32>, vector<2x192xf32> -> vector<2x192xf32>
    %843 = vector.extract_strided_slice %841 {offsets = [0, 0], sizes = [2, 128], strides = [1, 1]} : vector<2x192xf32> to vector<2x128xf32>
    %844 = vector.extract_strided_slice %842 {offsets = [0, 0], sizes = [2, 128], strides = [1, 1]} : vector<2x192xf32> to vector<2x128xf32>
    %845 = arith.addf %843, %844 : vector<2x128xf32>
    %846 = arith.negf %845 : vector<2x128xf32>
    %847 = math.exp %846 : vector<2x128xf32>
    %cst_153 = arith.constant 1.000000e+00 : f32
    %848 = vector.broadcast %cst_153 : f32 to vector<2x128xf32>
    %849 = arith.addf %848, %847 : vector<2x128xf32>
    %850 = arith.divf %848, %849 : vector<2x128xf32>
    %851 = vector.extract_strided_slice %850 {offsets = [0, 0], sizes = [2, 64], strides = [1, 1]} : vector<2x128xf32> to vector<2x64xf32>
    %852 = vector.extract_strided_slice %850 {offsets = [0, 64], sizes = [2, 64], strides = [1, 1]} : vector<2x128xf32> to vector<2x64xf32>
    %853 = vector.extract_strided_slice %841 {offsets = [0, 128], sizes = [2, 64], strides = [1, 1]} : vector<2x192xf32> to vector<2x64xf32>
    %854 = vector.extract_strided_slice %842 {offsets = [0, 128], sizes = [2, 64], strides = [1, 1]} : vector<2x192xf32> to vector<2x64xf32>
    %855 = arith.addf %854, %669 : vector<2x64xf32>
    %856 = arith.mulf %851, %855 : vector<2x64xf32>
    %857 = arith.addf %853, %856 : vector<2x64xf32>
    %858 = math.tanh %857 : vector<2x64xf32>
    %cst_154 = arith.constant 1.000000e+00 : f32
    %859 = vector.broadcast %cst_154 : f32 to vector<2x64xf32>
    %860 = arith.subf %859, %852 : vector<2x64xf32>
    %861 = arith.mulf %860, %858 : vector<2x64xf32>
    %862 = arith.mulf %852, %840 : vector<2x64xf32>
    %863 = arith.addf %861, %862 : vector<2x64xf32>
    %864 = arith.select %41, %863, %840 : vector<2x64xi1>, vector<2x64xf32>
    %c0_155 = arith.constant 0 : index
    %c0_156 = arith.constant 0 : index
    %865 = vector.load %arg7[%c0_155, %c0_156] : memref<64x100xf32, #tpu.memory_space<vmem>>, vector<64x100xf32>
    %cst_157 = arith.constant dense<0.000000e+00> : vector<2x100xf32>
    %866 = tpu.matmul %864, %865, %cst_157 {dimension_numbers = #tpu.dot_dimension_numbers<[1], [0], [0], [1], [0, 0, 1, 1], [], []>} : vector<2x64xf32>, vector<64x100xf32>, vector<2x100xf32> -> vector<2x100xf32>
    %c0_158 = arith.constant 0 : index
    %c0_159 = arith.constant 0 : index
    %867 = vector.load %arg8[%c0_158, %c0_159] : memref<1x100xf32, #tpu.memory_space<vmem>>, vector<1x100xf32>
    %868 = vector.broadcast %867 : vector<1x100xf32> to vector<2x100xf32>
    %869 = arith.addf %866, %868 : vector<2x100xf32>
    %c0_160 = arith.constant 0 : index
    %c0_161 = arith.constant 0 : index
    %870 = vector.load %arg19[%c0_160, %c0_161] : memref<2x100xf32, #tpu.memory_space<vmem>>, vector<2x100xf32>
    tpu.vector_store %arg19[%c0_160, %c0_161], %869 {strides = array<i32>} : memref<2x100xf32, #tpu.memory_space<vmem>>, vector<2x100xf32>,
    %871 = vector.extract_strided_slice %869 {offsets = [0, 0], sizes = [2, 50], strides = [1, 1]} : vector<2x100xf32> to vector<2x50xf32>
    %c0_162 = arith.constant 0 : index
    %c0_163 = arith.constant 0 : index
    %872 = vector.load %arg9[%c0_162, %c0_163] : memref<50x64xf32, #tpu.memory_space<vmem>>, vector<50x64xf32>
    %cst_164 = arith.constant dense<0.000000e+00> : vector<2x64xf32>
    %873 = tpu.matmul %871, %872, %cst_164 {dimension_numbers = #tpu.dot_dimension_numbers<[1], [0], [0], [1], [0, 0, 1, 1], [], []>} : vector<2x50xf32>, vector<50x64xf32>, vector<2x64xf32> -> vector<2x64xf32>
    %c0_165 = arith.constant 0 : index
    %c0_166 = arith.constant 0 : index
    %874 = vector.load %arg10[%c0_165, %c0_166] : memref<1x64xf32, #tpu.memory_space<vmem>>, vector<1x64xf32>
    %875 = vector.broadcast %874 : vector<1x64xf32> to vector<2x64xf32>
    %876 = arith.addf %873, %875 : vector<2x64xf32>
    %877 = vector.extract_strided_slice %871 {offsets = [0, 0], sizes = [1, 50], strides = [1, 1]} : vector<2x50xf32> to vector<1x50xf32>
    %878 = vector.extract_strided_slice %871 {offsets = [0, 0], sizes = [1, 50], strides = [1, 1]} : vector<2x50xf32> to vector<1x50xf32>
    %879 = vector.extract_strided_slice %871 {offsets = [1, 0], sizes = [1, 50], strides = [1, 1]} : vector<2x50xf32> to vector<1x50xf32>
    %880 = vector.extract_strided_slice %871 {offsets = [1, 0], sizes = [1, 50], strides = [1, 1]} : vector<2x50xf32> to vector<1x50xf32>
    %881 = vector.extract_strided_slice %871 {offsets = [0, 0], sizes = [1, 50], strides = [1, 1]} : vector<2x50xf32> to vector<1x50xf32>
    %882 = vector.extract_strided_slice %871 {offsets = [0, 0], sizes = [1, 50], strides = [1, 1]} : vector<2x50xf32> to vector<1x50xf32>
    %883 = vector.extract_strided_slice %871 {offsets = [1, 0], sizes = [1, 50], strides = [1, 1]} : vector<2x50xf32> to vector<1x50xf32>
    %884 = vector.extract_strided_slice %871 {offsets = [1, 0], sizes = [1, 50], strides = [1, 1]} : vector<2x50xf32> to vector<1x50xf32>
    %885 = vector.extract_strided_slice %871 {offsets = [0, 0], sizes = [1, 50], strides = [1, 1]} : vector<2x50xf32> to vector<1x50xf32>
    %886 = vector.extract_strided_slice %871 {offsets = [0, 0], sizes = [1, 50], strides = [1, 1]} : vector<2x50xf32> to vector<1x50xf32>
    %887 = vector.extract_strided_slice %871 {offsets = [1, 0], sizes = [1, 50], strides = [1, 1]} : vector<2x50xf32> to vector<1x50xf32>
    %888 = vector.extract_strided_slice %871 {offsets = [1, 0], sizes = [1, 50], strides = [1, 1]} : vector<2x50xf32> to vector<1x50xf32>
    %889 = vector.extract_strided_slice %871 {offsets = [0, 0], sizes = [1, 50], strides = [1, 1]} : vector<2x50xf32> to vector<1x50xf32>
    %890 = vector.extract_strided_slice %871 {offsets = [0, 0], sizes = [1, 50], strides = [1, 1]} : vector<2x50xf32> to vector<1x50xf32>
    %891 = vector.extract_strided_slice %871 {offsets = [1, 0], sizes = [1, 50], strides = [1, 1]} : vector<2x50xf32> to vector<1x50xf32>
    %892 = vector.extract_strided_slice %871 {offsets = [1, 0], sizes = [1, 50], strides = [1, 1]} : vector<2x50xf32> to vector<1x50xf32>
    %893 = tpu.concatenate %877, %878, %879, %880, %881, %882, %883, %884, %885, %886, %887, %888, %889, %890, %891, %892 in 0 : vector<1x50xf32>, vector<1x50xf32>, vector<1x50xf32>, vector<1x50xf32>, vector<1x50xf32>, vector<1x50xf32>, vector<1x50xf32>, vector<1x50xf32>, vector<1x50xf32>, vector<1x50xf32>, vector<1x50xf32>, vector<1x50xf32>, vector<1x50xf32>, vector<1x50xf32>, vector<1x50xf32>, vector<1x50xf32> -> vector<16x50xf32>
    %c0_167 = arith.constant 0 : index
    %c0_168 = arith.constant 0 : index
    %894 = vector.load %arg11[%c0_167, %c0_168] : memref<50x192xf32, #tpu.memory_space<vmem>>, vector<50x192xf32>
    %c0_169 = arith.constant 0 : index
    %c0_170 = arith.constant 0 : index
    %c0_171 = arith.constant 0 : index
    %895 = vector.load %arg13[%c0_169, %c0_170, %c0_171] : memref<4x64x192xf32, #tpu.memory_space<vmem>>, vector<1x64x192xf32>
    %896 = vector.shape_cast %895 : vector<1x64x192xf32> to vector<64x192xf32>
    %c0_172 = arith.constant 0 : index
    %c0_173 = arith.constant 0 : index
    %c0_174 = arith.constant 0 : index
    %897 = vector.load %arg14[%c0_172, %c0_173, %c0_174] : memref<4x1x192xf32, #tpu.memory_space<vmem>>, vector<1x1x192xf32>
    %898 = vector.shape_cast %897 : vector<1x1x192xf32> to vector<1x192xf32>
    %c0_175 = arith.constant 0 : index
    %c0_176 = arith.constant 0 : index
    %c0_177 = arith.constant 0 : index
    %899 = vector.load %arg15[%c0_175, %c0_176, %c0_177] : memref<4x1x64xf32, #tpu.memory_space<vmem>>, vector<1x1x64xf32>
    %900 = vector.shape_cast %899 : vector<1x1x64xf32> to vector<1x64xf32>
    %901 = vector.shape_cast %900 : vector<1x64xf32> to vector<1x64xf32>
    %902 = vector.broadcast %901 : vector<1x64xf32> to vector<2x64xf32>
    %cst_178 = arith.constant dense<0.000000e+00> : vector<16x192xf32>
    %903 = tpu.matmul %893, %894, %cst_178 {dimension_numbers = #tpu.dot_dimension_numbers<[1], [0], [0], [1], [0, 0, 1, 1], [], []>} : vector<16x50xf32>, vector<50x192xf32>, vector<16x192xf32> -> vector<16x192xf32>
    %904 = vector.broadcast %898 : vector<1x192xf32> to vector<16x192xf32>
    %905 = arith.addf %903, %904 : vector<16x192xf32>
    %906 = vector.extract_strided_slice %905 {offsets = [0, 0], sizes = [2, 192], strides = [1, 1]} : vector<16x192xf32> to vector<2x192xf32>
    %cst_179 = arith.constant dense<0.000000e+00> : vector<2x192xf32>
    %907 = tpu.matmul %876, %896, %cst_179 {dimension_numbers = #tpu.dot_dimension_numbers<[1], [0], [0], [1], [0, 0, 1, 1], [], []>} : vector<2x64xf32>, vector<64x192xf32>, vector<2x192xf32> -> vector<2x192xf32>
    %908 = vector.extract_strided_slice %906 {offsets = [0, 0], sizes = [2, 128], strides = [1, 1]} : vector<2x192xf32> to vector<2x128xf32>
    %909 = vector.extract_strided_slice %907 {offsets = [0, 0], sizes = [2, 128], strides = [1, 1]} : vector<2x192xf32> to vector<2x128xf32>
    %910 = arith.addf %908, %909 : vector<2x128xf32>
    %911 = arith.negf %910 : vector<2x128xf32>
    %912 = math.exp %911 : vector<2x128xf32>
    %cst_180 = arith.constant 1.000000e+00 : f32
    %913 = vector.broadcast %cst_180 : f32 to vector<2x128xf32>
    %914 = arith.addf %913, %912 : vector<2x128xf32>
    %915 = arith.divf %913, %914 : vector<2x128xf32>
    %916 = vector.extract_strided_slice %915 {offsets = [0, 0], sizes = [2, 64], strides = [1, 1]} : vector<2x128xf32> to vector<2x64xf32>
    %917 = vector.extract_strided_slice %915 {offsets = [0, 64], sizes = [2, 64], strides = [1, 1]} : vector<2x128xf32> to vector<2x64xf32>
    %918 = vector.extract_strided_slice %906 {offsets = [0, 128], sizes = [2, 64], strides = [1, 1]} : vector<2x192xf32> to vector<2x64xf32>
    %919 = vector.extract_strided_slice %907 {offsets = [0, 128], sizes = [2, 64], strides = [1, 1]} : vector<2x192xf32> to vector<2x64xf32>
    %920 = arith.addf %919, %902 : vector<2x64xf32>
    %921 = arith.mulf %916, %920 : vector<2x64xf32>
    %922 = arith.addf %918, %921 : vector<2x64xf32>
    %923 = math.tanh %922 : vector<2x64xf32>
    %cst_181 = arith.constant 1.000000e+00 : f32
    %924 = vector.broadcast %cst_181 : f32 to vector<2x64xf32>
    %925 = arith.subf %924, %917 : vector<2x64xf32>
    %926 = arith.mulf %925, %923 : vector<2x64xf32>
    %927 = arith.mulf %917, %876 : vector<2x64xf32>
    %928 = arith.addf %926, %927 : vector<2x64xf32>
    %929 = vector.extract_strided_slice %905 {offsets = [2, 0], sizes = [2, 192], strides = [1, 1]} : vector<16x192xf32> to vector<2x192xf32>
    %cst_182 = arith.constant dense<0.000000e+00> : vector<2x192xf32>
    %930 = tpu.matmul %928, %896, %cst_182 {dimension_numbers = #tpu.dot_dimension_numbers<[1], [0], [0], [1], [0, 0, 1, 1], [], []>} : vector<2x64xf32>, vector<64x192xf32>, vector<2x192xf32> -> vector<2x192xf32>
    %931 = vector.extract_strided_slice %929 {offsets = [0, 0], sizes = [2, 128], strides = [1, 1]} : vector<2x192xf32> to vector<2x128xf32>
    %932 = vector.extract_strided_slice %930 {offsets = [0, 0], sizes = [2, 128], strides = [1, 1]} : vector<2x192xf32> to vector<2x128xf32>
    %933 = arith.addf %931, %932 : vector<2x128xf32>
    %934 = arith.negf %933 : vector<2x128xf32>
    %935 = math.exp %934 : vector<2x128xf32>
    %cst_183 = arith.constant 1.000000e+00 : f32
    %936 = vector.broadcast %cst_183 : f32 to vector<2x128xf32>
    %937 = arith.addf %936, %935 : vector<2x128xf32>
    %938 = arith.divf %936, %937 : vector<2x128xf32>
    %939 = vector.extract_strided_slice %938 {offsets = [0, 0], sizes = [2, 64], strides = [1, 1]} : vector<2x128xf32> to vector<2x64xf32>
    %940 = vector.extract_strided_slice %938 {offsets = [0, 64], sizes = [2, 64], strides = [1, 1]} : vector<2x128xf32> to vector<2x64xf32>
    %941 = vector.extract_strided_slice %929 {offsets = [0, 128], sizes = [2, 64], strides = [1, 1]} : vector<2x192xf32> to vector<2x64xf32>
    %942 = vector.extract_strided_slice %930 {offsets = [0, 128], sizes = [2, 64], strides = [1, 1]} : vector<2x192xf32> to vector<2x64xf32>
    %943 = arith.addf %942, %902 : vector<2x64xf32>
    %944 = arith.mulf %939, %943 : vector<2x64xf32>
    %945 = arith.addf %941, %944 : vector<2x64xf32>
    %946 = math.tanh %945 : vector<2x64xf32>
    %cst_184 = arith.constant 1.000000e+00 : f32
    %947 = vector.broadcast %cst_184 : f32 to vector<2x64xf32>
    %948 = arith.subf %947, %940 : vector<2x64xf32>
    %949 = arith.mulf %948, %946 : vector<2x64xf32>
    %950 = arith.mulf %940, %928 : vector<2x64xf32>
    %951 = arith.addf %949, %950 : vector<2x64xf32>
    %952 = vector.extract_strided_slice %905 {offsets = [4, 0], sizes = [2, 192], strides = [1, 1]} : vector<16x192xf32> to vector<2x192xf32>
    %cst_185 = arith.constant dense<0.000000e+00> : vector<2x192xf32>
    %953 = tpu.matmul %951, %896, %cst_185 {dimension_numbers = #tpu.dot_dimension_numbers<[1], [0], [0], [1], [0, 0, 1, 1], [], []>} : vector<2x64xf32>, vector<64x192xf32>, vector<2x192xf32> -> vector<2x192xf32>
    %954 = vector.extract_strided_slice %952 {offsets = [0, 0], sizes = [2, 128], strides = [1, 1]} : vector<2x192xf32> to vector<2x128xf32>
    %955 = vector.extract_strided_slice %953 {offsets = [0, 0], sizes = [2, 128], strides = [1, 1]} : vector<2x192xf32> to vector<2x128xf32>
    %956 = arith.addf %954, %955 : vector<2x128xf32>
    %957 = arith.negf %956 : vector<2x128xf32>
    %958 = math.exp %957 : vector<2x128xf32>
    %cst_186 = arith.constant 1.000000e+00 : f32
    %959 = vector.broadcast %cst_186 : f32 to vector<2x128xf32>
    %960 = arith.addf %959, %958 : vector<2x128xf32>
    %961 = arith.divf %959, %960 : vector<2x128xf32>
    %962 = vector.extract_strided_slice %961 {offsets = [0, 0], sizes = [2, 64], strides = [1, 1]} : vector<2x128xf32> to vector<2x64xf32>
    %963 = vector.extract_strided_slice %961 {offsets = [0, 64], sizes = [2, 64], strides = [1, 1]} : vector<2x128xf32> to vector<2x64xf32>
    %964 = vector.extract_strided_slice %952 {offsets = [0, 128], sizes = [2, 64], strides = [1, 1]} : vector<2x192xf32> to vector<2x64xf32>
    %965 = vector.extract_strided_slice %953 {offsets = [0, 128], sizes = [2, 64], strides = [1, 1]} : vector<2x192xf32> to vector<2x64xf32>
    %966 = arith.addf %965, %902 : vector<2x64xf32>
    %967 = arith.mulf %962, %966 : vector<2x64xf32>
    %968 = arith.addf %964, %967 : vector<2x64xf32>
    %969 = math.tanh %968 : vector<2x64xf32>
    %cst_187 = arith.constant 1.000000e+00 : f32
    %970 = vector.broadcast %cst_187 : f32 to vector<2x64xf32>
    %971 = arith.subf %970, %963 : vector<2x64xf32>
    %972 = arith.mulf %971, %969 : vector<2x64xf32>
    %973 = arith.mulf %963, %951 : vector<2x64xf32>
    %974 = arith.addf %972, %973 : vector<2x64xf32>
    %975 = vector.extract_strided_slice %905 {offsets = [6, 0], sizes = [2, 192], strides = [1, 1]} : vector<16x192xf32> to vector<2x192xf32>
    %cst_188 = arith.constant dense<0.000000e+00> : vector<2x192xf32>
    %976 = tpu.matmul %974, %896, %cst_188 {dimension_numbers = #tpu.dot_dimension_numbers<[1], [0], [0], [1], [0, 0, 1, 1], [], []>} : vector<2x64xf32>, vector<64x192xf32>, vector<2x192xf32> -> vector<2x192xf32>
    %977 = vector.extract_strided_slice %975 {offsets = [0, 0], sizes = [2, 128], strides = [1, 1]} : vector<2x192xf32> to vector<2x128xf32>
    %978 = vector.extract_strided_slice %976 {offsets = [0, 0], sizes = [2, 128], strides = [1, 1]} : vector<2x192xf32> to vector<2x128xf32>
    %979 = arith.addf %977, %978 : vector<2x128xf32>
    %980 = arith.negf %979 : vector<2x128xf32>
    %981 = math.exp %980 : vector<2x128xf32>
    %cst_189 = arith.constant 1.000000e+00 : f32
    %982 = vector.broadcast %cst_189 : f32 to vector<2x128xf32>
    %983 = arith.addf %982, %981 : vector<2x128xf32>
    %984 = arith.divf %982, %983 : vector<2x128xf32>
    %985 = vector.extract_strided_slice %984 {offsets = [0, 0], sizes = [2, 64], strides = [1, 1]} : vector<2x128xf32> to vector<2x64xf32>
    %986 = vector.extract_strided_slice %984 {offsets = [0, 64], sizes = [2, 64], strides = [1, 1]} : vector<2x128xf32> to vector<2x64xf32>
    %987 = vector.extract_strided_slice %975 {offsets = [0, 128], sizes = [2, 64], strides = [1, 1]} : vector<2x192xf32> to vector<2x64xf32>
    %988 = vector.extract_strided_slice %976 {offsets = [0, 128], sizes = [2, 64], strides = [1, 1]} : vector<2x192xf32> to vector<2x64xf32>
    %989 = arith.addf %988, %902 : vector<2x64xf32>
    %990 = arith.mulf %985, %989 : vector<2x64xf32>
    %991 = arith.addf %987, %990 : vector<2x64xf32>
    %992 = math.tanh %991 : vector<2x64xf32>
    %cst_190 = arith.constant 1.000000e+00 : f32
    %993 = vector.broadcast %cst_190 : f32 to vector<2x64xf32>
    %994 = arith.subf %993, %986 : vector<2x64xf32>
    %995 = arith.mulf %994, %992 : vector<2x64xf32>
    %996 = arith.mulf %986, %974 : vector<2x64xf32>
    %997 = arith.addf %995, %996 : vector<2x64xf32>
    %998 = vector.extract_strided_slice %905 {offsets = [8, 0], sizes = [2, 192], strides = [1, 1]} : vector<16x192xf32> to vector<2x192xf32>
    %cst_191 = arith.constant dense<0.000000e+00> : vector<2x192xf32>
    %999 = tpu.matmul %997, %896, %cst_191 {dimension_numbers = #tpu.dot_dimension_numbers<[1], [0], [0], [1], [0, 0, 1, 1], [], []>} : vector<2x64xf32>, vector<64x192xf32>, vector<2x192xf32> -> vector<2x192xf32>
    %1000 = vector.extract_strided_slice %998 {offsets = [0, 0], sizes = [2, 128], strides = [1, 1]} : vector<2x192xf32> to vector<2x128xf32>
    %1001 = vector.extract_strided_slice %999 {offsets = [0, 0], sizes = [2, 128], strides = [1, 1]} : vector<2x192xf32> to vector<2x128xf32>
    %1002 = arith.addf %1000, %1001 : vector<2x128xf32>
    %1003 = arith.negf %1002 : vector<2x128xf32>
    %1004 = math.exp %1003 : vector<2x128xf32>
    %cst_192 = arith.constant 1.000000e+00 : f32
    %1005 = vector.broadcast %cst_192 : f32 to vector<2x128xf32>
    %1006 = arith.addf %1005, %1004 : vector<2x128xf32>
    %1007 = arith.divf %1005, %1006 : vector<2x128xf32>
    %1008 = vector.extract_strided_slice %1007 {offsets = [0, 0], sizes = [2, 64], strides = [1, 1]} : vector<2x128xf32> to vector<2x64xf32>
    %1009 = vector.extract_strided_slice %1007 {offsets = [0, 64], sizes = [2, 64], strides = [1, 1]} : vector<2x128xf32> to vector<2x64xf32>
    %1010 = vector.extract_strided_slice %998 {offsets = [0, 128], sizes = [2, 64], strides = [1, 1]} : vector<2x192xf32> to vector<2x64xf32>
    %1011 = vector.extract_strided_slice %999 {offsets = [0, 128], sizes = [2, 64], strides = [1, 1]} : vector<2x192xf32> to vector<2x64xf32>
    %1012 = arith.addf %1011, %902 : vector<2x64xf32>
    %1013 = arith.mulf %1008, %1012 : vector<2x64xf32>
    %1014 = arith.addf %1010, %1013 : vector<2x64xf32>
    %1015 = math.tanh %1014 : vector<2x64xf32>
    %cst_193 = arith.constant 1.000000e+00 : f32
    %1016 = vector.broadcast %cst_193 : f32 to vector<2x64xf32>
    %1017 = arith.subf %1016, %1009 : vector<2x64xf32>
    %1018 = arith.mulf %1017, %1015 : vector<2x64xf32>
    %1019 = arith.mulf %1009, %997 : vector<2x64xf32>
    %1020 = arith.addf %1018, %1019 : vector<2x64xf32>
    %1021 = vector.extract_strided_slice %905 {offsets = [10, 0], sizes = [2, 192], strides = [1, 1]} : vector<16x192xf32> to vector<2x192xf32>
    %cst_194 = arith.constant dense<0.000000e+00> : vector<2x192xf32>
    %1022 = tpu.matmul %1020, %896, %cst_194 {dimension_numbers = #tpu.dot_dimension_numbers<[1], [0], [0], [1], [0, 0, 1, 1], [], []>} : vector<2x64xf32>, vector<64x192xf32>, vector<2x192xf32> -> vector<2x192xf32>
    %1023 = vector.extract_strided_slice %1021 {offsets = [0, 0], sizes = [2, 128], strides = [1, 1]} : vector<2x192xf32> to vector<2x128xf32>
    %1024 = vector.extract_strided_slice %1022 {offsets = [0, 0], sizes = [2, 128], strides = [1, 1]} : vector<2x192xf32> to vector<2x128xf32>
    %1025 = arith.addf %1023, %1024 : vector<2x128xf32>
    %1026 = arith.negf %1025 : vector<2x128xf32>
    %1027 = math.exp %1026 : vector<2x128xf32>
    %cst_195 = arith.constant 1.000000e+00 : f32
    %1028 = vector.broadcast %cst_195 : f32 to vector<2x128xf32>
    %1029 = arith.addf %1028, %1027 : vector<2x128xf32>
    %1030 = arith.divf %1028, %1029 : vector<2x128xf32>
    %1031 = vector.extract_strided_slice %1030 {offsets = [0, 0], sizes = [2, 64], strides = [1, 1]} : vector<2x128xf32> to vector<2x64xf32>
    %1032 = vector.extract_strided_slice %1030 {offsets = [0, 64], sizes = [2, 64], strides = [1, 1]} : vector<2x128xf32> to vector<2x64xf32>
    %1033 = vector.extract_strided_slice %1021 {offsets = [0, 128], sizes = [2, 64], strides = [1, 1]} : vector<2x192xf32> to vector<2x64xf32>
    %1034 = vector.extract_strided_slice %1022 {offsets = [0, 128], sizes = [2, 64], strides = [1, 1]} : vector<2x192xf32> to vector<2x64xf32>
    %1035 = arith.addf %1034, %902 : vector<2x64xf32>
    %1036 = arith.mulf %1031, %1035 : vector<2x64xf32>
    %1037 = arith.addf %1033, %1036 : vector<2x64xf32>
    %1038 = math.tanh %1037 : vector<2x64xf32>
    %cst_196 = arith.constant 1.000000e+00 : f32
    %1039 = vector.broadcast %cst_196 : f32 to vector<2x64xf32>
    %1040 = arith.subf %1039, %1032 : vector<2x64xf32>
    %1041 = arith.mulf %1040, %1038 : vector<2x64xf32>
    %1042 = arith.mulf %1032, %1020 : vector<2x64xf32>
    %1043 = arith.addf %1041, %1042 : vector<2x64xf32>
    %1044 = vector.extract_strided_slice %905 {offsets = [12, 0], sizes = [2, 192], strides = [1, 1]} : vector<16x192xf32> to vector<2x192xf32>
    %cst_197 = arith.constant dense<0.000000e+00> : vector<2x192xf32>
    %1045 = tpu.matmul %1043, %896, %cst_197 {dimension_numbers = #tpu.dot_dimension_numbers<[1], [0], [0], [1], [0, 0, 1, 1], [], []>} : vector<2x64xf32>, vector<64x192xf32>, vector<2x192xf32> -> vector<2x192xf32>
    %1046 = vector.extract_strided_slice %1044 {offsets = [0, 0], sizes = [2, 128], strides = [1, 1]} : vector<2x192xf32> to vector<2x128xf32>
    %1047 = vector.extract_strided_slice %1045 {offsets = [0, 0], sizes = [2, 128], strides = [1, 1]} : vector<2x192xf32> to vector<2x128xf32>
    %1048 = arith.addf %1046, %1047 : vector<2x128xf32>
    %1049 = arith.negf %1048 : vector<2x128xf32>
    %1050 = math.exp %1049 : vector<2x128xf32>
    %cst_198 = arith.constant 1.000000e+00 : f32
    %1051 = vector.broadcast %cst_198 : f32 to vector<2x128xf32>
    %1052 = arith.addf %1051, %1050 : vector<2x128xf32>
    %1053 = arith.divf %1051, %1052 : vector<2x128xf32>
    %1054 = vector.extract_strided_slice %1053 {offsets = [0, 0], sizes = [2, 64], strides = [1, 1]} : vector<2x128xf32> to vector<2x64xf32>
    %1055 = vector.extract_strided_slice %1053 {offsets = [0, 64], sizes = [2, 64], strides = [1, 1]} : vector<2x128xf32> to vector<2x64xf32>
    %1056 = vector.extract_strided_slice %1044 {offsets = [0, 128], sizes = [2, 64], strides = [1, 1]} : vector<2x192xf32> to vector<2x64xf32>
    %1057 = vector.extract_strided_slice %1045 {offsets = [0, 128], sizes = [2, 64], strides = [1, 1]} : vector<2x192xf32> to vector<2x64xf32>
    %1058 = arith.addf %1057, %902 : vector<2x64xf32>
    %1059 = arith.mulf %1054, %1058 : vector<2x64xf32>
    %1060 = arith.addf %1056, %1059 : vector<2x64xf32>
    %1061 = math.tanh %1060 : vector<2x64xf32>
    %cst_199 = arith.constant 1.000000e+00 : f32
    %1062 = vector.broadcast %cst_199 : f32 to vector<2x64xf32>
    %1063 = arith.subf %1062, %1055 : vector<2x64xf32>
    %1064 = arith.mulf %1063, %1061 : vector<2x64xf32>
    %1065 = arith.mulf %1055, %1043 : vector<2x64xf32>
    %1066 = arith.addf %1064, %1065 : vector<2x64xf32>
    %1067 = vector.extract_strided_slice %905 {offsets = [14, 0], sizes = [2, 192], strides = [1, 1]} : vector<16x192xf32> to vector<2x192xf32>
    %cst_200 = arith.constant dense<0.000000e+00> : vector<2x192xf32>
    %1068 = tpu.matmul %1066, %896, %cst_200 {dimension_numbers = #tpu.dot_dimension_numbers<[1], [0], [0], [1], [0, 0, 1, 1], [], []>} : vector<2x64xf32>, vector<64x192xf32>, vector<2x192xf32> -> vector<2x192xf32>
    %1069 = vector.extract_strided_slice %1067 {offsets = [0, 0], sizes = [2, 128], strides = [1, 1]} : vector<2x192xf32> to vector<2x128xf32>
    %1070 = vector.extract_strided_slice %1068 {offsets = [0, 0], sizes = [2, 128], strides = [1, 1]} : vector<2x192xf32> to vector<2x128xf32>
    %1071 = arith.addf %1069, %1070 : vector<2x128xf32>
    %1072 = arith.negf %1071 : vector<2x128xf32>
    %1073 = math.exp %1072 : vector<2x128xf32>
    %cst_201 = arith.constant 1.000000e+00 : f32
    %1074 = vector.broadcast %cst_201 : f32 to vector<2x128xf32>
    %1075 = arith.addf %1074, %1073 : vector<2x128xf32>
    %1076 = arith.divf %1074, %1075 : vector<2x128xf32>
    %1077 = vector.extract_strided_slice %1076 {offsets = [0, 0], sizes = [2, 64], strides = [1, 1]} : vector<2x128xf32> to vector<2x64xf32>
    %1078 = vector.extract_strided_slice %1076 {offsets = [0, 64], sizes = [2, 64], strides = [1, 1]} : vector<2x128xf32> to vector<2x64xf32>
    %1079 = vector.extract_strided_slice %1067 {offsets = [0, 128], sizes = [2, 64], strides = [1, 1]} : vector<2x192xf32> to vector<2x64xf32>
    %1080 = vector.extract_strided_slice %1068 {offsets = [0, 128], sizes = [2, 64], strides = [1, 1]} : vector<2x192xf32> to vector<2x64xf32>
    %1081 = arith.addf %1080, %902 : vector<2x64xf32>
    %1082 = arith.mulf %1077, %1081 : vector<2x64xf32>
    %1083 = arith.addf %1079, %1082 : vector<2x64xf32>
    %1084 = math.tanh %1083 : vector<2x64xf32>
    %cst_202 = arith.constant 1.000000e+00 : f32
    %1085 = vector.broadcast %cst_202 : f32 to vector<2x64xf32>
    %1086 = arith.subf %1085, %1078 : vector<2x64xf32>
    %1087 = arith.mulf %1086, %1084 : vector<2x64xf32>
    %1088 = arith.mulf %1078, %1066 : vector<2x64xf32>
    %1089 = arith.addf %1087, %1088 : vector<2x64xf32>
    %1090 = tpu.concatenate %928, %951, %974, %997, %1020, %1043, %1066, %1089 in 0 : vector<2x64xf32>, vector<2x64xf32>, vector<2x64xf32>, vector<2x64xf32>, vector<2x64xf32>, vector<2x64xf32>, vector<2x64xf32>, vector<2x64xf32> -> vector<16x64xf32>
    %c0_203 = arith.constant 0 : index
    %c0_204 = arith.constant 0 : index
    %c0_205 = arith.constant 0 : index
    %1091 = vector.load %arg12[%c0_203, %c0_204, %c0_205] : memref<3x64x192xf32, #tpu.memory_space<vmem>>, vector<1x64x192xf32>
    %1092 = vector.shape_cast %1091 : vector<1x64x192xf32> to vector<64x192xf32>
    %c1_206 = arith.constant 1 : index
    %c0_207 = arith.constant 0 : index
    %c0_208 = arith.constant 0 : index
    %1093 = vector.load %arg13[%c1_206, %c0_207, %c0_208] : memref<4x64x192xf32, #tpu.memory_space<vmem>>, vector<1x64x192xf32>
    %1094 = vector.shape_cast %1093 : vector<1x64x192xf32> to vector<64x192xf32>
    %c1_209 = arith.constant 1 : index
    %c0_210 = arith.constant 0 : index
    %c0_211 = arith.constant 0 : index
    %1095 = vector.load %arg14[%c1_209, %c0_210, %c0_211] : memref<4x1x192xf32, #tpu.memory_space<vmem>>, vector<1x1x192xf32>
    %1096 = vector.shape_cast %1095 : vector<1x1x192xf32> to vector<1x192xf32>
    %c1_212 = arith.constant 1 : index
    %c0_213 = arith.constant 0 : index
    %c0_214 = arith.constant 0 : index
    %1097 = vector.load %arg15[%c1_212, %c0_213, %c0_214] : memref<4x1x64xf32, #tpu.memory_space<vmem>>, vector<1x1x64xf32>
    %1098 = vector.shape_cast %1097 : vector<1x1x64xf32> to vector<1x64xf32>
    %1099 = vector.shape_cast %1098 : vector<1x64xf32> to vector<1x64xf32>
    %1100 = vector.broadcast %1099 : vector<1x64xf32> to vector<2x64xf32>
    %cst_215 = arith.constant dense<0.000000e+00> : vector<16x192xf32>
    %1101 = tpu.matmul %1090, %1092, %cst_215 {dimension_numbers = #tpu.dot_dimension_numbers<[1], [0], [0], [1], [0, 0, 1, 1], [], []>} : vector<16x64xf32>, vector<64x192xf32>, vector<16x192xf32> -> vector<16x192xf32>
    %1102 = vector.broadcast %1096 : vector<1x192xf32> to vector<16x192xf32>
    %1103 = arith.addf %1101, %1102 : vector<16x192xf32>
    %1104 = vector.extract_strided_slice %1103 {offsets = [0, 0], sizes = [2, 192], strides = [1, 1]} : vector<16x192xf32> to vector<2x192xf32>
    %cst_216 = arith.constant dense<0.000000e+00> : vector<2x192xf32>
    %1105 = tpu.matmul %876, %1094, %cst_216 {dimension_numbers = #tpu.dot_dimension_numbers<[1], [0], [0], [1], [0, 0, 1, 1], [], []>} : vector<2x64xf32>, vector<64x192xf32>, vector<2x192xf32> -> vector<2x192xf32>
    %1106 = vector.extract_strided_slice %1104 {offsets = [0, 0], sizes = [2, 128], strides = [1, 1]} : vector<2x192xf32> to vector<2x128xf32>
    %1107 = vector.extract_strided_slice %1105 {offsets = [0, 0], sizes = [2, 128], strides = [1, 1]} : vector<2x192xf32> to vector<2x128xf32>
    %1108 = arith.addf %1106, %1107 : vector<2x128xf32>
    %1109 = arith.negf %1108 : vector<2x128xf32>
    %1110 = math.exp %1109 : vector<2x128xf32>
    %cst_217 = arith.constant 1.000000e+00 : f32
    %1111 = vector.broadcast %cst_217 : f32 to vector<2x128xf32>
    %1112 = arith.addf %1111, %1110 : vector<2x128xf32>
    %1113 = arith.divf %1111, %1112 : vector<2x128xf32>
    %1114 = vector.extract_strided_slice %1113 {offsets = [0, 0], sizes = [2, 64], strides = [1, 1]} : vector<2x128xf32> to vector<2x64xf32>
    %1115 = vector.extract_strided_slice %1113 {offsets = [0, 64], sizes = [2, 64], strides = [1, 1]} : vector<2x128xf32> to vector<2x64xf32>
    %1116 = vector.extract_strided_slice %1104 {offsets = [0, 128], sizes = [2, 64], strides = [1, 1]} : vector<2x192xf32> to vector<2x64xf32>
    %1117 = vector.extract_strided_slice %1105 {offsets = [0, 128], sizes = [2, 64], strides = [1, 1]} : vector<2x192xf32> to vector<2x64xf32>
    %1118 = arith.addf %1117, %1100 : vector<2x64xf32>
    %1119 = arith.mulf %1114, %1118 : vector<2x64xf32>
    %1120 = arith.addf %1116, %1119 : vector<2x64xf32>
    %1121 = math.tanh %1120 : vector<2x64xf32>
    %cst_218 = arith.constant 1.000000e+00 : f32
    %1122 = vector.broadcast %cst_218 : f32 to vector<2x64xf32>
    %1123 = arith.subf %1122, %1115 : vector<2x64xf32>
    %1124 = arith.mulf %1123, %1121 : vector<2x64xf32>
    %1125 = arith.mulf %1115, %876 : vector<2x64xf32>
    %1126 = arith.addf %1124, %1125 : vector<2x64xf32>
    %1127 = vector.extract_strided_slice %1103 {offsets = [2, 0], sizes = [2, 192], strides = [1, 1]} : vector<16x192xf32> to vector<2x192xf32>
    %cst_219 = arith.constant dense<0.000000e+00> : vector<2x192xf32>
    %1128 = tpu.matmul %1126, %1094, %cst_219 {dimension_numbers = #tpu.dot_dimension_numbers<[1], [0], [0], [1], [0, 0, 1, 1], [], []>} : vector<2x64xf32>, vector<64x192xf32>, vector<2x192xf32> -> vector<2x192xf32>
    %1129 = vector.extract_strided_slice %1127 {offsets = [0, 0], sizes = [2, 128], strides = [1, 1]} : vector<2x192xf32> to vector<2x128xf32>
    %1130 = vector.extract_strided_slice %1128 {offsets = [0, 0], sizes = [2, 128], strides = [1, 1]} : vector<2x192xf32> to vector<2x128xf32>
    %1131 = arith.addf %1129, %1130 : vector<2x128xf32>
    %1132 = arith.negf %1131 : vector<2x128xf32>
    %1133 = math.exp %1132 : vector<2x128xf32>
    %cst_220 = arith.constant 1.000000e+00 : f32
    %1134 = vector.broadcast %cst_220 : f32 to vector<2x128xf32>
    %1135 = arith.addf %1134, %1133 : vector<2x128xf32>
    %1136 = arith.divf %1134, %1135 : vector<2x128xf32>
    %1137 = vector.extract_strided_slice %1136 {offsets = [0, 0], sizes = [2, 64], strides = [1, 1]} : vector<2x128xf32> to vector<2x64xf32>
    %1138 = vector.extract_strided_slice %1136 {offsets = [0, 64], sizes = [2, 64], strides = [1, 1]} : vector<2x128xf32> to vector<2x64xf32>
    %1139 = vector.extract_strided_slice %1127 {offsets = [0, 128], sizes = [2, 64], strides = [1, 1]} : vector<2x192xf32> to vector<2x64xf32>
    %1140 = vector.extract_strided_slice %1128 {offsets = [0, 128], sizes = [2, 64], strides = [1, 1]} : vector<2x192xf32> to vector<2x64xf32>
    %1141 = arith.addf %1140, %1100 : vector<2x64xf32>
    %1142 = arith.mulf %1137, %1141 : vector<2x64xf32>
    %1143 = arith.addf %1139, %1142 : vector<2x64xf32>
    %1144 = math.tanh %1143 : vector<2x64xf32>
    %cst_221 = arith.constant 1.000000e+00 : f32
    %1145 = vector.broadcast %cst_221 : f32 to vector<2x64xf32>
    %1146 = arith.subf %1145, %1138 : vector<2x64xf32>
    %1147 = arith.mulf %1146, %1144 : vector<2x64xf32>
    %1148 = arith.mulf %1138, %1126 : vector<2x64xf32>
    %1149 = arith.addf %1147, %1148 : vector<2x64xf32>
    %1150 = vector.extract_strided_slice %1103 {offsets = [4, 0], sizes = [2, 192], strides = [1, 1]} : vector<16x192xf32> to vector<2x192xf32>
    %cst_222 = arith.constant dense<0.000000e+00> : vector<2x192xf32>
    %1151 = tpu.matmul %1149, %1094, %cst_222 {dimension_numbers = #tpu.dot_dimension_numbers<[1], [0], [0], [1], [0, 0, 1, 1], [], []>} : vector<2x64xf32>, vector<64x192xf32>, vector<2x192xf32> -> vector<2x192xf32>
    %1152 = vector.extract_strided_slice %1150 {offsets = [0, 0], sizes = [2, 128], strides = [1, 1]} : vector<2x192xf32> to vector<2x128xf32>
    %1153 = vector.extract_strided_slice %1151 {offsets = [0, 0], sizes = [2, 128], strides = [1, 1]} : vector<2x192xf32> to vector<2x128xf32>
    %1154 = arith.addf %1152, %1153 : vector<2x128xf32>
    %1155 = arith.negf %1154 : vector<2x128xf32>
    %1156 = math.exp %1155 : vector<2x128xf32>
    %cst_223 = arith.constant 1.000000e+00 : f32
    %1157 = vector.broadcast %cst_223 : f32 to vector<2x128xf32>
    %1158 = arith.addf %1157, %1156 : vector<2x128xf32>
    %1159 = arith.divf %1157, %1158 : vector<2x128xf32>
    %1160 = vector.extract_strided_slice %1159 {offsets = [0, 0], sizes = [2, 64], strides = [1, 1]} : vector<2x128xf32> to vector<2x64xf32>
    %1161 = vector.extract_strided_slice %1159 {offsets = [0, 64], sizes = [2, 64], strides = [1, 1]} : vector<2x128xf32> to vector<2x64xf32>
    %1162 = vector.extract_strided_slice %1150 {offsets = [0, 128], sizes = [2, 64], strides = [1, 1]} : vector<2x192xf32> to vector<2x64xf32>
    %1163 = vector.extract_strided_slice %1151 {offsets = [0, 128], sizes = [2, 64], strides = [1, 1]} : vector<2x192xf32> to vector<2x64xf32>
    %1164 = arith.addf %1163, %1100 : vector<2x64xf32>
    %1165 = arith.mulf %1160, %1164 : vector<2x64xf32>
    %1166 = arith.addf %1162, %1165 : vector<2x64xf32>
    %1167 = math.tanh %1166 : vector<2x64xf32>
    %cst_224 = arith.constant 1.000000e+00 : f32
    %1168 = vector.broadcast %cst_224 : f32 to vector<2x64xf32>
    %1169 = arith.subf %1168, %1161 : vector<2x64xf32>
    %1170 = arith.mulf %1169, %1167 : vector<2x64xf32>
    %1171 = arith.mulf %1161, %1149 : vector<2x64xf32>
    %1172 = arith.addf %1170, %1171 : vector<2x64xf32>
    %1173 = vector.extract_strided_slice %1103 {offsets = [6, 0], sizes = [2, 192], strides = [1, 1]} : vector<16x192xf32> to vector<2x192xf32>
    %cst_225 = arith.constant dense<0.000000e+00> : vector<2x192xf32>
    %1174 = tpu.matmul %1172, %1094, %cst_225 {dimension_numbers = #tpu.dot_dimension_numbers<[1], [0], [0], [1], [0, 0, 1, 1], [], []>} : vector<2x64xf32>, vector<64x192xf32>, vector<2x192xf32> -> vector<2x192xf32>
    %1175 = vector.extract_strided_slice %1173 {offsets = [0, 0], sizes = [2, 128], strides = [1, 1]} : vector<2x192xf32> to vector<2x128xf32>
    %1176 = vector.extract_strided_slice %1174 {offsets = [0, 0], sizes = [2, 128], strides = [1, 1]} : vector<2x192xf32> to vector<2x128xf32>
    %1177 = arith.addf %1175, %1176 : vector<2x128xf32>
    %1178 = arith.negf %1177 : vector<2x128xf32>
    %1179 = math.exp %1178 : vector<2x128xf32>
    %cst_226 = arith.constant 1.000000e+00 : f32
    %1180 = vector.broadcast %cst_226 : f32 to vector<2x128xf32>
    %1181 = arith.addf %1180, %1179 : vector<2x128xf32>
    %1182 = arith.divf %1180, %1181 : vector<2x128xf32>
    %1183 = vector.extract_strided_slice %1182 {offsets = [0, 0], sizes = [2, 64], strides = [1, 1]} : vector<2x128xf32> to vector<2x64xf32>
    %1184 = vector.extract_strided_slice %1182 {offsets = [0, 64], sizes = [2, 64], strides = [1, 1]} : vector<2x128xf32> to vector<2x64xf32>
    %1185 = vector.extract_strided_slice %1173 {offsets = [0, 128], sizes = [2, 64], strides = [1, 1]} : vector<2x192xf32> to vector<2x64xf32>
    %1186 = vector.extract_strided_slice %1174 {offsets = [0, 128], sizes = [2, 64], strides = [1, 1]} : vector<2x192xf32> to vector<2x64xf32>
    %1187 = arith.addf %1186, %1100 : vector<2x64xf32>
    %1188 = arith.mulf %1183, %1187 : vector<2x64xf32>
    %1189 = arith.addf %1185, %1188 : vector<2x64xf32>
    %1190 = math.tanh %1189 : vector<2x64xf32>
    %cst_227 = arith.constant 1.000000e+00 : f32
    %1191 = vector.broadcast %cst_227 : f32 to vector<2x64xf32>
    %1192 = arith.subf %1191, %1184 : vector<2x64xf32>
    %1193 = arith.mulf %1192, %1190 : vector<2x64xf32>
    %1194 = arith.mulf %1184, %1172 : vector<2x64xf32>
    %1195 = arith.addf %1193, %1194 : vector<2x64xf32>
    %1196 = vector.extract_strided_slice %1103 {offsets = [8, 0], sizes = [2, 192], strides = [1, 1]} : vector<16x192xf32> to vector<2x192xf32>
    %cst_228 = arith.constant dense<0.000000e+00> : vector<2x192xf32>
    %1197 = tpu.matmul %1195, %1094, %cst_228 {dimension_numbers = #tpu.dot_dimension_numbers<[1], [0], [0], [1], [0, 0, 1, 1], [], []>} : vector<2x64xf32>, vector<64x192xf32>, vector<2x192xf32> -> vector<2x192xf32>
    %1198 = vector.extract_strided_slice %1196 {offsets = [0, 0], sizes = [2, 128], strides = [1, 1]} : vector<2x192xf32> to vector<2x128xf32>
    %1199 = vector.extract_strided_slice %1197 {offsets = [0, 0], sizes = [2, 128], strides = [1, 1]} : vector<2x192xf32> to vector<2x128xf32>
    %1200 = arith.addf %1198, %1199 : vector<2x128xf32>
    %1201 = arith.negf %1200 : vector<2x128xf32>
    %1202 = math.exp %1201 : vector<2x128xf32>
    %cst_229 = arith.constant 1.000000e+00 : f32
    %1203 = vector.broadcast %cst_229 : f32 to vector<2x128xf32>
    %1204 = arith.addf %1203, %1202 : vector<2x128xf32>
    %1205 = arith.divf %1203, %1204 : vector<2x128xf32>
    %1206 = vector.extract_strided_slice %1205 {offsets = [0, 0], sizes = [2, 64], strides = [1, 1]} : vector<2x128xf32> to vector<2x64xf32>
    %1207 = vector.extract_strided_slice %1205 {offsets = [0, 64], sizes = [2, 64], strides = [1, 1]} : vector<2x128xf32> to vector<2x64xf32>
    %1208 = vector.extract_strided_slice %1196 {offsets = [0, 128], sizes = [2, 64], strides = [1, 1]} : vector<2x192xf32> to vector<2x64xf32>
    %1209 = vector.extract_strided_slice %1197 {offsets = [0, 128], sizes = [2, 64], strides = [1, 1]} : vector<2x192xf32> to vector<2x64xf32>
    %1210 = arith.addf %1209, %1100 : vector<2x64xf32>
    %1211 = arith.mulf %1206, %1210 : vector<2x64xf32>
    %1212 = arith.addf %1208, %1211 : vector<2x64xf32>
    %1213 = math.tanh %1212 : vector<2x64xf32>
    %cst_230 = arith.constant 1.000000e+00 : f32
    %1214 = vector.broadcast %cst_230 : f32 to vector<2x64xf32>
    %1215 = arith.subf %1214, %1207 : vector<2x64xf32>
    %1216 = arith.mulf %1215, %1213 : vector<2x64xf32>
    %1217 = arith.mulf %1207, %1195 : vector<2x64xf32>
    %1218 = arith.addf %1216, %1217 : vector<2x64xf32>
    %1219 = vector.extract_strided_slice %1103 {offsets = [10, 0], sizes = [2, 192], strides = [1, 1]} : vector<16x192xf32> to vector<2x192xf32>
    %cst_231 = arith.constant dense<0.000000e+00> : vector<2x192xf32>
    %1220 = tpu.matmul %1218, %1094, %cst_231 {dimension_numbers = #tpu.dot_dimension_numbers<[1], [0], [0], [1], [0, 0, 1, 1], [], []>} : vector<2x64xf32>, vector<64x192xf32>, vector<2x192xf32> -> vector<2x192xf32>
    %1221 = vector.extract_strided_slice %1219 {offsets = [0, 0], sizes = [2, 128], strides = [1, 1]} : vector<2x192xf32> to vector<2x128xf32>
    %1222 = vector.extract_strided_slice %1220 {offsets = [0, 0], sizes = [2, 128], strides = [1, 1]} : vector<2x192xf32> to vector<2x128xf32>
    %1223 = arith.addf %1221, %1222 : vector<2x128xf32>
    %1224 = arith.negf %1223 : vector<2x128xf32>
    %1225 = math.exp %1224 : vector<2x128xf32>
    %cst_232 = arith.constant 1.000000e+00 : f32
    %1226 = vector.broadcast %cst_232 : f32 to vector<2x128xf32>
    %1227 = arith.addf %1226, %1225 : vector<2x128xf32>
    %1228 = arith.divf %1226, %1227 : vector<2x128xf32>
    %1229 = vector.extract_strided_slice %1228 {offsets = [0, 0], sizes = [2, 64], strides = [1, 1]} : vector<2x128xf32> to vector<2x64xf32>
    %1230 = vector.extract_strided_slice %1228 {offsets = [0, 64], sizes = [2, 64], strides = [1, 1]} : vector<2x128xf32> to vector<2x64xf32>
    %1231 = vector.extract_strided_slice %1219 {offsets = [0, 128], sizes = [2, 64], strides = [1, 1]} : vector<2x192xf32> to vector<2x64xf32>
    %1232 = vector.extract_strided_slice %1220 {offsets = [0, 128], sizes = [2, 64], strides = [1, 1]} : vector<2x192xf32> to vector<2x64xf32>
    %1233 = arith.addf %1232, %1100 : vector<2x64xf32>
    %1234 = arith.mulf %1229, %1233 : vector<2x64xf32>
    %1235 = arith.addf %1231, %1234 : vector<2x64xf32>
    %1236 = math.tanh %1235 : vector<2x64xf32>
    %cst_233 = arith.constant 1.000000e+00 : f32
    %1237 = vector.broadcast %cst_233 : f32 to vector<2x64xf32>
    %1238 = arith.subf %1237, %1230 : vector<2x64xf32>
    %1239 = arith.mulf %1238, %1236 : vector<2x64xf32>
    %1240 = arith.mulf %1230, %1218 : vector<2x64xf32>
    %1241 = arith.addf %1239, %1240 : vector<2x64xf32>
    %1242 = vector.extract_strided_slice %1103 {offsets = [12, 0], sizes = [2, 192], strides = [1, 1]} : vector<16x192xf32> to vector<2x192xf32>
    %cst_234 = arith.constant dense<0.000000e+00> : vector<2x192xf32>
    %1243 = tpu.matmul %1241, %1094, %cst_234 {dimension_numbers = #tpu.dot_dimension_numbers<[1], [0], [0], [1], [0, 0, 1, 1], [], []>} : vector<2x64xf32>, vector<64x192xf32>, vector<2x192xf32> -> vector<2x192xf32>
    %1244 = vector.extract_strided_slice %1242 {offsets = [0, 0], sizes = [2, 128], strides = [1, 1]} : vector<2x192xf32> to vector<2x128xf32>
    %1245 = vector.extract_strided_slice %1243 {offsets = [0, 0], sizes = [2, 128], strides = [1, 1]} : vector<2x192xf32> to vector<2x128xf32>
    %1246 = arith.addf %1244, %1245 : vector<2x128xf32>
    %1247 = arith.negf %1246 : vector<2x128xf32>
    %1248 = math.exp %1247 : vector<2x128xf32>
    %cst_235 = arith.constant 1.000000e+00 : f32
    %1249 = vector.broadcast %cst_235 : f32 to vector<2x128xf32>
    %1250 = arith.addf %1249, %1248 : vector<2x128xf32>
    %1251 = arith.divf %1249, %1250 : vector<2x128xf32>
    %1252 = vector.extract_strided_slice %1251 {offsets = [0, 0], sizes = [2, 64], strides = [1, 1]} : vector<2x128xf32> to vector<2x64xf32>
    %1253 = vector.extract_strided_slice %1251 {offsets = [0, 64], sizes = [2, 64], strides = [1, 1]} : vector<2x128xf32> to vector<2x64xf32>
    %1254 = vector.extract_strided_slice %1242 {offsets = [0, 128], sizes = [2, 64], strides = [1, 1]} : vector<2x192xf32> to vector<2x64xf32>
    %1255 = vector.extract_strided_slice %1243 {offsets = [0, 128], sizes = [2, 64], strides = [1, 1]} : vector<2x192xf32> to vector<2x64xf32>
    %1256 = arith.addf %1255, %1100 : vector<2x64xf32>
    %1257 = arith.mulf %1252, %1256 : vector<2x64xf32>
    %1258 = arith.addf %1254, %1257 : vector<2x64xf32>
    %1259 = math.tanh %1258 : vector<2x64xf32>
    %cst_236 = arith.constant 1.000000e+00 : f32
    %1260 = vector.broadcast %cst_236 : f32 to vector<2x64xf32>
    %1261 = arith.subf %1260, %1253 : vector<2x64xf32>
    %1262 = arith.mulf %1261, %1259 : vector<2x64xf32>
    %1263 = arith.mulf %1253, %1241 : vector<2x64xf32>
    %1264 = arith.addf %1262, %1263 : vector<2x64xf32>
    %1265 = vector.extract_strided_slice %1103 {offsets = [14, 0], sizes = [2, 192], strides = [1, 1]} : vector<16x192xf32> to vector<2x192xf32>
    %cst_237 = arith.constant dense<0.000000e+00> : vector<2x192xf32>
    %1266 = tpu.matmul %1264, %1094, %cst_237 {dimension_numbers = #tpu.dot_dimension_numbers<[1], [0], [0], [1], [0, 0, 1, 1], [], []>} : vector<2x64xf32>, vector<64x192xf32>, vector<2x192xf32> -> vector<2x192xf32>
    %1267 = vector.extract_strided_slice %1265 {offsets = [0, 0], sizes = [2, 128], strides = [1, 1]} : vector<2x192xf32> to vector<2x128xf32>
    %1268 = vector.extract_strided_slice %1266 {offsets = [0, 0], sizes = [2, 128], strides = [1, 1]} : vector<2x192xf32> to vector<2x128xf32>
    %1269 = arith.addf %1267, %1268 : vector<2x128xf32>
    %1270 = arith.negf %1269 : vector<2x128xf32>
    %1271 = math.exp %1270 : vector<2x128xf32>
    %cst_238 = arith.constant 1.000000e+00 : f32
    %1272 = vector.broadcast %cst_238 : f32 to vector<2x128xf32>
    %1273 = arith.addf %1272, %1271 : vector<2x128xf32>
    %1274 = arith.divf %1272, %1273 : vector<2x128xf32>
    %1275 = vector.extract_strided_slice %1274 {offsets = [0, 0], sizes = [2, 64], strides = [1, 1]} : vector<2x128xf32> to vector<2x64xf32>
    %1276 = vector.extract_strided_slice %1274 {offsets = [0, 64], sizes = [2, 64], strides = [1, 1]} : vector<2x128xf32> to vector<2x64xf32>
    %1277 = vector.extract_strided_slice %1265 {offsets = [0, 128], sizes = [2, 64], strides = [1, 1]} : vector<2x192xf32> to vector<2x64xf32>
    %1278 = vector.extract_strided_slice %1266 {offsets = [0, 128], sizes = [2, 64], strides = [1, 1]} : vector<2x192xf32> to vector<2x64xf32>
    %1279 = arith.addf %1278, %1100 : vector<2x64xf32>
    %1280 = arith.mulf %1275, %1279 : vector<2x64xf32>
    %1281 = arith.addf %1277, %1280 : vector<2x64xf32>
    %1282 = math.tanh %1281 : vector<2x64xf32>
    %cst_239 = arith.constant 1.000000e+00 : f32
    %1283 = vector.broadcast %cst_239 : f32 to vector<2x64xf32>
    %1284 = arith.subf %1283, %1276 : vector<2x64xf32>
    %1285 = arith.mulf %1284, %1282 : vector<2x64xf32>
    %1286 = arith.mulf %1276, %1264 : vector<2x64xf32>
    %1287 = arith.addf %1285, %1286 : vector<2x64xf32>
    %1288 = tpu.concatenate %1126, %1149, %1172, %1195, %1218, %1241, %1264, %1287 in 0 : vector<2x64xf32>, vector<2x64xf32>, vector<2x64xf32>, vector<2x64xf32>, vector<2x64xf32>, vector<2x64xf32>, vector<2x64xf32>, vector<2x64xf32> -> vector<16x64xf32>
    %c1_240 = arith.constant 1 : index
    %c0_241 = arith.constant 0 : index
    %c0_242 = arith.constant 0 : index
    %1289 = vector.load %arg12[%c1_240, %c0_241, %c0_242] : memref<3x64x192xf32, #tpu.memory_space<vmem>>, vector<1x64x192xf32>
    %1290 = vector.shape_cast %1289 : vector<1x64x192xf32> to vector<64x192xf32>
    %c2_243 = arith.constant 2 : index
    %c0_244 = arith.constant 0 : index
    %c0_245 = arith.constant 0 : index
    %1291 = vector.load %arg13[%c2_243, %c0_244, %c0_245] : memref<4x64x192xf32, #tpu.memory_space<vmem>>, vector<1x64x192xf32>
    %1292 = vector.shape_cast %1291 : vector<1x64x192xf32> to vector<64x192xf32>
    %c2_246 = arith.constant 2 : index
    %c0_247 = arith.constant 0 : index
    %c0_248 = arith.constant 0 : index
    %1293 = vector.load %arg14[%c2_246, %c0_247, %c0_248] : memref<4x1x192xf32, #tpu.memory_space<vmem>>, vector<1x1x192xf32>
    %1294 = vector.shape_cast %1293 : vector<1x1x192xf32> to vector<1x192xf32>
    %c2_249 = arith.constant 2 : index
    %c0_250 = arith.constant 0 : index
    %c0_251 = arith.constant 0 : index
    %1295 = vector.load %arg15[%c2_249, %c0_250, %c0_251] : memref<4x1x64xf32, #tpu.memory_space<vmem>>, vector<1x1x64xf32>
    %1296 = vector.shape_cast %1295 : vector<1x1x64xf32> to vector<1x64xf32>
    %1297 = vector.shape_cast %1296 : vector<1x64xf32> to vector<1x64xf32>
    %1298 = vector.broadcast %1297 : vector<1x64xf32> to vector<2x64xf32>
    %cst_252 = arith.constant dense<0.000000e+00> : vector<16x192xf32>
    %1299 = tpu.matmul %1288, %1290, %cst_252 {dimension_numbers = #tpu.dot_dimension_numbers<[1], [0], [0], [1], [0, 0, 1, 1], [], []>} : vector<16x64xf32>, vector<64x192xf32>, vector<16x192xf32> -> vector<16x192xf32>
    %1300 = vector.broadcast %1294 : vector<1x192xf32> to vector<16x192xf32>
    %1301 = arith.addf %1299, %1300 : vector<16x192xf32>
    %1302 = vector.extract_strided_slice %1301 {offsets = [0, 0], sizes = [2, 192], strides = [1, 1]} : vector<16x192xf32> to vector<2x192xf32>
    %cst_253 = arith.constant dense<0.000000e+00> : vector<2x192xf32>
    %1303 = tpu.matmul %876, %1292, %cst_253 {dimension_numbers = #tpu.dot_dimension_numbers<[1], [0], [0], [1], [0, 0, 1, 1], [], []>} : vector<2x64xf32>, vector<64x192xf32>, vector<2x192xf32> -> vector<2x192xf32>
    %1304 = vector.extract_strided_slice %1302 {offsets = [0, 0], sizes = [2, 128], strides = [1, 1]} : vector<2x192xf32> to vector<2x128xf32>
    %1305 = vector.extract_strided_slice %1303 {offsets = [0, 0], sizes = [2, 128], strides = [1, 1]} : vector<2x192xf32> to vector<2x128xf32>
    %1306 = arith.addf %1304, %1305 : vector<2x128xf32>
    %1307 = arith.negf %1306 : vector<2x128xf32>
    %1308 = math.exp %1307 : vector<2x128xf32>
    %cst_254 = arith.constant 1.000000e+00 : f32
    %1309 = vector.broadcast %cst_254 : f32 to vector<2x128xf32>
    %1310 = arith.addf %1309, %1308 : vector<2x128xf32>
    %1311 = arith.divf %1309, %1310 : vector<2x128xf32>
    %1312 = vector.extract_strided_slice %1311 {offsets = [0, 0], sizes = [2, 64], strides = [1, 1]} : vector<2x128xf32> to vector<2x64xf32>
    %1313 = vector.extract_strided_slice %1311 {offsets = [0, 64], sizes = [2, 64], strides = [1, 1]} : vector<2x128xf32> to vector<2x64xf32>
    %1314 = vector.extract_strided_slice %1302 {offsets = [0, 128], sizes = [2, 64], strides = [1, 1]} : vector<2x192xf32> to vector<2x64xf32>
    %1315 = vector.extract_strided_slice %1303 {offsets = [0, 128], sizes = [2, 64], strides = [1, 1]} : vector<2x192xf32> to vector<2x64xf32>
    %1316 = arith.addf %1315, %1298 : vector<2x64xf32>
    %1317 = arith.mulf %1312, %1316 : vector<2x64xf32>
    %1318 = arith.addf %1314, %1317 : vector<2x64xf32>
    %1319 = math.tanh %1318 : vector<2x64xf32>
    %cst_255 = arith.constant 1.000000e+00 : f32
    %1320 = vector.broadcast %cst_255 : f32 to vector<2x64xf32>
    %1321 = arith.subf %1320, %1313 : vector<2x64xf32>
    %1322 = arith.mulf %1321, %1319 : vector<2x64xf32>
    %1323 = arith.mulf %1313, %876 : vector<2x64xf32>
    %1324 = arith.addf %1322, %1323 : vector<2x64xf32>
    %1325 = vector.extract_strided_slice %1301 {offsets = [2, 0], sizes = [2, 192], strides = [1, 1]} : vector<16x192xf32> to vector<2x192xf32>
    %cst_256 = arith.constant dense<0.000000e+00> : vector<2x192xf32>
    %1326 = tpu.matmul %1324, %1292, %cst_256 {dimension_numbers = #tpu.dot_dimension_numbers<[1], [0], [0], [1], [0, 0, 1, 1], [], []>} : vector<2x64xf32>, vector<64x192xf32>, vector<2x192xf32> -> vector<2x192xf32>
    %1327 = vector.extract_strided_slice %1325 {offsets = [0, 0], sizes = [2, 128], strides = [1, 1]} : vector<2x192xf32> to vector<2x128xf32>
    %1328 = vector.extract_strided_slice %1326 {offsets = [0, 0], sizes = [2, 128], strides = [1, 1]} : vector<2x192xf32> to vector<2x128xf32>
    %1329 = arith.addf %1327, %1328 : vector<2x128xf32>
    %1330 = arith.negf %1329 : vector<2x128xf32>
    %1331 = math.exp %1330 : vector<2x128xf32>
    %cst_257 = arith.constant 1.000000e+00 : f32
    %1332 = vector.broadcast %cst_257 : f32 to vector<2x128xf32>
    %1333 = arith.addf %1332, %1331 : vector<2x128xf32>
    %1334 = arith.divf %1332, %1333 : vector<2x128xf32>
    %1335 = vector.extract_strided_slice %1334 {offsets = [0, 0], sizes = [2, 64], strides = [1, 1]} : vector<2x128xf32> to vector<2x64xf32>
    %1336 = vector.extract_strided_slice %1334 {offsets = [0, 64], sizes = [2, 64], strides = [1, 1]} : vector<2x128xf32> to vector<2x64xf32>
    %1337 = vector.extract_strided_slice %1325 {offsets = [0, 128], sizes = [2, 64], strides = [1, 1]} : vector<2x192xf32> to vector<2x64xf32>
    %1338 = vector.extract_strided_slice %1326 {offsets = [0, 128], sizes = [2, 64], strides = [1, 1]} : vector<2x192xf32> to vector<2x64xf32>
    %1339 = arith.addf %1338, %1298 : vector<2x64xf32>
    %1340 = arith.mulf %1335, %1339 : vector<2x64xf32>
    %1341 = arith.addf %1337, %1340 : vector<2x64xf32>
    %1342 = math.tanh %1341 : vector<2x64xf32>
    %cst_258 = arith.constant 1.000000e+00 : f32
    %1343 = vector.broadcast %cst_258 : f32 to vector<2x64xf32>
    %1344 = arith.subf %1343, %1336 : vector<2x64xf32>
    %1345 = arith.mulf %1344, %1342 : vector<2x64xf32>
    %1346 = arith.mulf %1336, %1324 : vector<2x64xf32>
    %1347 = arith.addf %1345, %1346 : vector<2x64xf32>
    %1348 = vector.extract_strided_slice %1301 {offsets = [4, 0], sizes = [2, 192], strides = [1, 1]} : vector<16x192xf32> to vector<2x192xf32>
    %cst_259 = arith.constant dense<0.000000e+00> : vector<2x192xf32>
    %1349 = tpu.matmul %1347, %1292, %cst_259 {dimension_numbers = #tpu.dot_dimension_numbers<[1], [0], [0], [1], [0, 0, 1, 1], [], []>} : vector<2x64xf32>, vector<64x192xf32>, vector<2x192xf32> -> vector<2x192xf32>
    %1350 = vector.extract_strided_slice %1348 {offsets = [0, 0], sizes = [2, 128], strides = [1, 1]} : vector<2x192xf32> to vector<2x128xf32>
    %1351 = vector.extract_strided_slice %1349 {offsets = [0, 0], sizes = [2, 128], strides = [1, 1]} : vector<2x192xf32> to vector<2x128xf32>
    %1352 = arith.addf %1350, %1351 : vector<2x128xf32>
    %1353 = arith.negf %1352 : vector<2x128xf32>
    %1354 = math.exp %1353 : vector<2x128xf32>
    %cst_260 = arith.constant 1.000000e+00 : f32
    %1355 = vector.broadcast %cst_260 : f32 to vector<2x128xf32>
    %1356 = arith.addf %1355, %1354 : vector<2x128xf32>
    %1357 = arith.divf %1355, %1356 : vector<2x128xf32>
    %1358 = vector.extract_strided_slice %1357 {offsets = [0, 0], sizes = [2, 64], strides = [1, 1]} : vector<2x128xf32> to vector<2x64xf32>
    %1359 = vector.extract_strided_slice %1357 {offsets = [0, 64], sizes = [2, 64], strides = [1, 1]} : vector<2x128xf32> to vector<2x64xf32>
    %1360 = vector.extract_strided_slice %1348 {offsets = [0, 128], sizes = [2, 64], strides = [1, 1]} : vector<2x192xf32> to vector<2x64xf32>
    %1361 = vector.extract_strided_slice %1349 {offsets = [0, 128], sizes = [2, 64], strides = [1, 1]} : vector<2x192xf32> to vector<2x64xf32>
    %1362 = arith.addf %1361, %1298 : vector<2x64xf32>
    %1363 = arith.mulf %1358, %1362 : vector<2x64xf32>
    %1364 = arith.addf %1360, %1363 : vector<2x64xf32>
    %1365 = math.tanh %1364 : vector<2x64xf32>
    %cst_261 = arith.constant 1.000000e+00 : f32
    %1366 = vector.broadcast %cst_261 : f32 to vector<2x64xf32>
    %1367 = arith.subf %1366, %1359 : vector<2x64xf32>
    %1368 = arith.mulf %1367, %1365 : vector<2x64xf32>
    %1369 = arith.mulf %1359, %1347 : vector<2x64xf32>
    %1370 = arith.addf %1368, %1369 : vector<2x64xf32>
    %1371 = vector.extract_strided_slice %1301 {offsets = [6, 0], sizes = [2, 192], strides = [1, 1]} : vector<16x192xf32> to vector<2x192xf32>
    %cst_262 = arith.constant dense<0.000000e+00> : vector<2x192xf32>
    %1372 = tpu.matmul %1370, %1292, %cst_262 {dimension_numbers = #tpu.dot_dimension_numbers<[1], [0], [0], [1], [0, 0, 1, 1], [], []>} : vector<2x64xf32>, vector<64x192xf32>, vector<2x192xf32> -> vector<2x192xf32>
    %1373 = vector.extract_strided_slice %1371 {offsets = [0, 0], sizes = [2, 128], strides = [1, 1]} : vector<2x192xf32> to vector<2x128xf32>
    %1374 = vector.extract_strided_slice %1372 {offsets = [0, 0], sizes = [2, 128], strides = [1, 1]} : vector<2x192xf32> to vector<2x128xf32>
    %1375 = arith.addf %1373, %1374 : vector<2x128xf32>
    %1376 = arith.negf %1375 : vector<2x128xf32>
    %1377 = math.exp %1376 : vector<2x128xf32>
    %cst_263 = arith.constant 1.000000e+00 : f32
    %1378 = vector.broadcast %cst_263 : f32 to vector<2x128xf32>
    %1379 = arith.addf %1378, %1377 : vector<2x128xf32>
    %1380 = arith.divf %1378, %1379 : vector<2x128xf32>
    %1381 = vector.extract_strided_slice %1380 {offsets = [0, 0], sizes = [2, 64], strides = [1, 1]} : vector<2x128xf32> to vector<2x64xf32>
    %1382 = vector.extract_strided_slice %1380 {offsets = [0, 64], sizes = [2, 64], strides = [1, 1]} : vector<2x128xf32> to vector<2x64xf32>
    %1383 = vector.extract_strided_slice %1371 {offsets = [0, 128], sizes = [2, 64], strides = [1, 1]} : vector<2x192xf32> to vector<2x64xf32>
    %1384 = vector.extract_strided_slice %1372 {offsets = [0, 128], sizes = [2, 64], strides = [1, 1]} : vector<2x192xf32> to vector<2x64xf32>
    %1385 = arith.addf %1384, %1298 : vector<2x64xf32>
    %1386 = arith.mulf %1381, %1385 : vector<2x64xf32>
    %1387 = arith.addf %1383, %1386 : vector<2x64xf32>
    %1388 = math.tanh %1387 : vector<2x64xf32>
    %cst_264 = arith.constant 1.000000e+00 : f32
    %1389 = vector.broadcast %cst_264 : f32 to vector<2x64xf32>
    %1390 = arith.subf %1389, %1382 : vector<2x64xf32>
    %1391 = arith.mulf %1390, %1388 : vector<2x64xf32>
    %1392 = arith.mulf %1382, %1370 : vector<2x64xf32>
    %1393 = arith.addf %1391, %1392 : vector<2x64xf32>
    %1394 = vector.extract_strided_slice %1301 {offsets = [8, 0], sizes = [2, 192], strides = [1, 1]} : vector<16x192xf32> to vector<2x192xf32>
    %cst_265 = arith.constant dense<0.000000e+00> : vector<2x192xf32>
    %1395 = tpu.matmul %1393, %1292, %cst_265 {dimension_numbers = #tpu.dot_dimension_numbers<[1], [0], [0], [1], [0, 0, 1, 1], [], []>} : vector<2x64xf32>, vector<64x192xf32>, vector<2x192xf32> -> vector<2x192xf32>
    %1396 = vector.extract_strided_slice %1394 {offsets = [0, 0], sizes = [2, 128], strides = [1, 1]} : vector<2x192xf32> to vector<2x128xf32>
    %1397 = vector.extract_strided_slice %1395 {offsets = [0, 0], sizes = [2, 128], strides = [1, 1]} : vector<2x192xf32> to vector<2x128xf32>
    %1398 = arith.addf %1396, %1397 : vector<2x128xf32>
    %1399 = arith.negf %1398 : vector<2x128xf32>
    %1400 = math.exp %1399 : vector<2x128xf32>
    %cst_266 = arith.constant 1.000000e+00 : f32
    %1401 = vector.broadcast %cst_266 : f32 to vector<2x128xf32>
    %1402 = arith.addf %1401, %1400 : vector<2x128xf32>
    %1403 = arith.divf %1401, %1402 : vector<2x128xf32>
    %1404 = vector.extract_strided_slice %1403 {offsets = [0, 0], sizes = [2, 64], strides = [1, 1]} : vector<2x128xf32> to vector<2x64xf32>
    %1405 = vector.extract_strided_slice %1403 {offsets = [0, 64], sizes = [2, 64], strides = [1, 1]} : vector<2x128xf32> to vector<2x64xf32>
    %1406 = vector.extract_strided_slice %1394 {offsets = [0, 128], sizes = [2, 64], strides = [1, 1]} : vector<2x192xf32> to vector<2x64xf32>
    %1407 = vector.extract_strided_slice %1395 {offsets = [0, 128], sizes = [2, 64], strides = [1, 1]} : vector<2x192xf32> to vector<2x64xf32>
    %1408 = arith.addf %1407, %1298 : vector<2x64xf32>
    %1409 = arith.mulf %1404, %1408 : vector<2x64xf32>
    %1410 = arith.addf %1406, %1409 : vector<2x64xf32>
    %1411 = math.tanh %1410 : vector<2x64xf32>
    %cst_267 = arith.constant 1.000000e+00 : f32
    %1412 = vector.broadcast %cst_267 : f32 to vector<2x64xf32>
    %1413 = arith.subf %1412, %1405 : vector<2x64xf32>
    %1414 = arith.mulf %1413, %1411 : vector<2x64xf32>
    %1415 = arith.mulf %1405, %1393 : vector<2x64xf32>
    %1416 = arith.addf %1414, %1415 : vector<2x64xf32>
    %1417 = vector.extract_strided_slice %1301 {offsets = [10, 0], sizes = [2, 192], strides = [1, 1]} : vector<16x192xf32> to vector<2x192xf32>
    %cst_268 = arith.constant dense<0.000000e+00> : vector<2x192xf32>
    %1418 = tpu.matmul %1416, %1292, %cst_268 {dimension_numbers = #tpu.dot_dimension_numbers<[1], [0], [0], [1], [0, 0, 1, 1], [], []>} : vector<2x64xf32>, vector<64x192xf32>, vector<2x192xf32> -> vector<2x192xf32>
    %1419 = vector.extract_strided_slice %1417 {offsets = [0, 0], sizes = [2, 128], strides = [1, 1]} : vector<2x192xf32> to vector<2x128xf32>
    %1420 = vector.extract_strided_slice %1418 {offsets = [0, 0], sizes = [2, 128], strides = [1, 1]} : vector<2x192xf32> to vector<2x128xf32>
    %1421 = arith.addf %1419, %1420 : vector<2x128xf32>
    %1422 = arith.negf %1421 : vector<2x128xf32>
    %1423 = math.exp %1422 : vector<2x128xf32>
    %cst_269 = arith.constant 1.000000e+00 : f32
    %1424 = vector.broadcast %cst_269 : f32 to vector<2x128xf32>
    %1425 = arith.addf %1424, %1423 : vector<2x128xf32>
    %1426 = arith.divf %1424, %1425 : vector<2x128xf32>
    %1427 = vector.extract_strided_slice %1426 {offsets = [0, 0], sizes = [2, 64], strides = [1, 1]} : vector<2x128xf32> to vector<2x64xf32>
    %1428 = vector.extract_strided_slice %1426 {offsets = [0, 64], sizes = [2, 64], strides = [1, 1]} : vector<2x128xf32> to vector<2x64xf32>
    %1429 = vector.extract_strided_slice %1417 {offsets = [0, 128], sizes = [2, 64], strides = [1, 1]} : vector<2x192xf32> to vector<2x64xf32>
    %1430 = vector.extract_strided_slice %1418 {offsets = [0, 128], sizes = [2, 64], strides = [1, 1]} : vector<2x192xf32> to vector<2x64xf32>
    %1431 = arith.addf %1430, %1298 : vector<2x64xf32>
    %1432 = arith.mulf %1427, %1431 : vector<2x64xf32>
    %1433 = arith.addf %1429, %1432 : vector<2x64xf32>
    %1434 = math.tanh %1433 : vector<2x64xf32>
    %cst_270 = arith.constant 1.000000e+00 : f32
    %1435 = vector.broadcast %cst_270 : f32 to vector<2x64xf32>
    %1436 = arith.subf %1435, %1428 : vector<2x64xf32>
    %1437 = arith.mulf %1436, %1434 : vector<2x64xf32>
    %1438 = arith.mulf %1428, %1416 : vector<2x64xf32>
    %1439 = arith.addf %1437, %1438 : vector<2x64xf32>
    %1440 = vector.extract_strided_slice %1301 {offsets = [12, 0], sizes = [2, 192], strides = [1, 1]} : vector<16x192xf32> to vector<2x192xf32>
    %cst_271 = arith.constant dense<0.000000e+00> : vector<2x192xf32>
    %1441 = tpu.matmul %1439, %1292, %cst_271 {dimension_numbers = #tpu.dot_dimension_numbers<[1], [0], [0], [1], [0, 0, 1, 1], [], []>} : vector<2x64xf32>, vector<64x192xf32>, vector<2x192xf32> -> vector<2x192xf32>
    %1442 = vector.extract_strided_slice %1440 {offsets = [0, 0], sizes = [2, 128], strides = [1, 1]} : vector<2x192xf32> to vector<2x128xf32>
    %1443 = vector.extract_strided_slice %1441 {offsets = [0, 0], sizes = [2, 128], strides = [1, 1]} : vector<2x192xf32> to vector<2x128xf32>
    %1444 = arith.addf %1442, %1443 : vector<2x128xf32>
    %1445 = arith.negf %1444 : vector<2x128xf32>
    %1446 = math.exp %1445 : vector<2x128xf32>
    %cst_272 = arith.constant 1.000000e+00 : f32
    %1447 = vector.broadcast %cst_272 : f32 to vector<2x128xf32>
    %1448 = arith.addf %1447, %1446 : vector<2x128xf32>
    %1449 = arith.divf %1447, %1448 : vector<2x128xf32>
    %1450 = vector.extract_strided_slice %1449 {offsets = [0, 0], sizes = [2, 64], strides = [1, 1]} : vector<2x128xf32> to vector<2x64xf32>
    %1451 = vector.extract_strided_slice %1449 {offsets = [0, 64], sizes = [2, 64], strides = [1, 1]} : vector<2x128xf32> to vector<2x64xf32>
    %1452 = vector.extract_strided_slice %1440 {offsets = [0, 128], sizes = [2, 64], strides = [1, 1]} : vector<2x192xf32> to vector<2x64xf32>
    %1453 = vector.extract_strided_slice %1441 {offsets = [0, 128], sizes = [2, 64], strides = [1, 1]} : vector<2x192xf32> to vector<2x64xf32>
    %1454 = arith.addf %1453, %1298 : vector<2x64xf32>
    %1455 = arith.mulf %1450, %1454 : vector<2x64xf32>
    %1456 = arith.addf %1452, %1455 : vector<2x64xf32>
    %1457 = math.tanh %1456 : vector<2x64xf32>
    %cst_273 = arith.constant 1.000000e+00 : f32
    %1458 = vector.broadcast %cst_273 : f32 to vector<2x64xf32>
    %1459 = arith.subf %1458, %1451 : vector<2x64xf32>
    %1460 = arith.mulf %1459, %1457 : vector<2x64xf32>
    %1461 = arith.mulf %1451, %1439 : vector<2x64xf32>
    %1462 = arith.addf %1460, %1461 : vector<2x64xf32>
    %1463 = vector.extract_strided_slice %1301 {offsets = [14, 0], sizes = [2, 192], strides = [1, 1]} : vector<16x192xf32> to vector<2x192xf32>
    %cst_274 = arith.constant dense<0.000000e+00> : vector<2x192xf32>
    %1464 = tpu.matmul %1462, %1292, %cst_274 {dimension_numbers = #tpu.dot_dimension_numbers<[1], [0], [0], [1], [0, 0, 1, 1], [], []>} : vector<2x64xf32>, vector<64x192xf32>, vector<2x192xf32> -> vector<2x192xf32>
    %1465 = vector.extract_strided_slice %1463 {offsets = [0, 0], sizes = [2, 128], strides = [1, 1]} : vector<2x192xf32> to vector<2x128xf32>
    %1466 = vector.extract_strided_slice %1464 {offsets = [0, 0], sizes = [2, 128], strides = [1, 1]} : vector<2x192xf32> to vector<2x128xf32>
    %1467 = arith.addf %1465, %1466 : vector<2x128xf32>
    %1468 = arith.negf %1467 : vector<2x128xf32>
    %1469 = math.exp %1468 : vector<2x128xf32>
    %cst_275 = arith.constant 1.000000e+00 : f32
    %1470 = vector.broadcast %cst_275 : f32 to vector<2x128xf32>
    %1471 = arith.addf %1470, %1469 : vector<2x128xf32>
    %1472 = arith.divf %1470, %1471 : vector<2x128xf32>
    %1473 = vector.extract_strided_slice %1472 {offsets = [0, 0], sizes = [2, 64], strides = [1, 1]} : vector<2x128xf32> to vector<2x64xf32>
    %1474 = vector.extract_strided_slice %1472 {offsets = [0, 64], sizes = [2, 64], strides = [1, 1]} : vector<2x128xf32> to vector<2x64xf32>
    %1475 = vector.extract_strided_slice %1463 {offsets = [0, 128], sizes = [2, 64], strides = [1, 1]} : vector<2x192xf32> to vector<2x64xf32>
    %1476 = vector.extract_strided_slice %1464 {offsets = [0, 128], sizes = [2, 64], strides = [1, 1]} : vector<2x192xf32> to vector<2x64xf32>
    %1477 = arith.addf %1476, %1298 : vector<2x64xf32>
    %1478 = arith.mulf %1473, %1477 : vector<2x64xf32>
    %1479 = arith.addf %1475, %1478 : vector<2x64xf32>
    %1480 = math.tanh %1479 : vector<2x64xf32>
    %cst_276 = arith.constant 1.000000e+00 : f32
    %1481 = vector.broadcast %cst_276 : f32 to vector<2x64xf32>
    %1482 = arith.subf %1481, %1474 : vector<2x64xf32>
    %1483 = arith.mulf %1482, %1480 : vector<2x64xf32>
    %1484 = arith.mulf %1474, %1462 : vector<2x64xf32>
    %1485 = arith.addf %1483, %1484 : vector<2x64xf32>
    %1486 = tpu.concatenate %1324, %1347, %1370, %1393, %1416, %1439, %1462, %1485 in 0 : vector<2x64xf32>, vector<2x64xf32>, vector<2x64xf32>, vector<2x64xf32>, vector<2x64xf32>, vector<2x64xf32>, vector<2x64xf32>, vector<2x64xf32> -> vector<16x64xf32>
    %c2_277 = arith.constant 2 : index
    %c0_278 = arith.constant 0 : index
    %c0_279 = arith.constant 0 : index
    %1487 = vector.load %arg12[%c2_277, %c0_278, %c0_279] : memref<3x64x192xf32, #tpu.memory_space<vmem>>, vector<1x64x192xf32>
    %1488 = vector.shape_cast %1487 : vector<1x64x192xf32> to vector<64x192xf32>
    %c3_280 = arith.constant 3 : index
    %c0_281 = arith.constant 0 : index
    %c0_282 = arith.constant 0 : index
    %1489 = vector.load %arg13[%c3_280, %c0_281, %c0_282] : memref<4x64x192xf32, #tpu.memory_space<vmem>>, vector<1x64x192xf32>
    %1490 = vector.shape_cast %1489 : vector<1x64x192xf32> to vector<64x192xf32>
    %c3_283 = arith.constant 3 : index
    %c0_284 = arith.constant 0 : index
    %c0_285 = arith.constant 0 : index
    %1491 = vector.load %arg14[%c3_283, %c0_284, %c0_285] : memref<4x1x192xf32, #tpu.memory_space<vmem>>, vector<1x1x192xf32>
    %1492 = vector.shape_cast %1491 : vector<1x1x192xf32> to vector<1x192xf32>
    %c3_286 = arith.constant 3 : index
    %c0_287 = arith.constant 0 : index
    %c0_288 = arith.constant 0 : index
    %1493 = vector.load %arg15[%c3_286, %c0_287, %c0_288] : memref<4x1x64xf32, #tpu.memory_space<vmem>>, vector<1x1x64xf32>
    %1494 = vector.shape_cast %1493 : vector<1x1x64xf32> to vector<1x64xf32>
    %1495 = vector.shape_cast %1494 : vector<1x64xf32> to vector<1x64xf32>
    %1496 = vector.broadcast %1495 : vector<1x64xf32> to vector<2x64xf32>
    %cst_289 = arith.constant dense<0.000000e+00> : vector<16x192xf32>
    %1497 = tpu.matmul %1486, %1488, %cst_289 {dimension_numbers = #tpu.dot_dimension_numbers<[1], [0], [0], [1], [0, 0, 1, 1], [], []>} : vector<16x64xf32>, vector<64x192xf32>, vector<16x192xf32> -> vector<16x192xf32>
    %1498 = vector.broadcast %1492 : vector<1x192xf32> to vector<16x192xf32>
    %1499 = arith.addf %1497, %1498 : vector<16x192xf32>
    %1500 = vector.extract_strided_slice %1499 {offsets = [0, 0], sizes = [2, 192], strides = [1, 1]} : vector<16x192xf32> to vector<2x192xf32>
    %cst_290 = arith.constant dense<0.000000e+00> : vector<2x192xf32>
    %1501 = tpu.matmul %876, %1490, %cst_290 {dimension_numbers = #tpu.dot_dimension_numbers<[1], [0], [0], [1], [0, 0, 1, 1], [], []>} : vector<2x64xf32>, vector<64x192xf32>, vector<2x192xf32> -> vector<2x192xf32>
    %1502 = vector.extract_strided_slice %1500 {offsets = [0, 0], sizes = [2, 128], strides = [1, 1]} : vector<2x192xf32> to vector<2x128xf32>
    %1503 = vector.extract_strided_slice %1501 {offsets = [0, 0], sizes = [2, 128], strides = [1, 1]} : vector<2x192xf32> to vector<2x128xf32>
    %1504 = arith.addf %1502, %1503 : vector<2x128xf32>
    %1505 = arith.negf %1504 : vector<2x128xf32>
    %1506 = math.exp %1505 : vector<2x128xf32>
    %cst_291 = arith.constant 1.000000e+00 : f32
    %1507 = vector.broadcast %cst_291 : f32 to vector<2x128xf32>
    %1508 = arith.addf %1507, %1506 : vector<2x128xf32>
    %1509 = arith.divf %1507, %1508 : vector<2x128xf32>
    %1510 = vector.extract_strided_slice %1509 {offsets = [0, 0], sizes = [2, 64], strides = [1, 1]} : vector<2x128xf32> to vector<2x64xf32>
    %1511 = vector.extract_strided_slice %1509 {offsets = [0, 64], sizes = [2, 64], strides = [1, 1]} : vector<2x128xf32> to vector<2x64xf32>
    %1512 = vector.extract_strided_slice %1500 {offsets = [0, 128], sizes = [2, 64], strides = [1, 1]} : vector<2x192xf32> to vector<2x64xf32>
    %1513 = vector.extract_strided_slice %1501 {offsets = [0, 128], sizes = [2, 64], strides = [1, 1]} : vector<2x192xf32> to vector<2x64xf32>
    %1514 = arith.addf %1513, %1496 : vector<2x64xf32>
    %1515 = arith.mulf %1510, %1514 : vector<2x64xf32>
    %1516 = arith.addf %1512, %1515 : vector<2x64xf32>
    %1517 = math.tanh %1516 : vector<2x64xf32>
    %cst_292 = arith.constant 1.000000e+00 : f32
    %1518 = vector.broadcast %cst_292 : f32 to vector<2x64xf32>
    %1519 = arith.subf %1518, %1511 : vector<2x64xf32>
    %1520 = arith.mulf %1519, %1517 : vector<2x64xf32>
    %1521 = arith.mulf %1511, %876 : vector<2x64xf32>
    %1522 = arith.addf %1520, %1521 : vector<2x64xf32>
    %1523 = vector.extract_strided_slice %1499 {offsets = [2, 0], sizes = [2, 192], strides = [1, 1]} : vector<16x192xf32> to vector<2x192xf32>
    %cst_293 = arith.constant dense<0.000000e+00> : vector<2x192xf32>
    %1524 = tpu.matmul %1522, %1490, %cst_293 {dimension_numbers = #tpu.dot_dimension_numbers<[1], [0], [0], [1], [0, 0, 1, 1], [], []>} : vector<2x64xf32>, vector<64x192xf32>, vector<2x192xf32> -> vector<2x192xf32>
    %1525 = vector.extract_strided_slice %1523 {offsets = [0, 0], sizes = [2, 128], strides = [1, 1]} : vector<2x192xf32> to vector<2x128xf32>
    %1526 = vector.extract_strided_slice %1524 {offsets = [0, 0], sizes = [2, 128], strides = [1, 1]} : vector<2x192xf32> to vector<2x128xf32>
    %1527 = arith.addf %1525, %1526 : vector<2x128xf32>
    %1528 = arith.negf %1527 : vector<2x128xf32>
    %1529 = math.exp %1528 : vector<2x128xf32>
    %cst_294 = arith.constant 1.000000e+00 : f32
    %1530 = vector.broadcast %cst_294 : f32 to vector<2x128xf32>
    %1531 = arith.addf %1530, %1529 : vector<2x128xf32>
    %1532 = arith.divf %1530, %1531 : vector<2x128xf32>
    %1533 = vector.extract_strided_slice %1532 {offsets = [0, 0], sizes = [2, 64], strides = [1, 1]} : vector<2x128xf32> to vector<2x64xf32>
    %1534 = vector.extract_strided_slice %1532 {offsets = [0, 64], sizes = [2, 64], strides = [1, 1]} : vector<2x128xf32> to vector<2x64xf32>
    %1535 = vector.extract_strided_slice %1523 {offsets = [0, 128], sizes = [2, 64], strides = [1, 1]} : vector<2x192xf32> to vector<2x64xf32>
    %1536 = vector.extract_strided_slice %1524 {offsets = [0, 128], sizes = [2, 64], strides = [1, 1]} : vector<2x192xf32> to vector<2x64xf32>
    %1537 = arith.addf %1536, %1496 : vector<2x64xf32>
    %1538 = arith.mulf %1533, %1537 : vector<2x64xf32>
    %1539 = arith.addf %1535, %1538 : vector<2x64xf32>
    %1540 = math.tanh %1539 : vector<2x64xf32>
    %cst_295 = arith.constant 1.000000e+00 : f32
    %1541 = vector.broadcast %cst_295 : f32 to vector<2x64xf32>
    %1542 = arith.subf %1541, %1534 : vector<2x64xf32>
    %1543 = arith.mulf %1542, %1540 : vector<2x64xf32>
    %1544 = arith.mulf %1534, %1522 : vector<2x64xf32>
    %1545 = arith.addf %1543, %1544 : vector<2x64xf32>
    %1546 = vector.extract_strided_slice %1499 {offsets = [4, 0], sizes = [2, 192], strides = [1, 1]} : vector<16x192xf32> to vector<2x192xf32>
    %cst_296 = arith.constant dense<0.000000e+00> : vector<2x192xf32>
    %1547 = tpu.matmul %1545, %1490, %cst_296 {dimension_numbers = #tpu.dot_dimension_numbers<[1], [0], [0], [1], [0, 0, 1, 1], [], []>} : vector<2x64xf32>, vector<64x192xf32>, vector<2x192xf32> -> vector<2x192xf32>
    %1548 = vector.extract_strided_slice %1546 {offsets = [0, 0], sizes = [2, 128], strides = [1, 1]} : vector<2x192xf32> to vector<2x128xf32>
    %1549 = vector.extract_strided_slice %1547 {offsets = [0, 0], sizes = [2, 128], strides = [1, 1]} : vector<2x192xf32> to vector<2x128xf32>
    %1550 = arith.addf %1548, %1549 : vector<2x128xf32>
    %1551 = arith.negf %1550 : vector<2x128xf32>
    %1552 = math.exp %1551 : vector<2x128xf32>
    %cst_297 = arith.constant 1.000000e+00 : f32
    %1553 = vector.broadcast %cst_297 : f32 to vector<2x128xf32>
    %1554 = arith.addf %1553, %1552 : vector<2x128xf32>
    %1555 = arith.divf %1553, %1554 : vector<2x128xf32>
    %1556 = vector.extract_strided_slice %1555 {offsets = [0, 0], sizes = [2, 64], strides = [1, 1]} : vector<2x128xf32> to vector<2x64xf32>
    %1557 = vector.extract_strided_slice %1555 {offsets = [0, 64], sizes = [2, 64], strides = [1, 1]} : vector<2x128xf32> to vector<2x64xf32>
    %1558 = vector.extract_strided_slice %1546 {offsets = [0, 128], sizes = [2, 64], strides = [1, 1]} : vector<2x192xf32> to vector<2x64xf32>
    %1559 = vector.extract_strided_slice %1547 {offsets = [0, 128], sizes = [2, 64], strides = [1, 1]} : vector<2x192xf32> to vector<2x64xf32>
    %1560 = arith.addf %1559, %1496 : vector<2x64xf32>
    %1561 = arith.mulf %1556, %1560 : vector<2x64xf32>
    %1562 = arith.addf %1558, %1561 : vector<2x64xf32>
    %1563 = math.tanh %1562 : vector<2x64xf32>
    %cst_298 = arith.constant 1.000000e+00 : f32
    %1564 = vector.broadcast %cst_298 : f32 to vector<2x64xf32>
    %1565 = arith.subf %1564, %1557 : vector<2x64xf32>
    %1566 = arith.mulf %1565, %1563 : vector<2x64xf32>
    %1567 = arith.mulf %1557, %1545 : vector<2x64xf32>
    %1568 = arith.addf %1566, %1567 : vector<2x64xf32>
    %1569 = vector.extract_strided_slice %1499 {offsets = [6, 0], sizes = [2, 192], strides = [1, 1]} : vector<16x192xf32> to vector<2x192xf32>
    %cst_299 = arith.constant dense<0.000000e+00> : vector<2x192xf32>
    %1570 = tpu.matmul %1568, %1490, %cst_299 {dimension_numbers = #tpu.dot_dimension_numbers<[1], [0], [0], [1], [0, 0, 1, 1], [], []>} : vector<2x64xf32>, vector<64x192xf32>, vector<2x192xf32> -> vector<2x192xf32>
    %1571 = vector.extract_strided_slice %1569 {offsets = [0, 0], sizes = [2, 128], strides = [1, 1]} : vector<2x192xf32> to vector<2x128xf32>
    %1572 = vector.extract_strided_slice %1570 {offsets = [0, 0], sizes = [2, 128], strides = [1, 1]} : vector<2x192xf32> to vector<2x128xf32>
    %1573 = arith.addf %1571, %1572 : vector<2x128xf32>
    %1574 = arith.negf %1573 : vector<2x128xf32>
    %1575 = math.exp %1574 : vector<2x128xf32>
    %cst_300 = arith.constant 1.000000e+00 : f32
    %1576 = vector.broadcast %cst_300 : f32 to vector<2x128xf32>
    %1577 = arith.addf %1576, %1575 : vector<2x128xf32>
    %1578 = arith.divf %1576, %1577 : vector<2x128xf32>
    %1579 = vector.extract_strided_slice %1578 {offsets = [0, 0], sizes = [2, 64], strides = [1, 1]} : vector<2x128xf32> to vector<2x64xf32>
    %1580 = vector.extract_strided_slice %1578 {offsets = [0, 64], sizes = [2, 64], strides = [1, 1]} : vector<2x128xf32> to vector<2x64xf32>
    %1581 = vector.extract_strided_slice %1569 {offsets = [0, 128], sizes = [2, 64], strides = [1, 1]} : vector<2x192xf32> to vector<2x64xf32>
    %1582 = vector.extract_strided_slice %1570 {offsets = [0, 128], sizes = [2, 64], strides = [1, 1]} : vector<2x192xf32> to vector<2x64xf32>
    %1583 = arith.addf %1582, %1496 : vector<2x64xf32>
    %1584 = arith.mulf %1579, %1583 : vector<2x64xf32>
    %1585 = arith.addf %1581, %1584 : vector<2x64xf32>
    %1586 = math.tanh %1585 : vector<2x64xf32>
    %cst_301 = arith.constant 1.000000e+00 : f32
    %1587 = vector.broadcast %cst_301 : f32 to vector<2x64xf32>
    %1588 = arith.subf %1587, %1580 : vector<2x64xf32>
    %1589 = arith.mulf %1588, %1586 : vector<2x64xf32>
    %1590 = arith.mulf %1580, %1568 : vector<2x64xf32>
    %1591 = arith.addf %1589, %1590 : vector<2x64xf32>
    %1592 = vector.extract_strided_slice %1499 {offsets = [8, 0], sizes = [2, 192], strides = [1, 1]} : vector<16x192xf32> to vector<2x192xf32>
    %cst_302 = arith.constant dense<0.000000e+00> : vector<2x192xf32>
    %1593 = tpu.matmul %1591, %1490, %cst_302 {dimension_numbers = #tpu.dot_dimension_numbers<[1], [0], [0], [1], [0, 0, 1, 1], [], []>} : vector<2x64xf32>, vector<64x192xf32>, vector<2x192xf32> -> vector<2x192xf32>
    %1594 = vector.extract_strided_slice %1592 {offsets = [0, 0], sizes = [2, 128], strides = [1, 1]} : vector<2x192xf32> to vector<2x128xf32>
    %1595 = vector.extract_strided_slice %1593 {offsets = [0, 0], sizes = [2, 128], strides = [1, 1]} : vector<2x192xf32> to vector<2x128xf32>
    %1596 = arith.addf %1594, %1595 : vector<2x128xf32>
    %1597 = arith.negf %1596 : vector<2x128xf32>
    %1598 = math.exp %1597 : vector<2x128xf32>
    %cst_303 = arith.constant 1.000000e+00 : f32
    %1599 = vector.broadcast %cst_303 : f32 to vector<2x128xf32>
    %1600 = arith.addf %1599, %1598 : vector<2x128xf32>
    %1601 = arith.divf %1599, %1600 : vector<2x128xf32>
    %1602 = vector.extract_strided_slice %1601 {offsets = [0, 0], sizes = [2, 64], strides = [1, 1]} : vector<2x128xf32> to vector<2x64xf32>
    %1603 = vector.extract_strided_slice %1601 {offsets = [0, 64], sizes = [2, 64], strides = [1, 1]} : vector<2x128xf32> to vector<2x64xf32>
    %1604 = vector.extract_strided_slice %1592 {offsets = [0, 128], sizes = [2, 64], strides = [1, 1]} : vector<2x192xf32> to vector<2x64xf32>
    %1605 = vector.extract_strided_slice %1593 {offsets = [0, 128], sizes = [2, 64], strides = [1, 1]} : vector<2x192xf32> to vector<2x64xf32>
    %1606 = arith.addf %1605, %1496 : vector<2x64xf32>
    %1607 = arith.mulf %1602, %1606 : vector<2x64xf32>
    %1608 = arith.addf %1604, %1607 : vector<2x64xf32>
    %1609 = math.tanh %1608 : vector<2x64xf32>
    %cst_304 = arith.constant 1.000000e+00 : f32
    %1610 = vector.broadcast %cst_304 : f32 to vector<2x64xf32>
    %1611 = arith.subf %1610, %1603 : vector<2x64xf32>
    %1612 = arith.mulf %1611, %1609 : vector<2x64xf32>
    %1613 = arith.mulf %1603, %1591 : vector<2x64xf32>
    %1614 = arith.addf %1612, %1613 : vector<2x64xf32>
    %1615 = vector.extract_strided_slice %1499 {offsets = [10, 0], sizes = [2, 192], strides = [1, 1]} : vector<16x192xf32> to vector<2x192xf32>
    %cst_305 = arith.constant dense<0.000000e+00> : vector<2x192xf32>
    %1616 = tpu.matmul %1614, %1490, %cst_305 {dimension_numbers = #tpu.dot_dimension_numbers<[1], [0], [0], [1], [0, 0, 1, 1], [], []>} : vector<2x64xf32>, vector<64x192xf32>, vector<2x192xf32> -> vector<2x192xf32>
    %1617 = vector.extract_strided_slice %1615 {offsets = [0, 0], sizes = [2, 128], strides = [1, 1]} : vector<2x192xf32> to vector<2x128xf32>
    %1618 = vector.extract_strided_slice %1616 {offsets = [0, 0], sizes = [2, 128], strides = [1, 1]} : vector<2x192xf32> to vector<2x128xf32>
    %1619 = arith.addf %1617, %1618 : vector<2x128xf32>
    %1620 = arith.negf %1619 : vector<2x128xf32>
    %1621 = math.exp %1620 : vector<2x128xf32>
    %cst_306 = arith.constant 1.000000e+00 : f32
    %1622 = vector.broadcast %cst_306 : f32 to vector<2x128xf32>
    %1623 = arith.addf %1622, %1621 : vector<2x128xf32>
    %1624 = arith.divf %1622, %1623 : vector<2x128xf32>
    %1625 = vector.extract_strided_slice %1624 {offsets = [0, 0], sizes = [2, 64], strides = [1, 1]} : vector<2x128xf32> to vector<2x64xf32>
    %1626 = vector.extract_strided_slice %1624 {offsets = [0, 64], sizes = [2, 64], strides = [1, 1]} : vector<2x128xf32> to vector<2x64xf32>
    %1627 = vector.extract_strided_slice %1615 {offsets = [0, 128], sizes = [2, 64], strides = [1, 1]} : vector<2x192xf32> to vector<2x64xf32>
    %1628 = vector.extract_strided_slice %1616 {offsets = [0, 128], sizes = [2, 64], strides = [1, 1]} : vector<2x192xf32> to vector<2x64xf32>
    %1629 = arith.addf %1628, %1496 : vector<2x64xf32>
    %1630 = arith.mulf %1625, %1629 : vector<2x64xf32>
    %1631 = arith.addf %1627, %1630 : vector<2x64xf32>
    %1632 = math.tanh %1631 : vector<2x64xf32>
    %cst_307 = arith.constant 1.000000e+00 : f32
    %1633 = vector.broadcast %cst_307 : f32 to vector<2x64xf32>
    %1634 = arith.subf %1633, %1626 : vector<2x64xf32>
    %1635 = arith.mulf %1634, %1632 : vector<2x64xf32>
    %1636 = arith.mulf %1626, %1614 : vector<2x64xf32>
    %1637 = arith.addf %1635, %1636 : vector<2x64xf32>
    %1638 = vector.extract_strided_slice %1499 {offsets = [12, 0], sizes = [2, 192], strides = [1, 1]} : vector<16x192xf32> to vector<2x192xf32>
    %cst_308 = arith.constant dense<0.000000e+00> : vector<2x192xf32>
    %1639 = tpu.matmul %1637, %1490, %cst_308 {dimension_numbers = #tpu.dot_dimension_numbers<[1], [0], [0], [1], [0, 0, 1, 1], [], []>} : vector<2x64xf32>, vector<64x192xf32>, vector<2x192xf32> -> vector<2x192xf32>
    %1640 = vector.extract_strided_slice %1638 {offsets = [0, 0], sizes = [2, 128], strides = [1, 1]} : vector<2x192xf32> to vector<2x128xf32>
    %1641 = vector.extract_strided_slice %1639 {offsets = [0, 0], sizes = [2, 128], strides = [1, 1]} : vector<2x192xf32> to vector<2x128xf32>
    %1642 = arith.addf %1640, %1641 : vector<2x128xf32>
    %1643 = arith.negf %1642 : vector<2x128xf32>
    %1644 = math.exp %1643 : vector<2x128xf32>
    %cst_309 = arith.constant 1.000000e+00 : f32
    %1645 = vector.broadcast %cst_309 : f32 to vector<2x128xf32>
    %1646 = arith.addf %1645, %1644 : vector<2x128xf32>
    %1647 = arith.divf %1645, %1646 : vector<2x128xf32>
    %1648 = vector.extract_strided_slice %1647 {offsets = [0, 0], sizes = [2, 64], strides = [1, 1]} : vector<2x128xf32> to vector<2x64xf32>
    %1649 = vector.extract_strided_slice %1647 {offsets = [0, 64], sizes = [2, 64], strides = [1, 1]} : vector<2x128xf32> to vector<2x64xf32>
    %1650 = vector.extract_strided_slice %1638 {offsets = [0, 128], sizes = [2, 64], strides = [1, 1]} : vector<2x192xf32> to vector<2x64xf32>
    %1651 = vector.extract_strided_slice %1639 {offsets = [0, 128], sizes = [2, 64], strides = [1, 1]} : vector<2x192xf32> to vector<2x64xf32>
    %1652 = arith.addf %1651, %1496 : vector<2x64xf32>
    %1653 = arith.mulf %1648, %1652 : vector<2x64xf32>
    %1654 = arith.addf %1650, %1653 : vector<2x64xf32>
    %1655 = math.tanh %1654 : vector<2x64xf32>
    %cst_310 = arith.constant 1.000000e+00 : f32
    %1656 = vector.broadcast %cst_310 : f32 to vector<2x64xf32>
    %1657 = arith.subf %1656, %1649 : vector<2x64xf32>
    %1658 = arith.mulf %1657, %1655 : vector<2x64xf32>
    %1659 = arith.mulf %1649, %1637 : vector<2x64xf32>
    %1660 = arith.addf %1658, %1659 : vector<2x64xf32>
    %1661 = vector.extract_strided_slice %1499 {offsets = [14, 0], sizes = [2, 192], strides = [1, 1]} : vector<16x192xf32> to vector<2x192xf32>
    %cst_311 = arith.constant dense<0.000000e+00> : vector<2x192xf32>
    %1662 = tpu.matmul %1660, %1490, %cst_311 {dimension_numbers = #tpu.dot_dimension_numbers<[1], [0], [0], [1], [0, 0, 1, 1], [], []>} : vector<2x64xf32>, vector<64x192xf32>, vector<2x192xf32> -> vector<2x192xf32>
    %1663 = vector.extract_strided_slice %1661 {offsets = [0, 0], sizes = [2, 128], strides = [1, 1]} : vector<2x192xf32> to vector<2x128xf32>
    %1664 = vector.extract_strided_slice %1662 {offsets = [0, 0], sizes = [2, 128], strides = [1, 1]} : vector<2x192xf32> to vector<2x128xf32>
    %1665 = arith.addf %1663, %1664 : vector<2x128xf32>
    %1666 = arith.negf %1665 : vector<2x128xf32>
    %1667 = math.exp %1666 : vector<2x128xf32>
    %cst_312 = arith.constant 1.000000e+00 : f32
    %1668 = vector.broadcast %cst_312 : f32 to vector<2x128xf32>
    %1669 = arith.addf %1668, %1667 : vector<2x128xf32>
    %1670 = arith.divf %1668, %1669 : vector<2x128xf32>
    %1671 = vector.extract_strided_slice %1670 {offsets = [0, 0], sizes = [2, 64], strides = [1, 1]} : vector<2x128xf32> to vector<2x64xf32>
    %1672 = vector.extract_strided_slice %1670 {offsets = [0, 64], sizes = [2, 64], strides = [1, 1]} : vector<2x128xf32> to vector<2x64xf32>
    %1673 = vector.extract_strided_slice %1661 {offsets = [0, 128], sizes = [2, 64], strides = [1, 1]} : vector<2x192xf32> to vector<2x64xf32>
    %1674 = vector.extract_strided_slice %1662 {offsets = [0, 128], sizes = [2, 64], strides = [1, 1]} : vector<2x192xf32> to vector<2x64xf32>
    %1675 = arith.addf %1674, %1496 : vector<2x64xf32>
    %1676 = arith.mulf %1671, %1675 : vector<2x64xf32>
    %1677 = arith.addf %1673, %1676 : vector<2x64xf32>
    %1678 = math.tanh %1677 : vector<2x64xf32>
    %cst_313 = arith.constant 1.000000e+00 : f32
    %1679 = vector.broadcast %cst_313 : f32 to vector<2x64xf32>
    %1680 = arith.subf %1679, %1672 : vector<2x64xf32>
    %1681 = arith.mulf %1680, %1678 : vector<2x64xf32>
    %1682 = arith.mulf %1672, %1660 : vector<2x64xf32>
    %1683 = arith.addf %1681, %1682 : vector<2x64xf32>
    %c0_314 = arith.constant 0 : index
    %c0_315 = arith.constant 0 : index
    %1684 = vector.load %arg16[%c0_314, %c0_315] : memref<1x64xf32, #tpu.memory_space<vmem>>, vector<1x64xf32>
    %1685 = vector.broadcast %1684 : vector<1x64xf32> to vector<2x64xf32>
    %1686 = arith.mulf %1522, %1685 : vector<2x64xf32>
    %cst_316 = arith.constant dense<0.000000e+00> : vector<2xf32>
    %1687 = vector.multi_reduction <add>, %1686, %cst_316 [1] : vector<2x64xf32> to vector<2xf32>
    %1688 = vector.shape_cast %1687 : vector<2xf32> to vector<2x1xf32>
    %1689 = vector.broadcast %1684 : vector<1x64xf32> to vector<2x64xf32>
    %1690 = arith.mulf %1545, %1689 : vector<2x64xf32>
    %cst_317 = arith.constant dense<0.000000e+00> : vector<2xf32>
    %1691 = vector.multi_reduction <add>, %1690, %cst_317 [1] : vector<2x64xf32> to vector<2xf32>
    %1692 = vector.shape_cast %1691 : vector<2xf32> to vector<2x1xf32>
    %1693 = vector.broadcast %1684 : vector<1x64xf32> to vector<2x64xf32>
    %1694 = arith.mulf %1568, %1693 : vector<2x64xf32>
    %cst_318 = arith.constant dense<0.000000e+00> : vector<2xf32>
    %1695 = vector.multi_reduction <add>, %1694, %cst_318 [1] : vector<2x64xf32> to vector<2xf32>
    %1696 = vector.shape_cast %1695 : vector<2xf32> to vector<2x1xf32>
    %1697 = vector.broadcast %1684 : vector<1x64xf32> to vector<2x64xf32>
    %1698 = arith.mulf %1591, %1697 : vector<2x64xf32>
    %cst_319 = arith.constant dense<0.000000e+00> : vector<2xf32>
    %1699 = vector.multi_reduction <add>, %1698, %cst_319 [1] : vector<2x64xf32> to vector<2xf32>
    %1700 = vector.shape_cast %1699 : vector<2xf32> to vector<2x1xf32>
    %1701 = vector.broadcast %1684 : vector<1x64xf32> to vector<2x64xf32>
    %1702 = arith.mulf %1614, %1701 : vector<2x64xf32>
    %cst_320 = arith.constant dense<0.000000e+00> : vector<2xf32>
    %1703 = vector.multi_reduction <add>, %1702, %cst_320 [1] : vector<2x64xf32> to vector<2xf32>
    %1704 = vector.shape_cast %1703 : vector<2xf32> to vector<2x1xf32>
    %1705 = vector.broadcast %1684 : vector<1x64xf32> to vector<2x64xf32>
    %1706 = arith.mulf %1637, %1705 : vector<2x64xf32>
    %cst_321 = arith.constant dense<0.000000e+00> : vector<2xf32>
    %1707 = vector.multi_reduction <add>, %1706, %cst_321 [1] : vector<2x64xf32> to vector<2xf32>
    %1708 = vector.shape_cast %1707 : vector<2xf32> to vector<2x1xf32>
    %1709 = vector.broadcast %1684 : vector<1x64xf32> to vector<2x64xf32>
    %1710 = arith.mulf %1660, %1709 : vector<2x64xf32>
    %cst_322 = arith.constant dense<0.000000e+00> : vector<2xf32>
    %1711 = vector.multi_reduction <add>, %1710, %cst_322 [1] : vector<2x64xf32> to vector<2xf32>
    %1712 = vector.shape_cast %1711 : vector<2xf32> to vector<2x1xf32>
    %1713 = vector.broadcast %1684 : vector<1x64xf32> to vector<2x64xf32>
    %1714 = arith.mulf %1683, %1713 : vector<2x64xf32>
    %cst_323 = arith.constant dense<0.000000e+00> : vector<2xf32>
    %1715 = vector.multi_reduction <add>, %1714, %cst_323 [1] : vector<2x64xf32> to vector<2xf32>
    %1716 = vector.shape_cast %1715 : vector<2xf32> to vector<2x1xf32>
    %1717 = tpu.concatenate %1688, %1692, %1696, %1700, %1704, %1708, %1712, %1716 in 1 : vector<2x1xf32>, vector<2x1xf32>, vector<2x1xf32>, vector<2x1xf32>, vector<2x1xf32>, vector<2x1xf32>, vector<2x1xf32>, vector<2x1xf32> -> vector<2x8xf32>
    %c0_324 = arith.constant 0 : index
    %c0_325 = arith.constant 0 : index
    %1718 = vector.load %arg17[%c0_324, %c0_325] : memref<1x1xf32, #tpu.memory_space<vmem>>, vector<1x1xf32>
    %1719 = vector.broadcast %1718 : vector<1x1xf32> to vector<2x8xf32>
    %1720 = arith.addf %1717, %1719 : vector<2x8xf32>
    %1721 = math.exp %1720 : vector<2x8xf32>
    %c0_326 = arith.constant 0 : index
    %c0_327 = arith.constant 0 : index
    %1722 = vector.load %arg18[%c0_326, %c0_327] : memref<2x8xf32, #tpu.memory_space<vmem>>, vector<2x8xf32>
    tpu.vector_store %arg18[%c0_326, %c0_327], %1721 {strides = array<i32>} : memref<2x8xf32, #tpu.memory_space<vmem>>, vector<2x8xf32>,
    return
  }
}

</mosaic_0001>

<bundles_post_ra>
// kernel: rnn_vae_forward.1
= control target key start
LH: loop header
LB: loop body
LE: loop exit
PB: predicated region body
PF: predicated region fallthrough
CT: control target
= control target key end

     0   :  { %s10069_s0 = inlined_call_operand.vmem [shape: f32[16,3], index: 0, kind: input, shape index: {}]   ;;  %s10070_s1 = inlined_call_operand.vmem [shape: f32[16,1], index: 1, kind: input, shape index: {}]   ;;  %s10071_s2 = inlined_call_operand.vmem [shape: f32[3,192], index: 2, kind: input, shape index: {}]   ;;  %s10072_s3 = inlined_call_operand.hbm [shape: f32[3,64,192], index: 3, kind: input, shape index: {}]   ;;  %s10073_s4 = inlined_call_operand.hbm [shape: f32[4,64,192], index: 4, kind: input, shape index: {}]   ;;  %s10074_s5 = inlined_call_operand.vmem [shape: f32[4,1,192], index: 5, kind: input, shape index: {}]   ;;  %s10075_s6 = inlined_call_operand.vmem [shape: f32[4,1,64], index: 6, kind: input, shape index: {}]   ;;  %s10076_s7 = inlined_call_operand.hbm [shape: f32[64,100], index: 7, kind: input, shape index: {}]   ;;  %s10077_s8 = inlined_call_operand.vmem [shape: f32[1,100], index: 8, kind: input, shape index: {}]   ;;  %s10078_s9 = inlined_call_operand.hbm [shape: f32[50,64], index: 9, kind: input, shape index: {}]   ;;  %s10079_s10 = inlined_call_operand.vmem [shape: f32[1,64], index: 10, kind: input, shape index: {}]   ;;  %s10080_s11 = inlined_call_operand.hbm [shape: f32[50,192], index: 11, kind: input, shape index: {}]   ;;  %s10081_s12 = inlined_call_operand.hbm [shape: f32[3,64,192], index: 12, kind: input, shape index: {}]   ;;  %s10082_s13 = inlined_call_operand.hbm [shape: f32[4,64,192], index: 13, kind: input, shape index: {}]   ;;  %s10083_s14 = inlined_call_operand.vmem [shape: f32[4,1,192], index: 14, kind: input, shape index: {}]   ;;  %s10084_s15 = inlined_call_operand.vmem [shape: f32[4,1,64], index: 15, kind: input, shape index: {}]   ;;  %s10085_s16 = inlined_call_operand.vmem [shape: f32[1,64], index: 16, kind: input, shape index: {}]   ;;  %s10086_s17 = inlined_call_operand.<no memory space> [shape: f32[1,1], index: 17, kind: input, shape index: {}]   ;;  %s10087_s18 = inlined_call_operand.hbm [shape: f32[2,8], index: 18, kind: output, shape index: {0}]   ;;  %s10088_s19 = inlined_call_operand.vmem [shape: f32[2,100], index: 19, kind: output, shape index: {1}]  }
   0x1   :  { %10093 = sst [smem:[#allocation21_spill]] %s10069_s0  ;;  %v25_v0 = vstv %s10086_s17 }
   0x2   :  { %10094 = sst [smem:[#allocation22_spill]] %s10070_s1  ;;  %26 = vst [vmem:[#allocation2] sm:$0x1] %v25_v0 }
   0x3   :  { %10095 = sst [smem:[#allocation23_spill]] %s10071_s2 }
   0x4   :  { %10096 = sst [smem:[#allocation24_spill]] %s10072_s3 }
   0x5   :  { %27 = vsyncpa [#allocation4], 0 }
   0x6   :  { %28 = vsyncpa [#allocation7], 0 }
   0x7   :  { %29 = vsyncpa [#allocation10], 0 }
   0x8   :  { %30 = vsyncpa [#allocation13], 0 }
   0x9   :  { %31 = vsyncpa [#allocation5], 0  ;;  %s55_s1 = sshll.u32 %s10073_s4, 4  ;;  %s7478_s22 = smov [#allocation6]   ;;  %s56_s1 = int_to_ptr.hbm [resolvable:$true] %s55_s1 }
   0xa   :  { %s57_s2 = sshll.u32 %s7478_s22, 4  ;;  %s10091_s23 = smov 256   ;;  %s58_s2 = int_to_ptr.vmem [resolvable:$true] %s57_s2 }
   0xb   :  { %s7480_s24 = smov 16   ;;  %s87_s3 = sshll.u32 %s10078_s9, 4  ;;  %s88_s3 = int_to_ptr.hbm [resolvable:$true] %s87_s3 }
   0xc   :  { %63 = dma.hbm_to_vmem [thread:$0]  %s56_s1, 8192, %s58_s2, [#allocation7], %s10091_s23, %s10091_s23, %s7480_s24  }
   0xd   :  { %s7481_s26 = smov [#allocation9]   ;;  %s115_s4 = sshll.u32 %s10081_s12, 4  ;;  %s116_s4 = int_to_ptr.hbm [resolvable:$true] %s115_s4 }
   0xe   :  { %s89_s27 = sshll.u32 %s7481_s26, 4  ;;  %s7482_s0 = smov 128   ;;  %s90_s27 = int_to_ptr.vmem [resolvable:$true] %s89_s27 }
   0xf   :  { %s7483_s30 = smov 8   ;;  %s10097_s22 = sld [smem:[#allocation24_spill]] }
  0x10   :  { %95 = dma.hbm_to_vmem [thread:$0]  %s88_s3, 896, %s90_s27, [#allocation10], %s7482_s0, %s7482_s0, %s7483_s30  }
  0x11   :  { %s7484_s2 = smov [#allocation12]   ;;  %s10098_s9 = smov 256  }
  0x12   :  { %s117_s23 = sshll.u32 %s7484_s2, 4  ;;  %s7485_s17 = smov [#allocation3]   ;;  %s118_s23 = int_to_ptr.vmem [resolvable:$true] %s117_s23 }
  0x13   :  { %123 = dma.hbm_to_vmem [thread:$0]  %s116_s4, 6144, %s118_s23, [#allocation13], %s10098_s9, %s10098_s9, %s7480_s24  }
  0x14   :  { %s44_s25 = sshll.u32 %s7485_s17, 4  ;;  %s72_s28 = sshll.u32 %s10076_s7, 4  ;;  %s45_s25 = int_to_ptr.vmem [resolvable:$true] %s44_s25  ;;  %s73_s28 = int_to_ptr.hbm [resolvable:$true] %s72_s28 }
  0x15   :  { %s42_s1 = sshll.u32 %s10097_s22, 4  ;;  %s102_s29 = sshll.u32 %s10080_s11, 4  ;;  %s43_s1 = int_to_ptr.hbm [resolvable:$true] %s42_s1  ;;  %s103_s29 = int_to_ptr.hbm [resolvable:$true] %s102_s29 }
  0x16   :  { %50 = dma.hbm_to_vmem [thread:$0]  %s43_s1, 6144, %s45_s25, [#allocation4], %s10098_s9, %s10098_s9, %s7480_s24  }
  0x17   :  { %s7486_s20 = smov [#allocation8]   ;;  %s7487_s23 = smov [#allocation11]  }
  0x18   :  { %s74_s21 = sshll.u32 %s7486_s20, 4  ;;  %s104_s4 = sshll.u32 %s7487_s23, 4  ;;  %s75_s21 = int_to_ptr.vmem [resolvable:$true] %s74_s21  ;;  %s105_s4 = int_to_ptr.vmem [resolvable:$true] %s104_s4 }
  0x19   :  { %80 = dma.hbm_to_vmem [thread:$0]  %s73_s28, 1024, %s75_s21, [#allocation7], %s7482_s0, %s7482_s0, %s7483_s30  }
  0x1a   :  { %s128_s7 = sshll.u32 %s10082_s13, 4  ;;  %s7488_s1 = smov [#allocation14]   ;;  %s129_s7 = int_to_ptr.hbm [resolvable:$true] %s128_s7 }
  0x1b   :  { %110 = dma.hbm_to_vmem [thread:$0]  %s103_s29, 1792, %s105_s4, [#allocation10], %s10098_s9, %s10098_s9, %s7480_s24  }
  0x1c   :  { %s130_s17 = sshll.u32 %s7488_s1, 4  ;;  %s131_s17 = int_to_ptr.vmem [resolvable:$true] %s130_s17 }
  0x1d   :  { %136 = dma.hbm_to_vmem [thread:$0]  %s129_s7, 8192, %s131_s17, [#allocation13], %s10098_s9, %s10098_s9, %s7480_s24  }
  0x1e   :  { %7468 = dma.done.wait [#allocation4], 6144  }
  0x1f   :  { %7469 = vsyncadd [#allocation4], 4294961152 }
  0x20   :  { %7470 = dma.done.wait [#allocation7], 9216  }
  0x21   :  { %7471 = vsyncadd [#allocation7], 4294958080 }
  0x22   :  { %7472 = dma.done.wait [#allocation10], 2688  }
  0x23   :  { %7473 = vsyncadd [#allocation10], 4294964608 }
  0x24   :  { %7474 = dma.done.wait [#allocation13], 14336  }
  0x25   :  { %7475 = vsyncadd [#allocation13], 4294952960  ;;  %v7632_v1 = vld [vmem:[#allocation6 + $0x70] sm:$0xff]  ;;  %v7634_v2 = vld [vmem:[#allocation6 + $0x60] sm:$0xff]  ;;  %s10099_s0 = sld [smem:[#allocation23_spill]]  ;;  %vm227_vm0 = vcmask 1042432  }
  0x26   :  { %290 = vmatpush.msra.mxu2 %v7632_v1  ;;  %v7637_v3 = vld [vmem:[#allocation6 + $0x50] sm:$0xff]  ;;  %v7643_v5 = vld [vmem:[#allocation6 + $0x78] sm:$0xff]  ;;  %v7645_v6 = vld [vmem:[#allocation6 + $0x68] sm:$0xff]  ;;  %s10100_s9 = sld [smem:[#allocation21_spill]]  ;;  %vm220_vm1 = vcmask 23552   ;;  %v7489_v21 = vmov 0.0  }
  0x27   :  { %v7647_v7 = vld [vmem:[#allocation6 + $0x40] sm:$0xff]  ;;  %310 = vmatpush.msra.mxu3 %v7643_v5  ;;  %v7651_v8 = vld [vmem:[#allocation6 + $0x30] sm:$0xff]  ;;  %v7653_v9 = vld [vmem:[#allocation6 + $0x58] sm:$0xff]  ;;  %v7490_v30 = vmov 0   ;;  %s10101_s29 = sld [smem:[#allocation22_spill]]  ;;  %s7491_s20 = smov 64  }
  0x28   :  { %291 = vmatpush.msra.mxu2 %v7634_v2  ;;  %v7655_v10 = vld [vmem:[#allocation6 + $0x20] sm:$0xff]  ;;  %v7658_v11 = vld [vmem:[#allocation6 + $0x48] sm:$0xff]  ;;  %v7664_v13 = vld [vmem:[#allocation6 + $0x38] sm:$0xff]  ;;  %6873 = vset.pattern.permute.xlu0 %v7490_v30  ;;  %vm278_vm8 = vcmask 523264   ;;  %s6606_s27 = sshll.u32 %s10087_s18, 4  ;;  %s6607_s27 = int_to_ptr.hbm [resolvable:$true] %s6606_s27 }
  0x29   :  { %311 = vmatpush.msra.mxu3 %v7645_v6  ;;  %v7666_v14 = vld [vmem:[#allocation6 + $0x10] sm:$0xff]  ;;  %v7673_v17 = vld [vmem:[#allocation6 + $0x28] sm:$0xff]  ;;  %v7675_v18 = vld [vmem:[#allocation6] sm:$0xff]  ;;  %6874 = vset.pattern.permute.xlu2 %v7490_v30 }
  0x2a   :  { %292 = vmatpush.msra.mxu2 %v7637_v3  ;;  %v7680_v19 = vld [vmem:[#allocation6 + $0x18] sm:$0xff]  ;;  %v7686_v20 = vld [vmem:[#allocation6 + $0x8] sm:$0xff]  ;;  %v7772_v34 = vld [vmem:[%s10075_s6] ss:$0 sm:$0xff] }
  0x2b   :  { %v189_v4 = vld [vmem:[%s10099_s0] sm:$0x77]  ;;  %312 = vmatpush.msra.mxu3 %v7653_v9 }
  0x2c   :  { %217 = vst [vmem:[#allocation1] ss:$2 sm:$0xff] %v189_v4  ;;  %293 = vmatpush.msra.mxu2 %v7647_v7  ;;  %v173_v12 = vld [vmem:[%s10100_s9] sm:$0xff]  ;;  %v174_v53 = vld [vmem:[%s10100_s9 + $0x8] sm:$0xff] }
  0x2d   :  { %313 = vmatpush.msra.mxu3 %v7658_v11  ;;  %v7759_v22 = vld [vmem:[%s10074_s5] sm:$0x3] }
  0x2e   :  { %294 = vmatpush.msra.mxu2 %v7651_v8  ;;  %v212_v23 = vperm.slane %v7759_v22, 0  ;;  %v213_v40 = vperm.slane %v7759_v22, 1  ;;  %v175_v51 = vld [vmem:[%s10101_s29] sm:$0xff] }
  0x2f   :  { %314 = vmatpush.msra.mxu3 %v7664_v13  ;;  %vm177_vm6 = vcmp.gt.f32.partialorder %v175_v51, 0.0 }
  0x30   :  { %295 = vmatpush.msra.mxu2 %v7655_v10  ;;  %v178_v52 = vsel %vm177_vm6, 1, %v7490_v30 }
  0x31   :  { %315 = vmatpush.msra.mxu3 %v7673_v17 }
  0x32   :  { %296 = vmatpush.msra.mxu2 %v7666_v14 }
  0x33   :  { %v218_v15 = vld.sshfl [vmem:[#allocation1] sm:$0xff pattern:$0x75316420]  ;;  %v219_v16 = vld.sshfl [vmem:[#allocation1 + $0x8] sm:$0xff pattern:$0x75316420]  ;;  %316 = vmatpush.msra.mxu3 %v7680_v19 }
  0x34   :  { %6623 = vmatpush.msk.msra.mxu0 %vm227_vm0, %v218_v15  ;;  %6626 = vmatpush.msk.msra.mxu1 %vm227_vm0, %v219_v16 }
  0x35   :  { %6624 = vmatmul.msk.f32.vlgmr.msra.gmra.mxu0 %vm220_vm1, %v173_v12  ;;  %6627 = vmatmul.msk.f32.vlgmr.msra.gmra.mxu1 %vm220_vm1, %v173_v12 }
  0x36   :  { %297 = vmatpush.msra.mxu2 %v7675_v18  ;;  %368 = vmatpush.msrb.mxu0 %v7632_v1 }
  0x37   :  { %298 = vmatmul.f32.vlgmr.msra.gmra.mxu2 %v7489_v21  ;;  %388 = vmatpush.msrb.mxu1 %v7643_v5 }
  0x38   :  { %369 = vmatpush.msrb.mxu0 %v7634_v2  ;;  %317 = vmatpush.msra.mxu3 %v7686_v20 }
  0x39   :  { %455 = vmatpush.msrb.mxu2 %v7632_v1  ;;  %318 = vmatmul.f32.vlgmr.msra.gmra.mxu3 %v7489_v21 }
  0x3a   :  { %389 = vmatpush.msrb.mxu1 %v7645_v6  ;;  %370 = vmatpush.msrb.mxu0 %v7637_v3 }
  0x3b   :  { %475 = vmatpush.msrb.mxu3 %v7643_v5  ;;  %456 = vmatpush.msrb.mxu2 %v7634_v2 }
  0x3c   :  { %390 = vmatpush.msrb.mxu1 %v7653_v9  ;;  %371 = vmatpush.msrb.mxu0 %v7647_v7 }
  0x3d   :  { %476 = vmatpush.msrb.mxu3 %v7645_v6  ;;  %457 = vmatpush.msrb.mxu2 %v7637_v3 }
  0x3e   :  { %391 = vmatpush.msrb.mxu1 %v7658_v11  ;;  %372 = vmatpush.msrb.mxu0 %v7651_v8 }
  0x3f   :  { %477 = vmatpush.msrb.mxu3 %v7653_v9  ;;  %458 = vmatpush.msrb.mxu2 %v7647_v7 }
  0x40   :  { %392 = vmatpush.msrb.mxu1 %v7664_v13  ;;  %373 = vmatpush.msrb.mxu0 %v7655_v10 }
  0x41   :  { %478 = vmatpush.msrb.mxu3 %v7658_v11  ;;  %459 = vmatpush.msrb.mxu2 %v7651_v8 }
  0x42   :  { %393 = vmatpush.msrb.mxu1 %v7673_v17  ;;  %374 = vmatpush.msrb.mxu0 %v7666_v14 }
  0x43   :  { %479 = vmatpush.msrb.mxu3 %v7664_v13  ;;  %460 = vmatpush.msrb.mxu2 %v7655_v10 }
  0x44   :  { %394 = vmatpush.msrb.mxu1 %v7680_v19  ;;  %375 = vmatpush.msrb.mxu0 %v7675_v18 }
  0x45   :  { %480 = vmatpush.msrb.mxu3 %v7673_v17  ;;  %461 = vmatpush.msrb.mxu2 %v7666_v14 }
  0x46   :  { %395 = vmatpush.msrb.mxu1 %v7686_v20  ;;  %542 = vmatpush.msra.mxu0 %v7632_v1 }
  0x47   :  { %481 = vmatpush.msrb.mxu3 %v7680_v19  ;;  %462 = vmatpush.msrb.mxu2 %v7675_v18 }
  0x48   :  { %562 = vmatpush.msra.mxu1 %v7643_v5  ;;  %543 = vmatpush.msra.mxu0 %v7634_v2 }
  0x49   :  { %482 = vmatpush.msrb.mxu3 %v7686_v20  ;;  %629 = vmatpush.msra.mxu2 %v7632_v1 }
  0x4a   :  { %563 = vmatpush.msra.mxu1 %v7645_v6  ;;  %544 = vmatpush.msra.mxu0 %v7637_v3 }
  0x4b   :  { %649 = vmatpush.msra.mxu3 %v7643_v5  ;;  %630 = vmatpush.msra.mxu2 %v7634_v2 }
  0x4c   :  { %564 = vmatpush.msra.mxu1 %v7653_v9  ;;  %545 = vmatpush.msra.mxu0 %v7647_v7 }
  0x4d   :  { %650 = vmatpush.msra.mxu3 %v7645_v6  ;;  %631 = vmatpush.msra.mxu2 %v7637_v3 }
  0x4e   :  { %565 = vmatpush.msra.mxu1 %v7658_v11  ;;  %546 = vmatpush.msra.mxu0 %v7651_v8 }
  0x4f   :  { %651 = vmatpush.msra.mxu3 %v7653_v9  ;;  %632 = vmatpush.msra.mxu2 %v7647_v7 }
  0x50   :  { %566 = vmatpush.msra.mxu1 %v7664_v13  ;;  %547 = vmatpush.msra.mxu0 %v7655_v10 }
  0x51   :  { %652 = vmatpush.msra.mxu3 %v7658_v11  ;;  %633 = vmatpush.msra.mxu2 %v7651_v8 }
  0x52   :  { %567 = vmatpush.msra.mxu1 %v7673_v17  ;;  %548 = vmatpush.msra.mxu0 %v7666_v14 }
  0x53   :  { %653 = vmatpush.msra.mxu3 %v7664_v13  ;;  %634 = vmatpush.msra.mxu2 %v7655_v10 }
  0x54   :  { %568 = vmatpush.msra.mxu1 %v7680_v19  ;;  %549 = vmatpush.msra.mxu0 %v7675_v18 }
  0x55   :  { %654 = vmatpush.msra.mxu3 %v7673_v17  ;;  %635 = vmatpush.msra.mxu2 %v7666_v14 }
  0x56   :  { %569 = vmatpush.msra.mxu1 %v7686_v20  ;;  %6625 = vmatmul.msk.f32.gmra.mxu0 %vm220_vm1, %v174_v53 }
  0x57   :  { %655 = vmatpush.msra.mxu3 %v7680_v19  ;;  %636 = vmatpush.msra.mxu2 %v7675_v18 }
  0x58   :  { %6628 = vmatmul.msk.f32.gmra.mxu1 %vm220_vm1, %v174_v53 }
  0x59   :  { %656 = vmatpush.msra.mxu3 %v7686_v20 }
  0xb2   :  { %v249_v24 = vpop.f32.mrf.mxu0  ;;  %v272_v41 = vpop.f32.mrf.mxu1 }
  0xb3   :  { %v7764_v25 = vadd.f32 %v249_v24, %v212_v23  ;;  %v7778_v46 = vadd.f32 %v272_v41, %v213_v40 }
  0xba   :  { %v299_v26 = vpop.f32.mrf.mxu2 }
  0xbb   :  { %v322_v27 = vadd.f32 %v299_v26, %v7764_v25 }
  0xbc   :  { %v319_v36 = vpop.f32.mrf.mxu3 }
  0xbd   :  { %v6629_v28 = vmul.f32 -1.442695, %v322_v27  ;;  %v342_v43 = vadd.f32 %v7772_v34, %v319_v36 }
  0xbf   :  { %6887 = vpow2.f32 %v6629_v28 }
  0xc5   :  { %v6888_v29 = vpop.eup %6887 }
  0xc6   :  { %v326_v31 = vadd.f32 1.0, %v6888_v29 }
  0xc8   :  { %6889 = vrcp.f32 %v326_v31  ;;  %v338_v37 = vand.u32 2147483648, %v326_v31  ;;  %v336_v39 = vand.u32 2147483647, %v326_v31  ;;  %vm332_vm3 = vweird.f32 %v326_v31 }
  0xca   :  { %v339_v44 = vor.u32 1.1754944e-38, %v338_v37  ;;  %vm337_vm5 = vcmp.eq.f32.partialorder %v336_v39, 8.507059e+37 }
  0xce   :  { %v6890_v32 = vpop.eup %6889 }
  0xcf   :  { %v328_v33 = vmul.f32 %v6890_v32, %v326_v31  ;;  %vm333_vm2 = vweird.f32 %v6890_v32 }
  0xd0   :  { %vm334_vm4 = vmor %vm332_vm3, %vm333_vm2  ;;  %vm955_vm3 = vcmask 1041408  }
  0xd1   :  { %v329_v35 = vsub.f32 1.0, %v328_v33 }
  0xd3   :  { %v330_v38 = vmul.f32 %v6890_v32, %v329_v35  ;;  %v7818_v62 = vpop.f32.mrf.mxu0 }
  0xd5   :  { %v331_v42 = vadd.f32 %v6890_v32, %v330_v38  ;;  %v7821_v16 = vpop.f32.mrf.mxu1 }
  0xd7   :  { %v335_v45 = vsel %vm334_vm4, %v6890_v32, %v331_v42  ;;  %vm957_vm4 = vcmask 1043456  }
  0xd8   :  { %v340_v47 = vsel %vm337_vm5, %v339_v44, %v335_v45 }
  0xd9   :  { %v343_v48 = vmul.f32 %v342_v43, %v340_v47  ;;  %v346_v55 = vsub.f32 1.0, %v340_v47  ;;  %v352_v57 = vmul.f32 0.0, %v340_v47 }
  0xdb   :  { %v344_v49 = vadd.f32 %v343_v48, %v7778_v46 }
  0xdd   :  { %6891 = vtanh.f32 %v344_v49 }
  0xe3   :  { %v6892_v50 = vpop.eup %6891 }
  0xe4   :  { %348 = vrot.lane.b32.xlu0 %v6892_v50, %s7491_s20 }
  0xec   :  { %180 = vperm.xlu0 %6873, %v178_v52  }
 0x156   :  { %v349_v54 = vpop.permute.xlu0 %348 }
 0x157   :  { %v351_v56 = vmul.f32 %v349_v54, %v346_v55 }
 0x159   :  { %v353_v59 = vadd.f32 %v352_v57, %v351_v56 }
 0x15e   :  { %v7791_v58 = vpop.permute.xlu0 %180 }
 0x15f   :  { %vm182_vm7 = vcmp.eq.s32.totalorder %v7791_v58, 1 }
 0x160   :  { %v7796_v60 = vsel %vm182_vm7, %v353_v59, 0.0 }
 0x161   :  { %356 = vrot.lane.b32.xlu1 %v7796_v60, %s7491_s20  ;;  %v436_v45 = vrot.slane %v7796_v60, 6 }
 0x1d3   :  { %v357_v61 = vpop.permute.xlu1 %356 }
 0x1d4   :  { %6630 = vmatmul.msk.f32.vlgmr.msrb.gmra.mxu0 %vm278_vm8, %v357_v61  ;;  %6631 = vmatmul.msk.f32.vlgmr.msrb.gmra.mxu1 %vm278_vm8, %v357_v61 }
 0x1d5   :  { %708 = vmatpush.msrb.mxu0 %v7632_v1  ;;  %728 = vmatpush.msrb.mxu1 %v7643_v5 }
 0x1d7   :  { %709 = vmatpush.msrb.mxu0 %v7634_v2  ;;  %729 = vmatpush.msrb.mxu1 %v7645_v6 }
 0x1d9   :  { %710 = vmatpush.msrb.mxu0 %v7637_v3  ;;  %730 = vmatpush.msrb.mxu1 %v7653_v9 }
 0x1db   :  { %711 = vmatpush.msrb.mxu0 %v7647_v7  ;;  %731 = vmatpush.msrb.mxu1 %v7658_v11 }
 0x1dd   :  { %712 = vmatpush.msrb.mxu0 %v7651_v8  ;;  %732 = vmatpush.msrb.mxu1 %v7664_v13 }
 0x1df   :  { %713 = vmatpush.msrb.mxu0 %v7655_v10  ;;  %733 = vmatpush.msrb.mxu1 %v7673_v17 }
 0x1e1   :  { %714 = vmatpush.msrb.mxu0 %v7666_v14  ;;  %734 = vmatpush.msrb.mxu1 %v7680_v19 }
 0x1e3   :  { %715 = vmatpush.msrb.mxu0 %v7675_v18  ;;  %735 = vmatpush.msrb.mxu1 %v7686_v20 }
 0x251   :  { %v377_v63 = vpop.f32.mrf.mxu0  ;;  %v397_v28 = vpop.f32.mrf.mxu1 }
 0x252   :  { %v401_v0 = vrot.slane %v377_v63, 6  ;;  %v423_v35 = vadd.f32 %v7772_v34, %v397_v28 }
 0x254   :  { %v403_v4 = vadd.f32 %v401_v0, %v7764_v25  ;;  %v425_v39 = vrot.slane %v423_v35, 6 }
 0x256   :  { %v6632_v12 = vmul.f32 -1.442695, %v403_v4 }
 0x258   :  { %6893 = vpow2.f32 %v6632_v12 }
 0x25e   :  { %v6894_v15 = vpop.eup %6893 }
 0x25f   :  { %v407_v24 = vadd.f32 1.0, %v6894_v15 }
 0x261   :  { %6895 = vrcp.f32 %v407_v24  ;;  %v419_v31 = vand.u32 2147483648, %v407_v24  ;;  %v417_v33 = vand.u32 2147483647, %v407_v24  ;;  %vm413_vm10 = vweird.f32 %v407_v24 }
 0x263   :  { %v420_v37 = vor.u32 1.1754944e-38, %v419_v31  ;;  %vm418_vm12 = vcmp.eq.f32.partialorder %v417_v33, 8.507059e+37 }
 0x267   :  { %v6896_v26 = vpop.eup %6895 }
 0x268   :  { %v409_v27 = vmul.f32 %v6896_v26, %v407_v24  ;;  %vm414_vm9 = vweird.f32 %v6896_v26 }
 0x269   :  { %vm415_vm11 = vmor %vm413_vm10, %vm414_vm9 }
 0x26a   :  { %v410_v29 = vsub.f32 1.0, %v409_v27 }
 0x26c   :  { %v411_v32 = vmul.f32 %v6896_v26, %v410_v29 }
 0x26e   :  { %v412_v36 = vadd.f32 %v6896_v26, %v411_v32 }
 0x270   :  { %v416_v38 = vsel %vm415_vm11, %v6896_v26, %v412_v36  ;;  %vm959_vm11 = vcmask 1045504  }
 0x271   :  { %v421_v41 = vsel %vm418_vm12, %v420_v37, %v416_v38 }
 0x272   :  { %v427_v42 = vmul.f32 %v425_v39, %v421_v41  ;;  %v430_v47 = vsub.f32 1.0, %v421_v41  ;;  %v438_v50 = vmul.f32 %v436_v45, %v421_v41 }
 0x274   :  { %v428_v43 = vadd.f32 %v427_v42, %v7778_v46 }
 0x276   :  { %6897 = vtanh.f32 %v428_v43 }
 0x27c   :  { %v6898_v44 = vpop.eup %6897 }
 0x27d   :  { %432 = vrot.lane.b32.xlu1 %v6898_v44, %s7491_s20 }
 0x2ef   :  { %v433_v48 = vpop.permute.xlu1 %432 }
 0x2f0   :  { %v435_v49 = vmul.f32 %v433_v48, %v430_v47 }
 0x2f2   :  { %v439_v51 = vadd.f32 %v438_v50, %v435_v49 }
 0x2f4   :  { %v7829_v52 = vsel %vm182_vm7, %v439_v51, %v436_v45 }
 0x2f5   :  { %v442_v53 = vrot.slane %v7829_v52, 2  ;;  %v523_v32 = vrot.slane %v7829_v52, 6  ;;  %v956_v47 = vsel %vm955_vm3, %v7796_v60, %v7829_v52 }
 0x2f7   :  { %443 = vrot.lane.b32.xlu2 %v442_v53, %s7491_s20 }
 0x351   :  { %v444_v54 = vpop.permute.xlu2 %443 }
 0x352   :  { %6633 = vmatmul.msk.f32.vlgmr.msrb.gmra.mxu2 %vm278_vm8, %v444_v54  ;;  %6634 = vmatmul.msk.f32.vlgmr.msrb.gmra.mxu3 %vm278_vm8, %v444_v54 }
 0x353   :  { %795 = vmatpush.msrb.mxu2 %v7632_v1  ;;  %815 = vmatpush.msrb.mxu3 %v7643_v5 }
 0x355   :  { %796 = vmatpush.msrb.mxu2 %v7634_v2  ;;  %816 = vmatpush.msrb.mxu3 %v7645_v6 }
 0x357   :  { %797 = vmatpush.msrb.mxu2 %v7637_v3  ;;  %817 = vmatpush.msrb.mxu3 %v7653_v9 }
 0x359   :  { %798 = vmatpush.msrb.mxu2 %v7647_v7  ;;  %818 = vmatpush.msrb.mxu3 %v7658_v11 }
 0x35b   :  { %799 = vmatpush.msrb.mxu2 %v7651_v8  ;;  %819 = vmatpush.msrb.mxu3 %v7664_v13 }
 0x35d   :  { %800 = vmatpush.msrb.mxu2 %v7655_v10  ;;  %820 = vmatpush.msrb.mxu3 %v7673_v17 }
 0x35f   :  { %801 = vmatpush.msrb.mxu2 %v7666_v14  ;;  %821 = vmatpush.msrb.mxu3 %v7680_v19 }
 0x361   :  { %802 = vmatpush.msrb.mxu2 %v7675_v18  ;;  %822 = vmatpush.msrb.mxu3 %v7686_v20 }
 0x3d5   :  { %v464_v55 = vpop.f32.mrf.mxu2  ;;  %v484_v12 = vpop.f32.mrf.mxu3 }
 0x3d6   :  { %v488_v56 = vrot.slane %v464_v55, 4  ;;  %v510_v28 = vadd.f32 %v7772_v34, %v484_v12 }
 0x3d8   :  { %v490_v57 = vadd.f32 %v488_v56, %v7764_v25  ;;  %v512_v35 = vrot.slane %v510_v28, 4 }
 0x3da   :  { %v6635_v59 = vmul.f32 -1.442695, %v490_v57 }
 0x3dc   :  { %6899 = vpow2.f32 %v6635_v59 }
 0x3e2   :  { %v6900_v61 = vpop.eup %6899 }
 0x3e3   :  { %v494_v63 = vadd.f32 1.0, %v6900_v61 }
 0x3e5   :  { %6901 = vrcp.f32 %v494_v63  ;;  %v506_v24 = vand.u32 2147483648, %v494_v63  ;;  %v504_v27 = vand.u32 2147483647, %v494_v63  ;;  %vm500_vm14 = vweird.f32 %v494_v63 }
 0x3e7   :  { %v507_v31 = vor.u32 1.1754944e-38, %v506_v24  ;;  %vm505_vm2 = vcmp.eq.f32.partialorder %v504_v27, 8.507059e+37 }
 0x3eb   :  { %v6902_v0 = vpop.eup %6901 }
 0x3ec   :  { %v496_v4 = vmul.f32 %v6902_v0, %v494_v63  ;;  %vm501_vm13 = vweird.f32 %v6902_v0 }
 0x3ed   :  { %vm502_vm15 = vmor %vm500_vm14, %vm501_vm13 }
 0x3ee   :  { %v497_v15 = vsub.f32 1.0, %v496_v4 }
 0x3f0   :  { %v498_v26 = vmul.f32 %v6902_v0, %v497_v15 }
 0x3f2   :  { %v499_v29 = vadd.f32 %v6902_v0, %v498_v26 }
 0x3f4   :  { %v503_v33 = vsel %vm502_vm15, %v6902_v0, %v499_v29  ;;  %v176_v29 = vld [vmem:[%s10101_s29 + $0x8] sm:$0xff] }
 0x3f5   :  { %v508_v36 = vsel %vm505_vm2, %v507_v31, %v503_v33  ;;  %vm183_vm12 = vcmp.gt.f32.partialorder %v176_v29, 0.0 }
 0x3f6   :  { %v514_v37 = vmul.f32 %v512_v35, %v508_v36  ;;  %v525_v38 = vmul.f32 %v523_v32, %v508_v36  ;;  %v517_v42 = vsub.f32 1.0, %v508_v36  ;;  %v184_v33 = vsel %vm183_vm12, 1, %v7490_v30 }
 0x3f7   :  { %v7907_v30 = vadd.f32 %v7821_v16, %v213_v40 }
 0x3f8   :  { %v515_v39 = vadd.f32 %v514_v37, %v7778_v46 }
 0x3fa   :  { %6903 = vtanh.f32 %v515_v39 }
 0x400   :  { %v6904_v41 = vpop.eup %6903 }
 0x401   :  { %519 = vrot.lane.b32.xlu2 %v6904_v41, %s7491_s20 }
 0x45b   :  { %v520_v43 = vpop.permute.xlu2 %519 }
 0x45c   :  { %v522_v44 = vmul.f32 %v520_v43, %v517_v42 }
 0x45e   :  { %v526_v45 = vadd.f32 %v525_v38, %v522_v44 }
 0x460   :  { %v527_v48 = vsel %vm182_vm7, %v526_v45, %v523_v32 }
 0x461   :  { %v529_v49 = vrot.slane %v527_v48, 4  ;;  %v958_v50 = vsel %vm957_vm4, %v956_v47, %v527_v48  ;;  %v610_v52 = vrot.slane %v527_v48, 6 }
 0x463   :  { %530 = vrot.lane.b32.xlu1 %v529_v49, %s7491_s20 }
 0x4d5   :  { %v531_v51 = vpop.permute.xlu1 %530 }
 0x4d6   :  { %6636 = vmatmul.msk.f32.vlgmr.msra.gmra.mxu0 %vm278_vm8, %v531_v51  ;;  %6637 = vmatmul.msk.f32.vlgmr.msra.gmra.mxu1 %vm278_vm8, %v531_v51 }
 0x4d7   :  { %882 = vmatpush.msra.mxu0 %v7632_v1  ;;  %902 = vmatpush.msra.mxu1 %v7643_v5 }
 0x4d9   :  { %883 = vmatpush.msra.mxu0 %v7634_v2  ;;  %903 = vmatpush.msra.mxu1 %v7645_v6 }
 0x4db   :  { %884 = vmatpush.msra.mxu0 %v7637_v3  ;;  %904 = vmatpush.msra.mxu1 %v7653_v9 }
 0x4dd   :  { %885 = vmatpush.msra.mxu0 %v7647_v7  ;;  %905 = vmatpush.msra.mxu1 %v7658_v11 }
 0x4df   :  { %886 = vmatpush.msra.mxu0 %v7651_v8  ;;  %906 = vmatpush.msra.mxu1 %v7664_v13 }
 0x4e1   :  { %887 = vmatpush.msra.mxu0 %v7655_v10  ;;  %907 = vmatpush.msra.mxu1 %v7673_v17 }
 0x4e3   :  { %888 = vmatpush.msra.mxu0 %v7666_v14  ;;  %908 = vmatpush.msra.mxu1 %v7680_v19 }
 0x4e5   :  { %889 = vmatpush.msra.mxu0 %v7675_v18  ;;  %909 = vmatpush.msra.mxu1 %v7686_v20 }
 0x553   :  { %v551_v1 = vpop.f32.mrf.mxu0  ;;  %v571_v10 = vpop.f32.mrf.mxu1 }
 0x554   :  { %v575_v2 = vrot.slane %v551_v1, 2  ;;  %v597_v18 = vadd.f32 %v7772_v34, %v571_v10 }
 0x556   :  { %v577_v3 = vadd.f32 %v575_v2, %v7764_v25  ;;  %v599_v60 = vrot.slane %v597_v18, 2 }
 0x558   :  { %v6638_v5 = vmul.f32 -1.442695, %v577_v3 }
 0x55a   :  { %6905 = vpow2.f32 %v6638_v5 }
 0x560   :  { %v6906_v6 = vpop.eup %6905 }
 0x561   :  { %v581_v7 = vadd.f32 1.0, %v6906_v6 }
 0x563   :  { %6907 = vrcp.f32 %v581_v7  ;;  %v593_v13 = vand.u32 2147483648, %v581_v7  ;;  %v591_v17 = vand.u32 2147483647, %v581_v7  ;;  %vm587_vm6 = vweird.f32 %v581_v7 }
 0x565   :  { %v594_v20 = vor.u32 1.1754944e-38, %v593_v13  ;;  %vm592_vm10 = vcmp.eq.f32.partialorder %v591_v17, 8.507059e+37 }
 0x569   :  { %v6908_v8 = vpop.eup %6907 }
 0x56a   :  { %v583_v9 = vmul.f32 %v6908_v8, %v581_v7  ;;  %vm588_vm5 = vweird.f32 %v6908_v8 }
 0x56b   :  { %vm589_vm9 = vmor %vm587_vm6, %vm588_vm5 }
 0x56c   :  { %v584_v11 = vsub.f32 1.0, %v583_v9 }
 0x56e   :  { %v585_v14 = vmul.f32 %v6908_v8, %v584_v11 }
 0x570   :  { %v586_v19 = vadd.f32 %v6908_v8, %v585_v14 }
 0x572   :  { %v590_v25 = vsel %vm589_vm9, %v6908_v8, %v586_v19 }
 0x573   :  { %v595_v53 = vsel %vm592_vm10, %v594_v20, %v590_v25 }
 0x574   :  { %v601_v54 = vmul.f32 %v599_v60, %v595_v53  ;;  %v612_v55 = vmul.f32 %v610_v52, %v595_v53  ;;  %v604_v59 = vsub.f32 1.0, %v595_v53 }
 0x576   :  { %v602_v56 = vadd.f32 %v601_v54, %v7778_v46  ;;  %v7896_v46 = vadd.f32 %v7818_v62, %v212_v23 }
 0x578   :  { %6909 = vtanh.f32 %v602_v56 }
 0x57e   :  { %v6910_v57 = vpop.eup %6909 }
 0x57f   :  { %606 = vrot.lane.b32.xlu2 %v6910_v57, %s7491_s20 }
 0x587   :  { %186 = vperm.xlu2 %6874, %v184_v33  }
 0x5d9   :  { %v607_v61 = vpop.permute.xlu2 %606 }
 0x5da   :  { %v609_v63 = vmul.f32 %v607_v61, %v604_v59  ;;  %v978_v61 = vld [vmem:[#allocation3 + $0x70] sm:$0xff] }
 0x5dc   :  { %v613_v0 = vadd.f32 %v612_v55, %v609_v63  ;;  %v979_v63 = vld [vmem:[#allocation3 + $0x78] sm:$0xff] }
 0x5de   :  { %v614_v4 = vsel %vm182_vm7, %v613_v0, %v610_v52  ;;  %v976_v0 = vld [vmem:[#allocation3 + $0x60] sm:$0xff] }
 0x5df   :  { %v616_v12 = vrot.slane %v614_v4, 6  ;;  %v7888_v15 = vsel %vm959_vm11, %v958_v50, %v614_v4  ;;  %v977_v4 = vld [vmem:[#allocation3 + $0x68] sm:$0xff] }
 0x5e1   :  { %617 = vrot.lane.b32.xlu0 %v616_v12, %s7491_s20  ;;  %v7911_v51 = vpop.permute.xlu2 %186 }
 0x5e2   :  { %vm188_vm5 = vcmp.eq.s32.totalorder %v7911_v51, 1  ;;  %v3340_v51 = vld [vmem:[#allocation9] sm:$0xff] }
 0x653   :  { %v618_v24 = vpop.permute.xlu0 %617 }
 0x654   :  { %6639 = vmatmul.msk.f32.vlgmr.msra.gmra.mxu2 %vm278_vm8, %v618_v24  ;;  %6640 = vmatmul.msk.f32.vlgmr.msra.gmra.mxu3 %vm278_vm8, %v618_v24  ;;  %v975_v24 = vld [vmem:[#allocation3 + $0x58] sm:$0xff] }
 0x655   :  { %1027 = vmatpush.msra.mxu2 %v978_v61  ;;  %1050 = vmatpush.msra.mxu3 %v979_v63 }
 0x657   :  { %1028 = vmatpush.msra.mxu2 %v976_v0  ;;  %1051 = vmatpush.msra.mxu3 %v977_v4 }
 0x659   :  { %1052 = vmatpush.msra.mxu3 %v975_v24  ;;  %v7975_v24 = vld [vmem:[#allocation6 + $0xa0] sm:$0xff] }
 0x6d7   :  { %v638_v26 = vpop.f32.mrf.mxu2  ;;  %v658_v39 = vpop.f32.mrf.mxu3 }
 0x6d8   :  { %v661_v27 = vadd.f32 %v638_v26, %v7896_v46  ;;  %v681_v44 = vadd.f32 %v7772_v34, %v658_v39  ;;  %v972_v26 = vld [vmem:[#allocation3 + $0x40] sm:$0xff]  ;;  %v969_v39 = vld [vmem:[#allocation3 + $0x28] sm:$0xff] }
 0x6da   :  { %v6641_v28 = vmul.f32 -1.442695, %v661_v27  ;;  %v973_v27 = vld [vmem:[#allocation3 + $0x48] sm:$0xff] }
 0x6db   :  { %1053 = vmatpush.msra.mxu3 %v973_v27  ;;  %v7989_v27 = vld [vmem:[#allocation6 + $0xf8] sm:$0xff] }
 0x6dc   :  { %6911 = vpow2.f32 %v6641_v28 }
 0x6e2   :  { %v6912_v31 = vpop.eup %6911 }
 0x6e3   :  { %v665_v32 = vadd.f32 1.0, %v6912_v31 }
 0x6e5   :  { %6913 = vrcp.f32 %v665_v32  ;;  %v677_v62 = vand.u32 2147483648, %v665_v32  ;;  %v675_v38 = vand.u32 2147483647, %v665_v32  ;;  %vm671_vm14 = vweird.f32 %v665_v32 }
 0x6e7   :  { %v678_v42 = vor.u32 1.1754944e-38, %v677_v62  ;;  %vm676_vm2 = vcmp.eq.f32.partialorder %v675_v38, 8.507059e+37  ;;  %v970_v62 = vld [vmem:[#allocation3 + $0x30] sm:$0xff]  ;;  %v968_v38 = vld [vmem:[#allocation3 + $0x20] sm:$0xff] }
 0x6eb   :  { %v6914_v35 = vpop.eup %6913 }
 0x6ec   :  { %v667_v36 = vmul.f32 %v6914_v35, %v665_v32  ;;  %vm672_vm13 = vweird.f32 %v6914_v35 }
 0x6ed   :  { %vm673_vm15 = vmor %vm671_vm14, %vm672_vm13 }
 0x6ee   :  { %v668_v23 = vsub.f32 1.0, %v667_v36 }
 0x6f0   :  { %v669_v37 = vmul.f32 %v6914_v35, %v668_v23 }
 0x6f2   :  { %v670_v41 = vadd.f32 %v6914_v35, %v669_v37  ;;  %v971_v37 = vld [vmem:[#allocation3 + $0x38] sm:$0xff] }
 0x6f3   :  { %1054 = vmatpush.msra.mxu3 %v971_v37 }
 0x6f4   :  { %v674_v43 = vsel %vm673_vm15, %v6914_v35, %v670_v41  ;;  %v966_v41 = vld [vmem:[#allocation3 + $0x10] sm:$0xff] }
 0x6f5   :  { %v679_v45 = vsel %vm676_vm2, %v678_v42, %v674_v43  ;;  %v967_v42 = vld [vmem:[#allocation3 + $0x18] sm:$0xff]  ;;  %1055 = vmatpush.msra.mxu3 %v969_v39  ;;  %v964_v43 = vld [vmem:[#allocation3] sm:$0xff] }
 0x6f6   :  { %v682_v47 = vmul.f32 %v681_v44, %v679_v45  ;;  %v685_v50 = vsub.f32 1.0, %v679_v45  ;;  %v692_v2 = vmul.f32 %v679_v45, %v616_v12  ;;  %v965_v44 = vld [vmem:[#allocation3 + $0x8] sm:$0xff] }
 0x6f7   :  { %1056 = vmatpush.msra.mxu3 %v967_v42 }
 0x6f8   :  { %v683_v48 = vadd.f32 %v682_v47, %v7907_v30 }
 0x6f9   :  { %1057 = vmatpush.msra.mxu3 %v965_v44 }
 0x6fa   :  { %6915 = vtanh.f32 %v683_v48 }
 0x700   :  { %v6916_v49 = vpop.eup %6915 }
 0x701   :  { %687 = vrot.lane.b32.xlu1 %v6916_v49, %s7491_s20 }
 0x773   :  { %v688_v1 = vpop.permute.xlu1 %687 }
 0x774   :  { %v690_v3 = vmul.f32 %v688_v1, %v685_v50 }
 0x776   :  { %v693_v5 = vadd.f32 %v692_v2, %v690_v3 }
 0x778   :  { %v7916_v22 = vsel %vm188_vm5, %v693_v5, %v616_v12  ;;  %v974_v12 = vld [vmem:[#allocation3 + $0x50] sm:$0xff] }
 0x779   :  { %696 = vrot.lane.b32.xlu0 %v7916_v22, %s7491_s20  ;;  %1029 = vmatpush.msra.mxu2 %v974_v12  ;;  %v776_v28 = vrot.slane %v7916_v22, 6  ;;  %v7973_v12 = vld [vmem:[#allocation6 + $0xb0] sm:$0xff] }
 0x77b   :  { %1030 = vmatpush.msra.mxu2 %v972_v26  ;;  %v7979_v26 = vld [vmem:[#allocation6 + $0x90] sm:$0xff] }
 0x77d   :  { %1031 = vmatpush.msra.mxu2 %v970_v62  ;;  %v8076_v62 = vld [vmem:[%s10074_s5 + $0x2] sm:$0x3] }
 0x77e   :  { %v1005_v39 = vperm.slane %v8076_v62, 0 }
 0x77f   :  { %1032 = vmatpush.msra.mxu2 %v968_v38 }
 0x781   :  { %1033 = vmatpush.msra.mxu2 %v966_v41 }
 0x783   :  { %1034 = vmatpush.msra.mxu2 %v964_v43 }
 0x7eb   :  { %v697_v40 = vpop.permute.xlu0 %696 }
 0x7ec   :  { %6642 = vmatmul.msk.f32.vlgmr.msrb.gmra.mxu0 %vm278_vm8, %v697_v40  ;;  %6643 = vmatmul.msk.f32.vlgmr.msrb.gmra.mxu1 %vm278_vm8, %v697_v40 }
 0x7ed   :  { %1093 = vmatpush.msrb.mxu1 %v7989_v27 }
 0x869   :  { %v717_v16 = vpop.f32.mrf.mxu0  ;;  %v737_v14 = vpop.f32.mrf.mxu1 }
 0x86a   :  { %v741_v6 = vrot.slane %v717_v16, 6  ;;  %v763_v25 = vadd.f32 %v7772_v34, %v737_v14 }
 0x86c   :  { %v743_v7 = vadd.f32 %v741_v6, %v7896_v46  ;;  %v765_v54 = vrot.slane %v763_v25, 6 }
 0x86e   :  { %v6644_v8 = vmul.f32 -1.442695, %v743_v7 }
 0x870   :  { %6917 = vpow2.f32 %v6644_v8 }
 0x876   :  { %v6918_v9 = vpop.eup %6917 }
 0x877   :  { %v747_v10 = vadd.f32 1.0, %v6918_v9 }
 0x879   :  { %6919 = vrcp.f32 %v747_v10  ;;  %v759_v18 = vand.u32 2147483648, %v747_v10  ;;  %v757_v20 = vand.u32 2147483647, %v747_v10  ;;  %vm753_vm9 = vweird.f32 %v747_v10 }
 0x87b   :  { %v760_v52 = vor.u32 1.1754944e-38, %v759_v18  ;;  %vm758_vm12 = vcmp.eq.f32.partialorder %v757_v20, 8.507059e+37 }
 0x87f   :  { %v6920_v11 = vpop.eup %6919 }
 0x880   :  { %v749_v13 = vmul.f32 %v6920_v11, %v747_v10  ;;  %vm754_vm6 = vweird.f32 %v6920_v11 }
 0x881   :  { %vm755_vm10 = vmor %vm753_vm9, %vm754_vm6 }
 0x882   :  { %v750_v17 = vsub.f32 1.0, %v749_v13 }
 0x884   :  { %v751_v19 = vmul.f32 %v6920_v11, %v750_v17 }
 0x886   :  { %v752_v60 = vadd.f32 %v6920_v11, %v751_v19 }
 0x888   :  { %v756_v53 = vsel %vm755_vm10, %v6920_v11, %v752_v60 }
 0x889   :  { %v761_v55 = vsel %vm758_vm12, %v760_v52, %v756_v53  ;;  %v7944_v52 = vld [vmem:[#allocation6 + $0xf0] sm:$0xff] }
 0x88a   :  { %v767_v56 = vmul.f32 %v765_v54, %v761_v55  ;;  %v770_v29 = vsub.f32 1.0, %v761_v55  ;;  %v778_v33 = vmul.f32 %v776_v28, %v761_v55  ;;  %1073 = vmatpush.msrb.mxu0 %v7944_v52  ;;  %v7950_v53 = vld [vmem:[#allocation6 + $0xd0] sm:$0xff]  ;;  %v7954_v54 = vld [vmem:[#allocation6 + $0xc0] sm:$0xff] }
 0x88c   :  { %v768_v57 = vadd.f32 %v767_v56, %v7907_v30 }
 0x88e   :  { %6921 = vtanh.f32 %v768_v57 }
 0x894   :  { %v6922_v59 = vpop.eup %6921 }
 0x895   :  { %772 = vrot.lane.b32.xlu1 %v6922_v59, %s7491_s20 }
 0x907   :  { %v773_v31 = vpop.permute.xlu1 %772 }
 0x908   :  { %v775_v32 = vmul.f32 %v773_v31, %v770_v29  ;;  %v7996_v29 = vld [vmem:[#allocation6 + $0xd8] sm:$0xff]  ;;  %v8001_v31 = vld [vmem:[#allocation6 + $0xc8] sm:$0xff] }
 0x90a   :  { %v779_v35 = vadd.f32 %v778_v33, %v775_v32  ;;  %v8006_v32 = vld [vmem:[#allocation6 + $0xb8] sm:$0xff]  ;;  %v8011_v33 = vld [vmem:[#allocation6 + $0xa8] sm:$0xff] }
 0x90c   :  { %v7929_v36 = vsel %vm188_vm5, %v779_v35, %v776_v28  ;;  %v7991_v28 = vld [vmem:[#allocation6 + $0xe8] sm:$0xff]  ;;  %v8016_v35 = vld [vmem:[#allocation6 + $0x98] sm:$0xff] }
 0x90d   :  { %v782_v23 = vrot.slane %v7929_v36, 2  ;;  %v863_v17 = vrot.slane %v7929_v36, 6  ;;  %v961_v63 = vsel %vm955_vm3, %v7916_v22, %v7929_v36  ;;  %v7983_v22 = vld [vmem:[#allocation6 + $0x80] sm:$0xff]  ;;  %1094 = vmatpush.msrb.mxu1 %v7991_v28  ;;  %v8021_v36 = vld [vmem:[#allocation6 + $0x88] sm:$0xff] }
 0x90f   :  { %783 = vrot.lane.b32.xlu2 %v782_v23, %s7491_s20  ;;  %1095 = vmatpush.msrb.mxu1 %v7996_v29 }
 0x911   :  { %1096 = vmatpush.msrb.mxu1 %v8001_v31 }
 0x913   :  { %1097 = vmatpush.msrb.mxu1 %v8006_v32 }
 0x915   :  { %1098 = vmatpush.msrb.mxu1 %v8011_v33 }
 0x917   :  { %1011 = vrot.lane.b32.xlu2 %v7888_v15, %s7491_s20  ;;  %1099 = vmatpush.msrb.mxu1 %v8016_v35 }
 0x919   :  { %1100 = vmatpush.msrb.mxu1 %v8021_v36 }
 0x969   :  { %v784_v45 = vpop.permute.xlu2 %783 }
 0x96a   :  { %6645 = vmatmul.msk.f32.vlgmr.msrb.gmra.mxu2 %vm278_vm8, %v784_v45  ;;  %6646 = vmatmul.msk.f32.vlgmr.msrb.gmra.mxu3 %vm278_vm8, %v784_v45 }
 0x96b   :  { %1151 = vmatpush.msrb.mxu2 %v7944_v52  ;;  %1171 = vmatpush.msrb.mxu3 %v7989_v27 }
 0x96d   :  { %1172 = vmatpush.msrb.mxu3 %v7991_v28 }
 0x96f   :  { %1173 = vmatpush.msrb.mxu3 %v7996_v29 }
 0x971   :  { %v1012_v15 = vpop.permute.xlu2 %1011  ;;  %1174 = vmatpush.msrb.mxu3 %v8001_v31 }
 0x972   :  { %6653 = vmatmul.msk.f32.vlgmr.msra.gmra.mxu2 %vm278_vm8, %v1012_v15  ;;  %6655 = vmatmul.msk.f32.vlgmr.msra.gmra.mxu3 %vm278_vm8, %v1012_v15 }
 0x973   :  { %1175 = vmatpush.msrb.mxu3 %v8006_v32 }
 0x975   :  { %1176 = vmatpush.msrb.mxu3 %v8011_v33 }
 0x977   :  { %1177 = vmatpush.msrb.mxu3 %v8016_v35 }
 0x979   :  { %1178 = vmatpush.msrb.mxu3 %v8021_v36 }
 0x97b   :  { %1345 = vmatpush.msra.mxu3 %v7989_v27 }
 0x97d   :  { %1346 = vmatpush.msra.mxu3 %v7991_v28 }
 0x97f   :  { %1347 = vmatpush.msra.mxu3 %v7996_v29 }
 0x981   :  { %1348 = vmatpush.msra.mxu3 %v8001_v31 }
 0x983   :  { %1349 = vmatpush.msra.mxu3 %v8006_v32 }
 0x985   :  { %1350 = vmatpush.msra.mxu3 %v8011_v33 }
 0x987   :  { %1351 = vmatpush.msra.mxu3 %v8016_v35 }
 0x989   :  { %1352 = vmatpush.msra.mxu3 %v8021_v36 }
 0x9ed   :  { %v804_v47 = vpop.f32.mrf.mxu2  ;;  %v824_v40 = vpop.f32.mrf.mxu3 }
 0x9ee   :  { %v828_v48 = vrot.slane %v804_v47, 4  ;;  %v850_v9 = vadd.f32 %v7772_v34, %v824_v40  ;;  %v7946_v34 = vld [vmem:[#allocation6 + $0xe0] sm:$0xff] }
 0x9ef   :  { %1074 = vmatpush.msrb.mxu0 %v7946_v34  ;;  %1152 = vmatpush.msrb.mxu2 %v7946_v34 }
 0x9f0   :  { %v830_v49 = vadd.f32 %v828_v48, %v7896_v46  ;;  %v852_v14 = vrot.slane %v850_v9, 4 }
 0x9f1   :  { %1075 = vmatpush.msrb.mxu0 %v7950_v53  ;;  %1153 = vmatpush.msrb.mxu2 %v7950_v53 }
 0x9f2   :  { %v6647_v50 = vmul.f32 -1.442695, %v830_v49 }
 0x9f3   :  { %1076 = vmatpush.msrb.mxu0 %v7954_v54  ;;  %1154 = vmatpush.msrb.mxu2 %v7954_v54 }
 0x9f4   :  { %6923 = vpow2.f32 %v6647_v50 }
 0x9f5   :  { %1077 = vmatpush.msrb.mxu0 %v7973_v12  ;;  %1155 = vmatpush.msrb.mxu2 %v7973_v12  ;;  %v1036_v42 = vpop.f32.mrf.mxu2 }
 0x9f6   :  { %v8082_v44 = vadd.f32 %v1036_v42, %v1005_v39 }
 0x9f7   :  { %1078 = vmatpush.msrb.mxu0 %v7975_v24  ;;  %1156 = vmatpush.msrb.mxu2 %v7975_v24 }
 0x9f9   :  { %1079 = vmatpush.msrb.mxu0 %v7979_v26  ;;  %1157 = vmatpush.msrb.mxu2 %v7979_v26 }
 0x9fa   :  { %v6924_v1 = vpop.eup %6923 }
 0x9fb   :  { %v834_v2 = vadd.f32 1.0, %v6924_v1  ;;  %1080 = vmatpush.msrb.mxu0 %v7983_v22  ;;  %1158 = vmatpush.msrb.mxu2 %v7983_v22 }
 0x9fd   :  { %6925 = vrcp.f32 %v834_v2  ;;  %v846_v6 = vand.u32 2147483648, %v834_v2  ;;  %v844_v8 = vand.u32 2147483647, %v834_v2  ;;  %vm840_vm14 = vweird.f32 %v834_v2  ;;  %1325 = vmatpush.msra.mxu2 %v7944_v52 }
 0x9ff   :  { %v847_v11 = vor.u32 1.1754944e-38, %v846_v6  ;;  %vm845_vm2 = vcmp.eq.f32.partialorder %v844_v8, 8.507059e+37  ;;  %1326 = vmatpush.msra.mxu2 %v7946_v34 }
 0xa01   :  { %1327 = vmatpush.msra.mxu2 %v7950_v53 }
 0xa03   :  { %v6926_v3 = vpop.eup %6925  ;;  %1328 = vmatpush.msra.mxu2 %v7954_v54 }
 0xa04   :  { %v836_v5 = vmul.f32 %v6926_v3, %v834_v2  ;;  %vm841_vm13 = vweird.f32 %v6926_v3 }
 0xa05   :  { %vm842_vm15 = vmor %vm840_vm14, %vm841_vm13  ;;  %1329 = vmatpush.msra.mxu2 %v7973_v12 }
 0xa06   :  { %v837_v16 = vsub.f32 1.0, %v836_v5 }
 0xa07   :  { %1330 = vmatpush.msra.mxu2 %v7975_v24 }
 0xa08   :  { %v838_v7 = vmul.f32 %v6926_v3, %v837_v16 }
 0xa09   :  { %1331 = vmatpush.msra.mxu2 %v7979_v26 }
 0xa0a   :  { %v839_v10 = vadd.f32 %v6926_v3, %v838_v7  ;;  %v7273_v7 = vld [vmem:[%s10075_s6] ss:$0 sm:$0xff] }
 0xa0b   :  { %1332 = vmatpush.msra.mxu2 %v7983_v22 }
 0xa0c   :  { %v843_v13 = vsel %vm842_vm15, %v6926_v3, %v839_v10 }
 0xa0d   :  { %v848_v18 = vsel %vm845_vm2, %v847_v11, %v843_v13 }
 0xa0e   :  { %v854_v19 = vmul.f32 %v852_v14, %v848_v18  ;;  %v865_v20 = vmul.f32 %v863_v17, %v848_v18  ;;  %v857_v55 = vsub.f32 1.0, %v848_v18 }
 0xa10   :  { %v855_v25 = vadd.f32 %v854_v19, %v7907_v30  ;;  %v8092_v19 = vld [vmem:[%s10075_s6 + $0x1] ss:$0 sm:$0xff] }
 0xa12   :  { %6927 = vtanh.f32 %v855_v25 }
 0xa18   :  { %v6928_v60 = vpop.eup %6927 }
 0xa19   :  { %859 = vrot.lane.b32.xlu0 %v6928_v60, %s7491_s20 }
 0xa8b   :  { %v860_v56 = vpop.permute.xlu0 %859 }
 0xa8c   :  { %v862_v57 = vmul.f32 %v860_v56, %v857_v55 }
 0xa8e   :  { %v866_v59 = vadd.f32 %v865_v20, %v862_v57 }
 0xa90   :  { %v7962_v61 = vsel %vm188_vm5, %v866_v59, %v863_v17 }
 0xa91   :  { %v869_v0 = vrot.slane %v7962_v61, 4  ;;  %v7970_v4 = vsel %vm957_vm4, %v961_v63, %v7962_v61  ;;  %v950_v14 = vrot.slane %v7962_v61, 6 }
 0xa93   :  { %870 = vrot.lane.b32.xlu1 %v869_v0, %s7491_s20  ;;  %v1006_v0 = vperm.slane %v8076_v62, 1 }
 0xb05   :  { %v871_v23 = vpop.permute.xlu1 %870 }
 0xb06   :  { %6648 = vmatmul.msk.f32.vlgmr.msra.gmra.mxu0 %vm278_vm8, %v871_v23  ;;  %6649 = vmatmul.msk.f32.vlgmr.msra.gmra.mxu1 %vm278_vm8, %v871_v23 }
 0xb07   :  { %1238 = vmatpush.msra.mxu0 %v7944_v52  ;;  %1258 = vmatpush.msra.mxu1 %v7989_v27 }
 0xb09   :  { %1239 = vmatpush.msra.mxu0 %v7946_v34  ;;  %1259 = vmatpush.msra.mxu1 %v7991_v28 }
 0xb0b   :  { %1240 = vmatpush.msra.mxu0 %v7950_v53  ;;  %1260 = vmatpush.msra.mxu1 %v7996_v29 }
 0xb0d   :  { %1241 = vmatpush.msra.mxu0 %v7954_v54  ;;  %1261 = vmatpush.msra.mxu1 %v8001_v31 }
 0xb0e   :  { %1081 = vmatmul.f32.vlgmr.msrb.gmra.mxu0 %v7489_v21  ;;  %1101 = vmatmul.f32.vlgmr.msrb.gmra.mxu1 %v7489_v21 }
 0xb0f   :  { %1242 = vmatpush.msra.mxu0 %v7973_v12  ;;  %1262 = vmatpush.msra.mxu1 %v8006_v32 }
 0xb11   :  { %1243 = vmatpush.msra.mxu0 %v7975_v24  ;;  %1263 = vmatpush.msra.mxu1 %v8011_v33 }
 0xb13   :  { %1244 = vmatpush.msra.mxu0 %v7979_v26  ;;  %1264 = vmatpush.msra.mxu1 %v8016_v35 }
 0xb15   :  { %1245 = vmatpush.msra.mxu0 %v7983_v22  ;;  %1265 = vmatpush.msra.mxu1 %v8021_v36 }
 0xb17   :  { %1412 = vmatpush.msrb.mxu0 %v7944_v52  ;;  %1432 = vmatpush.msrb.mxu1 %v7989_v27 }
 0xb19   :  { %1413 = vmatpush.msrb.mxu0 %v7946_v34  ;;  %1433 = vmatpush.msrb.mxu1 %v7991_v28 }
 0xb1b   :  { %1414 = vmatpush.msrb.mxu0 %v7950_v53  ;;  %1434 = vmatpush.msrb.mxu1 %v7996_v29 }
 0xb1d   :  { %1415 = vmatpush.msrb.mxu0 %v7954_v54  ;;  %1435 = vmatpush.msrb.mxu1 %v8001_v31 }
 0xb1f   :  { %1416 = vmatpush.msrb.mxu0 %v7973_v12  ;;  %1436 = vmatpush.msrb.mxu1 %v8006_v32 }
 0xb21   :  { %1417 = vmatpush.msrb.mxu0 %v7975_v24  ;;  %1437 = vmatpush.msrb.mxu1 %v8011_v33 }
 0xb23   :  { %1418 = vmatpush.msrb.mxu0 %v7979_v26  ;;  %1438 = vmatpush.msrb.mxu1 %v8016_v35 }
 0xb25   :  { %1419 = vmatpush.msrb.mxu0 %v7983_v22  ;;  %1439 = vmatpush.msrb.mxu1 %v8021_v36 }
 0xb83   :  { %v891_v37 = vpop.f32.mrf.mxu0  ;;  %v911_v3 = vpop.f32.mrf.mxu1 }
 0xb84   :  { %v915_v38 = vrot.slane %v891_v37, 2  ;;  %v937_v8 = vadd.f32 %v7273_v7, %v911_v3 }
 0xb86   :  { %v917_v41 = vadd.f32 %v915_v38, %v7896_v46  ;;  %v939_v18 = vrot.slane %v937_v8, 2  ;;  %v1059_v38 = vpop.f32.mrf.mxu3 }
 0xb88   :  { %v6650_v43 = vmul.f32 -1.442695, %v917_v41 }
 0xb8a   :  { %6929 = vpow2.f32 %v6650_v43 }
 0xb8b   :  { %v1082_v45 = vpop.f32.mrf.mxu0  ;;  %v1102_v60 = vpop.f32.mrf.mxu1 }
 0xb8c   :  { %v1105_v15 = vadd.f32 %v1082_v45, %v8082_v44  ;;  %v1125_v37 = vadd.f32 %v8092_v19, %v1102_v60  ;;  %v8099_v45 = vadd.f32 %v1059_v38, %v1006_v0 }
 0xb8e   :  { %v6657_v47 = vmul.f32 -1.442695, %v1105_v15 }
 0xb90   :  { %v6930_v48 = vpop.eup %6929  ;;  %6931 = vpow2.f32 %v6657_v47 }
 0xb91   :  { %v921_v49 = vadd.f32 1.0, %v6930_v48 }
 0xb93   :  { %6933 = vrcp.f32 %v921_v49  ;;  %v933_v40 = vand.u32 2147483648, %v921_v49  ;;  %v931_v6 = vand.u32 2147483647, %v921_v49  ;;  %vm927_vm9 = vweird.f32 %v921_v49 }
 0xb95   :  { %v934_v13 = vor.u32 1.1754944e-38, %v933_v40  ;;  %vm932_vm12 = vcmp.eq.f32.partialorder %v931_v6, 8.507059e+37 }
 0xb96   :  { %v6932_v50 = vpop.eup %6931 }
 0xb97   :  { %v1109_v1 = vadd.f32 1.0, %v6932_v50 }
 0xb99   :  { %v6934_v2 = vpop.eup %6933  ;;  %6935 = vrcp.f32 %v1109_v1  ;;  %v1119_v55 = vand.u32 2147483647, %v1109_v1  ;;  %v1121_v56 = vand.u32 2147483648, %v1109_v1  ;;  %vm1115_vm14 = vweird.f32 %v1109_v1 }
 0xb9a   :  { %v923_v46 = vmul.f32 %v6934_v2, %v921_v49  ;;  %vm928_vm6 = vweird.f32 %v6934_v2 }
 0xb9b   :  { %vm929_vm10 = vmor %vm927_vm9, %vm928_vm6  ;;  %v1122_v41 = vor.u32 1.1754944e-38, %v1121_v56  ;;  %vm1120_vm2 = vcmp.eq.f32.partialorder %v1119_v55, 8.507059e+37 }
 0xb9c   :  { %v924_v5 = vsub.f32 1.0, %v923_v46 }
 0xb9e   :  { %v925_v16 = vmul.f32 %v6934_v2, %v924_v5 }
 0xb9f   :  { %v6936_v9 = vpop.eup %6935 }
 0xba0   :  { %v926_v10 = vadd.f32 %v6934_v2, %v925_v16  ;;  %v1111_v11 = vmul.f32 %v6936_v9, %v1109_v1  ;;  %vm1116_vm13 = vweird.f32 %v6936_v9 }
 0xba1   :  { %vm1117_vm15 = vmor %vm1115_vm14, %vm1116_vm13 }
 0xba2   :  { %v930_v17 = vsel %vm929_vm10, %v6934_v2, %v926_v10  ;;  %v1112_v20 = vsub.f32 1.0, %v1111_v11 }
 0xba3   :  { %v935_v25 = vsel %vm932_vm12, %v934_v13, %v930_v17 }
 0xba4   :  { %v941_v57 = vmul.f32 %v939_v18, %v935_v25  ;;  %v1113_v59 = vmul.f32 %v6936_v9, %v1112_v20  ;;  %v952_v63 = vmul.f32 %v950_v14, %v935_v25  ;;  %v944_v49 = vsub.f32 1.0, %v935_v25 }
 0xba6   :  { %v942_v61 = vadd.f32 %v941_v57, %v7907_v30  ;;  %v1114_v23 = vadd.f32 %v6936_v9, %v1113_v59 }
 0xba8   :  { %6937 = vtanh.f32 %v942_v61  ;;  %v1118_v42 = vsel %vm1117_vm15, %v6936_v9, %v1114_v23 }
 0xba9   :  { %v1123_v43 = vsel %vm1120_vm2, %v1122_v41, %v1118_v42 }
 0xbaa   :  { %v1126_v15 = vmul.f32 %v1125_v37, %v1123_v43  ;;  %v1129_v46 = vsub.f32 1.0, %v1123_v43  ;;  %v1135_v16 = vmul.f32 0.0, %v1123_v43 }
 0xbac   :  { %v1127_v47 = vadd.f32 %v1126_v15, %v8099_v45 }
 0xbae   :  { %v6938_v48 = vpop.eup %6937  ;;  %6939 = vtanh.f32 %v1127_v47 }
 0xbaf   :  { %946 = vrot.lane.b32.xlu0 %v6938_v48, %s7491_s20 }
 0xbb4   :  { %v6940_v30 = vpop.eup %6939 }
 0xbb5   :  { %1131 = vrot.lane.b32.xlu1 %v6940_v30, %s7491_s20 }
 0xc21   :  { %v947_v50 = vpop.permute.xlu0 %946 }
 0xc22   :  { %v949_v1 = vmul.f32 %v947_v50, %v944_v49 }
 0xc24   :  { %v953_v2 = vadd.f32 %v952_v63, %v949_v1 }
 0xc26   :  { %v954_v3 = vsel %vm188_vm5, %v953_v2, %v950_v14 }
 0xc27   :  { %v1132_v5 = vpop.permute.xlu1 %1131  ;;  %v963_v40 = vsel %vm959_vm11, %v7970_v4, %v954_v3 }
 0xc28   :  { %v1134_v6 = vmul.f32 %v1132_v5, %v1129_v46  ;;  %1013 = vrot.lane.b32.xlu2 %v963_v40, %s7491_s20 }
 0xc2a   :  { %v1136_v7 = vadd.f32 %v1135_v16, %v1134_v6 }
 0xc2c   :  { %v8111_v8 = vsel %vm182_vm7, %v1136_v7, 0.0 }
 0xc2d   :  { %1139 = vrot.lane.b32.xlu0 %v8111_v8, %s7491_s20  ;;  %v1219_v30 = vrot.slane %v8111_v8, 6 }
 0xc82   :  { %v1014_v9 = vpop.permute.xlu2 %1013 }
 0xc83   :  { %6654 = vmatmul.msk.f32.gmra.mxu2 %vm278_vm8, %v1014_v9  ;;  %6656 = vmatmul.msk.f32.gmra.mxu3 %vm278_vm8, %v1014_v9 }
 0xc9f   :  { %v1140_v10 = vpop.permute.xlu0 %1139 }
 0xca0   :  { %6658 = vmatmul.msk.f32.vlgmr.msrb.gmra.mxu2 %vm278_vm8, %v1140_v10  ;;  %6659 = vmatmul.msk.f32.vlgmr.msrb.gmra.mxu3 %vm278_vm8, %v1140_v10 }
 0xca1   :  { %1491 = vmatpush.msrb.mxu2 %v7944_v52  ;;  %1511 = vmatpush.msrb.mxu3 %v7989_v27 }
 0xca3   :  { %1492 = vmatpush.msrb.mxu2 %v7946_v34  ;;  %1512 = vmatpush.msrb.mxu3 %v7991_v28 }
 0xca5   :  { %1493 = vmatpush.msrb.mxu2 %v7950_v53  ;;  %1513 = vmatpush.msrb.mxu3 %v7996_v29 }
 0xca7   :  { %1494 = vmatpush.msrb.mxu2 %v7954_v54  ;;  %1514 = vmatpush.msrb.mxu3 %v8001_v31 }
 0xca9   :  { %1495 = vmatpush.msrb.mxu2 %v7973_v12  ;;  %1515 = vmatpush.msrb.mxu3 %v8006_v32 }
 0xcab   :  { %1496 = vmatpush.msrb.mxu2 %v7975_v24  ;;  %1516 = vmatpush.msrb.mxu3 %v8011_v33 }
 0xcad   :  { %1497 = vmatpush.msrb.mxu2 %v7979_v26  ;;  %1517 = vmatpush.msrb.mxu3 %v8016_v35 }
 0xcaf   :  { %1498 = vmatpush.msrb.mxu2 %v7983_v22  ;;  %1518 = vmatpush.msrb.mxu3 %v8021_v36 }
 0xd06   :  { %v8135_v4 = vpop.f32.mrf.mxu2  ;;  %v8138_v25 = vpop.f32.mrf.mxu3 }
 0xd23   :  { %v1160_v11 = vpop.f32.mrf.mxu2  ;;  %v1180_v56 = vpop.f32.mrf.mxu3 }
 0xd24   :  { %v1184_v13 = vrot.slane %v1160_v11, 6  ;;  %v1206_v23 = vadd.f32 %v8092_v19, %v1180_v56 }
 0xd26   :  { %v1186_v14 = vadd.f32 %v1184_v13, %v8082_v44  ;;  %v1208_v42 = vrot.slane %v1206_v23, 6 }
 0xd28   :  { %v6660_v17 = vmul.f32 -1.442695, %v1186_v14 }
 0xd2a   :  { %6941 = vpow2.f32 %v6660_v17 }
 0xd30   :  { %v6942_v18 = vpop.eup %6941 }
 0xd31   :  { %v1190_v20 = vadd.f32 1.0, %v6942_v18 }
 0xd33   :  { %6943 = vrcp.f32 %v1190_v20  ;;  %v1202_v59 = vand.u32 2147483648, %v1190_v20  ;;  %v1200_v61 = vand.u32 2147483647, %v1190_v20  ;;  %vm1196_vm9 = vweird.f32 %v1190_v20 }
 0xd35   :  { %v1203_v38 = vor.u32 1.1754944e-38, %v1202_v59  ;;  %vm1201_vm12 = vcmp.eq.f32.partialorder %v1200_v61, 8.507059e+37 }
 0xd39   :  { %v6944_v60 = vpop.eup %6943 }
 0xd3a   :  { %v1192_v55 = vmul.f32 %v6944_v60, %v1190_v20  ;;  %vm1197_vm6 = vweird.f32 %v6944_v60 }
 0xd3b   :  { %vm1198_vm10 = vmor %vm1196_vm9, %vm1197_vm6 }
 0xd3c   :  { %v1193_v57 = vsub.f32 1.0, %v1192_v55 }
 0xd3e   :  { %v1194_v63 = vmul.f32 %v6944_v60, %v1193_v57 }
 0xd40   :  { %v1195_v37 = vadd.f32 %v6944_v60, %v1194_v63 }
 0xd42   :  { %v1199_v41 = vsel %vm1198_vm10, %v6944_v60, %v1195_v37 }
 0xd43   :  { %v1204_v43 = vsel %vm1201_vm12, %v1203_v38, %v1199_v41 }
 0xd44   :  { %v1210_v15 = vmul.f32 %v1208_v42, %v1204_v43  ;;  %v1213_v49 = vsub.f32 1.0, %v1204_v43  ;;  %v1221_v1 = vmul.f32 %v1219_v30, %v1204_v43 }
 0xd46   :  { %v1211_v47 = vadd.f32 %v1210_v15, %v8099_v45 }
 0xd48   :  { %6945 = vtanh.f32 %v1211_v47 }
 0xd4e   :  { %v6946_v48 = vpop.eup %6945 }
 0xd4f   :  { %1215 = vrot.lane.b32.xlu1 %v6946_v48, %s7491_s20 }
 0xdc1   :  { %v1216_v50 = vpop.permute.xlu1 %1215 }
 0xdc2   :  { %v1218_v2 = vmul.f32 %v1216_v50, %v1213_v49 }
 0xdc4   :  { %v1222_v46 = vadd.f32 %v1221_v1, %v1218_v2 }
 0xdc6   :  { %v1223_v3 = vsel %vm182_vm7, %v1222_v46, %v1219_v30 }
 0xdc7   :  { %v1225_v5 = vrot.slane %v1223_v3, 2  ;;  %v1306_v23 = vrot.slane %v1223_v3, 6  ;;  %v1738_v50 = vsel %vm955_vm3, %v8111_v8, %v1223_v3 }
 0xdc9   :  { %1226 = vrot.lane.b32.xlu2 %v1225_v5, %s7491_s20 }
 0xe23   :  { %v1227_v40 = vpop.permute.xlu2 %1226 }
 0xe24   :  { %6661 = vmatmul.msk.f32.vlgmr.msra.gmra.mxu0 %vm278_vm8, %v1227_v40  ;;  %6662 = vmatmul.msk.f32.vlgmr.msra.gmra.mxu1 %vm278_vm8, %v1227_v40 }
 0xe25   :  { %1578 = vmatpush.msra.mxu0 %v7944_v52  ;;  %1598 = vmatpush.msra.mxu1 %v7989_v27 }
 0xe27   :  { %1579 = vmatpush.msra.mxu0 %v7946_v34  ;;  %1599 = vmatpush.msra.mxu1 %v7991_v28 }
 0xe29   :  { %1580 = vmatpush.msra.mxu0 %v7950_v53  ;;  %1600 = vmatpush.msra.mxu1 %v7996_v29 }
 0xe2b   :  { %1581 = vmatpush.msra.mxu0 %v7954_v54  ;;  %1601 = vmatpush.msra.mxu1 %v8001_v31 }
 0xe2d   :  { %1582 = vmatpush.msra.mxu0 %v7973_v12  ;;  %1602 = vmatpush.msra.mxu1 %v8006_v32 }
 0xe2f   :  { %1583 = vmatpush.msra.mxu0 %v7975_v24  ;;  %1603 = vmatpush.msra.mxu1 %v8011_v33 }
 0xe31   :  { %1584 = vmatpush.msra.mxu0 %v7979_v26  ;;  %1604 = vmatpush.msra.mxu1 %v8016_v35 }
 0xe33   :  { %1585 = vmatpush.msra.mxu0 %v7983_v22  ;;  %1605 = vmatpush.msra.mxu1 %v8021_v36 }
 0xea1   :  { %v1247_v16 = vpop.f32.mrf.mxu0  ;;  %v1267_v17 = vpop.f32.mrf.mxu1 }
 0xea2   :  { %v1271_v6 = vrot.slane %v1247_v16, 4  ;;  %v1293_v56 = vadd.f32 %v8092_v19, %v1267_v17 }
 0xea4   :  { %v1273_v7 = vadd.f32 %v1271_v6, %v8082_v44  ;;  %v1295_v61 = vrot.slane %v1293_v56, 4 }
 0xea6   :  { %v6663_v9 = vmul.f32 -1.442695, %v1273_v7 }
 0xea8   :  { %6947 = vpow2.f32 %v6663_v9 }
 0xeae   :  { %v6948_v10 = vpop.eup %6947 }
 0xeaf   :  { %v1277_v11 = vadd.f32 1.0, %v6948_v10 }
 0xeb1   :  { %6949 = vrcp.f32 %v1277_v11  ;;  %v1289_v20 = vand.u32 2147483648, %v1277_v11  ;;  %v1287_v55 = vand.u32 2147483647, %v1277_v11  ;;  %vm1283_vm14 = vweird.f32 %v1277_v11 }
 0xeb3   :  { %v1290_v59 = vor.u32 1.1754944e-38, %v1289_v20  ;;  %vm1288_vm2 = vcmp.eq.f32.partialorder %v1287_v55, 8.507059e+37 }
 0xeb7   :  { %v6950_v13 = vpop.eup %6949 }
 0xeb8   :  { %v1279_v14 = vmul.f32 %v6950_v13, %v1277_v11  ;;  %vm1284_vm13 = vweird.f32 %v6950_v13 }
 0xeb9   :  { %vm1285_vm15 = vmor %vm1283_vm14, %vm1284_vm13 }
 0xeba   :  { %v1280_v18 = vsub.f32 1.0, %v1279_v14 }
 0xebc   :  { %v1281_v60 = vmul.f32 %v6950_v13, %v1280_v18 }
 0xebe   :  { %v1282_v57 = vadd.f32 %v6950_v13, %v1281_v60 }
 0xec0   :  { %v1286_v63 = vsel %vm1285_vm15, %v6950_v13, %v1282_v57 }
 0xec1   :  { %v1291_v37 = vsel %vm1288_vm2, %v1290_v59, %v1286_v63 }
 0xec2   :  { %v1297_v38 = vmul.f32 %v1295_v61, %v1291_v37  ;;  %v1308_v41 = vmul.f32 %v1306_v23, %v1291_v37  ;;  %v1300_v15 = vsub.f32 1.0, %v1291_v37 }
 0xec4   :  { %v1298_v42 = vadd.f32 %v1297_v38, %v8099_v45 }
 0xec6   :  { %6951 = vtanh.f32 %v1298_v42 }
 0xecc   :  { %v6952_v43 = vpop.eup %6951 }
 0xecd   :  { %1302 = vrot.lane.b32.xlu0 %v6952_v43, %s7491_s20 }
 0xf3f   :  { %v1303_v47 = vpop.permute.xlu0 %1302 }
 0xf40   :  { %v1305_v48 = vmul.f32 %v1303_v47, %v1300_v15 }
 0xf42   :  { %v1309_v30 = vadd.f32 %v1308_v41, %v1305_v48  ;;  %v8215_v48 = vadd.f32 %v8138_v25, %v1006_v0 }
 0xf44   :  { %v1310_v49 = vsel %vm182_vm7, %v1309_v30, %v1306_v23 }
 0xf45   :  { %v1312_v1 = vrot.slane %v1310_v49, 4  ;;  %v1739_v2 = vsel %vm957_vm4, %v1738_v50, %v1310_v49  ;;  %v1393_v3 = vrot.slane %v1310_v49, 6 }
 0xf47   :  { %1313 = vrot.lane.b32.xlu1 %v1312_v1, %s7491_s20 }
 0xfb9   :  { %v1314_v46 = vpop.permute.xlu1 %1313 }
 0xfba   :  { %6664 = vmatmul.msk.f32.vlgmr.msra.gmra.mxu2 %vm278_vm8, %v1314_v46  ;;  %6665 = vmatmul.msk.f32.vlgmr.msra.gmra.mxu3 %vm278_vm8, %v1314_v46 }
 0xfbb   :  { %1665 = vmatpush.msra.mxu2 %v7944_v52  ;;  %1685 = vmatpush.msra.mxu3 %v7989_v27 }
 0xfbd   :  { %1666 = vmatpush.msra.mxu2 %v7946_v34  ;;  %1686 = vmatpush.msra.mxu3 %v7991_v28 }
 0xfbf   :  { %1667 = vmatpush.msra.mxu2 %v7950_v53  ;;  %1687 = vmatpush.msra.mxu3 %v7996_v29 }
 0xfc1   :  { %1668 = vmatpush.msra.mxu2 %v7954_v54  ;;  %1688 = vmatpush.msra.mxu3 %v8001_v31 }
 0xfc3   :  { %1669 = vmatpush.msra.mxu2 %v7973_v12  ;;  %1689 = vmatpush.msra.mxu3 %v8006_v32 }
 0xfc5   :  { %1670 = vmatpush.msra.mxu2 %v7975_v24  ;;  %1690 = vmatpush.msra.mxu3 %v8011_v33 }
 0xfc7   :  { %1671 = vmatpush.msra.mxu2 %v7979_v26  ;;  %1691 = vmatpush.msra.mxu3 %v8016_v35 }
 0xfc9   :  { %1672 = vmatpush.msra.mxu2 %v7983_v22  ;;  %1692 = vmatpush.msra.mxu3 %v8021_v36 }
0x103d   :  { %v1334_v52 = vpop.f32.mrf.mxu2  ;;  %v1354_v29 = vpop.f32.mrf.mxu3 }
0x103e   :  { %v1358_v34 = vrot.slane %v1334_v52, 2  ;;  %v1380_v22 = vadd.f32 %v8092_v19, %v1354_v29 }
0x1040   :  { %v1360_v53 = vadd.f32 %v1358_v34, %v8082_v44  ;;  %v1382_v8 = vrot.slane %v1380_v22, 2 }
0x1042   :  { %v6666_v54 = vmul.f32 -1.442695, %v1360_v53 }
0x1044   :  { %6953 = vpow2.f32 %v6666_v54 }
0x104a   :  { %v6954_v12 = vpop.eup %6953 }
0x104b   :  { %v1364_v27 = vadd.f32 1.0, %v6954_v12 }
0x104d   :  { %6955 = vrcp.f32 %v1364_v27  ;;  %v1376_v26 = vand.u32 2147483648, %v1364_v27  ;;  %v1374_v33 = vand.u32 2147483647, %v1364_v27  ;;  %vm1370_vm9 = vweird.f32 %v1364_v27 }
0x104f   :  { %v1377_v36 = vor.u32 1.1754944e-38, %v1376_v26  ;;  %vm1375_vm12 = vcmp.eq.f32.partialorder %v1374_v33, 8.507059e+37 }
0x1053   :  { %v6956_v24 = vpop.eup %6955 }
0x1054   :  { %v1366_v28 = vmul.f32 %v6956_v24, %v1364_v27  ;;  %vm1371_vm6 = vweird.f32 %v6956_v24 }
0x1055   :  { %vm1372_vm10 = vmor %vm1370_vm9, %vm1371_vm6 }
0x1056   :  { %v1367_v31 = vsub.f32 1.0, %v1366_v28 }
0x1058   :  { %v1368_v32 = vmul.f32 %v6956_v24, %v1367_v31 }
0x105a   :  { %v1369_v35 = vadd.f32 %v6956_v24, %v1368_v32 }
0x105c   :  { %v1373_v44 = vsel %vm1372_vm10, %v6956_v24, %v1369_v35 }
0x105d   :  { %v1378_v5 = vsel %vm1375_vm12, %v1377_v36, %v1373_v44 }
0x105e   :  { %v1384_v40 = vmul.f32 %v1382_v8, %v1378_v5  ;;  %v1395_v16 = vmul.f32 %v1393_v3, %v1378_v5  ;;  %v1387_v9 = vsub.f32 1.0, %v1378_v5 }
0x1060   :  { %v1385_v6 = vadd.f32 %v1384_v40, %v8099_v45  ;;  %v8208_v45 = vadd.f32 %v8135_v4, %v1005_v39 }
0x1062   :  { %6957 = vtanh.f32 %v1385_v6 }
0x1068   :  { %v6958_v7 = vpop.eup %6957 }
0x1069   :  { %1389 = vrot.lane.b32.xlu2 %v6958_v7, %s7491_s20  ;;  %v1759_v7 = vld [vmem:[#allocation3 + $0xf0] sm:$0xff] }
0x10c3   :  { %v1390_v10 = vpop.permute.xlu2 %1389 }
0x10c4   :  { %v1392_v11 = vmul.f32 %v1390_v10, %v1387_v9  ;;  %v1760_v9 = vld [vmem:[#allocation3 + $0xf8] sm:$0xff]  ;;  %v1757_v10 = vld [vmem:[#allocation3 + $0xe0] sm:$0xff] }
0x10c6   :  { %v1396_v13 = vadd.f32 %v1395_v16, %v1392_v11  ;;  %v1758_v11 = vld [vmem:[#allocation3 + $0xe8] sm:$0xff] }
0x10c8   :  { %v1397_v14 = vsel %vm182_vm7, %v1396_v13, %v1393_v3  ;;  %v1755_v13 = vld [vmem:[#allocation3 + $0xd0] sm:$0xff] }
0x10c9   :  { %v1399_v17 = vrot.slane %v1397_v14, 6  ;;  %v8200_v18 = vsel %vm959_vm11, %v1739_v2, %v1397_v14  ;;  %v1756_v14 = vld [vmem:[#allocation3 + $0xd8] sm:$0xff] }
0x10cb   :  { %1400 = vrot.lane.b32.xlu0 %v1399_v17, %s7491_s20 }
0x113d   :  { %v1401_v20 = vpop.permute.xlu0 %1400 }
0x113e   :  { %6667 = vmatmul.msk.f32.vlgmr.msrb.gmra.mxu0 %vm278_vm8, %v1401_v20  ;;  %6668 = vmatmul.msk.f32.vlgmr.msrb.gmra.mxu1 %vm278_vm8, %v1401_v20  ;;  %v1754_v20 = vld [vmem:[#allocation3 + $0xc8] sm:$0xff] }
0x113f   :  { %1808 = vmatpush.msrb.mxu0 %v1759_v7  ;;  %1831 = vmatpush.msrb.mxu1 %v1760_v9 }
0x1141   :  { %1809 = vmatpush.msrb.mxu0 %v1757_v10  ;;  %1832 = vmatpush.msrb.mxu1 %v1758_v11 }
0x1143   :  { %1810 = vmatpush.msrb.mxu0 %v1755_v13  ;;  %1833 = vmatpush.msrb.mxu1 %v1756_v14  ;;  %v8278_v13 = vld [vmem:[#allocation6 + $0x130] sm:$0xff]  ;;  %v8280_v14 = vld [vmem:[#allocation6 + $0x120] sm:$0xff] }
0x1145   :  { %1834 = vmatpush.msrb.mxu1 %v1754_v20  ;;  %v8294_v20 = vld [vmem:[#allocation6 + $0x178] sm:$0xff] }
0x11bb   :  { %v1421_v60 = vpop.f32.mrf.mxu0  ;;  %v1441_v42 = vpop.f32.mrf.mxu1 }
0x11bc   :  { %v1444_v55 = vadd.f32 %v1421_v60, %v8208_v45  ;;  %v1464_v15 = vadd.f32 %v8092_v19, %v1441_v42  ;;  %v1750_v42 = vld [vmem:[#allocation3 + $0xa8] sm:$0xff] }
0x11be   :  { %v6669_v56 = vmul.f32 -1.442695, %v1444_v55 }
0x11c0   :  { %6959 = vpow2.f32 %v6669_v56 }
0x11c6   :  { %v6960_v57 = vpop.eup %6959 }
0x11c7   :  { %v1448_v59 = vadd.f32 1.0, %v6960_v57 }
0x11c9   :  { %6961 = vrcp.f32 %v1448_v59  ;;  %v1460_v37 = vand.u32 2147483648, %v1448_v59  ;;  %v1458_v41 = vand.u32 2147483647, %v1448_v59  ;;  %vm1454_vm14 = vweird.f32 %v1448_v59 }
0x11cb   :  { %v1461_v39 = vor.u32 1.1754944e-38, %v1460_v37  ;;  %vm1459_vm2 = vcmp.eq.f32.partialorder %v1458_v41, 8.507059e+37  ;;  %v1751_v37 = vld [vmem:[#allocation3 + $0xb0] sm:$0xff]  ;;  %v1749_v41 = vld [vmem:[#allocation3 + $0xa0] sm:$0xff] }
0x11cf   :  { %v6962_v63 = vpop.eup %6961 }
0x11d0   :  { %v1450_v61 = vmul.f32 %v6962_v63, %v1448_v59  ;;  %vm1455_vm13 = vweird.f32 %v6962_v63 }
0x11d1   :  { %vm1456_vm15 = vmor %vm1454_vm14, %vm1455_vm13 }
0x11d2   :  { %v1451_v23 = vsub.f32 1.0, %v1450_v61 }
0x11d4   :  { %v1452_v38 = vmul.f32 %v6962_v63, %v1451_v23 }
0x11d6   :  { %v1453_v43 = vadd.f32 %v6962_v63, %v1452_v38  ;;  %v1752_v38 = vld [vmem:[#allocation3 + $0xb8] sm:$0xff] }
0x11d7   :  { %1835 = vmatpush.msrb.mxu1 %v1752_v38 }
0x11d8   :  { %v1457_v4 = vsel %vm1456_vm15, %v6962_v63, %v1453_v43  ;;  %v1747_v43 = vld [vmem:[#allocation3 + $0x90] sm:$0xff] }
0x11d9   :  { %v1462_v47 = vsel %vm1459_vm2, %v1461_v39, %v1457_v4  ;;  %v1748_v39 = vld [vmem:[#allocation3 + $0x98] sm:$0xff]  ;;  %1836 = vmatpush.msrb.mxu1 %v1750_v42  ;;  %v1745_v4 = vld [vmem:[#allocation3 + $0x80] sm:$0xff] }
0x11da   :  { %v1465_v30 = vmul.f32 %v1464_v15, %v1462_v47  ;;  %v1468_v1 = vsub.f32 1.0, %v1462_v47  ;;  %v1475_v46 = vmul.f32 %v1462_v47, %v1399_v17  ;;  %v1746_v15 = vld [vmem:[#allocation3 + $0x88] sm:$0xff] }
0x11db   :  { %1837 = vmatpush.msrb.mxu1 %v1748_v39 }
0x11dc   :  { %v1466_v49 = vadd.f32 %v1465_v30, %v8215_v48 }
0x11dd   :  { %1838 = vmatpush.msrb.mxu1 %v1746_v15 }
0x11de   :  { %6963 = vtanh.f32 %v1466_v49 }
0x11e4   :  { %v6964_v50 = vpop.eup %6963 }
0x11e5   :  { %1470 = vrot.lane.b32.xlu1 %v6964_v50, %s7491_s20 }
0x1257   :  { %v1471_v2 = vpop.permute.xlu1 %1470 }
0x1258   :  { %v1473_v52 = vmul.f32 %v1471_v2, %v1468_v1 }
0x125a   :  { %v1476_v34 = vadd.f32 %v1475_v46, %v1473_v52 }
0x125c   :  { %v8221_v53 = vsel %vm188_vm5, %v1476_v34, %v1399_v17  ;;  %v1753_v17 = vld [vmem:[#allocation3 + $0xc0] sm:$0xff] }
0x125d   :  { %1479 = vrot.lane.b32.xlu2 %v8221_v53, %s7491_s20  ;;  %1811 = vmatpush.msrb.mxu0 %v1753_v17  ;;  %v1559_v60 = vrot.slane %v8221_v53, 6  ;;  %v8284_v17 = vld [vmem:[#allocation6 + $0x110] sm:$0xff] }
0x125f   :  { %1812 = vmatpush.msrb.mxu0 %v1751_v37  ;;  %v8381_v37 = vld [vmem:[%s10074_s5 + $0x4] sm:$0x3] }
0x1260   :  { %v1786_v42 = vperm.slane %v8381_v37, 0 }
0x1261   :  { %1813 = vmatpush.msrb.mxu0 %v1749_v41 }
0x1263   :  { %1814 = vmatpush.msrb.mxu0 %v1747_v43 }
0x1265   :  { %1815 = vmatpush.msrb.mxu0 %v1745_v4 }
0x12b7   :  { %v1480_v62 = vpop.permute.xlu2 %1479 }
0x12b8   :  { %6670 = vmatmul.msk.f32.vlgmr.msrb.gmra.mxu2 %vm278_vm8, %v1480_v62  ;;  %6671 = vmatmul.msk.f32.vlgmr.msrb.gmra.mxu3 %vm278_vm8, %v1480_v62 }
0x12b9   :  { %1874 = vmatpush.msrb.mxu3 %v8294_v20 }
0x133b   :  { %v1500_v0 = vpop.f32.mrf.mxu2  ;;  %v1520_v31 = vpop.f32.mrf.mxu3 }
0x133c   :  { %v1524_v25 = vrot.slane %v1500_v0, 6  ;;  %v1546_v35 = vadd.f32 %v8092_v19, %v1520_v31 }
0x133e   :  { %v1526_v54 = vadd.f32 %v1524_v25, %v8208_v45  ;;  %v1548_v3 = vrot.slane %v1546_v35, 6 }
0x1340   :  { %v6672_v12 = vmul.f32 -1.442695, %v1526_v54 }
0x1342   :  { %6965 = vpow2.f32 %v6672_v12 }
0x1348   :  { %v6966_v27 = vpop.eup %6965 }
0x1349   :  { %v1530_v24 = vadd.f32 1.0, %v6966_v27 }
0x134b   :  { %6967 = vrcp.f32 %v1530_v24  ;;  %v1542_v32 = vand.u32 2147483648, %v1530_v24  ;;  %v1540_v22 = vand.u32 2147483647, %v1530_v24  ;;  %vm1536_vm9 = vweird.f32 %v1530_v24 }
0x134d   :  { %v1543_v44 = vor.u32 1.1754944e-38, %v1542_v32  ;;  %vm1541_vm12 = vcmp.eq.f32.partialorder %v1540_v22, 8.507059e+37 }
0x1351   :  { %v6968_v28 = vpop.eup %6967 }
0x1352   :  { %v1532_v29 = vmul.f32 %v6968_v28, %v1530_v24  ;;  %vm1537_vm6 = vweird.f32 %v6968_v28 }
0x1353   :  { %vm1538_vm10 = vmor %vm1536_vm9, %vm1537_vm6 }
0x1354   :  { %v1533_v26 = vsub.f32 1.0, %v1532_v29 }
0x1356   :  { %v1534_v33 = vmul.f32 %v6968_v28, %v1533_v26 }
0x1358   :  { %v1535_v36 = vadd.f32 %v6968_v28, %v1534_v33 }
0x135a   :  { %v1539_v8 = vsel %vm1538_vm10, %v6968_v28, %v1535_v36 }
0x135b   :  { %v1544_v5 = vsel %vm1541_vm12, %v1543_v44, %v1539_v8  ;;  %v8249_v44 = vld [vmem:[#allocation6 + $0x170] sm:$0xff] }
0x135c   :  { %v1550_v40 = vmul.f32 %v1548_v3, %v1544_v5  ;;  %v1553_v55 = vsub.f32 1.0, %v1544_v5  ;;  %v1561_v59 = vmul.f32 %v1559_v60, %v1544_v5  ;;  %1854 = vmatpush.msrb.mxu2 %v8249_v44  ;;  %v8255_v8 = vld [vmem:[#allocation6 + $0x150] sm:$0xff]  ;;  %v8259_v3 = vld [vmem:[#allocation6 + $0x140] sm:$0xff] }
0x135e   :  { %v1551_v16 = vadd.f32 %v1550_v40, %v8215_v48 }
0x1360   :  { %6969 = vtanh.f32 %v1551_v16 }
0x1366   :  { %v6970_v6 = vpop.eup %6969 }
0x1367   :  { %1555 = vrot.lane.b32.xlu0 %v6970_v6, %s7491_s20 }
0x13d9   :  { %v1556_v56 = vpop.permute.xlu0 %1555 }
0x13da   :  { %v1558_v57 = vmul.f32 %v1556_v56, %v1553_v55  ;;  %v8301_v55 = vld [vmem:[#allocation6 + $0x158] sm:$0xff]  ;;  %v8306_v56 = vld [vmem:[#allocation6 + $0x148] sm:$0xff] }
0x13dc   :  { %v1562_v63 = vadd.f32 %v1561_v59, %v1558_v57  ;;  %v8311_v57 = vld [vmem:[#allocation6 + $0x138] sm:$0xff]  ;;  %v8316_v59 = vld [vmem:[#allocation6 + $0x128] sm:$0xff] }
0x13de   :  { %v8234_v61 = vsel %vm188_vm5, %v1562_v63, %v1559_v60  ;;  %v8296_v60 = vld [vmem:[#allocation6 + $0x168] sm:$0xff]  ;;  %v8321_v63 = vld [vmem:[#allocation6 + $0x118] sm:$0xff] }
0x13df   :  { %v1565_v23 = vrot.slane %v8234_v61, 2  ;;  %v1646_v26 = vrot.slane %v8234_v61, 6  ;;  %v1741_v9 = vsel %vm955_vm3, %v8221_v53, %v8234_v61  ;;  %v8288_v53 = vld [vmem:[#allocation6 + $0x100] sm:$0xff]  ;;  %1875 = vmatpush.msrb.mxu3 %v8296_v60  ;;  %v8326_v61 = vld [vmem:[#allocation6 + $0x108] sm:$0xff] }
0x13e1   :  { %1566 = vrot.lane.b32.xlu1 %v1565_v23, %s7491_s20  ;;  %1876 = vmatpush.msrb.mxu3 %v8301_v55 }
0x13e3   :  { %1877 = vmatpush.msrb.mxu3 %v8306_v56 }
0x13e5   :  { %1878 = vmatpush.msrb.mxu3 %v8311_v57 }
0x13e7   :  { %1879 = vmatpush.msrb.mxu3 %v8316_v59 }
0x13e9   :  { %1792 = vrot.lane.b32.xlu1 %v8200_v18, %s7491_s20  ;;  %1880 = vmatpush.msrb.mxu3 %v8321_v63 }
0x13eb   :  { %1881 = vmatpush.msrb.mxu3 %v8326_v61 }
0x1453   :  { %v1567_v47 = vpop.permute.xlu1 %1566 }
0x1454   :  { %6673 = vmatmul.msk.f32.vlgmr.msra.gmra.mxu0 %vm278_vm8, %v1567_v47  ;;  %6674 = vmatmul.msk.f32.vlgmr.msra.gmra.mxu1 %vm278_vm8, %v1567_v47 }
0x1455   :  { %1932 = vmatpush.msra.mxu0 %v8249_v44  ;;  %1952 = vmatpush.msra.mxu1 %v8294_v20 }
0x1457   :  { %1953 = vmatpush.msra.mxu1 %v8296_v60 }
0x1459   :  { %1954 = vmatpush.msra.mxu1 %v8301_v55 }
0x145b   :  { %v1793_v18 = vpop.permute.xlu1 %1792  ;;  %1955 = vmatpush.msra.mxu1 %v8306_v56 }
0x145c   :  { %6681 = vmatmul.msk.f32.vlgmr.msrb.gmra.mxu0 %vm278_vm8, %v1793_v18  ;;  %6683 = vmatmul.msk.f32.vlgmr.msrb.gmra.mxu1 %vm278_vm8, %v1793_v18 }
0x145d   :  { %1956 = vmatpush.msra.mxu1 %v8311_v57 }
0x145f   :  { %1957 = vmatpush.msra.mxu1 %v8316_v59 }
0x1461   :  { %1958 = vmatpush.msra.mxu1 %v8321_v63 }
0x1463   :  { %1959 = vmatpush.msra.mxu1 %v8326_v61 }
0x1465   :  { %2126 = vmatpush.msrb.mxu1 %v8294_v20 }
0x1467   :  { %2127 = vmatpush.msrb.mxu1 %v8296_v60 }
0x1469   :  { %2128 = vmatpush.msrb.mxu1 %v8301_v55 }
0x146b   :  { %2129 = vmatpush.msrb.mxu1 %v8306_v56 }
0x146d   :  { %2130 = vmatpush.msrb.mxu1 %v8311_v57 }
0x146f   :  { %2131 = vmatpush.msrb.mxu1 %v8316_v59 }
0x1471   :  { %2132 = vmatpush.msrb.mxu1 %v8321_v63 }
0x1473   :  { %2133 = vmatpush.msrb.mxu1 %v8326_v61 }
0x14d1   :  { %v1587_v30 = vpop.f32.mrf.mxu0  ;;  %v1607_v62 = vpop.f32.mrf.mxu1 }
0x14d2   :  { %v1611_v49 = vrot.slane %v1587_v30, 4  ;;  %v1633_v27 = vadd.f32 %v8092_v19, %v1607_v62  ;;  %v8251_v19 = vld [vmem:[#allocation6 + $0x160] sm:$0xff] }
0x14d3   :  { %1855 = vmatpush.msrb.mxu2 %v8251_v19  ;;  %1933 = vmatpush.msra.mxu0 %v8251_v19 }
0x14d4   :  { %v1613_v50 = vadd.f32 %v1611_v49, %v8208_v45  ;;  %v1635_v31 = vrot.slane %v1633_v27, 4 }
0x14d5   :  { %1856 = vmatpush.msrb.mxu2 %v8255_v8  ;;  %1934 = vmatpush.msra.mxu0 %v8255_v8 }
0x14d6   :  { %v6675_v1 = vmul.f32 -1.442695, %v1613_v50 }
0x14d7   :  { %1857 = vmatpush.msrb.mxu2 %v8259_v3  ;;  %1935 = vmatpush.msra.mxu0 %v8259_v3 }
0x14d8   :  { %6971 = vpow2.f32 %v6675_v1 }
0x14d9   :  { %1858 = vmatpush.msrb.mxu2 %v8278_v13  ;;  %1936 = vmatpush.msra.mxu0 %v8278_v13  ;;  %v1817_v39 = vpop.f32.mrf.mxu0 }
0x14da   :  { %v8387_v15 = vadd.f32 %v1817_v39, %v1786_v42 }
0x14db   :  { %1859 = vmatpush.msrb.mxu2 %v8280_v14  ;;  %1937 = vmatpush.msra.mxu0 %v8280_v14 }
0x14dd   :  { %1860 = vmatpush.msrb.mxu2 %v8284_v17  ;;  %1938 = vmatpush.msra.mxu0 %v8284_v17 }
0x14de   :  { %v6972_v2 = vpop.eup %6971 }
0x14df   :  { %v1617_v46 = vadd.f32 1.0, %v6972_v2  ;;  %1861 = vmatpush.msrb.mxu2 %v8288_v53  ;;  %1939 = vmatpush.msra.mxu0 %v8288_v53 }
0x14e1   :  { %6973 = vrcp.f32 %v1617_v46  ;;  %v1629_v25 = vand.u32 2147483648, %v1617_v46  ;;  %v1627_v12 = vand.u32 2147483647, %v1617_v46  ;;  %vm1623_vm14 = vweird.f32 %v1617_v46  ;;  %2106 = vmatpush.msrb.mxu0 %v8249_v44 }
0x14e3   :  { %v1630_v28 = vor.u32 1.1754944e-38, %v1629_v25  ;;  %vm1628_vm2 = vcmp.eq.f32.partialorder %v1627_v12, 8.507059e+37  ;;  %2107 = vmatpush.msrb.mxu0 %v8251_v19 }
0x14e5   :  { %2108 = vmatpush.msrb.mxu0 %v8255_v8 }
0x14e7   :  { %v6974_v52 = vpop.eup %6973  ;;  %2109 = vmatpush.msrb.mxu0 %v8259_v3 }
0x14e8   :  { %v1619_v34 = vmul.f32 %v6974_v52, %v1617_v46  ;;  %vm1624_vm13 = vweird.f32 %v6974_v52 }
0x14e9   :  { %vm1625_vm15 = vmor %vm1623_vm14, %vm1624_vm13  ;;  %2110 = vmatpush.msrb.mxu0 %v8278_v13 }
0x14ea   :  { %v1620_v0 = vsub.f32 1.0, %v1619_v34 }
0x14eb   :  { %2111 = vmatpush.msrb.mxu0 %v8280_v14 }
0x14ec   :  { %v1621_v54 = vmul.f32 %v6974_v52, %v1620_v0 }
0x14ed   :  { %2112 = vmatpush.msrb.mxu0 %v8284_v17 }
0x14ee   :  { %v1622_v24 = vadd.f32 %v6974_v52, %v1621_v54  ;;  %v7274_v54 = vld [vmem:[%s10075_s6 + $0x1] ss:$0 sm:$0xff] }
0x14ef   :  { %2113 = vmatpush.msrb.mxu0 %v8288_v53 }
0x14f0   :  { %v1626_v29 = vsel %vm1625_vm15, %v6974_v52, %v1622_v24 }
0x14f1   :  { %v1631_v32 = vsel %vm1628_vm2, %v1630_v28, %v1626_v29 }
0x14f2   :  { %v1637_v33 = vmul.f32 %v1635_v31, %v1631_v32  ;;  %v1648_v22 = vmul.f32 %v1646_v26, %v1631_v32  ;;  %v1640_v5 = vsub.f32 1.0, %v1631_v32 }
0x14f4   :  { %v1638_v35 = vadd.f32 %v1637_v33, %v8215_v48  ;;  %v8397_v33 = vld [vmem:[%s10075_s6 + $0x2] ss:$0 sm:$0xff] }
0x14f6   :  { %6975 = vtanh.f32 %v1638_v35 }
0x14fc   :  { %v6976_v36 = vpop.eup %6975 }
0x14fd   :  { %1642 = vrot.lane.b32.xlu2 %v6976_v36, %s7491_s20 }
0x1557   :  { %v1643_v40 = vpop.permute.xlu2 %1642 }
0x1558   :  { %v1645_v16 = vmul.f32 %v1643_v40, %v1640_v5 }
0x155a   :  { %v1649_v6 = vadd.f32 %v1648_v22, %v1645_v16 }
0x155c   :  { %v8267_v7 = vsel %vm188_vm5, %v1649_v6, %v1646_v26 }
0x155d   :  { %v1652_v10 = vrot.slane %v8267_v7, 4  ;;  %v8275_v11 = vsel %vm957_vm4, %v1741_v9, %v8267_v7  ;;  %v1733_v31 = vrot.slane %v8267_v7, 6 }
0x155f   :  { %1653 = vrot.lane.b32.xlu0 %v1652_v10, %s7491_s20  ;;  %v1787_v10 = vperm.slane %v8381_v37, 1 }
0x15d1   :  { %v1654_v23 = vpop.permute.xlu0 %1653 }
0x15d2   :  { %6676 = vmatmul.msk.f32.vlgmr.msra.gmra.mxu2 %vm278_vm8, %v1654_v23  ;;  %6677 = vmatmul.msk.f32.vlgmr.msra.gmra.mxu3 %vm278_vm8, %v1654_v23 }
0x15d3   :  { %2019 = vmatpush.msra.mxu2 %v8249_v44  ;;  %2039 = vmatpush.msra.mxu3 %v8294_v20 }
0x15d5   :  { %2020 = vmatpush.msra.mxu2 %v8251_v19  ;;  %2040 = vmatpush.msra.mxu3 %v8296_v60 }
0x15d7   :  { %2021 = vmatpush.msra.mxu2 %v8255_v8  ;;  %2041 = vmatpush.msra.mxu3 %v8301_v55 }
0x15d9   :  { %2022 = vmatpush.msra.mxu2 %v8259_v3  ;;  %2042 = vmatpush.msra.mxu3 %v8306_v56 }
0x15da   :  { %1862 = vmatmul.f32.vlgmr.msrb.gmra.mxu2 %v7489_v21  ;;  %1882 = vmatmul.f32.vlgmr.msrb.gmra.mxu3 %v7489_v21 }
0x15db   :  { %2023 = vmatpush.msra.mxu2 %v8278_v13  ;;  %2043 = vmatpush.msra.mxu3 %v8311_v57 }
0x15dd   :  { %2024 = vmatpush.msra.mxu2 %v8280_v14  ;;  %2044 = vmatpush.msra.mxu3 %v8316_v59 }
0x15df   :  { %2025 = vmatpush.msra.mxu2 %v8284_v17  ;;  %2045 = vmatpush.msra.mxu3 %v8321_v63 }
0x15e1   :  { %2026 = vmatpush.msra.mxu2 %v8288_v53  ;;  %2046 = vmatpush.msra.mxu3 %v8326_v61 }
0x15e3   :  { %2193 = vmatpush.msrb.mxu2 %v8249_v44  ;;  %2213 = vmatpush.msrb.mxu3 %v8294_v20 }
0x15e5   :  { %2194 = vmatpush.msrb.mxu2 %v8251_v19  ;;  %2214 = vmatpush.msrb.mxu3 %v8296_v60 }
0x15e7   :  { %2195 = vmatpush.msrb.mxu2 %v8255_v8  ;;  %2215 = vmatpush.msrb.mxu3 %v8301_v55 }
0x15e9   :  { %2196 = vmatpush.msrb.mxu2 %v8259_v3  ;;  %2216 = vmatpush.msrb.mxu3 %v8306_v56 }
0x15eb   :  { %2197 = vmatpush.msrb.mxu2 %v8278_v13  ;;  %2217 = vmatpush.msrb.mxu3 %v8311_v57 }
0x15ed   :  { %2198 = vmatpush.msrb.mxu2 %v8280_v14  ;;  %2218 = vmatpush.msrb.mxu3 %v8316_v59 }
0x15ef   :  { %2199 = vmatpush.msrb.mxu2 %v8284_v17  ;;  %2219 = vmatpush.msrb.mxu3 %v8321_v63 }
0x15f1   :  { %2200 = vmatpush.msrb.mxu2 %v8288_v53  ;;  %2220 = vmatpush.msrb.mxu3 %v8326_v61 }
0x1655   :  { %v1674_v38 = vpop.f32.mrf.mxu2  ;;  %v1694_v52 = vpop.f32.mrf.mxu3 }
0x1656   :  { %v1698_v41 = vrot.slane %v1674_v38, 2  ;;  %v1720_v12 = vadd.f32 %v7274_v54, %v1694_v52 }
0x1658   :  { %v1700_v43 = vadd.f32 %v1698_v41, %v8208_v45  ;;  %v1722_v32 = vrot.slane %v1720_v12, 2  ;;  %v1840_v41 = vpop.f32.mrf.mxu1 }
0x165a   :  { %v6678_v4 = vmul.f32 -1.442695, %v1700_v43 }
0x165c   :  { %6977 = vpow2.f32 %v6678_v4 }
0x165d   :  { %v1863_v47 = vpop.f32.mrf.mxu2  ;;  %v1883_v36 = vpop.f32.mrf.mxu3 }
0x165e   :  { %v1886_v18 = vadd.f32 %v1863_v47, %v8387_v15  ;;  %v1906_v38 = vadd.f32 %v8397_v33, %v1883_v36  ;;  %v8404_v47 = vadd.f32 %v1840_v41, %v1787_v10 }
0x1660   :  { %v6685_v30 = vmul.f32 -1.442695, %v1886_v18 }
0x1662   :  { %v6978_v49 = vpop.eup %6977  ;;  %6979 = vpow2.f32 %v6685_v30 }
0x1663   :  { %v1704_v50 = vadd.f32 1.0, %v6978_v49 }
0x1665   :  { %6981 = vrcp.f32 %v1704_v50  ;;  %v1716_v62 = vand.u32 2147483648, %v1704_v50  ;;  %v1714_v25 = vand.u32 2147483647, %v1704_v50  ;;  %vm1710_vm9 = vweird.f32 %v1704_v50 }
0x1667   :  { %v1717_v29 = vor.u32 1.1754944e-38, %v1716_v62  ;;  %vm1715_vm12 = vcmp.eq.f32.partialorder %v1714_v25, 8.507059e+37 }
0x1668   :  { %v6980_v1 = vpop.eup %6979 }
0x1669   :  { %v1890_v2 = vadd.f32 1.0, %v6980_v1 }
0x166b   :  { %v6982_v46 = vpop.eup %6981  ;;  %6983 = vrcp.f32 %v1890_v2  ;;  %v1900_v5 = vand.u32 2147483647, %v1890_v2  ;;  %v1902_v40 = vand.u32 2147483648, %v1890_v2  ;;  %vm1896_vm14 = vweird.f32 %v1890_v2 }
0x166c   :  { %v1706_v45 = vmul.f32 %v6982_v46, %v1704_v50  ;;  %vm1711_vm6 = vweird.f32 %v6982_v46 }
0x166d   :  { %vm1712_vm10 = vmor %vm1710_vm9, %vm1711_vm6  ;;  %v1903_v43 = vor.u32 1.1754944e-38, %v1902_v40  ;;  %vm1901_vm2 = vcmp.eq.f32.partialorder %v1900_v5, 8.507059e+37 }
0x166e   :  { %v1707_v34 = vsub.f32 1.0, %v1706_v45 }
0x1670   :  { %v1708_v0 = vmul.f32 %v6982_v46, %v1707_v34 }
0x1671   :  { %v6984_v27 = vpop.eup %6983 }
0x1672   :  { %v1709_v24 = vadd.f32 %v6982_v46, %v1708_v0  ;;  %v1892_v28 = vmul.f32 %v6984_v27, %v1890_v2  ;;  %vm1897_vm13 = vweird.f32 %v6984_v27 }
0x1673   :  { %vm1898_vm15 = vmor %vm1896_vm14, %vm1897_vm13 }
0x1674   :  { %v1713_v26 = vsel %vm1712_vm10, %v6982_v46, %v1709_v24  ;;  %v1893_v22 = vsub.f32 1.0, %v1892_v28 }
0x1675   :  { %v1718_v35 = vsel %vm1715_vm12, %v1717_v29, %v1713_v26 }
0x1676   :  { %v1724_v16 = vmul.f32 %v1722_v32, %v1718_v35  ;;  %v1894_v6 = vmul.f32 %v6984_v27, %v1893_v22  ;;  %v1735_v9 = vmul.f32 %v1733_v31, %v1718_v35  ;;  %v1727_v50 = vsub.f32 1.0, %v1718_v35 }
0x1678   :  { %v1725_v7 = vadd.f32 %v1724_v16, %v8215_v48  ;;  %v1895_v23 = vadd.f32 %v6984_v27, %v1894_v6 }
0x167a   :  { %6985 = vtanh.f32 %v1725_v7  ;;  %v1899_v39 = vsel %vm1898_vm15, %v6984_v27, %v1895_v23 }
0x167b   :  { %v1904_v4 = vsel %vm1901_vm2, %v1903_v43, %v1899_v39 }
0x167c   :  { %v1907_v18 = vmul.f32 %v1906_v38, %v1904_v4  ;;  %v1910_v34 = vsub.f32 1.0, %v1904_v4  ;;  %v1916_v0 = vmul.f32 0.0, %v1904_v4 }
0x167e   :  { %v1908_v30 = vadd.f32 %v1907_v18, %v8404_v47 }
0x1680   :  { %v6986_v49 = vpop.eup %6985  ;;  %6987 = vtanh.f32 %v1908_v30 }
0x1681   :  { %1729 = vrot.lane.b32.xlu2 %v6986_v49, %s7491_s20 }
0x1686   :  { %v6988_v48 = vpop.eup %6987 }
0x1687   :  { %1912 = vrot.lane.b32.xlu0 %v6988_v48, %s7491_s20 }
0x16db   :  { %v1730_v1 = vpop.permute.xlu2 %1729 }
0x16dc   :  { %v1732_v2 = vmul.f32 %v1730_v1, %v1727_v50 }
0x16de   :  { %v1736_v46 = vadd.f32 %v1735_v9, %v1732_v2 }
0x16e0   :  { %v1737_v45 = vsel %vm188_vm5, %v1736_v46, %v1733_v31 }
0x16e1   :  { %v1743_v52 = vsel %vm959_vm11, %v8275_v11, %v1737_v45 }
0x16e2   :  { %1794 = vrot.lane.b32.xlu1 %v1743_v52, %s7491_s20 }
0x16f9   :  { %v1913_v62 = vpop.permute.xlu0 %1912 }
0x16fa   :  { %v1915_v25 = vmul.f32 %v1913_v62, %v1910_v34 }
0x16fc   :  { %v1917_v54 = vadd.f32 %v1916_v0, %v1915_v25 }
0x16fe   :  { %v8416_v12 = vsel %vm182_vm7, %v1917_v54, 0.0 }
0x16ff   :  { %1920 = vrot.lane.b32.xlu2 %v8416_v12, %s7491_s20  ;;  %v2000_v48 = vrot.slane %v8416_v12, 6 }
0x1754   :  { %v1795_v27 = vpop.permute.xlu1 %1794 }
0x1755   :  { %6682 = vmatmul.msk.f32.gmra.mxu0 %vm278_vm8, %v1795_v27  ;;  %6684 = vmatmul.msk.f32.gmra.mxu1 %vm278_vm8, %v1795_v27 }
0x1759   :  { %v1921_v11 = vpop.permute.xlu2 %1920 }
0x175d   :  { %6686 = vmatmul.msk.f32.vlgmr.msra.gmra.mxu0 %vm278_vm8, %v1921_v11  ;;  %6687 = vmatmul.msk.f32.vlgmr.msra.gmra.mxu1 %vm278_vm8, %v1921_v11 }
0x175e   :  { %2272 = vmatpush.msra.mxu0 %v8249_v44  ;;  %2292 = vmatpush.msra.mxu1 %v8294_v20 }
0x1760   :  { %2273 = vmatpush.msra.mxu0 %v8251_v19  ;;  %2293 = vmatpush.msra.mxu1 %v8296_v60 }
0x1762   :  { %2274 = vmatpush.msra.mxu0 %v8255_v8  ;;  %2294 = vmatpush.msra.mxu1 %v8301_v55 }
0x1764   :  { %2275 = vmatpush.msra.mxu0 %v8259_v3  ;;  %2295 = vmatpush.msra.mxu1 %v8306_v56 }
0x1766   :  { %2276 = vmatpush.msra.mxu0 %v8278_v13  ;;  %2296 = vmatpush.msra.mxu1 %v8311_v57 }
0x1768   :  { %2277 = vmatpush.msra.mxu0 %v8280_v14  ;;  %2297 = vmatpush.msra.mxu1 %v8316_v59 }
0x176a   :  { %2278 = vmatpush.msra.mxu0 %v8284_v17  ;;  %2298 = vmatpush.msra.mxu1 %v8321_v63 }
0x176c   :  { %2279 = vmatpush.msra.mxu0 %v8288_v53  ;;  %2299 = vmatpush.msra.mxu1 %v8326_v61 }
0x17d2   :  { %v8440_v24 = vpop.f32.mrf.mxu0  ;;  %v8443_v22 = vpop.f32.mrf.mxu1 }
0x17da   :  { %v1941_v28 = vpop.f32.mrf.mxu0  ;;  %v1961_v40 = vpop.f32.mrf.mxu1 }
0x17db   :  { %v1965_v29 = vrot.slane %v1941_v28, 6  ;;  %v1987_v23 = vadd.f32 %v8397_v33, %v1961_v40 }
0x17dd   :  { %v1967_v31 = vadd.f32 %v1965_v29, %v8387_v15  ;;  %v1989_v39 = vrot.slane %v1987_v23, 6 }
0x17df   :  { %v6688_v26 = vmul.f32 -1.442695, %v1967_v31 }
0x17e1   :  { %6989 = vpow2.f32 %v6688_v26 }
0x17e7   :  { %v6990_v32 = vpop.eup %6989 }
0x17e8   :  { %v1971_v35 = vadd.f32 1.0, %v6990_v32 }
0x17ea   :  { %6991 = vrcp.f32 %v1971_v35  ;;  %v1983_v6 = vand.u32 2147483648, %v1971_v35  ;;  %v1981_v7 = vand.u32 2147483647, %v1971_v35  ;;  %vm1977_vm9 = vweird.f32 %v1971_v35 }
0x17ec   :  { %v1984_v41 = vor.u32 1.1754944e-38, %v1983_v6  ;;  %vm1982_vm12 = vcmp.eq.f32.partialorder %v1981_v7, 8.507059e+37 }
0x17f0   :  { %v6992_v36 = vpop.eup %6991 }
0x17f1   :  { %v1973_v5 = vmul.f32 %v6992_v36, %v1971_v35  ;;  %vm1978_vm6 = vweird.f32 %v6992_v36 }
0x17f2   :  { %vm1979_vm10 = vmor %vm1977_vm9, %vm1978_vm6 }
0x17f3   :  { %v1974_v16 = vsub.f32 1.0, %v1973_v5 }
0x17f5   :  { %v1975_v9 = vmul.f32 %v6992_v36, %v1974_v16 }
0x17f7   :  { %v1976_v38 = vadd.f32 %v6992_v36, %v1975_v9 }
0x17f9   :  { %v1980_v43 = vsel %vm1979_vm10, %v6992_v36, %v1976_v38 }
0x17fa   :  { %v1985_v4 = vsel %vm1982_vm12, %v1984_v41, %v1980_v43 }
0x17fb   :  { %v1991_v18 = vmul.f32 %v1989_v39, %v1985_v4  ;;  %v1994_v50 = vsub.f32 1.0, %v1985_v4  ;;  %v2002_v2 = vmul.f32 %v2000_v48, %v1985_v4 }
0x17fd   :  { %v1992_v30 = vadd.f32 %v1991_v18, %v8404_v47 }
0x17ff   :  { %6993 = vtanh.f32 %v1992_v30 }
0x1805   :  { %v6994_v49 = vpop.eup %6993 }
0x1806   :  { %1996 = vrot.lane.b32.xlu0 %v6994_v49, %s7491_s20 }
0x1878   :  { %v1997_v1 = vpop.permute.xlu0 %1996 }
0x1879   :  { %v1999_v46 = vmul.f32 %v1997_v1, %v1994_v50 }
0x187b   :  { %v2003_v45 = vadd.f32 %v2002_v2, %v1999_v46 }
0x187d   :  { %v2004_v52 = vsel %vm182_vm7, %v2003_v45, %v2000_v48 }
0x187e   :  { %v2006_v34 = vrot.slane %v2004_v52, 2  ;;  %v2087_v23 = vrot.slane %v2004_v52, 6  ;;  %v2519_v1 = vsel %vm955_vm3, %v8416_v12, %v2004_v52 }
0x1880   :  { %2007 = vrot.lane.b32.xlu1 %v2006_v34, %s7491_s20 }
0x18f2   :  { %v2008_v62 = vpop.permute.xlu1 %2007 }
0x18f3   :  { %6689 = vmatmul.msk.f32.vlgmr.msra.gmra.mxu2 %vm278_vm8, %v2008_v62  ;;  %6690 = vmatmul.msk.f32.vlgmr.msra.gmra.mxu3 %vm278_vm8, %v2008_v62 }
0x18f4   :  { %2359 = vmatpush.msra.mxu2 %v8249_v44  ;;  %2379 = vmatpush.msra.mxu3 %v8294_v20 }
0x18f6   :  { %2360 = vmatpush.msra.mxu2 %v8251_v19  ;;  %2380 = vmatpush.msra.mxu3 %v8296_v60 }
0x18f8   :  { %2361 = vmatpush.msra.mxu2 %v8255_v8  ;;  %2381 = vmatpush.msra.mxu3 %v8301_v55 }
0x18fa   :  { %2362 = vmatpush.msra.mxu2 %v8259_v3  ;;  %2382 = vmatpush.msra.mxu3 %v8306_v56 }
0x18fc   :  { %2363 = vmatpush.msra.mxu2 %v8278_v13  ;;  %2383 = vmatpush.msra.mxu3 %v8311_v57 }
0x18fe   :  { %2364 = vmatpush.msra.mxu2 %v8280_v14  ;;  %2384 = vmatpush.msra.mxu3 %v8316_v59 }
0x1900   :  { %2365 = vmatpush.msra.mxu2 %v8284_v17  ;;  %2385 = vmatpush.msra.mxu3 %v8321_v63 }
0x1902   :  { %2366 = vmatpush.msra.mxu2 %v8288_v53  ;;  %2386 = vmatpush.msra.mxu3 %v8326_v61 }
0x1976   :  { %v2028_v0 = vpop.f32.mrf.mxu2  ;;  %v2048_v26 = vpop.f32.mrf.mxu3 }
0x1977   :  { %v2052_v25 = vrot.slane %v2028_v0, 4  ;;  %v2074_v40 = vadd.f32 %v8397_v33, %v2048_v26 }
0x1979   :  { %v2054_v54 = vadd.f32 %v2052_v25, %v8387_v15  ;;  %v2076_v7 = vrot.slane %v2074_v40, 4 }
0x197b   :  { %v6691_v27 = vmul.f32 -1.442695, %v2054_v54 }
0x197d   :  { %6995 = vpow2.f32 %v6691_v27 }
0x1983   :  { %v6996_v11 = vpop.eup %6995 }
0x1984   :  { %v2058_v28 = vadd.f32 1.0, %v6996_v11 }
0x1986   :  { %6997 = vrcp.f32 %v2058_v28  ;;  %v2070_v35 = vand.u32 2147483648, %v2058_v28  ;;  %v2068_v5 = vand.u32 2147483647, %v2058_v28  ;;  %vm2064_vm14 = vweird.f32 %v2058_v28 }
0x1988   :  { %v2071_v6 = vor.u32 1.1754944e-38, %v2070_v35  ;;  %vm2069_vm2 = vcmp.eq.f32.partialorder %v2068_v5, 8.507059e+37 }
0x198c   :  { %v6998_v29 = vpop.eup %6997 }
0x198d   :  { %v2060_v31 = vmul.f32 %v6998_v29, %v2058_v28  ;;  %vm2065_vm13 = vweird.f32 %v6998_v29 }
0x198e   :  { %vm2066_vm15 = vmor %vm2064_vm14, %vm2065_vm13 }
0x198f   :  { %v2061_v32 = vsub.f32 1.0, %v2060_v31 }
0x1991   :  { %v2062_v36 = vmul.f32 %v6998_v29, %v2061_v32 }
0x1993   :  { %v2063_v16 = vadd.f32 %v6998_v29, %v2062_v36 }
0x1995   :  { %v2067_v9 = vsel %vm2066_vm15, %v6998_v29, %v2063_v16 }
0x1996   :  { %v2072_v38 = vsel %vm2069_vm2, %v2071_v6, %v2067_v9 }
0x1997   :  { %v2078_v41 = vmul.f32 %v2076_v7, %v2072_v38  ;;  %v2089_v43 = vmul.f32 %v2087_v23, %v2072_v38  ;;  %v2081_v18 = vsub.f32 1.0, %v2072_v38 }
0x1999   :  { %v2079_v39 = vadd.f32 %v2078_v41, %v8404_v47 }
0x199b   :  { %6999 = vtanh.f32 %v2079_v39 }
0x19a1   :  { %v7000_v4 = vpop.eup %6999 }
0x19a2   :  { %2083 = vrot.lane.b32.xlu2 %v7000_v4, %s7491_s20 }
0x19fc   :  { %v2084_v30 = vpop.permute.xlu2 %2083 }
0x19fd   :  { %v2086_v49 = vmul.f32 %v2084_v30, %v2081_v18 }
0x19ff   :  { %v2090_v48 = vadd.f32 %v2089_v43, %v2086_v49  ;;  %v8520_v49 = vadd.f32 %v8443_v22, %v1787_v10 }
0x1a01   :  { %v2091_v50 = vsel %vm182_vm7, %v2090_v48, %v2087_v23 }
0x1a02   :  { %v2093_v2 = vrot.slane %v2091_v50, 4  ;;  %v2520_v46 = vsel %vm957_vm4, %v2519_v1, %v2091_v50  ;;  %v2174_v52 = vrot.slane %v2091_v50, 6 }
0x1a04   :  { %2094 = vrot.lane.b32.xlu0 %v2093_v2, %s7491_s20 }
0x1a76   :  { %v2095_v45 = vpop.permute.xlu0 %2094 }
0x1a77   :  { %6692 = vmatmul.msk.f32.vlgmr.msrb.gmra.mxu0 %vm278_vm8, %v2095_v45  ;;  %6693 = vmatmul.msk.f32.vlgmr.msrb.gmra.mxu1 %vm278_vm8, %v2095_v45 }
0x1a78   :  { %2446 = vmatpush.msrb.mxu0 %v8249_v44  ;;  %2466 = vmatpush.msrb.mxu1 %v8294_v20 }
0x1a7a   :  { %2447 = vmatpush.msrb.mxu0 %v8251_v19  ;;  %2467 = vmatpush.msrb.mxu1 %v8296_v60 }
0x1a7c   :  { %2448 = vmatpush.msrb.mxu0 %v8255_v8  ;;  %2468 = vmatpush.msrb.mxu1 %v8301_v55 }
0x1a7e   :  { %2449 = vmatpush.msrb.mxu0 %v8259_v3  ;;  %2469 = vmatpush.msrb.mxu1 %v8306_v56 }
0x1a80   :  { %2450 = vmatpush.msrb.mxu0 %v8278_v13  ;;  %2470 = vmatpush.msrb.mxu1 %v8311_v57 }
0x1a82   :  { %2451 = vmatpush.msrb.mxu0 %v8280_v14  ;;  %2471 = vmatpush.msrb.mxu1 %v8316_v59 }
0x1a84   :  { %2452 = vmatpush.msrb.mxu0 %v8284_v17  ;;  %2472 = vmatpush.msrb.mxu1 %v8321_v63 }
0x1a86   :  { %2453 = vmatpush.msrb.mxu0 %v8288_v53  ;;  %2473 = vmatpush.msrb.mxu1 %v8326_v61 }
0x1af4   :  { %v2115_v44 = vpop.f32.mrf.mxu0  ;;  %v2135_v55 = vpop.f32.mrf.mxu1 }
0x1af5   :  { %v2139_v19 = vrot.slane %v2115_v44, 2  ;;  %v2161_v53 = vadd.f32 %v8397_v33, %v2135_v55 }
0x1af7   :  { %v2141_v8 = vadd.f32 %v2139_v19, %v8387_v15  ;;  %v2163_v12 = vrot.slane %v2161_v53, 2 }
0x1af9   :  { %v6694_v3 = vmul.f32 -1.442695, %v2141_v8 }
0x1afb   :  { %7001 = vpow2.f32 %v6694_v3 }
0x1b01   :  { %v7002_v13 = vpop.eup %7001 }
0x1b02   :  { %v2145_v20 = vadd.f32 1.0, %v7002_v13 }
0x1b04   :  { %7003 = vrcp.f32 %v2145_v20  ;;  %v2157_v17 = vand.u32 2147483648, %v2145_v20  ;;  %v2155_v59 = vand.u32 2147483647, %v2145_v20  ;;  %vm2151_vm9 = vweird.f32 %v2145_v20 }
0x1b06   :  { %v2158_v61 = vor.u32 1.1754944e-38, %v2157_v17  ;;  %vm2156_vm12 = vcmp.eq.f32.partialorder %v2155_v59, 8.507059e+37 }
0x1b0a   :  { %v7004_v14 = vpop.eup %7003 }
0x1b0b   :  { %v2147_v60 = vmul.f32 %v7004_v14, %v2145_v20  ;;  %vm2152_vm6 = vweird.f32 %v7004_v14 }
0x1b0c   :  { %vm2153_vm10 = vmor %vm2151_vm9, %vm2152_vm6 }
0x1b0d   :  { %v2148_v56 = vsub.f32 1.0, %v2147_v60 }
0x1b0f   :  { %v2149_v57 = vmul.f32 %v7004_v14, %v2148_v56 }
0x1b11   :  { %v2150_v63 = vadd.f32 %v7004_v14, %v2149_v57 }
0x1b13   :  { %v2154_v15 = vsel %vm2153_vm10, %v7004_v14, %v2150_v63 }
0x1b14   :  { %v2159_v34 = vsel %vm2156_vm12, %v2158_v61, %v2154_v15 }
0x1b15   :  { %v2165_v62 = vmul.f32 %v2163_v12, %v2159_v34  ;;  %v2176_v0 = vmul.f32 %v2174_v52, %v2159_v34  ;;  %v2168_v27 = vsub.f32 1.0, %v2159_v34 }
0x1b17   :  { %v2166_v25 = vadd.f32 %v2165_v62, %v8404_v47  ;;  %v8513_v47 = vadd.f32 %v8440_v24, %v1786_v42 }
0x1b19   :  { %7005 = vtanh.f32 %v2166_v25 }
0x1b1f   :  { %v7006_v54 = vpop.eup %7005 }
0x1b20   :  { %2170 = vrot.lane.b32.xlu1 %v7006_v54, %s7491_s20  ;;  %v2540_v54 = vld [vmem:[#allocation3 + $0x170] sm:$0xff] }
0x1b92   :  { %v2171_v11 = vpop.permute.xlu1 %2170 }
0x1b93   :  { %v2173_v28 = vmul.f32 %v2171_v11, %v2168_v27  ;;  %v2541_v27 = vld [vmem:[#allocation3 + $0x178] sm:$0xff]  ;;  %v2538_v11 = vld [vmem:[#allocation3 + $0x160] sm:$0xff] }
0x1b95   :  { %v2177_v29 = vadd.f32 %v2176_v0, %v2173_v28  ;;  %v2539_v28 = vld [vmem:[#allocation3 + $0x168] sm:$0xff] }
0x1b97   :  { %v2178_v31 = vsel %vm182_vm7, %v2177_v29, %v2174_v52  ;;  %v2536_v29 = vld [vmem:[#allocation3 + $0x150] sm:$0xff] }
0x1b98   :  { %v2180_v26 = vrot.slane %v2178_v31, 6  ;;  %v8505_v32 = vsel %vm959_vm11, %v2520_v46, %v2178_v31  ;;  %v2537_v31 = vld [vmem:[#allocation3 + $0x158] sm:$0xff] }
0x1b9a   :  { %2181 = vrot.lane.b32.xlu2 %v2180_v26, %s7491_s20 }
0x1bf4   :  { %v2182_v35 = vpop.permute.xlu2 %2181 }
0x1bf5   :  { %6695 = vmatmul.msk.f32.vlgmr.msrb.gmra.mxu2 %vm278_vm8, %v2182_v35  ;;  %6696 = vmatmul.msk.f32.vlgmr.msrb.gmra.mxu3 %vm278_vm8, %v2182_v35  ;;  %v2535_v35 = vld [vmem:[#allocation3 + $0x148] sm:$0xff] }
0x1bf6   :  { %2589 = vmatpush.msrb.mxu2 %v2540_v54  ;;  %2612 = vmatpush.msrb.mxu3 %v2541_v27 }
0x1bf8   :  { %2590 = vmatpush.msrb.mxu2 %v2538_v11  ;;  %2613 = vmatpush.msrb.mxu3 %v2539_v28 }
0x1bfa   :  { %2591 = vmatpush.msrb.mxu2 %v2536_v29  ;;  %2614 = vmatpush.msrb.mxu3 %v2537_v31  ;;  %v8583_v29 = vld [vmem:[#allocation6 + $0x1b0] sm:$0xff]  ;;  %v8585_v31 = vld [vmem:[#allocation6 + $0x1a0] sm:$0xff] }
0x1bfc   :  { %2615 = vmatpush.msrb.mxu3 %v2535_v35  ;;  %v8599_v35 = vld [vmem:[#allocation6 + $0x1f8] sm:$0xff] }
0x1c78   :  { %v2202_v36 = vpop.f32.mrf.mxu2  ;;  %v2222_v39 = vpop.f32.mrf.mxu3 }
0x1c79   :  { %v2225_v5 = vadd.f32 %v2202_v36, %v8513_v47  ;;  %v2245_v18 = vadd.f32 %v8397_v33, %v2222_v39  ;;  %v2531_v39 = vld [vmem:[#allocation3 + $0x128] sm:$0xff] }
0x1c7b   :  { %v6697_v40 = vmul.f32 -1.442695, %v2225_v5 }
0x1c7d   :  { %7007 = vpow2.f32 %v6697_v40 }
0x1c83   :  { %v7008_v16 = vpop.eup %7007 }
0x1c84   :  { %v2229_v6 = vadd.f32 1.0, %v7008_v16 }
0x1c86   :  { %7009 = vrcp.f32 %v2229_v6  ;;  %v2241_v38 = vand.u32 2147483648, %v2229_v6  ;;  %v2239_v43 = vand.u32 2147483647, %v2229_v6  ;;  %vm2235_vm14 = vweird.f32 %v2229_v6 }
0x1c88   :  { %v2242_v42 = vor.u32 1.1754944e-38, %v2241_v38  ;;  %vm2240_vm2 = vcmp.eq.f32.partialorder %v2239_v43, 8.507059e+37  ;;  %v2532_v38 = vld [vmem:[#allocation3 + $0x130] sm:$0xff]  ;;  %v2530_v43 = vld [vmem:[#allocation3 + $0x120] sm:$0xff] }
0x1c8c   :  { %v7010_v9 = vpop.eup %7009 }
0x1c8d   :  { %v2231_v7 = vmul.f32 %v7010_v9, %v2229_v6  ;;  %vm2236_vm13 = vweird.f32 %v7010_v9 }
0x1c8e   :  { %vm2237_vm15 = vmor %vm2235_vm14, %vm2236_vm13 }
0x1c8f   :  { %v2232_v23 = vsub.f32 1.0, %v2231_v7 }
0x1c91   :  { %v2233_v41 = vmul.f32 %v7010_v9, %v2232_v23 }
0x1c93   :  { %v2234_v4 = vadd.f32 %v7010_v9, %v2233_v41  ;;  %v2533_v41 = vld [vmem:[#allocation3 + $0x138] sm:$0xff] }
0x1c94   :  { %2616 = vmatpush.msrb.mxu3 %v2533_v41 }
0x1c95   :  { %v2238_v24 = vsel %vm2237_vm15, %v7010_v9, %v2234_v4  ;;  %v2528_v4 = vld [vmem:[#allocation3 + $0x110] sm:$0xff] }
0x1c96   :  { %v2243_v30 = vsel %vm2240_vm2, %v2242_v42, %v2238_v24  ;;  %v2529_v42 = vld [vmem:[#allocation3 + $0x118] sm:$0xff]  ;;  %2617 = vmatpush.msrb.mxu3 %v2531_v39  ;;  %v2526_v24 = vld [vmem:[#allocation3 + $0x100] sm:$0xff] }
0x1c97   :  { %v2246_v48 = vmul.f32 %v2245_v18, %v2243_v30  ;;  %v2249_v2 = vsub.f32 1.0, %v2243_v30  ;;  %v2256_v45 = vmul.f32 %v2243_v30, %v2180_v26  ;;  %v2527_v18 = vld [vmem:[#allocation3 + $0x108] sm:$0xff] }
0x1c98   :  { %2618 = vmatpush.msrb.mxu3 %v2529_v42 }
0x1c99   :  { %v2247_v50 = vadd.f32 %v2246_v48, %v8520_v49 }
0x1c9a   :  { %2619 = vmatpush.msrb.mxu3 %v2527_v18 }
0x1c9b   :  { %7011 = vtanh.f32 %v2247_v50 }
0x1ca1   :  { %v7012_v1 = vpop.eup %7011 }
0x1ca2   :  { %2251 = vrot.lane.b32.xlu0 %v7012_v1, %s7491_s20 }
0x1d14   :  { %v2252_v46 = vpop.permute.xlu0 %2251 }
0x1d15   :  { %v2254_v44 = vmul.f32 %v2252_v46, %v2249_v2 }
0x1d17   :  { %v2257_v19 = vadd.f32 %v2256_v45, %v2254_v44 }
0x1d19   :  { %v8526_v8 = vsel %vm188_vm5, %v2257_v19, %v2180_v26  ;;  %v2534_v26 = vld [vmem:[#allocation3 + $0x140] sm:$0xff] }
0x1d1a   :  { %2260 = vrot.lane.b32.xlu1 %v8526_v8, %s7491_s20  ;;  %2592 = vmatpush.msrb.mxu2 %v2534_v26  ;;  %v2340_v36 = vrot.slane %v8526_v8, 6  ;;  %v8589_v26 = vld [vmem:[#allocation6 + $0x190] sm:$0xff] }
0x1d1c   :  { %2593 = vmatpush.msrb.mxu2 %v2532_v38 }
0x1d1e   :  { %2594 = vmatpush.msrb.mxu2 %v2530_v43 }
0x1d20   :  { %2595 = vmatpush.msrb.mxu2 %v2528_v4 }
0x1d22   :  { %2596 = vmatpush.msrb.mxu2 %v2526_v24 }
0x1d8c   :  { %v2261_v37 = vpop.permute.xlu1 %2260 }
0x1d8d   :  { %6698 = vmatmul.msk.f32.vlgmr.msra.gmra.mxu0 %vm278_vm8, %v2261_v37  ;;  %6699 = vmatmul.msk.f32.vlgmr.msra.gmra.mxu1 %vm278_vm8, %v2261_v37 }
0x1d8e   :  { %2655 = vmatpush.msra.mxu1 %v8599_v35 }
0x1e0a   :  { %v2281_v10 = vpop.f32.mrf.mxu0  ;;  %v2301_v56 = vpop.f32.mrf.mxu1 }
0x1e0b   :  { %v2305_v22 = vrot.slane %v2281_v10, 6  ;;  %v2327_v63 = vadd.f32 %v8397_v33, %v2301_v56 }
0x1e0d   :  { %v2307_v3 = vadd.f32 %v2305_v22, %v8513_v47  ;;  %v2329_v52 = vrot.slane %v2327_v63, 6 }
0x1e0f   :  { %v6700_v13 = vmul.f32 -1.442695, %v2307_v3 }
0x1e11   :  { %7013 = vpow2.f32 %v6700_v13 }
0x1e17   :  { %v7014_v20 = vpop.eup %7013 }
0x1e18   :  { %v2311_v14 = vadd.f32 1.0, %v7014_v20 }
0x1e1a   :  { %7015 = vrcp.f32 %v2311_v14  ;;  %v2323_v57 = vand.u32 2147483648, %v2311_v14  ;;  %v2321_v53 = vand.u32 2147483647, %v2311_v14  ;;  %vm2317_vm9 = vweird.f32 %v2311_v14 }
0x1e1c   :  { %v2324_v15 = vor.u32 1.1754944e-38, %v2323_v57  ;;  %vm2322_vm12 = vcmp.eq.f32.partialorder %v2321_v53, 8.507059e+37 }
0x1e20   :  { %v7016_v60 = vpop.eup %7015 }
0x1e21   :  { %v2313_v55 = vmul.f32 %v7016_v60, %v2311_v14  ;;  %vm2318_vm6 = vweird.f32 %v7016_v60 }
0x1e22   :  { %vm2319_vm10 = vmor %vm2317_vm9, %vm2318_vm6 }
0x1e23   :  { %v2314_v17 = vsub.f32 1.0, %v2313_v55 }
0x1e25   :  { %v2315_v59 = vmul.f32 %v7016_v60, %v2314_v17 }
0x1e27   :  { %v2316_v61 = vadd.f32 %v7016_v60, %v2315_v59 }
0x1e29   :  { %v2320_v12 = vsel %vm2319_vm10, %v7016_v60, %v2316_v61 }
0x1e2a   :  { %v2325_v34 = vsel %vm2322_vm12, %v2324_v15, %v2320_v12  ;;  %v8554_v15 = vld [vmem:[#allocation6 + $0x1f0] sm:$0xff] }
0x1e2b   :  { %v2331_v62 = vmul.f32 %v2329_v52, %v2325_v34  ;;  %v2334_v5 = vsub.f32 1.0, %v2325_v34  ;;  %v2342_v6 = vmul.f32 %v2340_v36, %v2325_v34  ;;  %2635 = vmatpush.msra.mxu0 %v8554_v15  ;;  %v8560_v12 = vld [vmem:[#allocation6 + $0x1d0] sm:$0xff]  ;;  %v8564_v52 = vld [vmem:[#allocation6 + $0x1c0] sm:$0xff] }
0x1e2d   :  { %v2332_v0 = vadd.f32 %v2331_v62, %v8520_v49 }
0x1e2f   :  { %7017 = vtanh.f32 %v2332_v0 }
0x1e35   :  { %v7018_v25 = vpop.eup %7017 }
0x1e36   :  { %2336 = vrot.lane.b32.xlu2 %v7018_v25, %s7491_s20 }
0x1e90   :  { %v2337_v40 = vpop.permute.xlu2 %2336 }
0x1e91   :  { %v2339_v16 = vmul.f32 %v2337_v40, %v2334_v5  ;;  %v8606_v5 = vld [vmem:[#allocation6 + $0x1d8] sm:$0xff]  ;;  %v8611_v40 = vld [vmem:[#allocation6 + $0x1c8] sm:$0xff] }
0x1e93   :  { %v2343_v9 = vadd.f32 %v2342_v6, %v2339_v16  ;;  %v8616_v16 = vld [vmem:[#allocation6 + $0x1b8] sm:$0xff]  ;;  %v8621_v6 = vld [vmem:[#allocation6 + $0x1a8] sm:$0xff] }
0x1e95   :  { %v8539_v7 = vsel %vm188_vm5, %v2343_v9, %v2340_v36  ;;  %v8601_v36 = vld [vmem:[#allocation6 + $0x1e8] sm:$0xff]  ;;  %v8626_v9 = vld [vmem:[#allocation6 + $0x198] sm:$0xff] }
0x1e96   :  { %v2346_v23 = vrot.slane %v8539_v7, 2  ;;  %v2427_v17 = vrot.slane %v8539_v7, 6  ;;  %v2522_v27 = vsel %vm955_vm3, %v8526_v8, %v8539_v7  ;;  %v8593_v8 = vld [vmem:[#allocation6 + $0x180] sm:$0xff]  ;;  %2656 = vmatpush.msra.mxu1 %v8601_v36  ;;  %v8631_v7 = vld [vmem:[#allocation6 + $0x188] sm:$0xff] }
0x1e98   :  { %2347 = vrot.lane.b32.xlu0 %v2346_v23, %s7491_s20  ;;  %2657 = vmatpush.msra.mxu1 %v8606_v5 }
0x1e9a   :  { %2658 = vmatpush.msra.mxu1 %v8611_v40 }
0x1e9c   :  { %2659 = vmatpush.msra.mxu1 %v8616_v16 }
0x1e9e   :  { %2660 = vmatpush.msra.mxu1 %v8621_v6 }
0x1ea0   :  { %2573 = vrot.lane.b32.xlu0 %v8505_v32, %s7491_s20  ;;  %2661 = vmatpush.msra.mxu1 %v8626_v9 }
0x1ea2   :  { %2662 = vmatpush.msra.mxu1 %v8631_v7 }
0x1f0a   :  { %v2348_v30 = vpop.permute.xlu0 %2347 }
0x1f0b   :  { %6701 = vmatmul.msk.f32.vlgmr.msra.gmra.mxu2 %vm278_vm8, %v2348_v30  ;;  %6702 = vmatmul.msk.f32.vlgmr.msra.gmra.mxu3 %vm278_vm8, %v2348_v30 }
0x1f0c   :  { %2713 = vmatpush.msra.mxu2 %v8554_v15  ;;  %2733 = vmatpush.msra.mxu3 %v8599_v35 }
0x1f0e   :  { %2734 = vmatpush.msra.mxu3 %v8601_v36 }
0x1f10   :  { %2735 = vmatpush.msra.mxu3 %v8606_v5 }
0x1f12   :  { %v2574_v32 = vpop.permute.xlu0 %2573  ;;  %2736 = vmatpush.msra.mxu3 %v8611_v40 }
0x1f13   :  { %6709 = vmatmul.msk.f32.vlgmr.msrb.gmra.mxu2 %vm278_vm8, %v2574_v32  ;;  %6711 = vmatmul.msk.f32.vlgmr.msrb.gmra.mxu3 %vm278_vm8, %v2574_v32 }
0x1f14   :  { %2737 = vmatpush.msra.mxu3 %v8616_v16 }
0x1f16   :  { %2738 = vmatpush.msra.mxu3 %v8621_v6 }
0x1f18   :  { %2739 = vmatpush.msra.mxu3 %v8626_v9 }
0x1f1a   :  { %2740 = vmatpush.msra.mxu3 %v8631_v7 }
0x1f1c   :  { %2907 = vmatpush.msrb.mxu3 %v8599_v35 }
0x1f1e   :  { %2908 = vmatpush.msrb.mxu3 %v8601_v36 }
0x1f20   :  { %2909 = vmatpush.msrb.mxu3 %v8606_v5 }
0x1f22   :  { %2910 = vmatpush.msrb.mxu3 %v8611_v40 }
0x1f24   :  { %2911 = vmatpush.msrb.mxu3 %v8616_v16 }
0x1f26   :  { %2912 = vmatpush.msrb.mxu3 %v8621_v6 }
0x1f28   :  { %2913 = vmatpush.msrb.mxu3 %v8626_v9 }
0x1f2a   :  { %2914 = vmatpush.msrb.mxu3 %v8631_v7 }
0x1f8e   :  { %v2368_v48 = vpop.f32.mrf.mxu2  ;;  %v2388_v37 = vpop.f32.mrf.mxu3 }
0x1f8f   :  { %v2392_v50 = vrot.slane %v2368_v48, 4  ;;  %v2414_v20 = vadd.f32 %v8397_v33, %v2388_v37  ;;  %v8556_v33 = vld [vmem:[#allocation6 + $0x1e0] sm:$0xff] }
0x1f90   :  { %2636 = vmatpush.msra.mxu0 %v8556_v33  ;;  %2714 = vmatpush.msra.mxu2 %v8556_v33 }
0x1f91   :  { %v2394_v1 = vadd.f32 %v2392_v50, %v8513_v47  ;;  %v2416_v56 = vrot.slane %v2414_v20, 4 }
0x1f92   :  { %2637 = vmatpush.msra.mxu0 %v8560_v12  ;;  %2715 = vmatpush.msra.mxu2 %v8560_v12 }
0x1f93   :  { %v6703_v2 = vmul.f32 -1.442695, %v2394_v1 }
0x1f94   :  { %2638 = vmatpush.msra.mxu0 %v8564_v52  ;;  %2716 = vmatpush.msra.mxu2 %v8564_v52 }
0x1f95   :  { %7019 = vpow2.f32 %v6703_v2 }
0x1f96   :  { %2639 = vmatpush.msra.mxu0 %v8583_v29  ;;  %2717 = vmatpush.msra.mxu2 %v8583_v29  ;;  %v2598_v4 = vpop.f32.mrf.mxu2 }
0x1f98   :  { %2640 = vmatpush.msra.mxu0 %v8585_v31  ;;  %2718 = vmatpush.msra.mxu2 %v8585_v31 }
0x1f9a   :  { %2641 = vmatpush.msra.mxu0 %v8589_v26  ;;  %2719 = vmatpush.msra.mxu2 %v8589_v26 }
0x1f9b   :  { %v7020_v46 = vpop.eup %7019 }
0x1f9c   :  { %v2398_v45 = vadd.f32 1.0, %v7020_v46  ;;  %2642 = vmatpush.msra.mxu0 %v8593_v8  ;;  %2720 = vmatpush.msra.mxu2 %v8593_v8 }
0x1f9e   :  { %7021 = vrcp.f32 %v2398_v45  ;;  %v2410_v22 = vand.u32 2147483648, %v2398_v45  ;;  %v2408_v13 = vand.u32 2147483647, %v2398_v45  ;;  %vm2404_vm14 = vweird.f32 %v2398_v45  ;;  %2887 = vmatpush.msrb.mxu2 %v8554_v15 }
0x1fa0   :  { %v2411_v60 = vor.u32 1.1754944e-38, %v2410_v22  ;;  %vm2409_vm2 = vcmp.eq.f32.partialorder %v2408_v13, 8.507059e+37  ;;  %2888 = vmatpush.msrb.mxu2 %v8556_v33  ;;  %v7275_v22 = vld [vmem:[%s10075_s6 + $0x2] ss:$0 sm:$0xff] }
0x1fa2   :  { %2889 = vmatpush.msrb.mxu2 %v8560_v12 }
0x1fa4   :  { %v7022_v44 = vpop.eup %7021  ;;  %2890 = vmatpush.msrb.mxu2 %v8564_v52 }
0x1fa5   :  { %v2400_v19 = vmul.f32 %v7022_v44, %v2398_v45  ;;  %vm2405_vm13 = vweird.f32 %v7022_v44 }
0x1fa6   :  { %vm2406_vm15 = vmor %vm2404_vm14, %vm2405_vm13  ;;  %2891 = vmatpush.msrb.mxu2 %v8583_v29 }
0x1fa7   :  { %v2401_v10 = vsub.f32 1.0, %v2400_v19 }
0x1fa8   :  { %2892 = vmatpush.msrb.mxu2 %v8585_v31 }
0x1fa9   :  { %v2402_v3 = vmul.f32 %v7022_v44, %v2401_v10 }
0x1faa   :  { %2893 = vmatpush.msrb.mxu2 %v8589_v26 }
0x1fab   :  { %v2403_v14 = vadd.f32 %v7022_v44, %v2402_v3 }
0x1fac   :  { %2894 = vmatpush.msrb.mxu2 %v8593_v8 }
0x1fad   :  { %v2407_v55 = vsel %vm2406_vm15, %v7022_v44, %v2403_v14 }
0x1fae   :  { %v2412_v57 = vsel %vm2409_vm2, %v2411_v60, %v2407_v55 }
0x1faf   :  { %v2418_v59 = vmul.f32 %v2416_v56, %v2412_v57  ;;  %v2429_v53 = vmul.f32 %v2427_v17, %v2412_v57  ;;  %v2421_v34 = vsub.f32 1.0, %v2412_v57  ;;  %v8702_v57 = vld [vmem:[%s10075_s6 + $0x3] ss:$0 sm:$0xff] }
0x1fb1   :  { %v2419_v63 = vadd.f32 %v2418_v59, %v8520_v49 }
0x1fb3   :  { %7023 = vtanh.f32 %v2419_v63 }
0x1fb9   :  { %v7024_v61 = vpop.eup %7023 }
0x1fba   :  { %2423 = vrot.lane.b32.xlu1 %v7024_v61, %s7491_s20 }
0x202c   :  { %v2424_v62 = vpop.permute.xlu1 %2423 }
0x202d   :  { %v2426_v0 = vmul.f32 %v2424_v62, %v2421_v34 }
0x202f   :  { %v2430_v25 = vadd.f32 %v2429_v53, %v2426_v0 }
0x2031   :  { %v8572_v54 = vsel %vm188_vm5, %v2430_v25, %v2427_v17 }
0x2032   :  { %v2433_v11 = vrot.slane %v8572_v54, 4  ;;  %v8580_v28 = vsel %vm957_vm4, %v2522_v27, %v8572_v54  ;;  %v2514_v55 = vrot.slane %v8572_v54, 6 }
0x2034   :  { %2434 = vrot.lane.b32.xlu2 %v2433_v11, %s7491_s20 }
0x208e   :  { %v2435_v23 = vpop.permute.xlu2 %2434 }
0x208f   :  { %6704 = vmatmul.msk.f32.vlgmr.msrb.gmra.mxu0 %vm278_vm8, %v2435_v23  ;;  %6705 = vmatmul.msk.f32.vlgmr.msrb.gmra.mxu1 %vm278_vm8, %v2435_v23 }
0x2090   :  { %2800 = vmatpush.msrb.mxu0 %v8554_v15  ;;  %2820 = vmatpush.msrb.mxu1 %v8599_v35 }
0x2092   :  { %2801 = vmatpush.msrb.mxu0 %v8556_v33  ;;  %2821 = vmatpush.msrb.mxu1 %v8601_v36 }
0x2094   :  { %2802 = vmatpush.msrb.mxu0 %v8560_v12  ;;  %2822 = vmatpush.msrb.mxu1 %v8606_v5 }
0x2096   :  { %2803 = vmatpush.msrb.mxu0 %v8564_v52  ;;  %2823 = vmatpush.msrb.mxu1 %v8611_v40 }
0x2097   :  { %2643 = vmatmul.f32.vlgmr.msra.gmra.mxu0 %v7489_v21  ;;  %2663 = vmatmul.f32.vlgmr.msra.gmra.mxu1 %v7489_v21  ;;  %v8686_v21 = vld [vmem:[%s10074_s5 + $0x6] sm:$0x3] }
0x2098   :  { %2804 = vmatpush.msrb.mxu0 %v8583_v29  ;;  %2824 = vmatpush.msrb.mxu1 %v8616_v16  ;;  %v2567_v43 = vperm.slane %v8686_v21, 0  ;;  %v2568_v27 = vperm.slane %v8686_v21, 1 }
0x209a   :  { %2805 = vmatpush.msrb.mxu0 %v8585_v31  ;;  %2825 = vmatpush.msrb.mxu1 %v8621_v6  ;;  %v8692_v24 = vadd.f32 %v2598_v4, %v2567_v43 }
0x209c   :  { %2806 = vmatpush.msrb.mxu0 %v8589_v26  ;;  %2826 = vmatpush.msrb.mxu1 %v8626_v9 }
0x209e   :  { %2807 = vmatpush.msrb.mxu0 %v8593_v8  ;;  %2827 = vmatpush.msrb.mxu1 %v8631_v7 }
0x20a0   :  { %2974 = vmatpush.msra.mxu0 %v8554_v15  ;;  %2994 = vmatpush.msra.mxu1 %v8599_v35 }
0x20a2   :  { %2975 = vmatpush.msra.mxu0 %v8556_v33  ;;  %2995 = vmatpush.msra.mxu1 %v8601_v36 }
0x20a4   :  { %2976 = vmatpush.msra.mxu0 %v8560_v12  ;;  %2996 = vmatpush.msra.mxu1 %v8606_v5 }
0x20a6   :  { %2977 = vmatpush.msra.mxu0 %v8564_v52  ;;  %2997 = vmatpush.msra.mxu1 %v8611_v40 }
0x20a8   :  { %2978 = vmatpush.msra.mxu0 %v8583_v29  ;;  %2998 = vmatpush.msra.mxu1 %v8616_v16 }
0x20aa   :  { %2979 = vmatpush.msra.mxu0 %v8585_v31  ;;  %2999 = vmatpush.msra.mxu1 %v8621_v6 }
0x20ac   :  { %2980 = vmatpush.msra.mxu0 %v8589_v26  ;;  %3000 = vmatpush.msra.mxu1 %v8626_v9 }
0x20ae   :  { %2981 = vmatpush.msra.mxu0 %v8593_v8  ;;  %3001 = vmatpush.msra.mxu1 %v8631_v7 }
0x210c   :  { %v2455_v38 = vpop.f32.mrf.mxu0  ;;  %v2475_v45 = vpop.f32.mrf.mxu1 }
0x210d   :  { %v2479_v41 = vrot.slane %v2455_v38, 2  ;;  %v2501_v3 = vadd.f32 %v7275_v22, %v2475_v45  ;;  %v2621_v38 = vpop.f32.mrf.mxu3 }
0x210f   :  { %v2481_v39 = vadd.f32 %v2479_v41, %v8513_v47  ;;  %v2503_v17 = vrot.slane %v2501_v3, 2 }
0x2111   :  { %v6706_v42 = vmul.f32 -1.442695, %v2481_v39 }
0x2113   :  { %7025 = vpow2.f32 %v6706_v42  ;;  %v8709_v42 = vadd.f32 %v2621_v38, %v2568_v27 }
0x2114   :  { %v2644_v18 = vpop.f32.mrf.mxu0  ;;  %v2664_v63 = vpop.f32.mrf.mxu1 }
0x2115   :  { %v2667_v30 = vadd.f32 %v2644_v18, %v8692_v24  ;;  %v2687_v23 = vadd.f32 %v8702_v57, %v2664_v63 }
0x2117   :  { %v6713_v32 = vmul.f32 -1.442695, %v2667_v30 }
0x2119   :  { %v7026_v48 = vpop.eup %7025  ;;  %7027 = vpow2.f32 %v6713_v32 }
0x211a   :  { %v2485_v50 = vadd.f32 1.0, %v7026_v48 }
0x211c   :  { %7029 = vrcp.f32 %v2485_v50  ;;  %v2497_v19 = vand.u32 2147483648, %v2485_v50  ;;  %v2495_v10 = vand.u32 2147483647, %v2485_v50  ;;  %vm2491_vm9 = vweird.f32 %v2485_v50 }
0x211e   :  { %v2498_v60 = vor.u32 1.1754944e-38, %v2497_v19  ;;  %vm2496_vm12 = vcmp.eq.f32.partialorder %v2495_v10, 8.507059e+37 }
0x211f   :  { %v7028_v1 = vpop.eup %7027 }
0x2120   :  { %v2671_v2 = vadd.f32 1.0, %v7028_v1 }
0x2122   :  { %v7030_v46 = vpop.eup %7029  ;;  %7031 = vrcp.f32 %v2671_v2  ;;  %v2681_v61 = vand.u32 2147483647, %v2671_v2  ;;  %v2683_v34 = vand.u32 2147483648, %v2671_v2  ;;  %vm2677_vm14 = vweird.f32 %v2671_v2 }
0x2123   :  { %v2487_v47 = vmul.f32 %v7030_v46, %v2485_v50  ;;  %vm2492_vm6 = vweird.f32 %v7030_v46 }
0x2124   :  { %vm2493_vm10 = vmor %vm2491_vm9, %vm2492_vm6  ;;  %v2684_v41 = vor.u32 1.1754944e-38, %v2683_v34  ;;  %vm2682_vm2 = vcmp.eq.f32.partialorder %v2681_v61, 8.507059e+37 }
0x2125   :  { %v2488_v44 = vsub.f32 1.0, %v2487_v47 }
0x2127   :  { %v2489_v37 = vmul.f32 %v7030_v46, %v2488_v44 }
0x2128   :  { %v7032_v13 = vpop.eup %7031 }
0x2129   :  { %v2490_v20 = vadd.f32 %v7030_v46, %v2489_v37  ;;  %v2673_v14 = vmul.f32 %v7032_v13, %v2671_v2  ;;  %vm2678_vm13 = vweird.f32 %v7032_v13 }
0x212a   :  { %vm2679_vm15 = vmor %vm2677_vm14, %vm2678_vm13 }
0x212b   :  { %v2494_v56 = vsel %vm2493_vm10, %v7030_v46, %v2490_v20  ;;  %v2674_v59 = vsub.f32 1.0, %v2673_v14 }
0x212c   :  { %v2499_v53 = vsel %vm2496_vm12, %v2498_v60, %v2494_v56 }
0x212d   :  { %v2505_v62 = vmul.f32 %v2503_v17, %v2499_v53  ;;  %v2675_v0 = vmul.f32 %v7032_v13, %v2674_v59  ;;  %v2516_v25 = vmul.f32 %v2514_v55, %v2499_v53  ;;  %v2508_v45 = vsub.f32 1.0, %v2499_v53 }
0x212f   :  { %v2506_v54 = vadd.f32 %v2505_v62, %v8520_v49  ;;  %v2676_v11 = vadd.f32 %v7032_v13, %v2675_v0 }
0x2131   :  { %7033 = vtanh.f32 %v2506_v54  ;;  %v2680_v39 = vsel %vm2679_vm15, %v7032_v13, %v2676_v11 }
0x2132   :  { %v2685_v4 = vsel %vm2682_vm2, %v2684_v41, %v2680_v39 }
0x2133   :  { %v2688_v18 = vmul.f32 %v2687_v23, %v2685_v4  ;;  %v2691_v48 = vsub.f32 1.0, %v2685_v4  ;;  %v2697_v1 = vmul.f32 0.0, %v2685_v4 }
0x2135   :  { %v2689_v30 = vadd.f32 %v2688_v18, %v8709_v42 }
0x2137   :  { %v7034_v32 = vpop.eup %7033  ;;  %7035 = vtanh.f32 %v2689_v30 }
0x2138   :  { %2510 = vrot.lane.b32.xlu1 %v7034_v32, %s7491_s20 }
0x213d   :  { %v7036_v49 = vpop.eup %7035 }
0x213e   :  { %2693 = vrot.lane.b32.xlu2 %v7036_v49, %s7491_s20 }
0x2198   :  { %v2694_v50 = vpop.permute.xlu2 %2693 }
0x2199   :  { %v2696_v2 = vmul.f32 %v2694_v50, %v2691_v48 }
0x219b   :  { %v2698_v46 = vadd.f32 %v2697_v1, %v2696_v2 }
0x219d   :  { %v8716_v47 = vsel %vm182_vm7, %v2698_v46, 0.0 }
0x219e   :  { %2701 = vrot.lane.b32.xlu1 %v8716_v47, %s7491_s20  ;;  %v2781_v38 = vrot.slane %v8716_v47, 6 }
0x21aa   :  { %v2511_v44 = vpop.permute.xlu1 %2510 }
0x21ab   :  { %v2513_v19 = vmul.f32 %v2511_v44, %v2508_v45 }
0x21ad   :  { %v2517_v37 = vadd.f32 %v2516_v25, %v2513_v19 }
0x21af   :  { %v2518_v10 = vsel %vm188_vm5, %v2517_v37, %v2514_v55 }
0x21b0   :  { %v2524_v22 = vsel %vm959_vm11, %v8580_v28, %v2518_v10 }
0x21b1   :  { %2575 = vrot.lane.b32.xlu0 %v2524_v22, %s7491_s20 }
0x2210   :  { %v2702_v13 = vpop.permute.xlu1 %2701 }
0x2223   :  { %v2576_v3 = vpop.permute.xlu0 %2575 }
0x2224   :  { %6710 = vmatmul.msk.f32.gmra.mxu2 %vm278_vm8, %v2576_v3  ;;  %6712 = vmatmul.msk.f32.gmra.mxu3 %vm278_vm8, %v2576_v3 }
0x222c   :  { %6714 = vmatmul.msk.f32.vlgmr.msra.gmra.mxu2 %vm278_vm8, %v2702_v13  ;;  %6715 = vmatmul.msk.f32.vlgmr.msra.gmra.mxu3 %vm278_vm8, %v2702_v13 }
0x222d   :  { %3053 = vmatpush.msra.mxu2 %v8554_v15  ;;  %3073 = vmatpush.msra.mxu3 %v8599_v35 }
0x222f   :  { %3054 = vmatpush.msra.mxu2 %v8556_v33  ;;  %3074 = vmatpush.msra.mxu3 %v8601_v36 }
0x2231   :  { %3055 = vmatpush.msra.mxu2 %v8560_v12  ;;  %3075 = vmatpush.msra.mxu3 %v8606_v5 }
0x2233   :  { %3056 = vmatpush.msra.mxu2 %v8564_v52  ;;  %3076 = vmatpush.msra.mxu3 %v8611_v40 }
0x2235   :  { %3057 = vmatpush.msra.mxu2 %v8583_v29  ;;  %3077 = vmatpush.msra.mxu3 %v8616_v16 }
0x2237   :  { %3058 = vmatpush.msra.mxu2 %v8585_v31  ;;  %3078 = vmatpush.msra.mxu3 %v8621_v6 }
0x2239   :  { %3059 = vmatpush.msra.mxu2 %v8589_v26  ;;  %3079 = vmatpush.msra.mxu3 %v8626_v9 }
0x223b   :  { %3060 = vmatpush.msra.mxu2 %v8593_v8  ;;  %3080 = vmatpush.msra.mxu3 %v8631_v7 }
0x22a7   :  { %v8745_v28 = vpop.f32.mrf.mxu2  ;;  %v8748_v17 = vpop.f32.mrf.mxu3 }
0x22af   :  { %v2722_v20 = vpop.f32.mrf.mxu2  ;;  %v2742_v61 = vpop.f32.mrf.mxu3 }
0x22b0   :  { %v2746_v14 = vrot.slane %v2722_v20, 6  ;;  %v2768_v54 = vadd.f32 %v8702_v57, %v2742_v61 }
0x22b2   :  { %v2748_v60 = vadd.f32 %v2746_v14, %v8692_v24  ;;  %v2770_v39 = vrot.slane %v2768_v54, 6 }
0x22b4   :  { %v6716_v55 = vmul.f32 -1.442695, %v2748_v60 }
0x22b6   :  { %7037 = vpow2.f32 %v6716_v55 }
0x22bc   :  { %v7038_v56 = vpop.eup %7037 }
0x22bd   :  { %v2752_v59 = vadd.f32 1.0, %v7038_v56 }
0x22bf   :  { %7039 = vrcp.f32 %v2752_v59  ;;  %v2764_v62 = vand.u32 2147483648, %v2752_v59  ;;  %v2762_v25 = vand.u32 2147483647, %v2752_v59  ;;  %vm2758_vm9 = vweird.f32 %v2752_v59 }
0x22c1   :  { %v2765_v23 = vor.u32 1.1754944e-38, %v2764_v62  ;;  %vm2763_vm12 = vcmp.eq.f32.partialorder %v2762_v25, 8.507059e+37 }
0x22c5   :  { %v7040_v53 = vpop.eup %7039 }
0x22c6   :  { %v2754_v63 = vmul.f32 %v7040_v53, %v2752_v59  ;;  %vm2759_vm6 = vweird.f32 %v7040_v53 }
0x22c7   :  { %vm2760_vm10 = vmor %vm2758_vm9, %vm2759_vm6 }
0x22c8   :  { %v2755_v34 = vsub.f32 1.0, %v2754_v63 }
0x22ca   :  { %v2756_v0 = vmul.f32 %v7040_v53, %v2755_v34 }
0x22cc   :  { %v2757_v11 = vadd.f32 %v7040_v53, %v2756_v0 }
0x22ce   :  { %v2761_v41 = vsel %vm2760_vm10, %v7040_v53, %v2757_v11 }
0x22cf   :  { %v2766_v4 = vsel %vm2763_vm12, %v2765_v23, %v2761_v41 }
0x22d0   :  { %v2772_v18 = vmul.f32 %v2770_v39, %v2766_v4  ;;  %v2783_v30 = vmul.f32 %v2781_v38, %v2766_v4  ;;  %v2775_v48 = vsub.f32 1.0, %v2766_v4 }
0x22d2   :  { %v2773_v32 = vadd.f32 %v2772_v18, %v8709_v42 }
0x22d4   :  { %7041 = vtanh.f32 %v2773_v32 }
0x22da   :  { %v7042_v49 = vpop.eup %7041 }
0x22db   :  { %2777 = vrot.lane.b32.xlu2 %v7042_v49, %s7491_s20 }
0x2335   :  { %v2778_v50 = vpop.permute.xlu2 %2777 }
0x2336   :  { %v2780_v1 = vmul.f32 %v2778_v50, %v2775_v48 }
0x2338   :  { %v2784_v2 = vadd.f32 %v2783_v30, %v2780_v1 }
0x233a   :  { %v2785_v46 = vsel %vm182_vm7, %v2784_v2, %v2781_v38 }
0x233b   :  { %v2787_v47 = vrot.slane %v2785_v46, 2  ;;  %v2868_v34 = vrot.slane %v2785_v46, 6 }
0x233d   :  { %2788 = vrot.lane.b32.xlu0 %v2787_v47, %s7491_s20 }
0x23af   :  { %v2789_v45 = vpop.permute.xlu0 %2788 }
0x23b0   :  { %6717 = vmatmul.msk.f32.vlgmr.msrb.gmra.mxu0 %vm278_vm8, %v2789_v45  ;;  %6718 = vmatmul.msk.f32.vlgmr.msrb.gmra.mxu1 %vm278_vm8, %v2789_v45 }
0x23b1   :  { %3140 = vmatpush.msrb.mxu0 %v8554_v15  ;;  %3160 = vmatpush.msrb.mxu1 %v8599_v35 }
0x23b3   :  { %3141 = vmatpush.msrb.mxu0 %v8556_v33  ;;  %3161 = vmatpush.msrb.mxu1 %v8601_v36 }
0x23b5   :  { %3142 = vmatpush.msrb.mxu0 %v8560_v12  ;;  %3162 = vmatpush.msrb.mxu1 %v8606_v5 }
0x23b7   :  { %3143 = vmatpush.msrb.mxu0 %v8564_v52  ;;  %3163 = vmatpush.msrb.mxu1 %v8611_v40 }
0x23b9   :  { %3144 = vmatpush.msrb.mxu0 %v8583_v29  ;;  %3164 = vmatpush.msrb.mxu1 %v8616_v16 }
0x23bb   :  { %3145 = vmatpush.msrb.mxu0 %v8585_v31  ;;  %3165 = vmatpush.msrb.mxu1 %v8621_v6 }
0x23bd   :  { %3146 = vmatpush.msrb.mxu0 %v8589_v26  ;;  %3166 = vmatpush.msrb.mxu1 %v8626_v9 }
0x23bf   :  { %3147 = vmatpush.msrb.mxu0 %v8593_v8  ;;  %3167 = vmatpush.msrb.mxu1 %v8631_v7 }
0x242d   :  { %v2809_v44 = vpop.f32.mrf.mxu0  ;;  %v2829_v14 = vpop.f32.mrf.mxu1 }
0x242e   :  { %v2833_v19 = vrot.slane %v2809_v44, 4  ;;  %v2855_v53 = vadd.f32 %v8702_v57, %v2829_v14 }
0x2430   :  { %v2835_v37 = vadd.f32 %v2833_v19, %v8692_v24  ;;  %v2857_v0 = vrot.slane %v2855_v53, 4 }
0x2432   :  { %v6719_v10 = vmul.f32 -1.442695, %v2835_v37 }
0x2434   :  { %7043 = vpow2.f32 %v6719_v10 }
0x243a   :  { %v7044_v22 = vpop.eup %7043 }
0x243b   :  { %v2839_v3 = vadd.f32 1.0, %v7044_v22 }
0x243d   :  { %7045 = vrcp.f32 %v2839_v3  ;;  %v2851_v55 = vand.u32 2147483648, %v2839_v3  ;;  %v2849_v59 = vand.u32 2147483647, %v2839_v3  ;;  %vm2845_vm14 = vweird.f32 %v2839_v3 }
0x243f   :  { %v2852_v61 = vor.u32 1.1754944e-38, %v2851_v55  ;;  %vm2850_vm2 = vcmp.eq.f32.partialorder %v2849_v59, 8.507059e+37 }
0x2443   :  { %v7046_v13 = vpop.eup %7045 }
0x2444   :  { %v2841_v20 = vmul.f32 %v7046_v13, %v2839_v3  ;;  %vm2846_vm13 = vweird.f32 %v7046_v13 }
0x2445   :  { %vm2847_vm15 = vmor %vm2845_vm14, %vm2846_vm13 }
0x2446   :  { %v2842_v60 = vsub.f32 1.0, %v2841_v20 }
0x2448   :  { %v2843_v56 = vmul.f32 %v7046_v13, %v2842_v60 }
0x244a   :  { %v2844_v63 = vadd.f32 %v7046_v13, %v2843_v56 }
0x244c   :  { %v2848_v62 = vsel %vm2847_vm15, %v7046_v13, %v2844_v63 }
0x244d   :  { %v2853_v25 = vsel %vm2850_vm2, %v2852_v61, %v2848_v62 }
0x244e   :  { %v2859_v54 = vmul.f32 %v2857_v0, %v2853_v25  ;;  %v2870_v11 = vmul.f32 %v2868_v34, %v2853_v25  ;;  %v2862_v41 = vsub.f32 1.0, %v2853_v25 }
0x2450   :  { %v2860_v23 = vadd.f32 %v2859_v54, %v8709_v42 }
0x2452   :  { %7047 = vtanh.f32 %v2860_v23 }
0x2458   :  { %v7048_v38 = vpop.eup %7047 }
0x2459   :  { %2864 = vrot.lane.b32.xlu1 %v7048_v38, %s7491_s20 }
0x24cb   :  { %v2865_v39 = vpop.permute.xlu1 %2864 }
0x24cc   :  { %v2867_v4 = vmul.f32 %v2865_v39, %v2862_v41 }
0x24ce   :  { %v2871_v18 = vadd.f32 %v2870_v11, %v2867_v4  ;;  %v8819_v11 = vadd.f32 %v8748_v17, %v2568_v27 }
0x24d0   :  { %v2872_v30 = vsel %vm182_vm7, %v2871_v18, %v2868_v34 }
0x24d1   :  { %v2874_v32 = vrot.slane %v2872_v30, 4 }
0x24d3   :  { %2875 = vrot.lane.b32.xlu2 %v2874_v32, %s7491_s20 }
0x252d   :  { %v2876_v49 = vpop.permute.xlu2 %2875 }
0x252e   :  { %6720 = vmatmul.msk.f32.vlgmr.msrb.gmra.mxu2 %vm278_vm8, %v2876_v49  ;;  %6721 = vmatmul.msk.f32.vlgmr.msrb.gmra.mxu3 %vm278_vm8, %v2876_v49 }
0x252f   :  { %3227 = vmatpush.msrb.mxu2 %v8554_v15  ;;  %3247 = vmatpush.msrb.mxu3 %v8599_v35 }
0x2531   :  { %3228 = vmatpush.msrb.mxu2 %v8556_v33  ;;  %3248 = vmatpush.msrb.mxu3 %v8601_v36 }
0x2533   :  { %3229 = vmatpush.msrb.mxu2 %v8560_v12  ;;  %3249 = vmatpush.msrb.mxu3 %v8606_v5 }
0x2535   :  { %3230 = vmatpush.msrb.mxu2 %v8564_v52  ;;  %3250 = vmatpush.msrb.mxu3 %v8611_v40 }
0x2537   :  { %3231 = vmatpush.msrb.mxu2 %v8583_v29  ;;  %3251 = vmatpush.msrb.mxu3 %v8616_v16 }
0x2539   :  { %3232 = vmatpush.msrb.mxu2 %v8585_v31  ;;  %3252 = vmatpush.msrb.mxu3 %v8621_v6 }
0x253b   :  { %3233 = vmatpush.msrb.mxu2 %v8589_v26  ;;  %3253 = vmatpush.msrb.mxu3 %v8626_v9 }
0x253d   :  { %3234 = vmatpush.msrb.mxu2 %v8593_v8  ;;  %3254 = vmatpush.msrb.mxu3 %v8631_v7 }
0x25b1   :  { %v2896_v15 = vpop.f32.mrf.mxu2  ;;  %v2916_v5 = vpop.f32.mrf.mxu3 }
0x25b2   :  { %v2920_v33 = vrot.slane %v2896_v15, 2  ;;  %v2942_v8 = vadd.f32 %v8702_v57, %v2916_v5 }
0x25b4   :  { %v2922_v12 = vadd.f32 %v2920_v33, %v8692_v24  ;;  %v2955_v24 = vrot.slane %v2872_v30, 6  ;;  %v2944_v50 = vrot.slane %v2942_v8, 2 }
0x25b6   :  { %v6722_v52 = vmul.f32 -1.442695, %v2922_v12 }
0x25b8   :  { %7049 = vpow2.f32 %v6722_v52 }
0x25be   :  { %v7050_v29 = vpop.eup %7049 }
0x25bf   :  { %v2926_v35 = vadd.f32 1.0, %v7050_v29 }
0x25c1   :  { %7051 = vrcp.f32 %v2926_v35  ;;  %v2938_v26 = vand.u32 2147483648, %v2926_v35  ;;  %v2936_v6 = vand.u32 2147483647, %v2926_v35  ;;  %vm2932_vm9 = vweird.f32 %v2926_v35 }
0x25c3   :  { %v2939_v7 = vor.u32 1.1754944e-38, %v2938_v26  ;;  %vm2937_vm12 = vcmp.eq.f32.partialorder %v2936_v6, 8.507059e+37 }
0x25c7   :  { %v7052_v31 = vpop.eup %7051 }
0x25c8   :  { %v2928_v36 = vmul.f32 %v7052_v31, %v2926_v35  ;;  %vm2933_vm6 = vweird.f32 %v7052_v31 }
0x25c9   :  { %vm2934_vm10 = vmor %vm2932_vm9, %vm2933_vm6 }
0x25ca   :  { %v2929_v40 = vsub.f32 1.0, %v2928_v36 }
0x25cc   :  { %v2930_v16 = vmul.f32 %v7052_v31, %v2929_v40 }
0x25ce   :  { %v2931_v9 = vadd.f32 %v7052_v31, %v2930_v16 }
0x25d0   :  { %v2935_v48 = vsel %vm2934_vm10, %v7052_v31, %v2931_v9 }
0x25d1   :  { %v2940_v1 = vsel %vm2937_vm12, %v2939_v7, %v2935_v48 }
0x25d2   :  { %v2946_v2 = vmul.f32 %v2944_v50, %v2940_v1  ;;  %v2957_v46 = vmul.f32 %v2955_v24, %v2940_v1  ;;  %v2949_v44 = vsub.f32 1.0, %v2940_v1 }
0x25d4   :  { %v2947_v47 = vadd.f32 %v2946_v2, %v8709_v42  ;;  %v8812_v42 = vadd.f32 %v8745_v28, %v2567_v43 }
0x25d6   :  { %7053 = vtanh.f32 %v2947_v47 }
0x25dc   :  { %v7054_v45 = vpop.eup %7053 }
0x25dd   :  { %2951 = vrot.lane.b32.xlu0 %v7054_v45, %s7491_s20 }
0x264f   :  { %v2952_v19 = vpop.permute.xlu0 %2951 }
0x2650   :  { %v2954_v37 = vmul.f32 %v2952_v19, %v2949_v44 }
0x2652   :  { %v2958_v10 = vadd.f32 %v2957_v46, %v2954_v37 }
0x2654   :  { %v2959_v22 = vsel %vm182_vm7, %v2958_v10, %v2955_v24 }
0x2655   :  { %v2961_v3 = vrot.slane %v2959_v22, 6 }
0x2657   :  { %2962 = vrot.lane.b32.xlu1 %v2961_v3, %s7491_s20 }
0x26c9   :  { %v2963_v13 = vpop.permute.xlu1 %2962 }
0x26ca   :  { %6723 = vmatmul.msk.f32.vlgmr.msra.gmra.mxu0 %vm278_vm8, %v2963_v13  ;;  %6724 = vmatmul.msk.f32.vlgmr.msra.gmra.mxu1 %vm278_vm8, %v2963_v13 }
0x2747   :  { %v2983_v20 = vpop.f32.mrf.mxu0  ;;  %v3003_v62 = vpop.f32.mrf.mxu1 }
0x2748   :  { %v3006_v14 = vadd.f32 %v2983_v20, %v8812_v42  ;;  %v3026_v25 = vadd.f32 %v8702_v57, %v3003_v62 }
0x274a   :  { %v6725_v60 = vmul.f32 -1.442695, %v3006_v14 }
0x274c   :  { %7055 = vpow2.f32 %v6725_v60 }
0x2752   :  { %v7056_v58 = vpop.eup %7055 }
0x2753   :  { %v3010_v55 = vadd.f32 1.0, %v7056_v58 }
0x2755   :  { %7057 = vrcp.f32 %v3010_v55  ;;  %v3022_v63 = vand.u32 2147483648, %v3010_v55  ;;  %v3020_v34 = vand.u32 2147483647, %v3010_v55  ;;  %vm3016_vm13 = vweird.f32 %v3010_v55 }
0x2757   :  { %v3023_v43 = vor.u32 1.1754944e-38, %v3022_v63  ;;  %vm3021_vm15 = vcmp.eq.f32.partialorder %v3020_v34, 8.507059e+37 }
0x275b   :  { %v7058_v56 = vpop.eup %7057 }
0x275c   :  { %v3012_v59 = vmul.f32 %v7058_v56, %v3010_v55  ;;  %vm3017_vm7 = vweird.f32 %v7058_v56 }
0x275d   :  { %vm3018_vm14 = vmor %vm3016_vm13, %vm3017_vm7 }
0x275e   :  { %v3013_v53 = vsub.f32 1.0, %v3012_v59 }
0x2760   :  { %v3014_v61 = vmul.f32 %v7058_v56, %v3013_v53 }
0x2762   :  { %v3015_v0 = vadd.f32 %v7058_v56, %v3014_v61 }
0x2764   :  { %v3019_v28 = vsel %vm3018_vm14, %v7058_v56, %v3015_v0 }
0x2765   :  { %v3024_v54 = vsel %vm3021_vm15, %v3023_v43, %v3019_v28 }
0x2766   :  { %v3027_v23 = vmul.f32 %v3026_v25, %v3024_v54  ;;  %v3030_v39 = vsub.f32 1.0, %v3024_v54  ;;  %v3037_v18 = vmul.f32 %v3024_v54, %v2961_v3 }
0x2768   :  { %v3028_v38 = vadd.f32 %v3027_v23, %v8819_v11 }
0x276a   :  { %7059 = vtanh.f32 %v3028_v38 }
0x2770   :  { %v7060_v41 = vpop.eup %7059 }
0x2771   :  { %3032 = vrot.lane.b32.xlu2 %v7060_v41, %s7491_s20 }
0x27cb   :  { %v3033_v4 = vpop.permute.xlu2 %3032 }
0x27cc   :  { %v3035_v30 = vmul.f32 %v3033_v4, %v3030_v39 }
0x27ce   :  { %v3038_v32 = vadd.f32 %v3037_v18, %v3035_v30 }
0x27d0   :  { %v3039_v49 = vsel %vm188_vm5, %v3038_v32, %v2961_v3 }
0x27d1   :  { %3041 = vrot.lane.b32.xlu0 %v3039_v49, %s7491_s20  ;;  %v3121_v9 = vrot.slane %v3039_v49, 6 }
0x2843   :  { %v3042_v21 = vpop.permute.xlu0 %3041 }
0x2844   :  { %6726 = vmatmul.msk.f32.vlgmr.msra.gmra.mxu2 %vm278_vm8, %v3042_v21  ;;  %6727 = vmatmul.msk.f32.vlgmr.msra.gmra.mxu3 %vm278_vm8, %v3042_v21 }
0x28c7   :  { %v3062_v27 = vpop.f32.mrf.mxu2  ;;  %v3082_v31 = vpop.f32.mrf.mxu3 }
0x28c8   :  { %v3086_v17 = vrot.slane %v3062_v27, 6  ;;  %v3108_v16 = vadd.f32 %v8702_v57, %v3082_v31 }
0x28ca   :  { %v3088_v15 = vadd.f32 %v3086_v17, %v8812_v42  ;;  %v3110_v24 = vrot.slane %v3108_v16, 6 }
0x28cc   :  { %v6728_v33 = vmul.f32 -1.442695, %v3088_v15 }
0x28ce   :  { %7061 = vpow2.f32 %v6728_v33 }
0x28d4   :  { %v7062_v12 = vpop.eup %7061 }
0x28d5   :  { %v3092_v52 = vadd.f32 1.0, %v7062_v12 }
0x28d7   :  { %7063 = vrcp.f32 %v3092_v52  ;;  %v3104_v5 = vand.u32 2147483648, %v3092_v52  ;;  %v3102_v26 = vand.u32 2147483647, %v3092_v52  ;;  %vm3098_vm6 = vweird.f32 %v3092_v52 }
0x28d9   :  { %v3105_v8 = vor.u32 1.1754944e-38, %v3104_v5  ;;  %vm3103_vm10 = vcmp.eq.f32.partialorder %v3102_v26, 8.507059e+37 }
0x28dd   :  { %v7064_v29 = vpop.eup %7063 }
0x28de   :  { %v3094_v35 = vmul.f32 %v7064_v29, %v3092_v52  ;;  %vm3099_vm2 = vweird.f32 %v7064_v29 }
0x28df   :  { %vm3100_vm9 = vmor %vm3098_vm6, %vm3099_vm2 }
0x28e0   :  { %v3095_v36 = vsub.f32 1.0, %v3094_v35 }
0x28e2   :  { %v3096_v40 = vmul.f32 %v7064_v29, %v3095_v36 }
0x28e4   :  { %v3097_v6 = vadd.f32 %v7064_v29, %v3096_v40 }
0x28e6   :  { %v3101_v7 = vsel %vm3100_vm9, %v7064_v29, %v3097_v6 }
0x28e7   :  { %v3106_v48 = vsel %vm3103_vm10, %v3105_v8, %v3101_v7  ;;  %vm3351_vm10 = vcmask 408576  }
0x28e8   :  { %v3112_v50 = vmul.f32 %v3110_v24, %v3106_v48  ;;  %v3123_v1 = vmul.f32 %v3121_v9, %v3106_v48  ;;  %v3115_v47 = vsub.f32 1.0, %v3106_v48 }
0x28ea   :  { %v3113_v2 = vadd.f32 %v3112_v50, %v8819_v11 }
0x28ec   :  { %7065 = vtanh.f32 %v3113_v2 }
0x28f2   :  { %v7066_v46 = vpop.eup %7065 }
0x28f3   :  { %3117 = vrot.lane.b32.xlu1 %v7066_v46, %s7491_s20 }
0x2965   :  { %v3118_v45 = vpop.permute.xlu1 %3117 }
0x2966   :  { %v3120_v44 = vmul.f32 %v3118_v45, %v3115_v47  ;;  %v3307_v45 = vld [vmem:[#allocation8 + $0x38] sm:$0xff] }
0x2967   :  { %3326 = vmatpush.msra.mxu0 %v3307_v45  ;;  %v8922_v45 = vld [vmem:[#allocation14 + $0x18] sm:$0xff] }
0x2968   :  { %v3124_v19 = vadd.f32 %v3123_v1, %v3120_v44  ;;  %v3306_v44 = vld [vmem:[#allocation8 + $0x30] sm:$0xff] }
0x2969   :  { %3327 = vmatpush.msra.mxu0 %v3306_v44  ;;  %v8926_v44 = vld [vmem:[#allocation14] sm:$0xff] }
0x296a   :  { %v3125_v37 = vsel %vm188_vm5, %v3124_v19, %v3121_v9  ;;  %v3304_v19 = vld [vmem:[#allocation8 + $0x20] sm:$0xff] }
0x296b   :  { %v3127_v10 = vrot.slane %v3125_v37, 2  ;;  %v3208_v28 = vrot.slane %v3125_v37, 6  ;;  %v3303_v37 = vld [vmem:[#allocation8 + $0x18] sm:$0xff] }
0x296d   :  { %3128 = vrot.lane.b32.xlu2 %v3127_v10, %s7491_s20  ;;  %v3302_v10 = vld [vmem:[#allocation8 + $0x10] sm:$0xff] }
0x29c7   :  { %v3129_v22 = vpop.permute.xlu2 %3128 }
0x29c8   :  { %6729 = vmatmul.msk.f32.vlgmr.msrb.gmra.mxu0 %vm278_vm8, %v3129_v22  ;;  %6730 = vmatmul.msk.f32.vlgmr.msrb.gmra.mxu1 %vm278_vm8, %v3129_v22  ;;  %v3301_v22 = vld [vmem:[#allocation8 + $0x8] sm:$0xff] }
0x2a45   :  { %v3149_v3 = vpop.f32.mrf.mxu0  ;;  %v3169_v59 = vpop.f32.mrf.mxu1 }
0x2a46   :  { %v3173_v13 = vrot.slane %v3149_v3, 4  ;;  %v3195_v62 = vadd.f32 %v8702_v57, %v3169_v59  ;;  %v3300_v3 = vld [vmem:[#allocation8] sm:$0xff] }
0x2a47   :  { %v3344_v59 = vld [vmem:[#allocation9 + $0x20] sm:$0xff] }
0x2a48   :  { %v3175_v20 = vadd.f32 %v3173_v13, %v8812_v42  ;;  %v3197_v54 = vrot.slane %v3195_v62, 4  ;;  %v3410_v62 = vld [vmem:[#allocation11 + $0x60] sm:$0x3] }
0x2a4a   :  { %v6731_v14 = vmul.f32 -1.442695, %v3175_v20 }
0x2a4c   :  { %7067 = vpow2.f32 %v6731_v14 }
0x2a52   :  { %v7068_v60 = vpop.eup %7067 }
0x2a53   :  { %v3179_v58 = vadd.f32 1.0, %v7068_v60 }
0x2a55   :  { %7069 = vrcp.f32 %v3179_v58  ;;  %v3191_v63 = vand.u32 2147483648, %v3179_v58  ;;  %v3189_v34 = vand.u32 2147483647, %v3179_v58  ;;  %vm3185_vm7 = vweird.f32 %v3179_v58 }
0x2a57   :  { %v3192_v43 = vor.u32 1.1754944e-38, %v3191_v63  ;;  %vm3190_vm14 = vcmp.eq.f32.partialorder %v3189_v34, 8.507059e+37  ;;  %v3343_v63 = vld [vmem:[#allocation9 + $0x18] sm:$0xff]  ;;  %v3341_v34 = vld [vmem:[#allocation9 + $0x8] sm:$0xff] }
0x2a5b   :  { %v7070_v55 = vpop.eup %7069 }
0x2a5c   :  { %v3181_v56 = vmul.f32 %v7070_v55, %v3179_v58  ;;  %vm3186_vm12 = vweird.f32 %v7070_v55 }
0x2a5d   :  { %vm3187_vm13 = vmor %vm3185_vm7, %vm3186_vm12  ;;  %vm3388_vm12 = vcmask 1040384   ;;  %vm3393_vm7 = vcmask 1044480  }
0x2a5e   :  { %v3182_v53 = vsub.f32 1.0, %v3181_v56  ;;  %v3345_v56 = vld [vmem:[#allocation9 + $0x28] sm:$0xff] }
0x2a60   :  { %v3183_v61 = vmul.f32 %v7070_v55, %v3182_v53  ;;  %v3411_v53 = vld [vmem:[#allocation11 + $0x68] sm:$0x3] }
0x2a61   :  { %6741 = vmatpush.msk.msra.mxu2 %vm955_vm3, %v3411_v53 }
0x2a62   :  { %v3184_v0 = vadd.f32 %v7070_v55, %v3183_v61  ;;  %v3342_v61 = vld [vmem:[#allocation9 + $0x10] sm:$0xff] }
0x2a64   :  { %v3188_v25 = vsel %vm3187_vm13, %v7070_v55, %v3184_v0  ;;  %v3346_v55 = vld [vmem:[#allocation9 + $0x30] sm:$0x3]  ;;  %vm3396_vm13 = vcmask 1046528  }
0x2a65   :  { %v3193_v23 = vsel %vm3190_vm14, %v3192_v43, %v3188_v25  ;;  %6736 = vmatpush.msk.msra.mxu1 %vm955_vm3, %v3346_v55  ;;  %v3408_v43 = vld [vmem:[#allocation11 + $0x50] sm:$0xff]  ;;  %v3406_v25 = vld [vmem:[#allocation11 + $0x40] sm:$0xff] }
0x2a66   :  { %v3199_v38 = vmul.f32 %v3197_v54, %v3193_v23  ;;  %v3210_v41 = vmul.f32 %v3208_v28, %v3193_v23  ;;  %v3202_v18 = vsub.f32 1.0, %v3193_v23  ;;  %v3407_v54 = vld [vmem:[#allocation11 + $0x48] sm:$0xff]  ;;  %v3404_v23 = vld [vmem:[#allocation11 + $0x30] sm:$0xff] }
0x2a67   :  { %3368 = vmatpush.msra.mxu1 %v3345_v56 }
0x2a68   :  { %v3200_v39 = vadd.f32 %v3199_v38, %v8819_v11  ;;  %v3405_v38 = vld [vmem:[#allocation11 + $0x38] sm:$0xff] }
0x2a69   :  { %3369 = vmatpush.msra.mxu1 %v3344_v59 }
0x2a6a   :  { %7071 = vtanh.f32 %v3200_v39  ;;  %v3403_v39 = vld [vmem:[#allocation11 + $0x28] sm:$0xff] }
0x2a6b   :  { %3370 = vmatpush.msra.mxu1 %v3343_v63 }
0x2a6d   :  { %3371 = vmatpush.msra.mxu1 %v3342_v61  ;;  %v9009_v61 = vld [vmem:[%s10084_s15] ss:$0 sm:$0xff] }
0x2a6f   :  { %3372 = vmatpush.msra.mxu1 %v3341_v34 }
0x2a70   :  { %v7072_v4 = vpop.eup %7071 }
0x2a71   :  { %3204 = vrot.lane.b32.xlu0 %v7072_v4, %s7491_s20  ;;  %3373 = vmatpush.msra.mxu1 %v3340_v51  ;;  %v3400_v4 = vld [vmem:[#allocation11 + $0x10] sm:$0xff] }
0x2a73   :  { %6738 = vmatpush.msk.msrb.mxu1 %vm955_vm3, %v3410_v62 }
0x2a75   :  { %3457 = vmatpush.msrb.mxu1 %v3408_v43 }
0x2a77   :  { %3458 = vmatpush.msrb.mxu1 %v3406_v25 }
0x2a79   :  { %3459 = vmatpush.msrb.mxu1 %v3404_v23 }
0x2ae3   :  { %v3205_v30 = vpop.permute.xlu0 %3204 }
0x2ae4   :  { %v3207_v32 = vmul.f32 %v3205_v30, %v3202_v18  ;;  %v3401_v18 = vld [vmem:[#allocation11 + $0x18] sm:$0xff]  ;;  %v3398_v30 = vld [vmem:[#allocation11] sm:$0xff] }
0x2ae6   :  { %v3211_v49 = vadd.f32 %v3210_v41, %v3207_v32  ;;  %v3402_v41 = vld [vmem:[#allocation11 + $0x20] sm:$0xff]  ;;  %v3399_v32 = vld [vmem:[#allocation11 + $0x8] sm:$0xff] }
0x2ae7   :  { %3460 = vmatpush.msrb.mxu1 %v3402_v41 }
0x2ae8   :  { %v3212_v21 = vsel %vm188_vm5, %v3211_v49, %v3208_v28  ;;  %v3409_v28 = vld [vmem:[#allocation11 + $0x58] sm:$0xff]  ;;  %v8857_v49 = vld [vmem:[#allocation14 + $0x70] sm:$0xff] }
0x2ae9   :  { %v3214_v27 = vrot.slane %v3212_v21, 4  ;;  %3480 = vmatpush.msra.mxu2 %v3409_v28  ;;  %3461 = vmatpush.msrb.mxu1 %v3400_v4 }
0x2aea   :  { %3504 = vmatpush.msra.mxu3 %v8857_v49 }
0x2aeb   :  { %3215 = vrot.lane.b32.xlu1 %v3214_v27, %s7491_s20  ;;  %3481 = vmatpush.msra.mxu2 %v3407_v54  ;;  %v8861_v27 = vld [vmem:[#allocation14 + $0x60] sm:$0xff] }
0x2aec   :  { %3462 = vmatpush.msrb.mxu1 %v3398_v30  ;;  %3505 = vmatpush.msra.mxu3 %v8861_v27 }
0x2aed   :  { %3482 = vmatpush.msra.mxu2 %v3405_v38 }
0x2aef   :  { %3483 = vmatpush.msra.mxu2 %v3403_v39 }
0x2af1   :  { %3484 = vmatpush.msra.mxu2 %v3401_v18 }
0x2af3   :  { %3485 = vmatpush.msra.mxu2 %v3399_v32 }
0x2b5d   :  { %v3216_v17 = vpop.permute.xlu1 %3215 }
0x2b5e   :  { %6732 = vmatmul.msk.f32.vlgmr.msrb.gmra.mxu2 %vm278_vm8, %v3216_v17  ;;  %6733 = vmatmul.msk.f32.vlgmr.msrb.gmra.mxu3 %vm278_vm8, %v3216_v17  ;;  %v8865_v17 = vld [vmem:[#allocation14 + $0x68] sm:$0xff] }
0x2be1   :  { %v3236_v15 = vpop.f32.mrf.mxu2  ;;  %v3256_v5 = vpop.f32.mrf.mxu3 }
0x2be2   :  { %v3260_v33 = vrot.slane %v3236_v15, 2  ;;  %v3282_v8 = vadd.f32 %v8702_v57, %v3256_v5  ;;  %v3305_v57 = vld [vmem:[#allocation8 + $0x28] sm:$0xff]  ;;  %v8867_v15 = vld [vmem:[#allocation14 + $0x50] sm:$0xff]  ;;  %v6879_v5 = vld [vmem:[%s10077_s8] ss:$0 sm:$0xff] }
0x2be3   :  { %3328 = vmatpush.msra.mxu0 %v3305_v57  ;;  %3506 = vmatpush.msra.mxu3 %v8867_v15  ;;  %v8928_v57 = vld [vmem:[#allocation14 + $0x8] sm:$0xff] }
0x2be4   :  { %v3262_v12 = vadd.f32 %v3260_v33, %v8812_v42  ;;  %v3295_v42 = vrot.slane %v3212_v21, 6  ;;  %v3284_v48 = vrot.slane %v3282_v8, 2  ;;  %v8859_v21 = vld [vmem:[#allocation14 + $0x78] sm:$0xff] }
0x2be5   :  { %3329 = vmatpush.msra.mxu0 %v3304_v19  ;;  %v8869_v33 = vld [vmem:[#allocation14 + $0x58] sm:$0xff]  ;;  %3604 = vmatpush.msrb.mxu2 %v8859_v21  ;;  %v6880_v19 = vld [vmem:[%s10079_s10] ss:$0 sm:$0xff] }
0x2be6   :  { %v6734_v52 = vmul.f32 -1.442695, %v3262_v12  ;;  %v8874_v12 = vld [vmem:[#allocation14 + $0x40] sm:$0xff] }
0x2be7   :  { %3330 = vmatpush.msra.mxu0 %v3303_v37  ;;  %3605 = vmatpush.msrb.mxu2 %v8865_v17 }
0x2be8   :  { %7073 = vpow2.f32 %v6734_v52  ;;  %v8876_v52 = vld [vmem:[#allocation14 + $0x48] sm:$0xff]  ;;  %3507 = vmatpush.msra.mxu3 %v8874_v12 }
0x2be9   :  { %3331 = vmatpush.msra.mxu0 %v3302_v10  ;;  %3606 = vmatpush.msrb.mxu2 %v8869_v33 }
0x2beb   :  { %3332 = vmatpush.msra.mxu0 %v3301_v22  ;;  %3607 = vmatpush.msrb.mxu2 %v8876_v52  ;;  %v8998_v22 = vld [vmem:[%s10083_s14] sm:$0x3] }
0x2bed   :  { %3333 = vmatpush.msra.mxu0 %v3300_v3  ;;  %v3434_v3 = vperm.slane %v8998_v22, 0 }
0x2bee   :  { %v7074_v29 = vpop.eup %7073 }
0x2bef   :  { %v3266_v35 = vadd.f32 1.0, %v7074_v29  ;;  %3524 = vmatpush.msrb.mxu0 %v8859_v21  ;;  %v8881_v29 = vld [vmem:[#allocation14 + $0x30] sm:$0xff] }
0x2bf0   :  { %3508 = vmatpush.msra.mxu3 %v8881_v29 }
0x2bf1   :  { %7075 = vrcp.f32 %v3266_v35  ;;  %v3278_v26 = vand.u32 2147483648, %v3266_v35  ;;  %v3276_v6 = vand.u32 2147483647, %v3266_v35  ;;  %vm3272_vm2 = vweird.f32 %v3266_v35  ;;  %3525 = vmatpush.msrb.mxu0 %v8865_v17 }
0x2bf3   :  { %v3279_v7 = vor.u32 1.1754944e-38, %v3278_v26  ;;  %vm3277_vm9 = vcmp.eq.f32.partialorder %v3276_v6, 8.507059e+37  ;;  %3526 = vmatpush.msrb.mxu0 %v8869_v33 }
0x2bf5   :  { %3527 = vmatpush.msrb.mxu0 %v8876_v52 }
0x2bf7   :  { %v7076_v31 = vpop.eup %7075 }
0x2bf8   :  { %v3268_v36 = vmul.f32 %v7076_v31, %v3266_v35  ;;  %vm3273_vm15 = vweird.f32 %v7076_v31  ;;  %v8883_v35 = vld [vmem:[#allocation14 + $0x38] sm:$0xff] }
0x2bf9   :  { %vm3274_vm6 = vmor %vm3272_vm2, %vm3273_vm15  ;;  %3528 = vmatpush.msrb.mxu0 %v8883_v35  ;;  %3608 = vmatpush.msrb.mxu2 %v8883_v35 }
0x2bfa   :  { %v3269_v40 = vsub.f32 1.0, %v3268_v36  ;;  %v8890_v36 = vld [vmem:[#allocation14 + $0x28] sm:$0xff] }
0x2bfb   :  { %3529 = vmatpush.msrb.mxu0 %v8890_v36  ;;  %3609 = vmatpush.msrb.mxu2 %v8890_v36 }
0x2bfc   :  { %v3270_v16 = vmul.f32 %v7076_v31, %v3269_v40 }
0x2bfd   :  { %3530 = vmatpush.msrb.mxu0 %v8922_v45  ;;  %3610 = vmatpush.msrb.mxu2 %v8922_v45 }
0x2bfe   :  { %v3271_v9 = vadd.f32 %v7076_v31, %v3270_v16 }
0x2bff   :  { %3531 = vmatpush.msrb.mxu0 %v8928_v57  ;;  %3611 = vmatpush.msrb.mxu2 %v8928_v57 }
0x2c00   :  { %v3275_v24 = vsel %vm3274_vm6, %v7076_v31, %v3271_v9  ;;  %v8888_v31 = vld [vmem:[#allocation14 + $0x20] sm:$0xff] }
0x2c01   :  { %v3280_v50 = vsel %vm3277_vm9, %v3279_v7, %v3275_v24  ;;  %3509 = vmatpush.msra.mxu3 %v8888_v31 }
0x2c02   :  { %v3286_v1 = vmul.f32 %v3284_v48, %v3280_v50  ;;  %v3297_v2 = vmul.f32 %v3295_v42, %v3280_v50 }
0x2c04   :  { %v3287_v46 = vadd.f32 %v3286_v1, %v8819_v11  ;;  %v3289_v11 = vsub.f32 1.0, %v3280_v50 }
0x2c06   :  { %7077 = vtanh.f32 %v3287_v46 }
0x2c0c   :  { %v7078_v47 = vpop.eup %7077 }
0x2c0d   :  { %3291 = vrot.lane.b32.xlu2 %v7078_v47, %s7491_s20  ;;  %v8920_v47 = vld [vmem:[#allocation14 + $0x10] sm:$0xff] }
0x2c0e   :  { %3510 = vmatpush.msra.mxu3 %v8920_v47 }
0x2c10   :  { %3511 = vmatpush.msra.mxu3 %v8926_v44 }
0x2c12   :  { %3670 = vmatpush.msrb.mxu3 %v8857_v49 }
0x2c14   :  { %3671 = vmatpush.msrb.mxu3 %v8861_v27 }
0x2c16   :  { %3672 = vmatpush.msrb.mxu3 %v8867_v15 }
0x2c18   :  { %3673 = vmatpush.msrb.mxu3 %v8874_v12 }
0x2c1a   :  { %3674 = vmatpush.msrb.mxu3 %v8881_v29 }
0x2c1c   :  { %3675 = vmatpush.msrb.mxu3 %v8888_v31 }
0x2c1e   :  { %3676 = vmatpush.msrb.mxu3 %v8920_v47 }
0x2c20   :  { %3677 = vmatpush.msrb.mxu3 %v8926_v44 }
0x2c67   :  { %v3292_v13 = vpop.permute.xlu2 %3291 }
0x2c68   :  { %v3294_v20 = vmul.f32 %v3292_v13, %v3289_v11 }
0x2c6a   :  { %v3298_v14 = vadd.f32 %v3297_v2, %v3294_v20 }
0x2c6c   :  { %v3299_v60 = vsel %vm188_vm5, %v3298_v14, %v3295_v42  ;;  %vm3338_vm5 = vcmask 812032  }
0x2c6d   :  { %v3313_v58 = vrot.slane %v3299_v60, 6 }
0x2c6f   :  { %3314 = vrot.lane.b32.xlu0 %v3313_v58, %s7491_s20 }
0x2ce1   :  { %v3315_v0 = vpop.permute.xlu0 %3314 }
0x2ce2   :  { %6735 = vmatmul.msk.f32.vlgmr.msra.gmra.mxu0 %vm278_vm8, %v3315_v0  ;;  %v3435_v0 = vperm.slane %v8998_v22, 1 }
0x2ce3   :  { %3690 = vmatpush.msra.mxu0 %v8859_v21 }
0x2ce5   :  { %3691 = vmatpush.msra.mxu0 %v8865_v17 }
0x2ce7   :  { %3692 = vmatpush.msra.mxu0 %v8869_v33 }
0x2ce9   :  { %3693 = vmatpush.msra.mxu0 %v8876_v52 }
0x2ceb   :  { %3694 = vmatpush.msra.mxu0 %v8883_v35 }
0x2ced   :  { %3695 = vmatpush.msra.mxu0 %v8890_v36 }
0x2cef   :  { %3696 = vmatpush.msra.mxu0 %v8922_v45 }
0x2cf1   :  { %3697 = vmatpush.msra.mxu0 %v8928_v57 }
0x2d5f   :  { %v3335_v40 = vpop.f32.mrf.mxu0 }
0x2d60   :  { %v3336_v26 = vadd.f32 %v6879_v5, %v3335_v40 }
0x2d62   :  { %3339 = vst.msk [vmem:[%s10088_s19] sm:$0x3] %vm3338_vm5, %v3336_v26  ;;  %6737 = vmatmul.msk.f32.vlgmr.msra.gmra.mxu1 %vm3351_vm10, %v3336_v26  ;;  %v3378_v16 = vrot.slane %v3336_v26, 7  ;;  %v3380_v6 = vrot.slane %v3336_v26, 6  ;;  %v3382_v9 = vrot.slane %v3336_v26, 4  ;;  %v3384_v42 = vrot.slane %v3336_v26, 3 }
0x2d63   :  { %3584 = vmatpush.msra.mxu1 %v8857_v49  ;;  %v3386_v50 = vrot.slane %v3336_v26, 2 }
0x2d64   :  { %v3389_v8 = vsel %vm3388_vm12, %v3336_v26, %v3378_v16 }
0x2d65   :  { %v3390_v7 = vsel %vm955_vm3, %v3389_v8, %v3378_v16  ;;  %3585 = vmatpush.msra.mxu1 %v8861_v27 }
0x2d66   :  { %v3391_v24 = vsel %vm227_vm0, %v3390_v7, %v3380_v6 }
0x2d67   :  { %v3392_v48 = vsel %vm957_vm4, %v3391_v24, %v3382_v9  ;;  %3586 = vmatpush.msra.mxu1 %v8867_v15 }
0x2d68   :  { %v3394_v1 = vsel %vm3393_vm7, %v3392_v48, %v3384_v42 }
0x2d69   :  { %v3395_v2 = vsel %vm959_vm11, %v3394_v1, %v3384_v42  ;;  %3587 = vmatpush.msra.mxu1 %v8874_v12 }
0x2d6a   :  { %v3397_v46 = vsel %vm3396_vm13, %v3395_v2, %v3386_v50 }
0x2d6b   :  { %6739 = vmatmul.msk.f32.vlgmr.msrb.gmra.mxu1 %vm3351_vm10, %v3397_v46  ;;  %6742 = vmatmul.msk.f32.vlgmr.msra.gmra.mxu2 %vm3351_vm10, %v3397_v46 }
0x2d6c   :  { %3588 = vmatpush.msra.mxu1 %v8881_v29  ;;  %3776 = vmatpush.msra.mxu2 %v8859_v21 }
0x2d6e   :  { %3589 = vmatpush.msra.mxu1 %v8888_v31  ;;  %3777 = vmatpush.msra.mxu2 %v8865_v17 }
0x2d70   :  { %3590 = vmatpush.msra.mxu1 %v8920_v47  ;;  %3778 = vmatpush.msra.mxu2 %v8869_v33 }
0x2d72   :  { %3591 = vmatpush.msra.mxu1 %v8926_v44  ;;  %3779 = vmatpush.msra.mxu2 %v8876_v52 }
0x2d73   :  { %6740 = vmatmul.msk.f32.gmra.mxu1 %vm3351_vm10, %v3397_v46  ;;  %6743 = vmatmul.msk.f32.gmra.mxu2 %vm3351_vm10, %v3397_v46 }
0x2d74   :  { %3756 = vmatpush.msrb.mxu1 %v8857_v49  ;;  %3780 = vmatpush.msra.mxu2 %v8883_v35 }
0x2d76   :  { %3757 = vmatpush.msrb.mxu1 %v8861_v27  ;;  %3781 = vmatpush.msra.mxu2 %v8890_v36 }
0x2d78   :  { %3758 = vmatpush.msrb.mxu1 %v8867_v15  ;;  %3782 = vmatpush.msra.mxu2 %v8922_v45 }
0x2d7a   :  { %3759 = vmatpush.msrb.mxu1 %v8874_v12  ;;  %3783 = vmatpush.msra.mxu2 %v8928_v57 }
0x2d7c   :  { %3760 = vmatpush.msrb.mxu1 %v8881_v29 }
0x2d7e   :  { %3761 = vmatpush.msrb.mxu1 %v8888_v31 }
0x2d80   :  { %3762 = vmatpush.msrb.mxu1 %v8920_v47 }
0x2d82   :  { %3763 = vmatpush.msrb.mxu1 %v8926_v44 }
0x2ddf   :  { %v3375_v37 = vpop.f32.mrf.mxu1 }
0x2de0   :  { %v8971_v10 = vadd.f32 %v6880_v19, %v3375_v37 }
0x2de2   :  { %3566 = vrot.lane.b32.xlu2 %v8971_v10, %s7491_s20  ;;  %6744 = vmatmul.msk.f32.vlgmr.msra.gmra.mxu3 %vm278_vm8, %v8971_v10 }
0x2de3   :  { %6745 = vmatmul.msk.f32.vlgmr.msrb.gmra.mxu0 %vm278_vm8, %v8971_v10  ;;  %3842 = vmatpush.msra.mxu3 %v8857_v49 }
0x2de4   :  { %3862 = vmatpush.msrb.mxu0 %v8859_v21 }
0x2de5   :  { %3843 = vmatpush.msra.mxu3 %v8861_v27 }
0x2de6   :  { %3863 = vmatpush.msrb.mxu0 %v8865_v17 }
0x2de7   :  { %3844 = vmatpush.msra.mxu3 %v8867_v15 }
0x2de8   :  { %3864 = vmatpush.msrb.mxu0 %v8869_v33  ;;  %v3464_v11 = vpop.f32.mrf.mxu1 }
0x2de9   :  { %3845 = vmatpush.msra.mxu3 %v8874_v12  ;;  %v9003_v13 = vadd.f32 %v3464_v11, %v3434_v3 }
0x2dea   :  { %3865 = vmatpush.msrb.mxu0 %v8876_v52 }
0x2deb   :  { %3846 = vmatpush.msra.mxu3 %v8881_v29 }
0x2dec   :  { %3866 = vmatpush.msrb.mxu0 %v8883_v35 }
0x2ded   :  { %3847 = vmatpush.msra.mxu3 %v8888_v31 }
0x2dee   :  { %3867 = vmatpush.msrb.mxu0 %v8890_v36  ;;  %v3487_v28 = vpop.f32.mrf.mxu2 }
0x2def   :  { %3848 = vmatpush.msra.mxu3 %v8920_v47  ;;  %v9015_v41 = vadd.f32 %v3487_v28, %v3435_v0 }
0x2df0   :  { %3868 = vmatpush.msrb.mxu0 %v8922_v45  ;;  %v9044_v8 = vpop.f32.mrf.mxu1 }
0x2df1   :  { %3849 = vmatpush.msra.mxu3 %v8926_v44 }
0x2df2   :  { %3869 = vmatpush.msrb.mxu0 %v8928_v57 }
0x2df6   :  { %v9047_v1 = vpop.f32.mrf.mxu2 }
0x2e3c   :  { %v9019_v32 = vpop.permute.xlu2 %3566 }
0x2e60   :  { %v3533_v62 = vpop.f32.mrf.mxu0 }
0x2e61   :  { %v3556_v54 = vadd.f32 %v9009_v61, %v3533_v62 }
0x2e65   :  { %v3513_v20 = vpop.f32.mrf.mxu3 }
0x2e66   :  { %v3536_v14 = vadd.f32 %v3513_v20, %v9003_v13 }
0x2e68   :  { %v6746_v60 = vmul.f32 -1.442695, %v3536_v14 }
0x2e6a   :  { %7079 = vpow2.f32 %v6746_v60 }
0x2e70   :  { %v7080_v58 = vpop.eup %7079 }
0x2e71   :  { %v3540_v55 = vadd.f32 1.0, %v7080_v58 }
0x2e73   :  { %7081 = vrcp.f32 %v3540_v55  ;;  %v3552_v63 = vand.u32 2147483648, %v3540_v55  ;;  %v3550_v51 = vand.u32 2147483647, %v3540_v55  ;;  %vm3546_vm14 = vweird.f32 %v3540_v55 }
0x2e75   :  { %v3553_v25 = vor.u32 1.1754944e-38, %v3552_v63  ;;  %vm3551_vm2 = vcmp.eq.f32.partialorder %v3550_v51, 8.507059e+37 }
0x2e79   :  { %v7082_v56 = vpop.eup %7081 }
0x2e7a   :  { %v3542_v59 = vmul.f32 %v7082_v56, %v3540_v55  ;;  %vm3547_vm0 = vweird.f32 %v7082_v56 }
0x2e7b   :  { %vm3548_vm15 = vmor %vm3546_vm14, %vm3547_vm0 }
0x2e7c   :  { %v3543_v53 = vsub.f32 1.0, %v3542_v59 }
0x2e7e   :  { %v3544_v34 = vmul.f32 %v7082_v56, %v3543_v53 }
0x2e80   :  { %v3545_v43 = vadd.f32 %v7082_v56, %v3544_v34 }
0x2e82   :  { %v3549_v23 = vsel %vm3548_vm15, %v7082_v56, %v3545_v43 }
0x2e83   :  { %v3554_v38 = vsel %vm3551_vm2, %v3553_v25, %v3549_v23 }
0x2e84   :  { %v3557_v39 = vmul.f32 %v3556_v54, %v3554_v38  ;;  %v3560_v30 = vsub.f32 1.0, %v3554_v38  ;;  %v3569_v40 = vmul.f32 %v9019_v32, %v3554_v38 }
0x2e86   :  { %v3558_v4 = vadd.f32 %v3557_v39, %v9015_v41 }
0x2e88   :  { %7083 = vtanh.f32 %v3558_v4 }
0x2e8e   :  { %v7084_v18 = vpop.eup %7083 }
0x2e8f   :  { %3562 = vrot.lane.b32.xlu1 %v7084_v18, %s7491_s20 }
0x2f01   :  { %v3563_v5 = vpop.permute.xlu1 %3562 }
0x2f02   :  { %v3565_v26 = vmul.f32 %v3563_v5, %v3560_v30 }
0x2f04   :  { %v9022_v16 = vadd.f32 %v3569_v40, %v3565_v26 }
0x2f06   :  { %3572 = vrot.lane.b32.xlu0 %v9022_v16, %s7491_s20  ;;  %v3652_v43 = vrot.slane %v9022_v16, 6 }
0x2f78   :  { %v3573_v6 = vpop.permute.xlu0 %3572 }
0x2f79   :  { %6747 = vmatmul.msk.f32.vlgmr.msra.gmra.mxu1 %vm278_vm8, %v3573_v6  ;;  %6748 = vmatmul.msk.f32.vlgmr.msrb.gmra.mxu2 %vm278_vm8, %v3573_v6 }
0x2f7a   :  { %3920 = vmatpush.msra.mxu1 %v8857_v49  ;;  %3940 = vmatpush.msrb.mxu2 %v8859_v21 }
0x2f7c   :  { %3921 = vmatpush.msra.mxu1 %v8861_v27  ;;  %3941 = vmatpush.msrb.mxu2 %v8865_v17 }
0x2f7e   :  { %3922 = vmatpush.msra.mxu1 %v8867_v15  ;;  %3942 = vmatpush.msrb.mxu2 %v8869_v33 }
0x2f80   :  { %3923 = vmatpush.msra.mxu1 %v8874_v12  ;;  %3943 = vmatpush.msrb.mxu2 %v8876_v52 }
0x2f82   :  { %3924 = vmatpush.msra.mxu1 %v8881_v29  ;;  %3944 = vmatpush.msrb.mxu2 %v8883_v35 }
0x2f84   :  { %3925 = vmatpush.msra.mxu1 %v8888_v31  ;;  %3945 = vmatpush.msrb.mxu2 %v8890_v36 }
0x2f86   :  { %3926 = vmatpush.msra.mxu1 %v8920_v47  ;;  %3946 = vmatpush.msrb.mxu2 %v8922_v45 }
0x2f88   :  { %3927 = vmatpush.msra.mxu1 %v8926_v44  ;;  %3947 = vmatpush.msrb.mxu2 %v8928_v57 }
0x2ff6   :  { %v3593_v9 = vpop.f32.mrf.mxu1 }
0x2ff7   :  { %v3617_v7 = vrot.slane %v3593_v9, 6 }
0x2ff9   :  { %v3619_v42 = vadd.f32 %v3617_v7, %v9003_v13 }
0x2ffb   :  { %v6749_v24 = vmul.f32 -1.442695, %v3619_v42 }
0x2ffc   :  { %v3613_v19 = vpop.f32.mrf.mxu2 }
0x2ffd   :  { %7085 = vpow2.f32 %v6749_v24  ;;  %v3639_v60 = vadd.f32 %v9009_v61, %v3613_v19 }
0x2fff   :  { %v3641_v59 = vrot.slane %v3639_v60, 6 }
0x3003   :  { %v7086_v48 = vpop.eup %7085 }
0x3004   :  { %v3623_v50 = vadd.f32 1.0, %v7086_v48 }
0x3006   :  { %7087 = vrcp.f32 %v3623_v50  ;;  %v3635_v11 = vand.u32 2147483648, %v3623_v50  ;;  %v3633_v14 = vand.u32 2147483647, %v3623_v50  ;;  %vm3629_vm9 = vweird.f32 %v3623_v50 }
0x3008   :  { %v3636_v55 = vor.u32 1.1754944e-38, %v3635_v11  ;;  %vm3634_vm10 = vcmp.eq.f32.partialorder %v3633_v14, 8.507059e+37 }
0x300c   :  { %v7088_v2 = vpop.eup %7087 }
0x300d   :  { %v3625_v46 = vmul.f32 %v7088_v2, %v3623_v50  ;;  %vm3630_vm6 = vweird.f32 %v7088_v2 }
0x300e   :  { %vm3631_vm5 = vmor %vm3629_vm9, %vm3630_vm6 }
0x300f   :  { %v3626_v37 = vsub.f32 1.0, %v3625_v46 }
0x3011   :  { %v3627_v20 = vmul.f32 %v7088_v2, %v3626_v37 }
0x3013   :  { %v3628_v58 = vadd.f32 %v7088_v2, %v3627_v20 }
0x3015   :  { %v3632_v56 = vsel %vm3631_vm5, %v7088_v2, %v3628_v58 }
0x3016   :  { %v3637_v53 = vsel %vm3634_vm10, %v3636_v55, %v3632_v56 }
0x3017   :  { %v3643_v63 = vmul.f32 %v3641_v59, %v3637_v53  ;;  %v3646_v62 = vsub.f32 1.0, %v3637_v53  ;;  %v3654_v54 = vmul.f32 %v3652_v43, %v3637_v53 }
0x3019   :  { %v3644_v34 = vadd.f32 %v3643_v63, %v9015_v41 }
0x301b   :  { %7089 = vtanh.f32 %v3644_v34 }
0x3021   :  { %v7090_v51 = vpop.eup %7089 }
0x3022   :  { %3648 = vrot.lane.b32.xlu1 %v7090_v51, %s7491_s20 }
0x3094   :  { %v3649_v28 = vpop.permute.xlu1 %3648 }
0x3095   :  { %v3651_v25 = vmul.f32 %v3649_v28, %v3646_v62 }
0x3097   :  { %v3655_v23 = vadd.f32 %v3654_v54, %v3651_v25 }
0x3099   :  { %v3657_v38 = vrot.slane %v3655_v23, 2  ;;  %v3738_v20 = vrot.slane %v3655_v23, 6  ;;  %v4164_v51 = vsel %vm955_vm3, %v9022_v16, %v3655_v23 }
0x309b   :  { %3658 = vrot.lane.b32.xlu2 %v3657_v38, %s7491_s20 }
0x30f5   :  { %v3659_v39 = vpop.permute.xlu2 %3658 }
0x30f6   :  { %6750 = vmatmul.msk.f32.vlgmr.msrb.gmra.mxu3 %vm278_vm8, %v3659_v39  ;;  %6751 = vmatmul.msk.f32.vlgmr.msra.gmra.mxu0 %vm278_vm8, %v3659_v39 }
0x30f7   :  { %4006 = vmatpush.msrb.mxu3 %v8857_v49  ;;  %4026 = vmatpush.msra.mxu0 %v8859_v21 }
0x30f9   :  { %4007 = vmatpush.msrb.mxu3 %v8861_v27  ;;  %4027 = vmatpush.msra.mxu0 %v8865_v17 }
0x30fb   :  { %4008 = vmatpush.msrb.mxu3 %v8867_v15  ;;  %4028 = vmatpush.msra.mxu0 %v8869_v33 }
0x30fd   :  { %4009 = vmatpush.msrb.mxu3 %v8874_v12  ;;  %4029 = vmatpush.msra.mxu0 %v8876_v52 }
0x30ff   :  { %4010 = vmatpush.msrb.mxu3 %v8881_v29  ;;  %4030 = vmatpush.msra.mxu0 %v8883_v35 }
0x3101   :  { %4011 = vmatpush.msrb.mxu3 %v8888_v31  ;;  %4031 = vmatpush.msra.mxu0 %v8890_v36 }
0x3103   :  { %4012 = vmatpush.msrb.mxu3 %v8920_v47  ;;  %4032 = vmatpush.msra.mxu0 %v8922_v45 }
0x3105   :  { %4013 = vmatpush.msrb.mxu3 %v8926_v44  ;;  %4033 = vmatpush.msra.mxu0 %v8928_v57 }
0x3173   :  { %v3699_v7 = vpop.f32.mrf.mxu0 }
0x3174   :  { %v3725_v48 = vadd.f32 %v9009_v61, %v3699_v7 }
0x3176   :  { %v3727_v37 = vrot.slane %v3725_v48, 4 }
0x3179   :  { %v3679_v4 = vpop.f32.mrf.mxu3 }
0x317a   :  { %v3703_v18 = vrot.slane %v3679_v4, 4 }
0x317c   :  { %v3705_v30 = vadd.f32 %v3703_v18, %v9003_v13 }
0x317e   :  { %v6752_v5 = vmul.f32 -1.442695, %v3705_v30 }
0x3180   :  { %7091 = vpow2.f32 %v6752_v5 }
0x3186   :  { %v7092_v40 = vpop.eup %7091 }
0x3187   :  { %v3709_v26 = vadd.f32 1.0, %v7092_v40 }
0x3189   :  { %7093 = vrcp.f32 %v3709_v26  ;;  %v3721_v24 = vand.u32 2147483648, %v3709_v26  ;;  %v3719_v2 = vand.u32 2147483647, %v3709_v26  ;;  %vm3715_vm7 = vweird.f32 %v3709_v26 }
0x318b   :  { %v3722_v19 = vor.u32 1.1754944e-38, %v3721_v24  ;;  %vm3720_vm0 = vcmp.eq.f32.partialorder %v3719_v2, 8.507059e+37 }
0x318f   :  { %v7094_v6 = vpop.eup %7093 }
0x3190   :  { %v3711_v9 = vmul.f32 %v7094_v6, %v3709_v26  ;;  %vm3716_vm12 = vweird.f32 %v7094_v6 }
0x3191   :  { %vm3717_vm13 = vmor %vm3715_vm7, %vm3716_vm12 }
0x3192   :  { %v3712_v42 = vsub.f32 1.0, %v3711_v9 }
0x3194   :  { %v3713_v50 = vmul.f32 %v7094_v6, %v3712_v42 }
0x3196   :  { %v3714_v46 = vadd.f32 %v7094_v6, %v3713_v50 }
0x3198   :  { %v3718_v11 = vsel %vm3717_vm13, %v7094_v6, %v3714_v46 }
0x3199   :  { %v3723_v14 = vsel %vm3720_vm0, %v3722_v19, %v3718_v11 }
0x319a   :  { %v3729_v60 = vmul.f32 %v3727_v37, %v3723_v14  ;;  %v3740_v58 = vmul.f32 %v3738_v20, %v3723_v14  ;;  %v3732_v59 = vsub.f32 1.0, %v3723_v14 }
0x319c   :  { %v3730_v55 = vadd.f32 %v3729_v60, %v9015_v41 }
0x319e   :  { %7095 = vtanh.f32 %v3730_v55 }
0x31a4   :  { %v7096_v56 = vpop.eup %7095 }
0x31a5   :  { %3734 = vrot.lane.b32.xlu0 %v7096_v56, %s7491_s20  ;;  %v9118_v56 = vadd.f32 %v9047_v1, %v3435_v0 }
0x3217   :  { %v3735_v53 = vpop.permute.xlu0 %3734 }
0x3218   :  { %v3737_v63 = vmul.f32 %v3735_v53, %v3732_v59 }
0x321a   :  { %v3741_v34 = vadd.f32 %v3740_v58, %v3737_v63 }
0x321c   :  { %v3743_v62 = vrot.slane %v3741_v34, 4  ;;  %v4165_v43 = vsel %vm957_vm4, %v4164_v51, %v3741_v34  ;;  %v3824_v25 = vrot.slane %v3741_v34, 6 }
0x321e   :  { %3744 = vrot.lane.b32.xlu1 %v3743_v62, %s7491_s20 }
0x3290   :  { %v3745_v28 = vpop.permute.xlu1 %3744 }
0x3291   :  { %6753 = vmatmul.msk.f32.vlgmr.msrb.gmra.mxu1 %vm278_vm8, %v3745_v28  ;;  %6754 = vmatmul.msk.f32.vlgmr.msra.gmra.mxu2 %vm278_vm8, %v3745_v28 }
0x3292   :  { %4092 = vmatpush.msrb.mxu1 %v8857_v49  ;;  %4112 = vmatpush.msra.mxu2 %v8859_v21 }
0x3294   :  { %4093 = vmatpush.msrb.mxu1 %v8861_v27  ;;  %4113 = vmatpush.msra.mxu2 %v8865_v17 }
0x3296   :  { %4094 = vmatpush.msrb.mxu1 %v8867_v15  ;;  %4114 = vmatpush.msra.mxu2 %v8869_v33 }
0x3298   :  { %4095 = vmatpush.msrb.mxu1 %v8874_v12  ;;  %4115 = vmatpush.msra.mxu2 %v8876_v52 }
0x329a   :  { %4096 = vmatpush.msrb.mxu1 %v8881_v29  ;;  %4116 = vmatpush.msra.mxu2 %v8883_v35 }
0x329c   :  { %4097 = vmatpush.msrb.mxu1 %v8888_v31  ;;  %4117 = vmatpush.msra.mxu2 %v8890_v36 }
0x329e   :  { %4098 = vmatpush.msrb.mxu1 %v8920_v47  ;;  %4118 = vmatpush.msra.mxu2 %v8922_v45 }
0x32a0   :  { %4099 = vmatpush.msrb.mxu1 %v8926_v44  ;;  %4119 = vmatpush.msra.mxu2 %v8928_v57 }
0x330e   :  { %v3765_v49 = vpop.f32.mrf.mxu1 }
0x330f   :  { %v3789_v21 = vrot.slane %v3765_v49, 2 }
0x3311   :  { %v3791_v27 = vadd.f32 %v3789_v21, %v9003_v13 }
0x3313   :  { %v6755_v17 = vmul.f32 -1.442695, %v3791_v27 }
0x3314   :  { %v3785_v29 = vpop.f32.mrf.mxu2 }
0x3315   :  { %7097 = vpow2.f32 %v6755_v17  ;;  %v3811_v45 = vadd.f32 %v9009_v61, %v3785_v29 }
0x3317   :  { %v3813_v16 = vrot.slane %v3811_v45, 2 }
0x331b   :  { %v7098_v15 = vpop.eup %7097 }
0x331c   :  { %v3795_v33 = vadd.f32 1.0, %v7098_v15 }
0x331e   :  { %7099 = vrcp.f32 %v3795_v33  ;;  %v3807_v31 = vand.u32 2147483648, %v3795_v33  ;;  %v3805_v47 = vand.u32 2147483647, %v3795_v33  ;;  %vm3801_vm15 = vweird.f32 %v3795_v33 }
0x3320   :  { %v3808_v57 = vor.u32 1.1754944e-38, %v3807_v31  ;;  %vm3806_vm6 = vcmp.eq.f32.partialorder %v3805_v47, 8.507059e+37 }
0x3324   :  { %v7100_v12 = vpop.eup %7099 }
0x3325   :  { %v3797_v52 = vmul.f32 %v7100_v12, %v3795_v33  ;;  %vm3802_vm14 = vweird.f32 %v7100_v12 }
0x3326   :  { %vm3803_vm2 = vmor %vm3801_vm15, %vm3802_vm14 }
0x3327   :  { %v3798_v35 = vsub.f32 1.0, %v3797_v52 }
0x3329   :  { %v3799_v36 = vmul.f32 %v7100_v12, %v3798_v35 }
0x332b   :  { %v3800_v44 = vadd.f32 %v7100_v12, %v3799_v36 }
0x332d   :  { %v3804_v13 = vsel %vm3803_vm2, %v7100_v12, %v3800_v44 }
0x332e   :  { %v3809_v54 = vsel %vm3806_vm6, %v3808_v57, %v3804_v13 }
0x332f   :  { %v3815_v23 = vmul.f32 %v3813_v16, %v3809_v54  ;;  %v3826_v38 = vmul.f32 %v3824_v25, %v3809_v54  ;;  %v3818_v18 = vsub.f32 1.0, %v3809_v54 }
0x3331   :  { %v3816_v39 = vadd.f32 %v3815_v23, %v9015_v41  ;;  %v9111_v41 = vadd.f32 %v9044_v8, %v3434_v3  ;;  %v4184_v23 = vld [vmem:[#allocation12 + $0x70] sm:$0xff] }
0x3333   :  { %7101 = vtanh.f32 %v3816_v39  ;;  %v4182_v39 = vld [vmem:[#allocation12 + $0x60] sm:$0xff] }
0x3339   :  { %v7102_v4 = vpop.eup %7101 }
0x333a   :  { %3820 = vrot.lane.b32.xlu2 %v7102_v4, %s7491_s20  ;;  %v4183_v4 = vld [vmem:[#allocation12 + $0x68] sm:$0xff] }
0x3394   :  { %v3821_v30 = vpop.permute.xlu2 %3820 }
0x3395   :  { %v3823_v5 = vmul.f32 %v3821_v30, %v3818_v18  ;;  %v4180_v18 = vld [vmem:[#allocation12 + $0x50] sm:$0xff]  ;;  %v4181_v30 = vld [vmem:[#allocation12 + $0x58] sm:$0xff] }
0x3397   :  { %v3827_v40 = vadd.f32 %v3826_v38, %v3823_v5  ;;  %v4185_v38 = vld [vmem:[#allocation12 + $0x78] sm:$0xff]  ;;  %v4178_v5 = vld [vmem:[#allocation12 + $0x40] sm:$0xff] }
0x3399   :  { %v3829_v26 = vrot.slane %v3827_v40, 6  ;;  %v9103_v6 = vsel %vm959_vm11, %v4165_v43, %v3827_v40  ;;  %v4179_v40 = vld [vmem:[#allocation12 + $0x48] sm:$0xff] }
0x339b   :  { %3830 = vrot.lane.b32.xlu0 %v3829_v26, %s7491_s20 }
0x340d   :  { %v3831_v9 = vpop.permute.xlu0 %3830 }
0x340e   :  { %6756 = vmatmul.msk.f32.vlgmr.msra.gmra.mxu3 %vm278_vm8, %v3831_v9  ;;  %6757 = vmatmul.msk.f32.vlgmr.msrb.gmra.mxu0 %vm278_vm8, %v3831_v9 }
0x340f   :  { %4233 = vmatpush.msra.mxu3 %v4184_v23  ;;  %4256 = vmatpush.msrb.mxu0 %v4185_v38 }
0x3411   :  { %4234 = vmatpush.msra.mxu3 %v4182_v39  ;;  %4257 = vmatpush.msrb.mxu0 %v4183_v4 }
0x3413   :  { %4235 = vmatpush.msra.mxu3 %v4180_v18  ;;  %4258 = vmatpush.msrb.mxu0 %v4181_v30 }
0x3415   :  { %4236 = vmatpush.msra.mxu3 %v4178_v5  ;;  %4259 = vmatpush.msrb.mxu0 %v4179_v40  ;;  %v9191_v5 = vld [vmem:[#allocation14 + $0xb0] sm:$0xff]  ;;  %v9193_v40 = vld [vmem:[#allocation14 + $0xb8] sm:$0xff] }
0x348b   :  { %v3871_v14 = vpop.f32.mrf.mxu0 }
0x348c   :  { %v3894_v8 = vadd.f32 %v9009_v61, %v3871_v14  ;;  %v4170_v14 = vld [vmem:[#allocation12] sm:$0xff] }
0x3491   :  { %v3851_v7 = vpop.f32.mrf.mxu3 }
0x3492   :  { %v3874_v42 = vadd.f32 %v3851_v7, %v9111_v41 }
0x3494   :  { %v6758_v24 = vmul.f32 -1.442695, %v3874_v42 }
0x3496   :  { %7103 = vpow2.f32 %v6758_v24 }
0x349c   :  { %v7104_v48 = vpop.eup %7103 }
0x349d   :  { %v3878_v50 = vadd.f32 1.0, %v7104_v48 }
0x349f   :  { %7105 = vrcp.f32 %v3878_v50  ;;  %v3890_v37 = vand.u32 2147483648, %v3878_v50  ;;  %v3888_v20 = vand.u32 2147483647, %v3878_v50  ;;  %vm3884_vm5 = vweird.f32 %v3878_v50 }
0x34a1   :  { %v3891_v3 = vor.u32 1.1754944e-38, %v3890_v37  ;;  %vm3889_vm12 = vcmp.eq.f32.partialorder %v3888_v20, 8.507059e+37  ;;  %v4175_v37 = vld [vmem:[#allocation12 + $0x28] sm:$0xff]  ;;  %v4173_v20 = vld [vmem:[#allocation12 + $0x18] sm:$0xff] }
0x34a5   :  { %v7106_v2 = vpop.eup %7105 }
0x34a6   :  { %v3880_v46 = vmul.f32 %v7106_v2, %v3878_v50  ;;  %vm3885_vm9 = vweird.f32 %v7106_v2 }
0x34a7   :  { %vm3886_vm10 = vmor %vm3884_vm5, %vm3885_vm9 }
0x34a8   :  { %v3881_v19 = vsub.f32 1.0, %v3880_v46  ;;  %v4177_v46 = vld [vmem:[#allocation12 + $0x38] sm:$0xff] }
0x34a9   :  { %4260 = vmatpush.msrb.mxu0 %v4177_v46  ;;  %v9280_v46 = vld [vmem:[%s10083_s14 + $0x2] sm:$0x3] }
0x34aa   :  { %v3882_v11 = vmul.f32 %v7106_v2, %v3881_v19  ;;  %v4174_v19 = vld [vmem:[#allocation12 + $0x20] sm:$0xff] }
0x34ab   :  { %4261 = vmatpush.msrb.mxu0 %v4175_v37 }
0x34ac   :  { %v3883_v60 = vadd.f32 %v7106_v2, %v3882_v11  ;;  %v4172_v11 = vld [vmem:[#allocation12 + $0x10] sm:$0xff] }
0x34ad   :  { %4262 = vmatpush.msrb.mxu0 %v4173_v20 }
0x34ae   :  { %v3887_v58 = vsel %vm3886_vm10, %v7106_v2, %v3883_v60  ;;  %v4176_v2 = vld [vmem:[#allocation12 + $0x30] sm:$0xff]  ;;  %v4171_v60 = vld [vmem:[#allocation12 + $0x8] sm:$0xff] }
0x34af   :  { %v3892_v55 = vsel %vm3889_vm12, %v3891_v3, %v3887_v58  ;;  %4237 = vmatpush.msra.mxu3 %v4176_v2  ;;  %4263 = vmatpush.msrb.mxu0 %v4171_v60 }
0x34b0   :  { %v3895_v59 = vmul.f32 %v3894_v8, %v3892_v55  ;;  %v3898_v34 = vsub.f32 1.0, %v3892_v55  ;;  %v3905_v62 = vmul.f32 %v3892_v55, %v3829_v26 }
0x34b1   :  { %4238 = vmatpush.msra.mxu3 %v4174_v19  ;;  %v4211_v19 = vperm.slane %v9280_v46, 0 }
0x34b2   :  { %v3896_v53 = vadd.f32 %v3895_v59, %v9118_v56 }
0x34b3   :  { %4239 = vmatpush.msra.mxu3 %v4172_v11 }
0x34b4   :  { %7107 = vtanh.f32 %v3896_v53 }
0x34b5   :  { %4240 = vmatpush.msra.mxu3 %v4170_v14 }
0x34ba   :  { %v7108_v63 = vpop.eup %7107 }
0x34bb   :  { %3900 = vrot.lane.b32.xlu1 %v7108_v63, %s7491_s20 }
0x352d   :  { %v3901_v51 = vpop.permute.xlu1 %3900 }
0x352e   :  { %v3903_v43 = vmul.f32 %v3901_v51, %v3898_v34 }
0x3530   :  { %v9122_v28 = vadd.f32 %v3905_v62, %v3903_v43 }
0x3532   :  { %3908 = vrot.lane.b32.xlu2 %v9122_v28, %s7491_s20  ;;  %v3988_v9 = vrot.slane %v9122_v28, 6 }
0x358c   :  { %v3909_v22 = vpop.permute.xlu2 %3908 }
0x358d   :  { %6759 = vmatmul.msk.f32.vlgmr.msra.gmra.mxu1 %vm278_vm8, %v3909_v22  ;;  %6760 = vmatmul.msk.f32.vlgmr.msrb.gmra.mxu2 %vm278_vm8, %v3909_v22 }
0x360a   :  { %v3929_v0 = vpop.f32.mrf.mxu1 }
0x360b   :  { %v3953_v1 = vrot.slane %v3929_v0, 6 }
0x360d   :  { %v3955_v49 = vadd.f32 %v3953_v1, %v9111_v41 }
0x360f   :  { %v6761_v21 = vmul.f32 -1.442695, %v3955_v49 }
0x3610   :  { %v3949_v12 = vpop.f32.mrf.mxu2 }
0x3611   :  { %7109 = vpow2.f32 %v6761_v21  ;;  %v3975_v36 = vadd.f32 %v9009_v61, %v3949_v12 }
0x3613   :  { %v3977_v57 = vrot.slane %v3975_v36, 6  ;;  %v9148_v36 = vld [vmem:[#allocation14 + $0xf0] sm:$0xff] }
0x3614   :  { %4279 = vmatpush.msra.mxu1 %v9148_v36 }
0x3617   :  { %v7110_v27 = vpop.eup %7109 }
0x3618   :  { %v3959_v17 = vadd.f32 1.0, %v7110_v27 }
0x361a   :  { %7111 = vrcp.f32 %v3959_v17  ;;  %v3971_v29 = vand.u32 2147483648, %v3959_v17  ;;  %v3969_v31 = vand.u32 2147483647, %v3959_v17  ;;  %vm3965_vm13 = vweird.f32 %v3959_v17 }
0x361c   :  { %v3972_v45 = vor.u32 1.1754944e-38, %v3971_v29  ;;  %vm3970_vm14 = vcmp.eq.f32.partialorder %v3969_v31, 8.507059e+37 }
0x3620   :  { %v7112_v15 = vpop.eup %7111 }
0x3621   :  { %v3961_v33 = vmul.f32 %v7112_v15, %v3959_v17  ;;  %vm3966_vm7 = vweird.f32 %v7112_v15 }
0x3622   :  { %vm3967_vm0 = vmor %vm3965_vm13, %vm3966_vm7 }
0x3623   :  { %v3962_v52 = vsub.f32 1.0, %v3961_v33 }
0x3625   :  { %v3963_v35 = vmul.f32 %v7112_v15, %v3962_v52 }
0x3627   :  { %v3964_v47 = vadd.f32 %v7112_v15, %v3963_v35 }
0x3629   :  { %v3968_v44 = vsel %vm3967_vm0, %v7112_v15, %v3964_v47  ;;  %v9150_v47 = vld [vmem:[#allocation14 + $0xf8] sm:$0xff] }
0x362a   :  { %v3973_v13 = vsel %vm3970_vm14, %v3972_v45, %v3968_v44  ;;  %v9152_v45 = vld [vmem:[#allocation14 + $0xe0] sm:$0xff]  ;;  %4299 = vmatpush.msrb.mxu2 %v9150_v47  ;;  %v9156_v44 = vld [vmem:[#allocation14 + $0xe8] sm:$0xff] }
0x362b   :  { %v3979_v16 = vmul.f32 %v3977_v57, %v3973_v13  ;;  %v3982_v26 = vsub.f32 1.0, %v3973_v13  ;;  %v3990_v24 = vmul.f32 %v3988_v9, %v3973_v13  ;;  %v9158_v57 = vld [vmem:[#allocation14 + $0xd0] sm:$0xff]  ;;  %v9160_v13 = vld [vmem:[#allocation14 + $0xd8] sm:$0xff]  ;;  %4280 = vmatpush.msra.mxu1 %v9152_v45  ;;  %v9199_v9 = vld [vmem:[#allocation14 + $0xa8] sm:$0xff] }
0x362c   :  { %4300 = vmatpush.msrb.mxu2 %v9156_v44 }
0x362d   :  { %v3980_v25 = vadd.f32 %v3979_v16, %v9118_v56  ;;  %v9166_v16 = vld [vmem:[#allocation14 + $0xc0] sm:$0xff]  ;;  %4281 = vmatpush.msra.mxu1 %v9158_v57 }
0x362e   :  { %4301 = vmatpush.msrb.mxu2 %v9160_v13 }
0x362f   :  { %7113 = vtanh.f32 %v3980_v25  ;;  %v9168_v25 = vld [vmem:[#allocation14 + $0xc8] sm:$0xff]  ;;  %4282 = vmatpush.msra.mxu1 %v9166_v16 }
0x3630   :  { %4302 = vmatpush.msrb.mxu2 %v9168_v25 }
0x3631   :  { %4283 = vmatpush.msra.mxu1 %v9191_v5 }
0x3632   :  { %4303 = vmatpush.msrb.mxu2 %v9193_v40 }
0x3634   :  { %4304 = vmatpush.msrb.mxu2 %v9199_v9 }
0x3635   :  { %v7114_v54 = vpop.eup %7113 }
0x3636   :  { %3984 = vrot.lane.b32.xlu0 %v7114_v54, %s7491_s20 }
0x36a8   :  { %v3985_v7 = vpop.permute.xlu0 %3984 }
0x36a9   :  { %v3987_v42 = vmul.f32 %v3985_v7, %v3982_v26  ;;  %v9195_v26 = vld [vmem:[#allocation14 + $0xa0] sm:$0xff]  ;;  %v9203_v7 = vld [vmem:[#allocation14 + $0x98] sm:$0xff] }
0x36aa   :  { %4284 = vmatpush.msra.mxu1 %v9195_v26  ;;  %4305 = vmatpush.msrb.mxu2 %v9203_v7 }
0x36ab   :  { %v9133_v48 = vadd.f32 %v3990_v24, %v3987_v42  ;;  %v9209_v42 = vld [vmem:[#allocation14 + $0x80] sm:$0xff]  ;;  %v9211_v24 = vld [vmem:[#allocation14 + $0x88] sm:$0xff] }
0x36ac   :  { %4306 = vmatpush.msrb.mxu2 %v9211_v24 }
0x36ad   :  { %v3993_v50 = vrot.slane %v9133_v48, 2  ;;  %v4074_v33 = vrot.slane %v9133_v48, 6  ;;  %v4167_v4 = vsel %vm955_vm3, %v9122_v28, %v9133_v48  ;;  %v9201_v28 = vld [vmem:[#allocation14 + $0x90] sm:$0xff] }
0x36ae   :  { %4285 = vmatpush.msra.mxu1 %v9201_v28 }
0x36af   :  { %3994 = vrot.lane.b32.xlu1 %v3993_v50, %s7491_s20 }
0x36b0   :  { %4286 = vmatpush.msra.mxu1 %v9209_v42 }
0x36b7   :  { %4217 = vrot.lane.b32.xlu1 %v9103_v6, %s7491_s20 }
0x3721   :  { %v3995_v3 = vpop.permute.xlu1 %3994 }
0x3722   :  { %6762 = vmatmul.msk.f32.vlgmr.msrb.gmra.mxu3 %vm278_vm8, %v3995_v3  ;;  %6763 = vmatmul.msk.f32.vlgmr.msra.gmra.mxu0 %vm278_vm8, %v3995_v3 }
0x3723   :  { %4356 = vmatpush.msrb.mxu3 %v9148_v36  ;;  %4376 = vmatpush.msra.mxu0 %v9150_v47 }
0x3725   :  { %4357 = vmatpush.msrb.mxu3 %v9152_v45  ;;  %4377 = vmatpush.msra.mxu0 %v9156_v44 }
0x3727   :  { %4358 = vmatpush.msrb.mxu3 %v9158_v57  ;;  %4378 = vmatpush.msra.mxu0 %v9160_v13 }
0x3729   :  { %v4218_v6 = vpop.permute.xlu1 %4217  ;;  %4359 = vmatpush.msrb.mxu3 %v9166_v16  ;;  %4379 = vmatpush.msra.mxu0 %v9168_v25 }
0x372a   :  { %6770 = vmatmul.msk.f32.vlgmr.msra.gmra.mxu3 %vm278_vm8, %v4218_v6  ;;  %6772 = vmatmul.msk.f32.vlgmr.msrb.gmra.mxu0 %vm278_vm8, %v4218_v6 }
0x372b   :  { %4360 = vmatpush.msrb.mxu3 %v9191_v5  ;;  %4380 = vmatpush.msra.mxu0 %v9193_v40 }
0x372d   :  { %4361 = vmatpush.msrb.mxu3 %v9195_v26  ;;  %4381 = vmatpush.msra.mxu0 %v9199_v9 }
0x372f   :  { %4362 = vmatpush.msrb.mxu3 %v9201_v28  ;;  %4382 = vmatpush.msra.mxu0 %v9203_v7 }
0x3731   :  { %4363 = vmatpush.msrb.mxu3 %v9209_v42  ;;  %4383 = vmatpush.msra.mxu0 %v9211_v24 }
0x3733   :  { %4528 = vmatpush.msra.mxu3 %v9148_v36  ;;  %4548 = vmatpush.msrb.mxu0 %v9150_v47 }
0x3735   :  { %4529 = vmatpush.msra.mxu3 %v9152_v45  ;;  %4549 = vmatpush.msrb.mxu0 %v9156_v44 }
0x3737   :  { %4530 = vmatpush.msra.mxu3 %v9158_v57  ;;  %4550 = vmatpush.msrb.mxu0 %v9160_v13 }
0x3739   :  { %4531 = vmatpush.msra.mxu3 %v9166_v16  ;;  %4551 = vmatpush.msrb.mxu0 %v9168_v25 }
0x373b   :  { %4532 = vmatpush.msra.mxu3 %v9191_v5  ;;  %4552 = vmatpush.msrb.mxu0 %v9193_v40 }
0x373d   :  { %4533 = vmatpush.msra.mxu3 %v9195_v26  ;;  %4553 = vmatpush.msrb.mxu0 %v9199_v9 }
0x373f   :  { %4534 = vmatpush.msra.mxu3 %v9201_v28  ;;  %4554 = vmatpush.msrb.mxu0 %v9203_v7 }
0x3741   :  { %4535 = vmatpush.msra.mxu3 %v9209_v42  ;;  %4555 = vmatpush.msrb.mxu0 %v9211_v24 }
0x379f   :  { %v4035_v62 = vpop.f32.mrf.mxu0 }
0x37a0   :  { %v4061_v0 = vadd.f32 %v9009_v61, %v4035_v62 }
0x37a2   :  { %v4063_v17 = vrot.slane %v4061_v0, 4 }
0x37a5   :  { %v4015_v8 = vpop.f32.mrf.mxu3 }
0x37a6   :  { %v4039_v58 = vrot.slane %v4015_v8, 4 }
0x37a8   :  { %v4041_v55 = vadd.f32 %v4039_v58, %v9111_v41 }
0x37aa   :  { %v6764_v59 = vmul.f32 -1.442695, %v4041_v55 }
0x37ac   :  { %7115 = vpow2.f32 %v6764_v59 }
0x37ad   :  { %v4242_v11 = vpop.f32.mrf.mxu3 }
0x37ae   :  { %v9286_v14 = vadd.f32 %v4242_v11, %v4211_v19 }
0x37b2   :  { %v7116_v53 = vpop.eup %7115 }
0x37b3   :  { %v4045_v63 = vadd.f32 1.0, %v7116_v53 }
0x37b5   :  { %7117 = vrcp.f32 %v4045_v63  ;;  %v4057_v22 = vand.u32 2147483648, %v4045_v63  ;;  %v4055_v49 = vand.u32 2147483647, %v4045_v63  ;;  %vm4051_vm2 = vweird.f32 %v4045_v63 }
0x37b7   :  { %v4058_v27 = vor.u32 1.1754944e-38, %v4057_v22  ;;  %vm4056_vm9 = vcmp.eq.f32.partialorder %v4055_v49, 8.507059e+37 }
0x37bb   :  { %v7118_v34 = vpop.eup %7117 }
0x37bc   :  { %v4047_v51 = vmul.f32 %v7118_v34, %v4045_v63  ;;  %vm4052_vm15 = vweird.f32 %v7118_v34 }
0x37bd   :  { %vm4053_vm6 = vmor %vm4051_vm2, %vm4052_vm15 }
0x37be   :  { %v4048_v43 = vsub.f32 1.0, %v4047_v51 }
0x37c0   :  { %v4049_v1 = vmul.f32 %v7118_v34, %v4048_v43 }
0x37c2   :  { %v4050_v21 = vadd.f32 %v7118_v34, %v4049_v1 }
0x37c4   :  { %v4054_v15 = vsel %vm4053_vm6, %v7118_v34, %v4050_v21 }
0x37c5   :  { %v4059_v12 = vsel %vm4056_vm9, %v4058_v27, %v4054_v15 }
0x37c6   :  { %v4065_v52 = vmul.f32 %v4063_v17, %v4059_v12  ;;  %v4076_v29 = vmul.f32 %v4074_v33, %v4059_v12  ;;  %v4068_v54 = vsub.f32 1.0, %v4059_v12 }
0x37c8   :  { %v4066_v35 = vadd.f32 %v4065_v52, %v9118_v56 }
0x37ca   :  { %7119 = vtanh.f32 %v4066_v35 }
0x37d0   :  { %v7120_v31 = vpop.eup %7119 }
0x37d1   :  { %4070 = vrot.lane.b32.xlu2 %v7120_v31, %s7491_s20 }
0x382b   :  { %v4071_v23 = vpop.permute.xlu2 %4070 }
0x382c   :  { %v4073_v38 = vmul.f32 %v4071_v23, %v4068_v54 }
0x382e   :  { %v9180_v39 = vadd.f32 %v4076_v29, %v4073_v38  ;;  %v4212_v38 = vperm.slane %v9280_v46, 1 }
0x3830   :  { %v4079_v18 = vrot.slane %v9180_v39, 4  ;;  %v9188_v30 = vsel %vm957_vm4, %v4167_v4, %v9180_v39  ;;  %v4160_v27 = vrot.slane %v9180_v39, 6 }
0x3832   :  { %4080 = vrot.lane.b32.xlu0 %v4079_v18, %s7491_s20  ;;  %v4265_v18 = vpop.f32.mrf.mxu0 }
0x3833   :  { %v9301_v11 = vadd.f32 %v4265_v18, %v4212_v38 }
0x38a4   :  { %v4081_v48 = vpop.permute.xlu0 %4080 }
0x38a5   :  { %6765 = vmatmul.msk.f32.vlgmr.msrb.gmra.mxu1 %vm278_vm8, %v4081_v48  ;;  %6766 = vmatmul.msk.f32.vlgmr.msra.gmra.mxu2 %vm278_vm8, %v4081_v48 }
0x38a6   :  { %4442 = vmatpush.msrb.mxu1 %v9148_v36  ;;  %4462 = vmatpush.msra.mxu2 %v9150_v47 }
0x38a8   :  { %4443 = vmatpush.msrb.mxu1 %v9152_v45  ;;  %4463 = vmatpush.msra.mxu2 %v9156_v44 }
0x38aa   :  { %4444 = vmatpush.msrb.mxu1 %v9158_v57  ;;  %4464 = vmatpush.msra.mxu2 %v9160_v13 }
0x38ac   :  { %4445 = vmatpush.msrb.mxu1 %v9166_v16  ;;  %4465 = vmatpush.msra.mxu2 %v9168_v25 }
0x38ad   :  { %6774 = vmatmul.msk.f32.vlgmr.msra.gmra.mxu1 %vm278_vm8, %v8971_v10  ;;  %6775 = vmatmul.msk.f32.vlgmr.msrb.gmra.mxu2 %vm278_vm8, %v8971_v10 }
0x38ae   :  { %4446 = vmatpush.msrb.mxu1 %v9191_v5  ;;  %4466 = vmatpush.msra.mxu2 %v9193_v40 }
0x38b0   :  { %4447 = vmatpush.msrb.mxu1 %v9195_v26  ;;  %4467 = vmatpush.msra.mxu2 %v9199_v9 }
0x38b2   :  { %4448 = vmatpush.msrb.mxu1 %v9201_v28  ;;  %4468 = vmatpush.msra.mxu2 %v9203_v7 }
0x38b4   :  { %4449 = vmatpush.msrb.mxu1 %v9209_v42  ;;  %4469 = vmatpush.msra.mxu2 %v9211_v24 }
0x38b6   :  { %4614 = vmatpush.msra.mxu1 %v9148_v36  ;;  %4634 = vmatpush.msrb.mxu2 %v9150_v47 }
0x38b8   :  { %4615 = vmatpush.msra.mxu1 %v9152_v45  ;;  %4635 = vmatpush.msrb.mxu2 %v9156_v44 }
0x38ba   :  { %4616 = vmatpush.msra.mxu1 %v9158_v57  ;;  %4636 = vmatpush.msrb.mxu2 %v9160_v13 }
0x38bc   :  { %4617 = vmatpush.msra.mxu1 %v9166_v16  ;;  %4637 = vmatpush.msrb.mxu2 %v9168_v25 }
0x38be   :  { %4618 = vmatpush.msra.mxu1 %v9191_v5  ;;  %4638 = vmatpush.msrb.mxu2 %v9193_v40 }
0x38c0   :  { %4619 = vmatpush.msra.mxu1 %v9195_v26  ;;  %4639 = vmatpush.msrb.mxu2 %v9199_v9 }
0x38c2   :  { %4620 = vmatpush.msra.mxu1 %v9201_v28  ;;  %4640 = vmatpush.msrb.mxu2 %v9203_v7 }
0x38c4   :  { %4621 = vmatpush.msra.mxu1 %v9209_v42  ;;  %4641 = vmatpush.msrb.mxu2 %v9211_v24 }
0x3922   :  { %v4101_v50 = vpop.f32.mrf.mxu1 }
0x3923   :  { %v4125_v2 = vrot.slane %v4101_v50, 2 }
0x3925   :  { %v4127_v37 = vadd.f32 %v4125_v2, %v9111_v41 }
0x3927   :  { %v6767_v20 = vmul.f32 -1.442695, %v4127_v37 }
0x3928   :  { %v4121_v63 = vpop.f32.mrf.mxu2 }
0x3929   :  { %7121 = vpow2.f32 %v6767_v20  ;;  %v4147_v22 = vadd.f32 %v9009_v61, %v4121_v63  ;;  %v9294_v61 = vld [vmem:[%s10084_s15 + $0x1] ss:$0 sm:$0xff] }
0x392a   :  { %v4288_v60 = vpop.f32.mrf.mxu1 }
0x392b   :  { %v4311_v3 = vadd.f32 %v4288_v60, %v9286_v14  ;;  %v4149_v15 = vrot.slane %v4147_v22, 2 }
0x392d   :  { %v6776_v6 = vmul.f32 -1.442695, %v4311_v3 }
0x392f   :  { %v7122_v8 = vpop.eup %7121  ;;  %7123 = vpow2.f32 %v6776_v6 }
0x3930   :  { %v4131_v58 = vadd.f32 1.0, %v7122_v8  ;;  %v4308_v23 = vpop.f32.mrf.mxu2 }
0x3931   :  { %v4331_v2 = vadd.f32 %v9294_v61, %v4308_v23 }
0x3932   :  { %7125 = vrcp.f32 %v4131_v58  ;;  %v4143_v51 = vand.u32 2147483648, %v4131_v58  ;;  %v4141_v43 = vand.u32 2147483647, %v4131_v58  ;;  %vm4137_vm10 = vweird.f32 %v4131_v58 }
0x3934   :  { %v4144_v21 = vor.u32 1.1754944e-38, %v4143_v51  ;;  %vm4142_vm7 = vcmp.eq.f32.partialorder %v4141_v43, 8.507059e+37 }
0x3935   :  { %v7124_v55 = vpop.eup %7123 }
0x3936   :  { %v4315_v59 = vadd.f32 1.0, %v7124_v55 }
0x3938   :  { %v7126_v53 = vpop.eup %7125  ;;  %7127 = vrcp.f32 %v4315_v59  ;;  %v4325_v52 = vand.u32 2147483647, %v4315_v59  ;;  %v4327_v29 = vand.u32 2147483648, %v4315_v59  ;;  %vm4321_vm0 = vweird.f32 %v4315_v59 }
0x3939   :  { %v4133_v41 = vmul.f32 %v7126_v53, %v4131_v58  ;;  %vm4138_vm5 = vweird.f32 %v7126_v53 }
0x393a   :  { %vm4139_vm12 = vmor %vm4137_vm10, %vm4138_vm5  ;;  %v4328_v48 = vor.u32 1.1754944e-38, %v4327_v29  ;;  %vm4326_vm15 = vcmp.eq.f32.partialorder %v4325_v52, 8.507059e+37 }
0x393b   :  { %v4134_v34 = vsub.f32 1.0, %v4133_v41 }
0x393d   :  { %v4135_v62 = vmul.f32 %v7126_v53, %v4134_v34 }
0x393e   :  { %v7128_v0 = vpop.eup %7127 }
0x393f   :  { %v4136_v1 = vadd.f32 %v7126_v53, %v4135_v62  ;;  %v4317_v49 = vmul.f32 %v7128_v0, %v4315_v59  ;;  %vm4322_vm13 = vweird.f32 %v7128_v0 }
0x3940   :  { %vm4323_vm14 = vmor %vm4321_vm0, %vm4322_vm13 }
0x3941   :  { %v4140_v17 = vsel %vm4139_vm12, %v7126_v53, %v4136_v1  ;;  %v4318_v33 = vsub.f32 1.0, %v4317_v49 }
0x3942   :  { %v4145_v12 = vsel %vm4142_vm7, %v4144_v21, %v4140_v17 }
0x3943   :  { %v4151_v35 = vmul.f32 %v4149_v15, %v4145_v12  ;;  %v4319_v31 = vmul.f32 %v7128_v0, %v4318_v33  ;;  %v4162_v54 = vmul.f32 %v4160_v27, %v4145_v12  ;;  %v4154_v6 = vsub.f32 1.0, %v4145_v12 }
0x3945   :  { %v4152_v39 = vadd.f32 %v4151_v35, %v9118_v56  ;;  %v4320_v4 = vadd.f32 %v7128_v0, %v4319_v31 }
0x3947   :  { %7129 = vtanh.f32 %v4152_v39  ;;  %v4324_v50 = vsel %vm4323_vm14, %v7128_v0, %v4320_v4 }
0x3948   :  { %v4329_v37 = vsel %vm4326_vm15, %v4328_v48, %v4324_v50 }
0x3949   :  { %v4332_v20 = vmul.f32 %v4331_v2, %v4329_v37  ;;  %v4335_v53 = vsub.f32 1.0, %v4329_v37  ;;  %v4341_v63 = vmul.f32 %v4329_v37, %v9019_v32 }
0x394b   :  { %v4333_v60 = vadd.f32 %v4332_v20, %v9301_v11 }
0x394d   :  { %v7130_v3 = vpop.eup %7129  ;;  %7131 = vtanh.f32 %v4333_v60 }
0x394e   :  { %4156 = vrot.lane.b32.xlu2 %v7130_v3, %s7491_s20 }
0x3953   :  { %v7132_v56 = vpop.eup %7131 }
0x3954   :  { %4337 = vrot.lane.b32.xlu0 %v7132_v56, %s7491_s20 }
0x39a8   :  { %v4157_v8 = vpop.permute.xlu2 %4156 }
0x39a9   :  { %v4159_v58 = vmul.f32 %v4157_v8, %v4154_v6 }
0x39ab   :  { %v4163_v55 = vadd.f32 %v4162_v54, %v4159_v58 }
0x39ad   :  { %v4169_v59 = vsel %vm959_vm11, %v9188_v30, %v4163_v55 }
0x39ae   :  { %4219 = vrot.lane.b32.xlu1 %v4169_v59, %s7491_s20 }
0x39c6   :  { %v4338_v41 = vpop.permute.xlu0 %4337 }
0x39c7   :  { %v4340_v34 = vmul.f32 %v4338_v41, %v4335_v53 }
0x39c9   :  { %v9310_v51 = vadd.f32 %v4341_v63, %v4340_v34 }
0x39cb   :  { %4344 = vrot.lane.b32.xlu2 %v9310_v51, %s7491_s20  ;;  %v4424_v60 = vrot.slane %v9310_v51, 6 }
0x3a20   :  { %v4220_v62 = vpop.permute.xlu1 %4219 }
0x3a21   :  { %6771 = vmatmul.msk.f32.gmra.mxu3 %vm278_vm8, %v4220_v62  ;;  %6773 = vmatmul.msk.f32.gmra.mxu0 %vm278_vm8, %v4220_v62 }
0x3a25   :  { %v4345_v43 = vpop.permute.xlu2 %4344 }
0x3a29   :  { %6777 = vmatmul.msk.f32.vlgmr.msrb.gmra.mxu3 %vm278_vm8, %v4345_v43  ;;  %6778 = vmatmul.msk.f32.vlgmr.msra.gmra.mxu0 %vm278_vm8, %v4345_v43 }
0x3a2a   :  { %4692 = vmatpush.msrb.mxu3 %v9148_v36  ;;  %4712 = vmatpush.msra.mxu0 %v9150_v47 }
0x3a2c   :  { %4693 = vmatpush.msrb.mxu3 %v9152_v45  ;;  %4713 = vmatpush.msra.mxu0 %v9156_v44 }
0x3a2e   :  { %4694 = vmatpush.msrb.mxu3 %v9158_v57  ;;  %4714 = vmatpush.msra.mxu0 %v9160_v13 }
0x3a30   :  { %4695 = vmatpush.msrb.mxu3 %v9166_v16  ;;  %4715 = vmatpush.msra.mxu0 %v9168_v25 }
0x3a32   :  { %4696 = vmatpush.msrb.mxu3 %v9191_v5  ;;  %4716 = vmatpush.msra.mxu0 %v9193_v40 }
0x3a34   :  { %4697 = vmatpush.msrb.mxu3 %v9195_v26  ;;  %4717 = vmatpush.msra.mxu0 %v9199_v9 }
0x3a36   :  { %4698 = vmatpush.msrb.mxu3 %v9201_v28  ;;  %4718 = vmatpush.msra.mxu0 %v9203_v7 }
0x3a38   :  { %4699 = vmatpush.msrb.mxu3 %v9209_v42  ;;  %4719 = vmatpush.msra.mxu0 %v9211_v24 }
0x3a9e   :  { %v9337_v27 = vpop.f32.mrf.mxu0 }
0x3aa4   :  { %v9334_v30 = vpop.f32.mrf.mxu3 }
0x3aa6   :  { %v4385_v12 = vpop.f32.mrf.mxu0 }
0x3aa7   :  { %v4411_v35 = vadd.f32 %v9294_v61, %v4385_v12 }
0x3aa9   :  { %v4413_v4 = vrot.slane %v4411_v35, 6 }
0x3aac   :  { %v4365_v22 = vpop.f32.mrf.mxu3 }
0x3aad   :  { %v4389_v0 = vrot.slane %v4365_v22, 6 }
0x3aaf   :  { %v4391_v1 = vadd.f32 %v4389_v0, %v9286_v14 }
0x3ab1   :  { %v6779_v49 = vmul.f32 -1.442695, %v4391_v1 }
0x3ab3   :  { %7133 = vpow2.f32 %v6779_v49 }
0x3ab9   :  { %v7134_v21 = vpop.eup %7133 }
0x3aba   :  { %v4395_v17 = vadd.f32 1.0, %v7134_v21 }
0x3abc   :  { %7135 = vrcp.f32 %v4395_v17  ;;  %v4407_v29 = vand.u32 2147483648, %v4395_v17  ;;  %v4405_v54 = vand.u32 2147483647, %v4395_v17  ;;  %vm4401_vm6 = vweird.f32 %v4395_v17 }
0x3abe   :  { %v4408_v39 = vor.u32 1.1754944e-38, %v4407_v29  ;;  %vm4406_vm5 = vcmp.eq.f32.partialorder %v4405_v54, 8.507059e+37 }
0x3ac2   :  { %v7136_v15 = vpop.eup %7135 }
0x3ac3   :  { %v4397_v33 = vmul.f32 %v7136_v15, %v4395_v17  ;;  %vm4402_vm2 = vweird.f32 %v7136_v15 }
0x3ac4   :  { %vm4403_vm9 = vmor %vm4401_vm6, %vm4402_vm2 }
0x3ac5   :  { %v4398_v52 = vsub.f32 1.0, %v4397_v33 }
0x3ac7   :  { %v4399_v31 = vmul.f32 %v7136_v15, %v4398_v52 }
0x3ac9   :  { %v4400_v23 = vadd.f32 %v7136_v15, %v4399_v31 }
0x3acb   :  { %v4404_v18 = vsel %vm4403_vm9, %v7136_v15, %v4400_v23 }
0x3acc   :  { %v4409_v48 = vsel %vm4406_vm5, %v4408_v39, %v4404_v18 }
0x3acd   :  { %v4415_v50 = vmul.f32 %v4413_v4, %v4409_v48  ;;  %v4418_v20 = vsub.f32 1.0, %v4409_v48  ;;  %v4426_v56 = vmul.f32 %v4424_v60, %v4409_v48 }
0x3acf   :  { %v4416_v2 = vadd.f32 %v4415_v50, %v9301_v11 }
0x3ad1   :  { %7137 = vtanh.f32 %v4416_v2 }
0x3ad7   :  { %v7138_v37 = vpop.eup %7137 }
0x3ad8   :  { %4420 = vrot.lane.b32.xlu0 %v7138_v37, %s7491_s20 }
0x3b4a   :  { %v4421_v3 = vpop.permute.xlu0 %4420 }
0x3b4b   :  { %v4423_v6 = vmul.f32 %v4421_v3, %v4418_v20 }
0x3b4d   :  { %v4427_v8 = vadd.f32 %v4426_v56, %v4423_v6 }
0x3b4f   :  { %v4429_v58 = vrot.slane %v4427_v8, 2  ;;  %v4510_v35 = vrot.slane %v4427_v8, 6  ;;  %v4936_v37 = vsel %vm955_vm3, %v9310_v51, %v4427_v8 }
0x3b51   :  { %4430 = vrot.lane.b32.xlu1 %v4429_v58, %s7491_s20 }
0x3bc3   :  { %v4431_v55 = vpop.permute.xlu1 %4430 }
0x3bc4   :  { %6780 = vmatmul.msk.f32.vlgmr.msrb.gmra.mxu1 %vm278_vm8, %v4431_v55  ;;  %6781 = vmatmul.msk.f32.vlgmr.msra.gmra.mxu2 %vm278_vm8, %v4431_v55 }
0x3bc5   :  { %4778 = vmatpush.msrb.mxu1 %v9148_v36  ;;  %4798 = vmatpush.msra.mxu2 %v9150_v47 }
0x3bc7   :  { %4779 = vmatpush.msrb.mxu1 %v9152_v45  ;;  %4799 = vmatpush.msra.mxu2 %v9156_v44 }
0x3bc9   :  { %4780 = vmatpush.msrb.mxu1 %v9158_v57  ;;  %4800 = vmatpush.msra.mxu2 %v9160_v13 }
0x3bcb   :  { %4781 = vmatpush.msrb.mxu1 %v9166_v16  ;;  %4801 = vmatpush.msra.mxu2 %v9168_v25 }
0x3bcd   :  { %4782 = vmatpush.msrb.mxu1 %v9191_v5  ;;  %4802 = vmatpush.msra.mxu2 %v9193_v40 }
0x3bcf   :  { %4783 = vmatpush.msrb.mxu1 %v9195_v26  ;;  %4803 = vmatpush.msra.mxu2 %v9199_v9 }
0x3bd1   :  { %4784 = vmatpush.msrb.mxu1 %v9201_v28  ;;  %4804 = vmatpush.msra.mxu2 %v9203_v7 }
0x3bd3   :  { %4785 = vmatpush.msrb.mxu1 %v9209_v42  ;;  %4805 = vmatpush.msra.mxu2 %v9211_v24 }
0x3c41   :  { %v4451_v59 = vpop.f32.mrf.mxu1 }
0x3c42   :  { %v4475_v53 = vrot.slane %v4451_v59, 4 }
0x3c44   :  { %v4477_v41 = vadd.f32 %v4475_v53, %v9286_v14 }
0x3c46   :  { %v6782_v63 = vmul.f32 -1.442695, %v4477_v41 }
0x3c47   :  { %v4471_v0 = vpop.f32.mrf.mxu2 }
0x3c48   :  { %7139 = vpow2.f32 %v6782_v63  ;;  %v4497_v15 = vadd.f32 %v9294_v61, %v4471_v0 }
0x3c4a   :  { %v4499_v29 = vrot.slane %v4497_v15, 4 }
0x3c4e   :  { %v7140_v34 = vpop.eup %7139 }
0x3c4f   :  { %v4481_v62 = vadd.f32 1.0, %v7140_v34 }
0x3c51   :  { %7141 = vrcp.f32 %v4481_v62  ;;  %v4493_v49 = vand.u32 2147483648, %v4481_v62  ;;  %v4491_v17 = vand.u32 2147483647, %v4481_v62  ;;  %vm4487_vm12 = vweird.f32 %v4481_v62 }
0x3c53   :  { %v4494_v12 = vor.u32 1.1754944e-38, %v4493_v49  ;;  %vm4492_vm13 = vcmp.eq.f32.partialorder %v4491_v17, 8.507059e+37 }
0x3c57   :  { %v7142_v43 = vpop.eup %7141 }
0x3c58   :  { %v4483_v22 = vmul.f32 %v7142_v43, %v4481_v62  ;;  %vm4488_vm10 = vweird.f32 %v7142_v43 }
0x3c59   :  { %vm4489_vm7 = vmor %vm4487_vm12, %vm4488_vm10 }
0x3c5a   :  { %v4484_v1 = vsub.f32 1.0, %v4483_v22 }
0x3c5c   :  { %v4485_v21 = vmul.f32 %v7142_v43, %v4484_v1 }
0x3c5e   :  { %v4486_v33 = vadd.f32 %v7142_v43, %v4485_v21 }
0x3c60   :  { %v4490_v52 = vsel %vm4489_vm7, %v7142_v43, %v4486_v33 }
0x3c61   :  { %v4495_v31 = vsel %vm4492_vm13, %v4494_v12, %v4490_v52 }
0x3c62   :  { %v4501_v54 = vmul.f32 %v4499_v29, %v4495_v31  ;;  %v4512_v23 = vmul.f32 %v4510_v35, %v4495_v31  ;;  %v4504_v18 = vsub.f32 1.0, %v4495_v31 }
0x3c64   :  { %v4502_v39 = vadd.f32 %v4501_v54, %v9301_v11 }
0x3c66   :  { %7143 = vtanh.f32 %v4502_v39 }
0x3c6c   :  { %v7144_v4 = vpop.eup %7143 }
0x3c6d   :  { %4506 = vrot.lane.b32.xlu2 %v7144_v4, %s7491_s20  ;;  %v9408_v4 = vadd.f32 %v9337_v27, %v4212_v38 }
0x3cc7   :  { %v4507_v48 = vpop.permute.xlu2 %4506 }
0x3cc8   :  { %v4509_v50 = vmul.f32 %v4507_v48, %v4504_v18 }
0x3cca   :  { %v4513_v2 = vadd.f32 %v4512_v23, %v4509_v50 }
0x3ccc   :  { %v4515_v20 = vrot.slane %v4513_v2, 4  ;;  %v4937_v60 = vsel %vm957_vm4, %v4936_v37, %v4513_v2  ;;  %v4596_v56 = vrot.slane %v4513_v2, 6 }
0x3cce   :  { %4516 = vrot.lane.b32.xlu0 %v4515_v20, %s7491_s20 }
0x3d40   :  { %v4517_v3 = vpop.permute.xlu0 %4516 }
0x3d41   :  { %6783 = vmatmul.msk.f32.vlgmr.msra.gmra.mxu3 %vm278_vm8, %v4517_v3  ;;  %6784 = vmatmul.msk.f32.vlgmr.msrb.gmra.mxu0 %vm278_vm8, %v4517_v3 }
0x3d42   :  { %4864 = vmatpush.msra.mxu3 %v9148_v36  ;;  %4884 = vmatpush.msrb.mxu0 %v9150_v47 }
0x3d44   :  { %4865 = vmatpush.msra.mxu3 %v9152_v45  ;;  %4885 = vmatpush.msrb.mxu0 %v9156_v44 }
0x3d46   :  { %4866 = vmatpush.msra.mxu3 %v9158_v57  ;;  %4886 = vmatpush.msrb.mxu0 %v9160_v13 }
0x3d48   :  { %4867 = vmatpush.msra.mxu3 %v9166_v16  ;;  %4887 = vmatpush.msrb.mxu0 %v9168_v25 }
0x3d4a   :  { %4868 = vmatpush.msra.mxu3 %v9191_v5  ;;  %4888 = vmatpush.msrb.mxu0 %v9193_v40 }
0x3d4c   :  { %4869 = vmatpush.msra.mxu3 %v9195_v26  ;;  %4889 = vmatpush.msrb.mxu0 %v9199_v9 }
0x3d4e   :  { %4870 = vmatpush.msra.mxu3 %v9201_v28  ;;  %4890 = vmatpush.msrb.mxu0 %v9203_v7 }
0x3d50   :  { %4871 = vmatpush.msra.mxu3 %v9209_v42  ;;  %4891 = vmatpush.msrb.mxu0 %v9211_v24 }
0x3dbe   :  { %v4557_v5 = vpop.f32.mrf.mxu0 }
0x3dbf   :  { %v4583_v9 = vadd.f32 %v9294_v61, %v4557_v5 }
0x3dc4   :  { %v4537_v36 = vpop.f32.mrf.mxu3 }
0x3dc5   :  { %v4561_v47 = vrot.slane %v4537_v36, 2 }
0x3dc7   :  { %v4563_v45 = vadd.f32 %v4561_v47, %v9286_v14  ;;  %v4585_v14 = vrot.slane %v4583_v9, 2 }
0x3dc9   :  { %v6785_v44 = vmul.f32 -1.442695, %v4563_v45 }
0x3dcb   :  { %7145 = vpow2.f32 %v6785_v44 }
0x3dd1   :  { %v7146_v57 = vpop.eup %7145 }
0x3dd2   :  { %v4567_v13 = vadd.f32 1.0, %v7146_v57 }
0x3dd4   :  { %7147 = vrcp.f32 %v4567_v13  ;;  %v4579_v26 = vand.u32 2147483648, %v4567_v13  ;;  %v4577_v7 = vand.u32 2147483647, %v4567_v13  ;;  %vm4573_vm14 = vweird.f32 %v4567_v13 }
0x3dd6   :  { %v4580_v24 = vor.u32 1.1754944e-38, %v4579_v26  ;;  %vm4578_vm2 = vcmp.eq.f32.partialorder %v4577_v7, 8.507059e+37 }
0x3dda   :  { %v7148_v16 = vpop.eup %7147 }
0x3ddb   :  { %v4569_v25 = vmul.f32 %v7148_v16, %v4567_v13  ;;  %vm4574_vm0 = vweird.f32 %v7148_v16 }
0x3ddc   :  { %vm4575_vm15 = vmor %vm4573_vm14, %vm4574_vm0 }
0x3ddd   :  { %v4570_v40 = vsub.f32 1.0, %v4569_v25 }
0x3ddf   :  { %v4571_v28 = vmul.f32 %v7148_v16, %v4570_v40 }
0x3de1   :  { %v4572_v42 = vadd.f32 %v7148_v16, %v4571_v28 }
0x3de3   :  { %v4576_v51 = vsel %vm4575_vm15, %v7148_v16, %v4572_v42 }
0x3de4   :  { %v4581_v6 = vsel %vm4578_vm2, %v4580_v24, %v4576_v51 }
0x3de5   :  { %v4587_v8 = vmul.f32 %v4585_v14, %v4581_v6  ;;  %v4598_v58 = vmul.f32 %v4596_v56, %v4581_v6  ;;  %v4590_v53 = vsub.f32 1.0, %v4581_v6 }
0x3de7   :  { %v4588_v55 = vadd.f32 %v4587_v8, %v9301_v11  ;;  %v9401_v11 = vadd.f32 %v9334_v30, %v4211_v19  ;;  %v4957_v8 = vld [vmem:[#allocation12 + $0xf0] sm:$0xff] }
0x3de9   :  { %7149 = vtanh.f32 %v4588_v55  ;;  %v4955_v55 = vld [vmem:[#allocation12 + $0xe0] sm:$0xff] }
0x3def   :  { %v7150_v59 = vpop.eup %7149 }
0x3df0   :  { %4592 = vrot.lane.b32.xlu1 %v7150_v59, %s7491_s20  ;;  %v4956_v59 = vld [vmem:[#allocation12 + $0xe8] sm:$0xff] }
0x3e62   :  { %v4593_v41 = vpop.permute.xlu1 %4592 }
0x3e63   :  { %v4595_v63 = vmul.f32 %v4593_v41, %v4590_v53  ;;  %v4953_v53 = vld [vmem:[#allocation12 + $0xd0] sm:$0xff]  ;;  %v4954_v41 = vld [vmem:[#allocation12 + $0xd8] sm:$0xff] }
0x3e65   :  { %v4599_v34 = vadd.f32 %v4598_v58, %v4595_v63  ;;  %v4958_v58 = vld [vmem:[#allocation12 + $0xf8] sm:$0xff]  ;;  %v4951_v63 = vld [vmem:[#allocation12 + $0xc0] sm:$0xff] }
0x3e67   :  { %v4601_v62 = vrot.slane %v4599_v34, 6  ;;  %v9393_v43 = vsel %vm959_vm11, %v4937_v60, %v4599_v34  ;;  %v4952_v34 = vld [vmem:[#allocation12 + $0xc8] sm:$0xff] }
0x3e69   :  { %4602 = vrot.lane.b32.xlu2 %v4601_v62, %s7491_s20 }
0x3ec3   :  { %v4603_v22 = vpop.permute.xlu2 %4602 }
0x3ec4   :  { %6786 = vmatmul.msk.f32.vlgmr.msra.gmra.mxu1 %vm278_vm8, %v4603_v22  ;;  %6787 = vmatmul.msk.f32.vlgmr.msrb.gmra.mxu2 %vm278_vm8, %v4603_v22 }
0x3ec5   :  { %5006 = vmatpush.msra.mxu1 %v4957_v8  ;;  %5029 = vmatpush.msrb.mxu2 %v4958_v58 }
0x3ec7   :  { %5007 = vmatpush.msra.mxu1 %v4955_v55  ;;  %5030 = vmatpush.msrb.mxu2 %v4956_v59 }
0x3ec9   :  { %5008 = vmatpush.msra.mxu1 %v4953_v53  ;;  %5031 = vmatpush.msrb.mxu2 %v4954_v41 }
0x3ecb   :  { %5009 = vmatpush.msra.mxu1 %v4951_v63  ;;  %5032 = vmatpush.msrb.mxu2 %v4952_v34  ;;  %v9481_v63 = vld [vmem:[#allocation14 + $0x130] sm:$0xff]  ;;  %v9483_v34 = vld [vmem:[#allocation14 + $0x138] sm:$0xff] }
0x3f41   :  { %v4623_v0 = vpop.f32.mrf.mxu1 }
0x3f42   :  { %v4646_v1 = vadd.f32 %v4623_v0, %v9401_v11 }
0x3f44   :  { %v6788_v49 = vmul.f32 -1.442695, %v4646_v1 }
0x3f46   :  { %7151 = vpow2.f32 %v6788_v49 }
0x3f47   :  { %v4643_v31 = vpop.f32.mrf.mxu2 }
0x3f48   :  { %v4666_v23 = vadd.f32 %v9294_v61, %v4643_v31  ;;  %v4943_v31 = vld [vmem:[#allocation12 + $0x80] sm:$0xff] }
0x3f4c   :  { %v7152_v21 = vpop.eup %7151 }
0x3f4d   :  { %v4650_v17 = vadd.f32 1.0, %v7152_v21 }
0x3f4f   :  { %7153 = vrcp.f32 %v4650_v17  ;;  %v4662_v52 = vand.u32 2147483648, %v4650_v17  ;;  %v4660_v35 = vand.u32 2147483647, %v4650_v17  ;;  %vm4656_vm9 = vweird.f32 %v4650_v17 }
0x3f51   :  { %v4663_v19 = vor.u32 1.1754944e-38, %v4662_v52  ;;  %vm4661_vm10 = vcmp.eq.f32.partialorder %v4660_v35, 8.507059e+37  ;;  %v4948_v52 = vld [vmem:[#allocation12 + $0xa8] sm:$0xff]  ;;  %v4946_v35 = vld [vmem:[#allocation12 + $0x98] sm:$0xff] }
0x3f55   :  { %v7154_v15 = vpop.eup %7153 }
0x3f56   :  { %v4652_v33 = vmul.f32 %v7154_v15, %v4650_v17  ;;  %vm4657_vm6 = vweird.f32 %v7154_v15 }
0x3f57   :  { %vm4658_vm5 = vmor %vm4656_vm9, %vm4657_vm6 }
0x3f58   :  { %v4653_v12 = vsub.f32 1.0, %v4652_v33  ;;  %v4950_v33 = vld [vmem:[#allocation12 + $0xb8] sm:$0xff] }
0x3f59   :  { %5033 = vmatpush.msrb.mxu2 %v4950_v33 }
0x3f5a   :  { %v4654_v29 = vmul.f32 %v7154_v15, %v4653_v12  ;;  %v4947_v12 = vld [vmem:[#allocation12 + $0xa0] sm:$0xff] }
0x3f5b   :  { %5034 = vmatpush.msrb.mxu2 %v4948_v52 }
0x3f5c   :  { %v4655_v54 = vadd.f32 %v7154_v15, %v4654_v29  ;;  %v4945_v29 = vld [vmem:[#allocation12 + $0x90] sm:$0xff] }
0x3f5d   :  { %5035 = vmatpush.msrb.mxu2 %v4946_v35 }
0x3f5e   :  { %v4659_v30 = vsel %vm4658_vm5, %v7154_v15, %v4655_v54  ;;  %v4949_v15 = vld [vmem:[#allocation12 + $0xb0] sm:$0xff]  ;;  %v4944_v54 = vld [vmem:[#allocation12 + $0x88] sm:$0xff] }
0x3f5f   :  { %v4664_v39 = vsel %vm4661_vm10, %v4663_v19, %v4659_v30  ;;  %5010 = vmatpush.msra.mxu1 %v4949_v15  ;;  %5036 = vmatpush.msrb.mxu2 %v4944_v54 }
0x3f60   :  { %v4667_v18 = vmul.f32 %v4666_v23, %v4664_v39  ;;  %v4670_v2 = vsub.f32 1.0, %v4664_v39  ;;  %v4677_v20 = vmul.f32 %v4664_v39, %v4601_v62 }
0x3f61   :  { %5011 = vmatpush.msra.mxu1 %v4947_v12 }
0x3f62   :  { %v4668_v48 = vadd.f32 %v4667_v18, %v9408_v4 }
0x3f63   :  { %5012 = vmatpush.msra.mxu1 %v4945_v29 }
0x3f64   :  { %7155 = vtanh.f32 %v4668_v48 }
0x3f65   :  { %5013 = vmatpush.msra.mxu1 %v4943_v31 }
0x3f6a   :  { %v7156_v50 = vpop.eup %7155 }
0x3f6b   :  { %4672 = vrot.lane.b32.xlu0 %v7156_v50, %s7491_s20 }
0x3fdd   :  { %v4673_v37 = vpop.permute.xlu0 %4672 }
0x3fde   :  { %v4675_v60 = vmul.f32 %v4673_v37, %v4670_v2 }
0x3fe0   :  { %v9412_v3 = vadd.f32 %v4677_v20, %v4675_v60 }
0x3fe2   :  { %4680 = vrot.lane.b32.xlu1 %v9412_v3, %s7491_s20  ;;  %v4760_v22 = vrot.slane %v9412_v3, 6 }
0x4054   :  { %v4681_v46 = vpop.permute.xlu1 %4680 }
0x4055   :  { %6789 = vmatmul.msk.f32.vlgmr.msrb.gmra.mxu3 %vm278_vm8, %v4681_v46  ;;  %6790 = vmatmul.msk.f32.vlgmr.msra.gmra.mxu0 %vm278_vm8, %v4681_v46 }
0x40d2   :  { %v4721_v16 = vpop.f32.mrf.mxu0 }
0x40d3   :  { %v4747_v40 = vadd.f32 %v9294_v61, %v4721_v16 }
0x40d5   :  { %v4749_v42 = vrot.slane %v4747_v40, 6 }
0x40d8   :  { %v4701_v38 = vpop.f32.mrf.mxu3 }
0x40d9   :  { %v4725_v27 = vrot.slane %v4701_v38, 6 }
0x40db   :  { %v4727_v36 = vadd.f32 %v4725_v27, %v9401_v11 }
0x40dd   :  { %v6791_v47 = vmul.f32 -1.442695, %v4727_v36 }
0x40df   :  { %7157 = vpow2.f32 %v6791_v47 }
0x40e5   :  { %v7158_v45 = vpop.eup %7157 }
0x40e6   :  { %v4731_v44 = vadd.f32 1.0, %v7158_v45 }
0x40e8   :  { %7159 = vrcp.f32 %v4731_v44  ;;  %v4743_v5 = vand.u32 2147483648, %v4731_v44  ;;  %v4741_v9 = vand.u32 2147483647, %v4731_v44  ;;  %vm4737_vm7 = vweird.f32 %v4731_v44 }
0x40ea   :  { %v4744_v7 = vor.u32 1.1754944e-38, %v4743_v5  ;;  %vm4742_vm0 = vcmp.eq.f32.partialorder %v4741_v9, 8.507059e+37  ;;  %v9438_v9 = vld [vmem:[#allocation14 + $0x170] sm:$0xff] }
0x40eb   :  { %5052 = vmatpush.msrb.mxu3 %v9438_v9 }
0x40ee   :  { %v7160_v57 = vpop.eup %7159 }
0x40ef   :  { %v4733_v13 = vmul.f32 %v7160_v57, %v4731_v44  ;;  %vm4738_vm12 = vweird.f32 %v7160_v57 }
0x40f0   :  { %vm4739_vm13 = vmor %vm4737_vm7, %vm4738_vm12 }
0x40f1   :  { %v4734_v25 = vsub.f32 1.0, %v4733_v13 }
0x40f3   :  { %v4735_v26 = vmul.f32 %v7160_v57, %v4734_v25 }
0x40f5   :  { %v4736_v28 = vadd.f32 %v7160_v57, %v4735_v26 }
0x40f7   :  { %v4740_v24 = vsel %vm4739_vm13, %v7160_v57, %v4736_v28  ;;  %v9440_v28 = vld [vmem:[#allocation14 + $0x178] sm:$0xff] }
0x40f8   :  { %v4745_v14 = vsel %vm4742_vm0, %v4744_v7, %v4740_v24  ;;  %v9442_v7 = vld [vmem:[#allocation14 + $0x160] sm:$0xff]  ;;  %5072 = vmatpush.msra.mxu0 %v9440_v28  ;;  %v9448_v24 = vld [vmem:[#allocation14 + $0x150] sm:$0xff] }
0x40f9   :  { %v4751_v51 = vmul.f32 %v4749_v42, %v4745_v14  ;;  %v4754_v62 = vsub.f32 1.0, %v4745_v14  ;;  %v4762_v49 = vmul.f32 %v4760_v22, %v4745_v14  ;;  %v9446_v42 = vld [vmem:[#allocation14 + $0x168] sm:$0xff]  ;;  %v9450_v14 = vld [vmem:[#allocation14 + $0x158] sm:$0xff]  ;;  %5053 = vmatpush.msrb.mxu3 %v9442_v7 }
0x40fa   :  { %5073 = vmatpush.msra.mxu0 %v9446_v42  ;;  %v9489_v22 = vld [vmem:[#allocation14 + $0x128] sm:$0xff] }
0x40fb   :  { %v4752_v56 = vadd.f32 %v4751_v51, %v9408_v4  ;;  %v9456_v51 = vld [vmem:[#allocation14 + $0x140] sm:$0xff]  ;;  %5054 = vmatpush.msrb.mxu3 %v9448_v24 }
0x40fc   :  { %5074 = vmatpush.msra.mxu0 %v9450_v14 }
0x40fd   :  { %7161 = vtanh.f32 %v4752_v56  ;;  %v9458_v56 = vld [vmem:[#allocation14 + $0x148] sm:$0xff]  ;;  %5055 = vmatpush.msrb.mxu3 %v9456_v51 }
0x40fe   :  { %5075 = vmatpush.msra.mxu0 %v9458_v56 }
0x40ff   :  { %5056 = vmatpush.msrb.mxu3 %v9481_v63 }
0x4100   :  { %5076 = vmatpush.msra.mxu0 %v9483_v34 }
0x4102   :  { %5077 = vmatpush.msra.mxu0 %v9489_v22 }
0x4103   :  { %v7162_v6 = vpop.eup %7161 }
0x4104   :  { %4756 = vrot.lane.b32.xlu2 %v7162_v6, %s7491_s20 }
0x415e   :  { %v4757_v0 = vpop.permute.xlu2 %4756 }
0x415f   :  { %v4759_v1 = vmul.f32 %v4757_v0, %v4754_v62  ;;  %v9485_v62 = vld [vmem:[#allocation14 + $0x120] sm:$0xff]  ;;  %v9493_v0 = vld [vmem:[#allocation14 + $0x118] sm:$0xff] }
0x4160   :  { %5057 = vmatpush.msrb.mxu3 %v9485_v62  ;;  %5078 = vmatpush.msra.mxu0 %v9493_v0 }
0x4161   :  { %v9423_v21 = vadd.f32 %v4762_v49, %v4759_v1  ;;  %v9499_v1 = vld [vmem:[#allocation14 + $0x100] sm:$0xff]  ;;  %v9501_v49 = vld [vmem:[#allocation14 + $0x108] sm:$0xff] }
0x4162   :  { %5079 = vmatpush.msra.mxu0 %v9501_v49 }
0x4163   :  { %v4765_v17 = vrot.slane %v9423_v21, 2  ;;  %v4846_v13 = vrot.slane %v9423_v21, 6  ;;  %v4939_v59 = vsel %vm955_vm3, %v9412_v3, %v9423_v21  ;;  %v9491_v3 = vld [vmem:[#allocation14 + $0x110] sm:$0xff] }
0x4164   :  { %5058 = vmatpush.msrb.mxu3 %v9491_v3 }
0x4165   :  { %4766 = vrot.lane.b32.xlu0 %v4765_v17, %s7491_s20  ;;  %v9570_v17 = vld [vmem:[%s10083_s14 + $0x4] sm:$0x3] }
0x4166   :  { %5059 = vmatpush.msrb.mxu3 %v9499_v1  ;;  %v4984_v12 = vperm.slane %v9570_v17, 0 }
0x416d   :  { %4990 = vrot.lane.b32.xlu0 %v9393_v43, %s7491_s20 }
0x41d7   :  { %v4767_v19 = vpop.permute.xlu0 %4766 }
0x41d8   :  { %6792 = vmatmul.msk.f32.vlgmr.msrb.gmra.mxu1 %vm278_vm8, %v4767_v19  ;;  %6793 = vmatmul.msk.f32.vlgmr.msra.gmra.mxu2 %vm278_vm8, %v4767_v19 }
0x41d9   :  { %5129 = vmatpush.msrb.mxu1 %v9438_v9  ;;  %5149 = vmatpush.msra.mxu2 %v9440_v28 }
0x41db   :  { %5130 = vmatpush.msrb.mxu1 %v9442_v7  ;;  %5150 = vmatpush.msra.mxu2 %v9446_v42 }
0x41dd   :  { %5131 = vmatpush.msrb.mxu1 %v9448_v24  ;;  %5151 = vmatpush.msra.mxu2 %v9450_v14 }
0x41df   :  { %v4991_v43 = vpop.permute.xlu0 %4990  ;;  %5132 = vmatpush.msrb.mxu1 %v9456_v51  ;;  %5152 = vmatpush.msra.mxu2 %v9458_v56 }
0x41e0   :  { %6800 = vmatmul.msk.f32.vlgmr.msra.gmra.mxu1 %vm278_vm8, %v4991_v43  ;;  %6802 = vmatmul.msk.f32.vlgmr.msrb.gmra.mxu2 %vm278_vm8, %v4991_v43 }
0x41e1   :  { %5133 = vmatpush.msrb.mxu1 %v9481_v63  ;;  %5153 = vmatpush.msra.mxu2 %v9483_v34 }
0x41e3   :  { %5134 = vmatpush.msrb.mxu1 %v9485_v62  ;;  %5154 = vmatpush.msra.mxu2 %v9489_v22 }
0x41e5   :  { %5135 = vmatpush.msrb.mxu1 %v9491_v3  ;;  %5155 = vmatpush.msra.mxu2 %v9493_v0 }
0x41e7   :  { %5136 = vmatpush.msrb.mxu1 %v9499_v1  ;;  %5156 = vmatpush.msra.mxu2 %v9501_v49 }
0x41e9   :  { %5301 = vmatpush.msra.mxu1 %v9438_v9  ;;  %5321 = vmatpush.msrb.mxu2 %v9440_v28 }
0x41eb   :  { %5302 = vmatpush.msra.mxu1 %v9442_v7  ;;  %5322 = vmatpush.msrb.mxu2 %v9446_v42 }
0x41ed   :  { %5303 = vmatpush.msra.mxu1 %v9448_v24  ;;  %5323 = vmatpush.msrb.mxu2 %v9450_v14 }
0x41ef   :  { %5304 = vmatpush.msra.mxu1 %v9456_v51  ;;  %5324 = vmatpush.msrb.mxu2 %v9458_v56 }
0x41f1   :  { %5305 = vmatpush.msra.mxu1 %v9481_v63  ;;  %5325 = vmatpush.msrb.mxu2 %v9483_v34 }
0x41f3   :  { %5306 = vmatpush.msra.mxu1 %v9485_v62  ;;  %5326 = vmatpush.msrb.mxu2 %v9489_v22 }
0x41f5   :  { %5307 = vmatpush.msra.mxu1 %v9491_v3  ;;  %5327 = vmatpush.msrb.mxu2 %v9493_v0 }
0x41f7   :  { %5308 = vmatpush.msra.mxu1 %v9499_v1  ;;  %5328 = vmatpush.msrb.mxu2 %v9501_v49 }
0x4255   :  { %v4787_v30 = vpop.f32.mrf.mxu1 }
0x4256   :  { %v4811_v23 = vrot.slane %v4787_v30, 4 }
0x4258   :  { %v4813_v39 = vadd.f32 %v4811_v23, %v9401_v11 }
0x425a   :  { %v6794_v18 = vmul.f32 -1.442695, %v4813_v39 }
0x425b   :  { %v4807_v20 = vpop.f32.mrf.mxu2 }
0x425c   :  { %7163 = vpow2.f32 %v6794_v18  ;;  %v4833_v36 = vadd.f32 %v9294_v61, %v4807_v20 }
0x425d   :  { %v5015_v29 = vpop.f32.mrf.mxu1 }
0x425e   :  { %v4835_v57 = vrot.slane %v4833_v36, 4  ;;  %v9576_v31 = vadd.f32 %v5015_v29, %v4984_v12 }
0x4262   :  { %v7164_v48 = vpop.eup %7163 }
0x4263   :  { %v4817_v50 = vadd.f32 1.0, %v7164_v48 }
0x4265   :  { %7165 = vrcp.f32 %v4817_v50  ;;  %v4829_v46 = vand.u32 2147483648, %v4817_v50  ;;  %v4827_v27 = vand.u32 2147483647, %v4817_v50  ;;  %vm4823_vm15 = vweird.f32 %v4817_v50 }
0x4267   :  { %v4830_v45 = vor.u32 1.1754944e-38, %v4829_v46  ;;  %vm4828_vm6 = vcmp.eq.f32.partialorder %v4827_v27, 8.507059e+37 }
0x426b   :  { %v7166_v2 = vpop.eup %7165 }
0x426c   :  { %v4819_v37 = vmul.f32 %v7166_v2, %v4817_v50  ;;  %vm4824_vm14 = vweird.f32 %v7166_v2 }
0x426d   :  { %vm4825_vm2 = vmor %vm4823_vm15, %vm4824_vm14 }
0x426e   :  { %v4820_v60 = vsub.f32 1.0, %v4819_v37 }
0x4270   :  { %v4821_v38 = vmul.f32 %v7166_v2, %v4820_v60 }
0x4272   :  { %v4822_v47 = vadd.f32 %v7166_v2, %v4821_v38 }
0x4274   :  { %v4826_v44 = vsel %vm4825_vm2, %v7166_v2, %v4822_v47 }
0x4275   :  { %v4831_v16 = vsel %vm4828_vm6, %v4830_v45, %v4826_v44 }
0x4276   :  { %v4837_v25 = vmul.f32 %v4835_v57, %v4831_v16  ;;  %v4848_v5 = vmul.f32 %v4846_v13, %v4831_v16  ;;  %v4840_v6 = vsub.f32 1.0, %v4831_v16 }
0x4278   :  { %v4838_v40 = vadd.f32 %v4837_v25, %v9408_v4 }
0x427a   :  { %7167 = vtanh.f32 %v4838_v40 }
0x4280   :  { %v7168_v26 = vpop.eup %7167 }
0x4281   :  { %4842 = vrot.lane.b32.xlu1 %v7168_v26, %s7491_s20 }
0x42f3   :  { %v4843_v8 = vpop.permute.xlu1 %4842 }
0x42f4   :  { %v4845_v58 = vmul.f32 %v4843_v8, %v4840_v6 }
0x42f6   :  { %v9470_v55 = vadd.f32 %v4848_v5, %v4845_v58  ;;  %v4985_v58 = vperm.slane %v9570_v17, 1 }
0x42f8   :  { %v4851_v53 = vrot.slane %v9470_v55, 4  ;;  %v9478_v41 = vsel %vm957_vm4, %v4939_v59, %v9470_v55  ;;  %v4932_v45 = vrot.slane %v9470_v55, 6 }
0x42fa   :  { %4852 = vrot.lane.b32.xlu2 %v4851_v53, %s7491_s20  ;;  %v5038_v53 = vpop.f32.mrf.mxu2 }
0x42fb   :  { %v9591_v29 = vadd.f32 %v5038_v53, %v4985_v58 }
0x4354   :  { %v4853_v21 = vpop.permute.xlu2 %4852 }
0x4355   :  { %6795 = vmatmul.msk.f32.vlgmr.msra.gmra.mxu3 %vm278_vm8, %v4853_v21  ;;  %6796 = vmatmul.msk.f32.vlgmr.msrb.gmra.mxu0 %vm278_vm8, %v4853_v21 }
0x4356   :  { %5215 = vmatpush.msra.mxu3 %v9438_v9  ;;  %5235 = vmatpush.msrb.mxu0 %v9440_v28 }
0x4358   :  { %5216 = vmatpush.msra.mxu3 %v9442_v7  ;;  %5236 = vmatpush.msrb.mxu0 %v9446_v42 }
0x435a   :  { %5217 = vmatpush.msra.mxu3 %v9448_v24  ;;  %5237 = vmatpush.msrb.mxu0 %v9450_v14 }
0x435c   :  { %5218 = vmatpush.msra.mxu3 %v9456_v51  ;;  %5238 = vmatpush.msrb.mxu0 %v9458_v56 }
0x435d   :  { %6804 = vmatmul.msk.f32.vlgmr.msrb.gmra.mxu3 %vm278_vm8, %v8971_v10  ;;  %6805 = vmatmul.msk.f32.vlgmr.msra.gmra.mxu0 %vm278_vm8, %v8971_v10 }
0x435e   :  { %5219 = vmatpush.msra.mxu3 %v9481_v63  ;;  %5239 = vmatpush.msrb.mxu0 %v9483_v34 }
0x4360   :  { %5220 = vmatpush.msra.mxu3 %v9485_v62  ;;  %5240 = vmatpush.msrb.mxu0 %v9489_v22 }
0x4362   :  { %5221 = vmatpush.msra.mxu3 %v9491_v3  ;;  %5241 = vmatpush.msrb.mxu0 %v9493_v0 }
0x4364   :  { %5222 = vmatpush.msra.mxu3 %v9499_v1  ;;  %5242 = vmatpush.msrb.mxu0 %v9501_v49 }
0x4366   :  { %5387 = vmatpush.msrb.mxu3 %v9438_v9  ;;  %5407 = vmatpush.msra.mxu0 %v9440_v28 }
0x4368   :  { %5388 = vmatpush.msrb.mxu3 %v9442_v7  ;;  %5408 = vmatpush.msra.mxu0 %v9446_v42 }
0x436a   :  { %5389 = vmatpush.msrb.mxu3 %v9448_v24  ;;  %5409 = vmatpush.msra.mxu0 %v9450_v14 }
0x436c   :  { %5390 = vmatpush.msrb.mxu3 %v9456_v51  ;;  %5410 = vmatpush.msra.mxu0 %v9458_v56 }
0x436e   :  { %5391 = vmatpush.msrb.mxu3 %v9481_v63  ;;  %5411 = vmatpush.msra.mxu0 %v9483_v34 }
0x4370   :  { %5392 = vmatpush.msrb.mxu3 %v9485_v62  ;;  %5412 = vmatpush.msra.mxu0 %v9489_v22 }
0x4372   :  { %5393 = vmatpush.msrb.mxu3 %v9491_v3  ;;  %5413 = vmatpush.msra.mxu0 %v9493_v0 }
0x4374   :  { %5394 = vmatpush.msrb.mxu3 %v9499_v1  ;;  %5414 = vmatpush.msra.mxu0 %v9501_v49 }
0x43d2   :  { %v4893_v50 = vpop.f32.mrf.mxu0 }
0x43d3   :  { %v4919_v20 = vadd.f32 %v9294_v61, %v4893_v50  ;;  %v9584_v61 = vld [vmem:[%s10084_s15 + $0x2] ss:$0 sm:$0xff] }
0x43d5   :  { %v4921_v44 = vrot.slane %v4919_v20, 2 }
0x43d8   :  { %v4873_v15 = vpop.f32.mrf.mxu3 }
0x43d9   :  { %v4897_v33 = vrot.slane %v4873_v15, 2 }
0x43da   :  { %v5081_v8 = vpop.f32.mrf.mxu0 }
0x43db   :  { %v4899_v52 = vadd.f32 %v4897_v33, %v9401_v11  ;;  %v5104_v15 = vadd.f32 %v9584_v61, %v5081_v8 }
0x43dd   :  { %v6797_v35 = vmul.f32 -1.442695, %v4899_v52 }
0x43df   :  { %7169 = vpow2.f32 %v6797_v35 }
0x43e0   :  { %v5061_v54 = vpop.f32.mrf.mxu3 }
0x43e1   :  { %v5084_v19 = vadd.f32 %v5061_v54, %v9576_v31 }
0x43e3   :  { %v6806_v43 = vmul.f32 -1.442695, %v5084_v19 }
0x43e5   :  { %v7170_v30 = vpop.eup %7169  ;;  %7171 = vpow2.f32 %v6806_v43 }
0x43e6   :  { %v4903_v23 = vadd.f32 1.0, %v7170_v30 }
0x43e8   :  { %7173 = vrcp.f32 %v4903_v23  ;;  %v4915_v37 = vand.u32 2147483648, %v4903_v23  ;;  %v4913_v46 = vand.u32 2147483647, %v4903_v23  ;;  %vm4909_vm5 = vweird.f32 %v4903_v23 }
0x43ea   :  { %v4916_v47 = vor.u32 1.1754944e-38, %v4915_v37  ;;  %vm4914_vm12 = vcmp.eq.f32.partialorder %v4913_v46, 8.507059e+37 }
0x43eb   :  { %v7172_v39 = vpop.eup %7171 }
0x43ec   :  { %v5088_v18 = vadd.f32 1.0, %v7172_v39 }
0x43ee   :  { %v7174_v48 = vpop.eup %7173  ;;  %7175 = vrcp.f32 %v5088_v18  ;;  %v5098_v16 = vand.u32 2147483647, %v5088_v18  ;;  %v5100_v25 = vand.u32 2147483648, %v5088_v18  ;;  %vm5094_vm13 = vweird.f32 %v5088_v18 }
0x43ef   :  { %v4905_v11 = vmul.f32 %v7174_v48, %v4903_v23  ;;  %vm4910_vm9 = vweird.f32 %v7174_v48 }
0x43f0   :  { %vm4911_vm10 = vmor %vm4909_vm5, %vm4910_vm9  ;;  %v5101_v21 = vor.u32 1.1754944e-38, %v5100_v25  ;;  %vm5099_vm14 = vcmp.eq.f32.partialorder %v5098_v16, 8.507059e+37 }
0x43f1   :  { %v4906_v2 = vsub.f32 1.0, %v4905_v11 }
0x43f3   :  { %v4907_v60 = vmul.f32 %v7174_v48, %v4906_v2 }
0x43f4   :  { %v7176_v38 = vpop.eup %7175 }
0x43f5   :  { %v4908_v27 = vadd.f32 %v7174_v48, %v4907_v60  ;;  %v5090_v36 = vmul.f32 %v7176_v38, %v5088_v18  ;;  %vm5095_vm7 = vweird.f32 %v7176_v38 }
0x43f6   :  { %vm5096_vm0 = vmor %vm5094_vm13, %vm5095_vm7 }
0x43f7   :  { %v4912_v57 = vsel %vm4911_vm10, %v7174_v48, %v4908_v27  ;;  %v5091_v13 = vsub.f32 1.0, %v5090_v36 }
0x43f8   :  { %v4917_v5 = vsel %vm4914_vm12, %v4916_v47, %v4912_v57 }
0x43f9   :  { %v5092_v40 = vmul.f32 %v7176_v38, %v5091_v13  ;;  %v4923_v26 = vmul.f32 %v4921_v44, %v4917_v5  ;;  %v4934_v6 = vmul.f32 %v4932_v45, %v4917_v5  ;;  %v4926_v48 = vsub.f32 1.0, %v4917_v5 }
0x43fb   :  { %v5093_v55 = vadd.f32 %v7176_v38, %v5092_v40  ;;  %v4924_v59 = vadd.f32 %v4923_v26, %v9408_v4 }
0x43fd   :  { %v5097_v33 = vsel %vm5096_vm0, %v7176_v38, %v5093_v55  ;;  %7177 = vtanh.f32 %v4924_v59 }
0x43fe   :  { %v5102_v52 = vsel %vm5099_vm14, %v5101_v21, %v5097_v33 }
0x43ff   :  { %v5105_v35 = vmul.f32 %v5104_v15, %v5102_v52  ;;  %v5108_v43 = vsub.f32 1.0, %v5102_v52  ;;  %v5114_v23 = vmul.f32 %v5102_v52, %v9019_v32 }
0x4401   :  { %v5106_v54 = vadd.f32 %v5105_v35, %v9591_v29 }
0x4403   :  { %v7178_v19 = vpop.eup %7177  ;;  %7179 = vtanh.f32 %v5106_v54 }
0x4404   :  { %4928 = vrot.lane.b32.xlu1 %v7178_v19, %s7491_s20 }
0x4409   :  { %v7180_v4 = vpop.eup %7179 }
0x440a   :  { %5110 = vrot.lane.b32.xlu2 %v7180_v4, %s7491_s20 }
0x4464   :  { %v5111_v30 = vpop.permute.xlu2 %5110 }
0x4465   :  { %v5113_v39 = vmul.f32 %v5111_v30, %v5108_v43 }
0x4467   :  { %v9597_v18 = vadd.f32 %v5114_v23, %v5113_v39 }
0x4469   :  { %5117 = vrot.lane.b32.xlu1 %v9597_v18, %s7491_s20  ;;  %v5197_v54 = vrot.slane %v9597_v18, 6 }
0x4476   :  { %v4929_v11 = vpop.permute.xlu1 %4928 }
0x4477   :  { %v4931_v50 = vmul.f32 %v4929_v11, %v4926_v48 }
0x4479   :  { %v4935_v2 = vadd.f32 %v4934_v6, %v4931_v50 }
0x447b   :  { %v4941_v37 = vsel %vm959_vm11, %v9478_v41, %v4935_v2 }
0x447c   :  { %4992 = vrot.lane.b32.xlu0 %v4941_v37, %s7491_s20 }
0x44db   :  { %v5118_v60 = vpop.permute.xlu1 %5117 }
0x44ee   :  { %v4993_v20 = vpop.permute.xlu0 %4992 }
0x44ef   :  { %6801 = vmatmul.msk.f32.gmra.mxu1 %vm278_vm8, %v4993_v20  ;;  %6803 = vmatmul.msk.f32.gmra.mxu2 %vm278_vm8, %v4993_v20 }
0x44f7   :  { %6807 = vmatmul.msk.f32.vlgmr.msrb.gmra.mxu1 %vm278_vm8, %v5118_v60  ;;  %6808 = vmatmul.msk.f32.vlgmr.msra.gmra.mxu2 %vm278_vm8, %v5118_v60 }
0x44f8   :  { %5465 = vmatpush.msrb.mxu1 %v9438_v9  ;;  %5485 = vmatpush.msra.mxu2 %v9440_v28 }
0x44fa   :  { %5466 = vmatpush.msrb.mxu1 %v9442_v7  ;;  %5486 = vmatpush.msra.mxu2 %v9446_v42 }
0x44fc   :  { %5467 = vmatpush.msrb.mxu1 %v9448_v24  ;;  %5487 = vmatpush.msra.mxu2 %v9450_v14 }
0x44fe   :  { %5468 = vmatpush.msrb.mxu1 %v9456_v51  ;;  %5488 = vmatpush.msra.mxu2 %v9458_v56 }
0x4500   :  { %5469 = vmatpush.msrb.mxu1 %v9481_v63  ;;  %5489 = vmatpush.msra.mxu2 %v9483_v34 }
0x4502   :  { %5470 = vmatpush.msrb.mxu1 %v9485_v62  ;;  %5490 = vmatpush.msra.mxu2 %v9489_v22 }
0x4504   :  { %5471 = vmatpush.msrb.mxu1 %v9491_v3  ;;  %5491 = vmatpush.msra.mxu2 %v9493_v0 }
0x4506   :  { %5472 = vmatpush.msrb.mxu1 %v9499_v1  ;;  %5492 = vmatpush.msra.mxu2 %v9501_v49 }
0x456c   :  { %v9624_v41 = vpop.f32.mrf.mxu1 }
0x4572   :  { %v9627_v45 = vpop.f32.mrf.mxu2 }
0x4574   :  { %v5138_v46 = vpop.f32.mrf.mxu1 }
0x4575   :  { %v5162_v38 = vrot.slane %v5138_v46, 6 }
0x4577   :  { %v5164_v27 = vadd.f32 %v5162_v38, %v9576_v31 }
0x4579   :  { %v6809_v36 = vmul.f32 -1.442695, %v5164_v27 }
0x457a   :  { %v5158_v16 = vpop.f32.mrf.mxu2 }
0x457b   :  { %7181 = vpow2.f32 %v6809_v36  ;;  %v5184_v6 = vadd.f32 %v9584_v61, %v5158_v16 }
0x457d   :  { %v5186_v53 = vrot.slane %v5184_v6, 6 }
0x4581   :  { %v7182_v47 = vpop.eup %7181 }
0x4582   :  { %v5168_v44 = vadd.f32 1.0, %v7182_v47 }
0x4584   :  { %7183 = vrcp.f32 %v5168_v44  ;;  %v5180_v5 = vand.u32 2147483648, %v5168_v44  ;;  %v5178_v26 = vand.u32 2147483647, %v5168_v44  ;;  %vm5174_vm2 = vweird.f32 %v5168_v44 }
0x4586   :  { %v5181_v55 = vor.u32 1.1754944e-38, %v5180_v5  ;;  %vm5179_vm9 = vcmp.eq.f32.partialorder %v5178_v26, 8.507059e+37 }
0x458a   :  { %v7184_v57 = vpop.eup %7183 }
0x458b   :  { %v5170_v13 = vmul.f32 %v7184_v57, %v5168_v44  ;;  %vm5175_vm15 = vweird.f32 %v7184_v57 }
0x458c   :  { %vm5176_vm6 = vmor %vm5174_vm2, %vm5175_vm15 }
0x458d   :  { %v5171_v25 = vsub.f32 1.0, %v5170_v13 }
0x458f   :  { %v5172_v40 = vmul.f32 %v7184_v57, %v5171_v25 }
0x4591   :  { %v5173_v8 = vadd.f32 %v7184_v57, %v5172_v40 }
0x4593   :  { %v5177_v59 = vsel %vm5176_vm6, %v7184_v57, %v5173_v8 }
0x4594   :  { %v5182_v21 = vsel %vm5179_vm9, %v5181_v55, %v5177_v59 }
0x4595   :  { %v5188_v15 = vmul.f32 %v5186_v53, %v5182_v21  ;;  %v5191_v35 = vsub.f32 1.0, %v5182_v21  ;;  %v5199_v4 = vmul.f32 %v5197_v54, %v5182_v21 }
0x4597   :  { %v5189_v33 = vadd.f32 %v5188_v15, %v9591_v29 }
0x4599   :  { %7185 = vtanh.f32 %v5189_v33 }
0x459f   :  { %v7186_v52 = vpop.eup %7185 }
0x45a0   :  { %5193 = vrot.lane.b32.xlu2 %v7186_v52, %s7491_s20 }
0x45fa   :  { %v5194_v19 = vpop.permute.xlu2 %5193 }
0x45fb   :  { %v5196_v43 = vmul.f32 %v5194_v19, %v5191_v35 }
0x45fd   :  { %v5200_v30 = vadd.f32 %v5199_v4, %v5196_v43 }
0x45ff   :  { %v5202_v23 = vrot.slane %v5200_v30, 2  ;;  %v5283_v40 = vrot.slane %v5200_v30, 6  ;;  %v5709_v52 = vsel %vm955_vm3, %v9597_v18, %v5200_v30 }
0x4601   :  { %5203 = vrot.lane.b32.xlu0 %v5202_v23, %s7491_s20 }
0x4673   :  { %v5204_v39 = vpop.permute.xlu0 %5203 }
0x4674   :  { %6810 = vmatmul.msk.f32.vlgmr.msra.gmra.mxu3 %vm278_vm8, %v5204_v39  ;;  %6811 = vmatmul.msk.f32.vlgmr.msrb.gmra.mxu0 %vm278_vm8, %v5204_v39 }
0x4675   :  { %5551 = vmatpush.msra.mxu3 %v9438_v9  ;;  %5571 = vmatpush.msrb.mxu0 %v9440_v28 }
0x4677   :  { %5552 = vmatpush.msra.mxu3 %v9442_v7  ;;  %5572 = vmatpush.msrb.mxu0 %v9446_v42 }
0x4679   :  { %5553 = vmatpush.msra.mxu3 %v9448_v24  ;;  %5573 = vmatpush.msrb.mxu0 %v9450_v14 }
0x467b   :  { %5554 = vmatpush.msra.mxu3 %v9456_v51  ;;  %5574 = vmatpush.msrb.mxu0 %v9458_v56 }
0x467d   :  { %5555 = vmatpush.msra.mxu3 %v9481_v63  ;;  %5575 = vmatpush.msrb.mxu0 %v9483_v34 }
0x467f   :  { %5556 = vmatpush.msra.mxu3 %v9485_v62  ;;  %5576 = vmatpush.msrb.mxu0 %v9489_v22 }
0x4681   :  { %5557 = vmatpush.msra.mxu3 %v9491_v3  ;;  %5577 = vmatpush.msrb.mxu0 %v9493_v0 }
0x4683   :  { %5558 = vmatpush.msra.mxu3 %v9499_v1  ;;  %5578 = vmatpush.msrb.mxu0 %v9501_v49 }
0x46f1   :  { %v5244_v38 = vpop.f32.mrf.mxu0 }
0x46f2   :  { %v5270_v47 = vadd.f32 %v9584_v61, %v5244_v38 }
0x46f4   :  { %v5272_v25 = vrot.slane %v5270_v47, 4 }
0x46f7   :  { %v5224_v48 = vpop.f32.mrf.mxu3 }
0x46f8   :  { %v5248_v11 = vrot.slane %v5224_v48, 4 }
0x46fa   :  { %v5250_v50 = vadd.f32 %v5248_v11, %v9576_v31 }
0x46fc   :  { %v6812_v2 = vmul.f32 -1.442695, %v5250_v50 }
0x46fe   :  { %7187 = vpow2.f32 %v6812_v2 }
0x4704   :  { %v7188_v37 = vpop.eup %7187 }
0x4705   :  { %v5254_v20 = vadd.f32 1.0, %v7188_v37 }
0x4707   :  { %7189 = vrcp.f32 %v5254_v20  ;;  %v5266_v36 = vand.u32 2147483648, %v5254_v20  ;;  %v5264_v57 = vand.u32 2147483647, %v5254_v20  ;;  %vm5260_vm10 = vweird.f32 %v5254_v20 }
0x4709   :  { %v5267_v16 = vor.u32 1.1754944e-38, %v5266_v36  ;;  %vm5265_vm7 = vcmp.eq.f32.partialorder %v5264_v57, 8.507059e+37 }
0x470d   :  { %v7190_v60 = vpop.eup %7189 }
0x470e   :  { %v5256_v46 = vmul.f32 %v7190_v60, %v5254_v20  ;;  %vm5261_vm5 = vweird.f32 %v7190_v60 }
0x470f   :  { %vm5262_vm12 = vmor %vm5260_vm10, %vm5261_vm5 }
0x4710   :  { %v5257_v27 = vsub.f32 1.0, %v5256_v46 }
0x4712   :  { %v5258_v44 = vmul.f32 %v7190_v60, %v5257_v27 }
0x4714   :  { %v5259_v13 = vadd.f32 %v7190_v60, %v5258_v44 }
0x4716   :  { %v5263_v5 = vsel %vm5262_vm12, %v7190_v60, %v5259_v13 }
0x4717   :  { %v5268_v26 = vsel %vm5265_vm7, %v5267_v16, %v5263_v5 }
0x4718   :  { %v5274_v6 = vmul.f32 %v5272_v25, %v5268_v26  ;;  %v5285_v8 = vmul.f32 %v5283_v40, %v5268_v26  ;;  %v5277_v53 = vsub.f32 1.0, %v5268_v26 }
0x471a   :  { %v5275_v55 = vadd.f32 %v5274_v6, %v9591_v29 }
0x471c   :  { %7191 = vtanh.f32 %v5275_v55 }
0x4722   :  { %v7192_v59 = vpop.eup %7191 }
0x4723   :  { %5279 = vrot.lane.b32.xlu1 %v7192_v59, %s7491_s20  ;;  %v9698_v59 = vadd.f32 %v9627_v45, %v4985_v58 }
0x4795   :  { %v5280_v21 = vpop.permute.xlu1 %5279 }
0x4796   :  { %v5282_v15 = vmul.f32 %v5280_v21, %v5277_v53 }
0x4798   :  { %v5286_v33 = vadd.f32 %v5285_v8, %v5282_v15 }
0x479a   :  { %v5288_v35 = vrot.slane %v5286_v33, 4  ;;  %v5710_v54 = vsel %vm957_vm4, %v5709_v52, %v5286_v33  ;;  %v5369_v4 = vrot.slane %v5286_v33, 6 }
0x479c   :  { %5289 = vrot.lane.b32.xlu2 %v5288_v35, %s7491_s20 }
0x47f6   :  { %v5290_v19 = vpop.permute.xlu2 %5289 }
0x47f7   :  { %6813 = vmatmul.msk.f32.vlgmr.msra.gmra.mxu1 %vm278_vm8, %v5290_v19  ;;  %6814 = vmatmul.msk.f32.vlgmr.msrb.gmra.mxu2 %vm278_vm8, %v5290_v19 }
0x47f8   :  { %5637 = vmatpush.msra.mxu1 %v9438_v9  ;;  %5657 = vmatpush.msrb.mxu2 %v9440_v28 }
0x47fa   :  { %5638 = vmatpush.msra.mxu1 %v9442_v7  ;;  %5658 = vmatpush.msrb.mxu2 %v9446_v42 }
0x47fc   :  { %5639 = vmatpush.msra.mxu1 %v9448_v24  ;;  %5659 = vmatpush.msrb.mxu2 %v9450_v14 }
0x47fe   :  { %5640 = vmatpush.msra.mxu1 %v9456_v51  ;;  %5660 = vmatpush.msrb.mxu2 %v9458_v56 }
0x4800   :  { %5641 = vmatpush.msra.mxu1 %v9481_v63  ;;  %5661 = vmatpush.msrb.mxu2 %v9483_v34 }
0x4802   :  { %5642 = vmatpush.msra.mxu1 %v9485_v62  ;;  %5662 = vmatpush.msrb.mxu2 %v9489_v22 }
0x4804   :  { %5643 = vmatpush.msra.mxu1 %v9491_v3  ;;  %5663 = vmatpush.msrb.mxu2 %v9493_v0 }
0x4806   :  { %5644 = vmatpush.msra.mxu1 %v9499_v1  ;;  %5664 = vmatpush.msrb.mxu2 %v9501_v49 }
0x4874   :  { %v5310_v9 = vpop.f32.mrf.mxu1 }
0x4875   :  { %v5334_v28 = vrot.slane %v5310_v9, 2 }
0x4877   :  { %v5336_v7 = vadd.f32 %v5334_v28, %v9576_v31 }
0x4879   :  { %v6815_v42 = vmul.f32 -1.442695, %v5336_v7 }
0x487a   :  { %v5330_v63 = vpop.f32.mrf.mxu2 }
0x487b   :  { %7193 = vpow2.f32 %v6815_v42  ;;  %v5356_v0 = vadd.f32 %v9584_v61, %v5330_v63 }
0x487d   :  { %v5358_v18 = vrot.slane %v5356_v0, 2 }
0x4881   :  { %v7194_v24 = vpop.eup %7193 }
0x4882   :  { %v5340_v14 = vadd.f32 1.0, %v7194_v24 }
0x4884   :  { %7195 = vrcp.f32 %v5340_v14  ;;  %v5352_v62 = vand.u32 2147483648, %v5340_v14  ;;  %v5350_v3 = vand.u32 2147483647, %v5340_v14  ;;  %vm5346_vm0 = vweird.f32 %v5340_v14 }
0x4886   :  { %v5353_v49 = vor.u32 1.1754944e-38, %v5352_v62  ;;  %vm5351_vm15 = vcmp.eq.f32.partialorder %v5350_v3, 8.507059e+37 }
0x488a   :  { %v7196_v51 = vpop.eup %7195 }
0x488b   :  { %v5342_v56 = vmul.f32 %v7196_v51, %v5340_v14  ;;  %vm5347_vm13 = vweird.f32 %v7196_v51 }
0x488c   :  { %vm5348_vm14 = vmor %vm5346_vm0, %vm5347_vm13 }
0x488d   :  { %v5343_v34 = vsub.f32 1.0, %v5342_v56 }
0x488f   :  { %v5344_v22 = vmul.f32 %v7196_v51, %v5343_v34 }
0x4891   :  { %v5345_v1 = vadd.f32 %v7196_v51, %v5344_v22 }
0x4893   :  { %v5349_v31 = vsel %vm5348_vm14, %v7196_v51, %v5345_v1 }
0x4894   :  { %v5354_v43 = vsel %vm5351_vm15, %v5353_v49, %v5349_v31 }
0x4895   :  { %v5360_v30 = vmul.f32 %v5358_v18, %v5354_v43  ;;  %v5371_v23 = vmul.f32 %v5369_v4, %v5354_v43  ;;  %v5363_v11 = vsub.f32 1.0, %v5354_v43 }
0x4897   :  { %v5361_v39 = vadd.f32 %v5360_v30, %v9591_v29  ;;  %v9691_v29 = vadd.f32 %v9624_v41, %v4984_v12  ;;  %v5730_v30 = vld [vmem:[#allocation12 + $0x170] sm:$0xff] }
0x4899   :  { %7197 = vtanh.f32 %v5361_v39  ;;  %v5728_v39 = vld [vmem:[#allocation12 + $0x160] sm:$0xff] }
0x489f   :  { %v7198_v48 = vpop.eup %7197 }
0x48a0   :  { %5365 = vrot.lane.b32.xlu0 %v7198_v48, %s7491_s20  ;;  %v5729_v48 = vld [vmem:[#allocation12 + $0x168] sm:$0xff] }
0x4912   :  { %v5366_v50 = vpop.permute.xlu0 %5365 }
0x4913   :  { %v5368_v2 = vmul.f32 %v5366_v50, %v5363_v11  ;;  %v5726_v11 = vld [vmem:[#allocation12 + $0x150] sm:$0xff]  ;;  %v5727_v50 = vld [vmem:[#allocation12 + $0x158] sm:$0xff] }
0x4915   :  { %v5372_v37 = vadd.f32 %v5371_v23, %v5368_v2  ;;  %v5731_v23 = vld [vmem:[#allocation12 + $0x178] sm:$0xff]  ;;  %v5724_v2 = vld [vmem:[#allocation12 + $0x140] sm:$0xff] }
0x4917   :  { %v5374_v20 = vrot.slane %v5372_v37, 6  ;;  %v9683_v60 = vsel %vm959_vm11, %v5710_v54, %v5372_v37  ;;  %v5725_v37 = vld [vmem:[#allocation12 + $0x148] sm:$0xff] }
0x4919   :  { %5375 = vrot.lane.b32.xlu1 %v5374_v20, %s7491_s20 }
0x498b   :  { %v5376_v46 = vpop.permute.xlu1 %5375 }
0x498c   :  { %6816 = vmatmul.msk.f32.vlgmr.msrb.gmra.mxu3 %vm278_vm8, %v5376_v46  ;;  %6817 = vmatmul.msk.f32.vlgmr.msra.gmra.mxu0 %vm278_vm8, %v5376_v46 }
0x498d   :  { %5779 = vmatpush.msrb.mxu3 %v5730_v30  ;;  %5802 = vmatpush.msra.mxu0 %v5731_v23 }
0x498f   :  { %5780 = vmatpush.msrb.mxu3 %v5728_v39  ;;  %5803 = vmatpush.msra.mxu0 %v5729_v48 }
0x4991   :  { %5781 = vmatpush.msrb.mxu3 %v5726_v11  ;;  %5804 = vmatpush.msra.mxu0 %v5727_v50 }
0x4993   :  { %5782 = vmatpush.msrb.mxu3 %v5724_v2  ;;  %5805 = vmatpush.msra.mxu0 %v5725_v37  ;;  %v9771_v2 = vld [vmem:[#allocation14 + $0x1b0] sm:$0xff]  ;;  %v9773_v37 = vld [vmem:[#allocation14 + $0x1b8] sm:$0xff] }
0x4a09   :  { %v5416_v26 = vpop.f32.mrf.mxu0 }
0x4a0a   :  { %v5439_v41 = vadd.f32 %v9584_v61, %v5416_v26  ;;  %v5716_v26 = vld [vmem:[#allocation12 + $0x100] sm:$0xff] }
0x4a0f   :  { %v5396_v38 = vpop.f32.mrf.mxu3 }
0x4a10   :  { %v5419_v27 = vadd.f32 %v5396_v38, %v9691_v29 }
0x4a12   :  { %v6818_v36 = vmul.f32 -1.442695, %v5419_v27 }
0x4a14   :  { %7199 = vpow2.f32 %v6818_v36 }
0x4a1a   :  { %v7200_v47 = vpop.eup %7199 }
0x4a1b   :  { %v5423_v44 = vadd.f32 1.0, %v7200_v47 }
0x4a1d   :  { %7201 = vrcp.f32 %v5423_v44  ;;  %v5435_v25 = vand.u32 2147483648, %v5423_v44  ;;  %v5433_v40 = vand.u32 2147483647, %v5423_v44  ;;  %vm5429_vm6 = vweird.f32 %v5423_v44 }
0x4a1f   :  { %v5436_v12 = vor.u32 1.1754944e-38, %v5435_v25  ;;  %vm5434_vm5 = vcmp.eq.f32.partialorder %v5433_v40, 8.507059e+37  ;;  %v5721_v25 = vld [vmem:[#allocation12 + $0x128] sm:$0xff]  ;;  %v5719_v40 = vld [vmem:[#allocation12 + $0x118] sm:$0xff] }
0x4a23   :  { %v7202_v57 = vpop.eup %7201 }
0x4a24   :  { %v5425_v13 = vmul.f32 %v7202_v57, %v5423_v44  ;;  %vm5430_vm2 = vweird.f32 %v7202_v57 }
0x4a25   :  { %vm5431_vm9 = vmor %vm5429_vm6, %vm5430_vm2 }
0x4a26   :  { %v5426_v16 = vsub.f32 1.0, %v5425_v13  ;;  %v5723_v13 = vld [vmem:[#allocation12 + $0x138] sm:$0xff] }
0x4a27   :  { %5806 = vmatpush.msra.mxu0 %v5723_v13 }
0x4a28   :  { %v5427_v5 = vmul.f32 %v7202_v57, %v5426_v16  ;;  %v5720_v16 = vld [vmem:[#allocation12 + $0x120] sm:$0xff] }
0x4a29   :  { %5807 = vmatpush.msra.mxu0 %v5721_v25 }
0x4a2a   :  { %v5428_v6 = vadd.f32 %v7202_v57, %v5427_v5  ;;  %v5718_v5 = vld [vmem:[#allocation12 + $0x110] sm:$0xff] }
0x4a2b   :  { %5808 = vmatpush.msra.mxu0 %v5719_v40 }
0x4a2c   :  { %v5432_v8 = vsel %vm5431_vm9, %v7202_v57, %v5428_v6  ;;  %v5722_v57 = vld [vmem:[#allocation12 + $0x130] sm:$0xff]  ;;  %v5717_v6 = vld [vmem:[#allocation12 + $0x108] sm:$0xff] }
0x4a2d   :  { %v5437_v55 = vsel %vm5434_vm5, %v5436_v12, %v5432_v8  ;;  %5783 = vmatpush.msrb.mxu3 %v5722_v57  ;;  %5809 = vmatpush.msra.mxu0 %v5717_v6  ;;  %v9860_v57 = vld [vmem:[%s10083_s14 + $0x6] sm:$0x3] }
0x4a2e   :  { %v5440_v53 = vmul.f32 %v5439_v41, %v5437_v55  ;;  %v5443_v33 = vsub.f32 1.0, %v5437_v55  ;;  %v5450_v35 = vmul.f32 %v5437_v55, %v5374_v20  ;;  %v5757_v13 = vperm.slane %v9860_v57, 0 }
0x4a2f   :  { %5784 = vmatpush.msrb.mxu3 %v5720_v16 }
0x4a30   :  { %v5441_v21 = vadd.f32 %v5440_v53, %v9698_v59 }
0x4a31   :  { %5785 = vmatpush.msrb.mxu3 %v5718_v5 }
0x4a32   :  { %7203 = vtanh.f32 %v5441_v21 }
0x4a33   :  { %5786 = vmatpush.msrb.mxu3 %v5716_v26 }
0x4a38   :  { %v7204_v15 = vpop.eup %7203 }
0x4a39   :  { %5445 = vrot.lane.b32.xlu2 %v7204_v15, %s7491_s20 }
0x4a93   :  { %v5446_v52 = vpop.permute.xlu2 %5445 }
0x4a94   :  { %v5448_v54 = vmul.f32 %v5446_v52, %v5443_v33 }
0x4a96   :  { %v9702_v19 = vadd.f32 %v5450_v35, %v5448_v54 }
0x4a98   :  { %5453 = vrot.lane.b32.xlu0 %v9702_v19, %s7491_s20  ;;  %v5533_v46 = vrot.slane %v9702_v19, 6 }
0x4b0a   :  { %v5454_v17 = vpop.permute.xlu0 %5453 }
0x4b0b   :  { %6819 = vmatmul.msk.f32.vlgmr.msrb.gmra.mxu1 %vm278_vm8, %v5454_v17  ;;  %6820 = vmatmul.msk.f32.vlgmr.msra.gmra.mxu2 %vm278_vm8, %v5454_v17 }
0x4b88   :  { %v5474_v58 = vpop.f32.mrf.mxu1 }
0x4b89   :  { %v5498_v45 = vrot.slane %v5474_v58, 6 }
0x4b8b   :  { %v5500_v9 = vadd.f32 %v5498_v45, %v9691_v29 }
0x4b8d   :  { %v6821_v28 = vmul.f32 -1.442695, %v5500_v9 }
0x4b8e   :  { %v5494_v51 = vpop.f32.mrf.mxu2 }
0x4b8f   :  { %7205 = vpow2.f32 %v6821_v28  ;;  %v5520_v22 = vadd.f32 %v9584_v61, %v5494_v51 }
0x4b91   :  { %v5522_v49 = vrot.slane %v5520_v22, 6  ;;  %v9728_v22 = vld [vmem:[#allocation14 + $0x1f0] sm:$0xff] }
0x4b92   :  { %5825 = vmatpush.msrb.mxu1 %v9728_v22 }
0x4b95   :  { %v7206_v7 = vpop.eup %7205 }
0x4b96   :  { %v5504_v42 = vadd.f32 1.0, %v7206_v7 }
0x4b98   :  { %7207 = vrcp.f32 %v5504_v42  ;;  %v5516_v63 = vand.u32 2147483648, %v5504_v42  ;;  %v5514_v62 = vand.u32 2147483647, %v5504_v42  ;;  %vm5510_vm12 = vweird.f32 %v5504_v42 }
0x4b9a   :  { %v5517_v0 = vor.u32 1.1754944e-38, %v5516_v63  ;;  %vm5515_vm13 = vcmp.eq.f32.partialorder %v5514_v62, 8.507059e+37 }
0x4b9e   :  { %v7208_v24 = vpop.eup %7207 }
0x4b9f   :  { %v5506_v14 = vmul.f32 %v7208_v24, %v5504_v42  ;;  %vm5511_vm10 = vweird.f32 %v7208_v24 }
0x4ba0   :  { %vm5512_vm7 = vmor %vm5510_vm12, %vm5511_vm10 }
0x4ba1   :  { %v5507_v56 = vsub.f32 1.0, %v5506_v14 }
0x4ba3   :  { %v5508_v34 = vmul.f32 %v7208_v24, %v5507_v56 }
0x4ba5   :  { %v5509_v3 = vadd.f32 %v7208_v24, %v5508_v34 }
0x4ba7   :  { %v5513_v1 = vsel %vm5512_vm7, %v7208_v24, %v5509_v3  ;;  %v9730_v3 = vld [vmem:[#allocation14 + $0x1f8] sm:$0xff] }
0x4ba8   :  { %v5518_v31 = vsel %vm5515_vm13, %v5517_v0, %v5513_v1  ;;  %v9732_v0 = vld [vmem:[#allocation14 + $0x1e0] sm:$0xff]  ;;  %5845 = vmatpush.msra.mxu2 %v9730_v3  ;;  %v9736_v1 = vld [vmem:[#allocation14 + $0x1e8] sm:$0xff] }
0x4ba9   :  { %v5524_v18 = vmul.f32 %v5522_v49, %v5518_v31  ;;  %v5527_v20 = vsub.f32 1.0, %v5518_v31  ;;  %v5535_v36 = vmul.f32 %v5533_v46, %v5518_v31  ;;  %v9738_v49 = vld [vmem:[#allocation14 + $0x1d0] sm:$0xff]  ;;  %v9740_v31 = vld [vmem:[#allocation14 + $0x1d8] sm:$0xff]  ;;  %5826 = vmatpush.msrb.mxu1 %v9732_v0  ;;  %v9779_v46 = vld [vmem:[#allocation14 + $0x1a8] sm:$0xff] }
0x4baa   :  { %5846 = vmatpush.msra.mxu2 %v9736_v1 }
0x4bab   :  { %v5525_v4 = vadd.f32 %v5524_v18, %v9698_v59  ;;  %v9746_v18 = vld [vmem:[#allocation14 + $0x1c0] sm:$0xff]  ;;  %5827 = vmatpush.msrb.mxu1 %v9738_v49 }
0x4bac   :  { %5847 = vmatpush.msra.mxu2 %v9740_v31 }
0x4bad   :  { %7209 = vtanh.f32 %v5525_v4  ;;  %v9748_v4 = vld [vmem:[#allocation14 + $0x1c8] sm:$0xff]  ;;  %5828 = vmatpush.msrb.mxu1 %v9746_v18 }
0x4bae   :  { %5848 = vmatpush.msra.mxu2 %v9748_v4 }
0x4baf   :  { %5829 = vmatpush.msrb.mxu1 %v9771_v2 }
0x4bb0   :  { %5849 = vmatpush.msra.mxu2 %v9773_v37 }
0x4bb2   :  { %5850 = vmatpush.msra.mxu2 %v9779_v46 }
0x4bb3   :  { %v7210_v43 = vpop.eup %7209 }
0x4bb4   :  { %5529 = vrot.lane.b32.xlu1 %v7210_v43, %s7491_s20 }
0x4c26   :  { %v5530_v38 = vpop.permute.xlu1 %5529 }
0x4c27   :  { %v5532_v27 = vmul.f32 %v5530_v38, %v5527_v20  ;;  %v9775_v20 = vld [vmem:[#allocation14 + $0x1a0] sm:$0xff]  ;;  %v9783_v38 = vld [vmem:[#allocation14 + $0x198] sm:$0xff] }
0x4c28   :  { %5830 = vmatpush.msrb.mxu1 %v9775_v20  ;;  %5851 = vmatpush.msra.mxu2 %v9783_v38 }
0x4c29   :  { %v9713_v47 = vadd.f32 %v5535_v36, %v5532_v27  ;;  %v9789_v27 = vld [vmem:[#allocation14 + $0x180] sm:$0xff]  ;;  %v9791_v36 = vld [vmem:[#allocation14 + $0x188] sm:$0xff] }
0x4c2a   :  { %5852 = vmatpush.msra.mxu2 %v9791_v36 }
0x4c2b   :  { %v5538_v44 = vrot.slane %v9713_v47, 2  ;;  %v5619_v14 = vrot.slane %v9713_v47, 6  ;;  %v5712_v48 = vsel %vm955_vm3, %v9702_v19, %v9713_v47  ;;  %v9781_v19 = vld [vmem:[#allocation14 + $0x190] sm:$0xff] }
0x4c2c   :  { %5831 = vmatpush.msrb.mxu1 %v9781_v19 }
0x4c2d   :  { %5539 = vrot.lane.b32.xlu2 %v5538_v44, %s7491_s20 }
0x4c2e   :  { %5832 = vmatpush.msrb.mxu1 %v9789_v27 }
0x4c35   :  { %5763 = vrot.lane.b32.xlu2 %v9683_v60, %s7491_s20 }
0x4c87   :  { %v5540_v12 = vpop.permute.xlu2 %5539 }
0x4c88   :  { %6822 = vmatmul.msk.f32.vlgmr.msra.gmra.mxu3 %vm278_vm8, %v5540_v12  ;;  %6823 = vmatmul.msk.f32.vlgmr.msrb.gmra.mxu0 %vm278_vm8, %v5540_v12 }
0x4c89   :  { %5902 = vmatpush.msra.mxu3 %v9728_v22  ;;  %5922 = vmatpush.msrb.mxu0 %v9730_v3 }
0x4c8b   :  { %5903 = vmatpush.msra.mxu3 %v9732_v0  ;;  %5923 = vmatpush.msrb.mxu0 %v9736_v1 }
0x4c8d   :  { %5904 = vmatpush.msra.mxu3 %v9738_v49  ;;  %5924 = vmatpush.msrb.mxu0 %v9740_v31 }
0x4c8f   :  { %v5764_v60 = vpop.permute.xlu2 %5763  ;;  %5905 = vmatpush.msra.mxu3 %v9746_v18  ;;  %5925 = vmatpush.msrb.mxu0 %v9748_v4 }
0x4c90   :  { %6830 = vmatmul.msk.f32.vlgmr.msrb.gmra.mxu3 %vm278_vm8, %v5764_v60  ;;  %6832 = vmatmul.msk.f32.vlgmr.msra.gmra.mxu0 %vm278_vm8, %v5764_v60 }
0x4c91   :  { %5906 = vmatpush.msra.mxu3 %v9771_v2  ;;  %5926 = vmatpush.msrb.mxu0 %v9773_v37 }
0x4c93   :  { %5907 = vmatpush.msra.mxu3 %v9775_v20  ;;  %5927 = vmatpush.msrb.mxu0 %v9779_v46 }
0x4c95   :  { %5908 = vmatpush.msra.mxu3 %v9781_v19  ;;  %5928 = vmatpush.msrb.mxu0 %v9783_v38 }
0x4c97   :  { %5909 = vmatpush.msra.mxu3 %v9789_v27  ;;  %5929 = vmatpush.msrb.mxu0 %v9791_v36 }
0x4c99   :  { %6074 = vmatpush.msrb.mxu3 %v9728_v22  ;;  %6094 = vmatpush.msra.mxu0 %v9730_v3 }
0x4c9b   :  { %6075 = vmatpush.msrb.mxu3 %v9732_v0  ;;  %6095 = vmatpush.msra.mxu0 %v9736_v1 }
0x4c9d   :  { %6076 = vmatpush.msrb.mxu3 %v9738_v49  ;;  %6096 = vmatpush.msra.mxu0 %v9740_v31 }
0x4c9f   :  { %6077 = vmatpush.msrb.mxu3 %v9746_v18  ;;  %6097 = vmatpush.msra.mxu0 %v9748_v4 }
0x4ca1   :  { %6078 = vmatpush.msrb.mxu3 %v9771_v2  ;;  %6098 = vmatpush.msra.mxu0 %v9773_v37 }
0x4ca3   :  { %6079 = vmatpush.msrb.mxu3 %v9775_v20  ;;  %6099 = vmatpush.msra.mxu0 %v9779_v46 }
0x4ca5   :  { %6080 = vmatpush.msrb.mxu3 %v9781_v19  ;;  %6100 = vmatpush.msra.mxu0 %v9783_v38 }
0x4ca7   :  { %6081 = vmatpush.msrb.mxu3 %v9789_v27  ;;  %6101 = vmatpush.msra.mxu0 %v9791_v36 }
0x4d05   :  { %v5580_v35 = vpop.f32.mrf.mxu0 }
0x4d06   :  { %v5606_v58 = vadd.f32 %v9584_v61, %v5580_v35 }
0x4d08   :  { %v5608_v42 = vrot.slane %v5606_v58, 4 }
0x4d0b   :  { %v5560_v41 = vpop.f32.mrf.mxu3 }
0x4d0c   :  { %v5584_v8 = vrot.slane %v5560_v41, 4 }
0x4d0e   :  { %v5586_v55 = vadd.f32 %v5584_v8, %v9691_v29 }
0x4d10   :  { %v6824_v53 = vmul.f32 -1.442695, %v5586_v55 }
0x4d12   :  { %7211 = vpow2.f32 %v6824_v53 }
0x4d13   :  { %v5788_v25 = vpop.f32.mrf.mxu3 }
0x4d14   :  { %v9866_v40 = vadd.f32 %v5788_v25, %v5757_v13 }
0x4d18   :  { %v7212_v21 = vpop.eup %7211 }
0x4d19   :  { %v5590_v15 = vadd.f32 1.0, %v7212_v21 }
0x4d1b   :  { %7213 = vrcp.f32 %v5590_v15  ;;  %v5602_v17 = vand.u32 2147483648, %v5590_v15  ;;  %v5600_v9 = vand.u32 2147483647, %v5590_v15  ;;  %vm5596_vm14 = vweird.f32 %v5590_v15 }
0x4d1d   :  { %v5603_v7 = vor.u32 1.1754944e-38, %v5602_v17  ;;  %vm5601_vm2 = vcmp.eq.f32.partialorder %v5600_v9, 8.507059e+37 }
0x4d21   :  { %v7214_v33 = vpop.eup %7213 }
0x4d22   :  { %v5592_v52 = vmul.f32 %v7214_v33, %v5590_v15  ;;  %vm5597_vm0 = vweird.f32 %v7214_v33 }
0x4d23   :  { %vm5598_vm15 = vmor %vm5596_vm14, %vm5597_vm0 }
0x4d24   :  { %v5593_v54 = vsub.f32 1.0, %v5592_v52 }
0x4d26   :  { %v5594_v45 = vmul.f32 %v7214_v33, %v5593_v54 }
0x4d28   :  { %v5595_v28 = vadd.f32 %v7214_v33, %v5594_v45 }
0x4d2a   :  { %v5599_v24 = vsel %vm5598_vm15, %v7214_v33, %v5595_v28 }
0x4d2b   :  { %v5604_v51 = vsel %vm5601_vm2, %v5603_v7, %v5599_v24 }
0x4d2c   :  { %v5610_v56 = vmul.f32 %v5608_v42, %v5604_v51  ;;  %v5621_v63 = vmul.f32 %v5619_v14, %v5604_v51  ;;  %v5613_v43 = vsub.f32 1.0, %v5604_v51 }
0x4d2e   :  { %v5611_v34 = vadd.f32 %v5610_v56, %v9698_v59 }
0x4d30   :  { %7215 = vtanh.f32 %v5611_v34 }
0x4d36   :  { %v7216_v62 = vpop.eup %7215 }
0x4d37   :  { %5615 = vrot.lane.b32.xlu0 %v7216_v62, %s7491_s20 }
0x4da9   :  { %v5616_v30 = vpop.permute.xlu0 %5615 }
0x4daa   :  { %v5618_v23 = vmul.f32 %v5616_v30, %v5613_v43  ;;  %v5758_v30 = vperm.slane %v9860_v57, 1 }
0x4dac   :  { %v9760_v39 = vadd.f32 %v5621_v63, %v5618_v23 }
0x4dae   :  { %v5624_v11 = vrot.slane %v9760_v39, 4  ;;  %v9768_v50 = vsel %vm957_vm4, %v5712_v48, %v9760_v39  ;;  %v5705_v28 = vrot.slane %v9760_v39, 6  ;;  %v5811_v48 = vpop.f32.mrf.mxu0 }
0x4db0   :  { %5625 = vrot.lane.b32.xlu1 %v5624_v11, %s7491_s20 }
0x4e22   :  { %v5626_v47 = vpop.permute.xlu1 %5625 }
0x4e23   :  { %6825 = vmatmul.msk.f32.vlgmr.msra.gmra.mxu1 %vm278_vm8, %v5626_v47  ;;  %6826 = vmatmul.msk.f32.vlgmr.msrb.gmra.mxu2 %vm278_vm8, %v5626_v47 }
0x4e24   :  { %5988 = vmatpush.msra.mxu1 %v9728_v22  ;;  %6008 = vmatpush.msrb.mxu2 %v9730_v3 }
0x4e26   :  { %5989 = vmatpush.msra.mxu1 %v9732_v0  ;;  %6009 = vmatpush.msrb.mxu2 %v9736_v1 }
0x4e28   :  { %5990 = vmatpush.msra.mxu1 %v9738_v49  ;;  %6010 = vmatpush.msrb.mxu2 %v9740_v31 }
0x4e2a   :  { %5991 = vmatpush.msra.mxu1 %v9746_v18  ;;  %6011 = vmatpush.msrb.mxu2 %v9748_v4 }
0x4e2b   :  { %6834 = vmatmul.msk.f32.vlgmr.msrb.gmra.mxu1 %vm278_vm8, %v8971_v10  ;;  %6835 = vmatmul.msk.f32.vlgmr.msra.gmra.mxu2 %vm278_vm8, %v8971_v10 }
0x4e2c   :  { %5992 = vmatpush.msra.mxu1 %v9771_v2  ;;  %6012 = vmatpush.msrb.mxu2 %v9773_v37 }
0x4e2e   :  { %5993 = vmatpush.msra.mxu1 %v9775_v20  ;;  %6013 = vmatpush.msrb.mxu2 %v9779_v46 }
0x4e30   :  { %5994 = vmatpush.msra.mxu1 %v9781_v19  ;;  %6014 = vmatpush.msrb.mxu2 %v9783_v38 }
0x4e32   :  { %5995 = vmatpush.msra.mxu1 %v9789_v27  ;;  %6015 = vmatpush.msrb.mxu2 %v9791_v36 }
0x4e34   :  { %6160 = vmatpush.msrb.mxu1 %v9728_v22  ;;  %6180 = vmatpush.msra.mxu2 %v9730_v3 }
0x4e36   :  { %6161 = vmatpush.msrb.mxu1 %v9732_v0  ;;  %6181 = vmatpush.msra.mxu2 %v9736_v1 }
0x4e38   :  { %6162 = vmatpush.msrb.mxu1 %v9738_v49  ;;  %6182 = vmatpush.msra.mxu2 %v9740_v31 }
0x4e3a   :  { %6163 = vmatpush.msrb.mxu1 %v9746_v18  ;;  %6183 = vmatpush.msra.mxu2 %v9748_v4 }
0x4e3c   :  { %6164 = vmatpush.msrb.mxu1 %v9771_v2  ;;  %6184 = vmatpush.msra.mxu2 %v9773_v37 }
0x4e3e   :  { %6165 = vmatpush.msrb.mxu1 %v9775_v20  ;;  %6185 = vmatpush.msra.mxu2 %v9779_v46 }
0x4e40   :  { %6166 = vmatpush.msrb.mxu1 %v9781_v19  ;;  %6186 = vmatpush.msra.mxu2 %v9783_v38 }
0x4e42   :  { %6167 = vmatpush.msrb.mxu1 %v9789_v27  ;;  %6187 = vmatpush.msra.mxu2 %v9791_v36 }
0x4ea0   :  { %v5646_v10 = vpop.f32.mrf.mxu1 }
0x4ea1   :  { %v5670_v44 = vrot.slane %v5646_v10, 2 }
0x4ea3   :  { %v5672_v16 = vadd.f32 %v5670_v44, %v9691_v29 }
0x4ea5   :  { %v6827_v5 = vmul.f32 -1.442695, %v5672_v16  ;;  %v9881_v16 = vadd.f32 %v5811_v48, %v5758_v30 }
0x4ea6   :  { %v5666_v21 = vpop.f32.mrf.mxu2 }
0x4ea7   :  { %7217 = vpow2.f32 %v6827_v5  ;;  %v5692_v54 = vadd.f32 %v9584_v61, %v5666_v21  ;;  %v9874_v61 = vld [vmem:[%s10084_s15 + $0x3] ss:$0 sm:$0xff] }
0x4ea8   :  { %v5834_v26 = vpop.f32.mrf.mxu1 }
0x4ea9   :  { %v5857_v6 = vadd.f32 %v5834_v26, %v9866_v40  ;;  %v5694_v42 = vrot.slane %v5692_v54, 2 }
0x4eab   :  { %v6836_v12 = vmul.f32 -1.442695, %v5857_v6 }
0x4ead   :  { %v7218_v60 = vpop.eup %7217  ;;  %7219 = vpow2.f32 %v6836_v12 }
0x4eae   :  { %v5676_v41 = vadd.f32 1.0, %v7218_v60  ;;  %v5854_v43 = vpop.f32.mrf.mxu2 }
0x4eaf   :  { %v5877_v10 = vadd.f32 %v9874_v61, %v5854_v43 }
0x4eb0   :  { %7221 = vrcp.f32 %v5676_v41  ;;  %v5688_v33 = vand.u32 2147483648, %v5676_v41  ;;  %v5686_v35 = vand.u32 2147483647, %v5676_v41  ;;  %vm5682_vm4 = vweird.f32 %v5676_v41 }
0x4eb2   :  { %v5689_v9 = vor.u32 1.1754944e-38, %v5688_v33  ;;  %vm5687_vm9 = vcmp.eq.f32.partialorder %v5686_v35, 8.507059e+37 }
0x4eb3   :  { %v7220_v8 = vpop.eup %7219 }
0x4eb4   :  { %v5861_v55 = vadd.f32 1.0, %v7220_v8 }
0x4eb6   :  { %v7222_v53 = vpop.eup %7221  ;;  %7223 = vrcp.f32 %v5861_v55  ;;  %v5871_v51 = vand.u32 2147483647, %v5861_v55  ;;  %v5873_v56 = vand.u32 2147483648, %v5861_v55  ;;  %vm5867_vm10 = vweird.f32 %v5861_v55 }
0x4eb7   :  { %v5678_v29 = vmul.f32 %v7222_v53, %v5676_v41  ;;  %vm5683_vm3 = vweird.f32 %v7222_v53 }
0x4eb8   :  { %vm5684_vm6 = vmor %vm5682_vm4, %vm5683_vm3  ;;  %v5874_v11 = vor.u32 1.1754944e-38, %v5873_v56  ;;  %vm5872_vm7 = vcmp.eq.f32.partialorder %v5871_v51, 8.507059e+37 }
0x4eb9   :  { %v5679_v15 = vsub.f32 1.0, %v5678_v29 }
0x4ebb   :  { %v5680_v52 = vmul.f32 %v7222_v53, %v5679_v15 }
0x4ebc   :  { %v7224_v17 = vpop.eup %7223 }
0x4ebd   :  { %v5681_v58 = vadd.f32 %v7222_v53, %v5680_v52  ;;  %v5863_v45 = vmul.f32 %v7224_v17, %v5861_v55  ;;  %vm5868_vm5 = vweird.f32 %v7224_v17 }
0x4ebe   :  { %vm5869_vm12 = vmor %vm5867_vm10, %vm5868_vm5 }
0x4ebf   :  { %v5685_v7 = vsel %vm5684_vm6, %v7222_v53, %v5681_v58  ;;  %v5864_v24 = vsub.f32 1.0, %v5863_v45 }
0x4ec0   :  { %v5690_v14 = vsel %vm5687_vm9, %v5689_v9, %v5685_v7 }
0x4ec1   :  { %v5696_v63 = vmul.f32 %v5694_v42, %v5690_v14  ;;  %v5865_v34 = vmul.f32 %v7224_v17, %v5864_v24  ;;  %v5707_v62 = vmul.f32 %v5705_v28, %v5690_v14  ;;  %v5699_v6 = vsub.f32 1.0, %v5690_v14 }
0x4ec3   :  { %v5697_v23 = vadd.f32 %v5696_v63, %v9698_v59  ;;  %v5866_v39 = vadd.f32 %v7224_v17, %v5865_v34 }
0x4ec5   :  { %7225 = vtanh.f32 %v5697_v23  ;;  %v5870_v47 = vsel %vm5869_vm12, %v7224_v17, %v5866_v39 }
0x4ec6   :  { %v5875_v44 = vsel %vm5872_vm7, %v5874_v11, %v5870_v47 }
0x4ec7   :  { %v5878_v25 = vmul.f32 %v5877_v10, %v5875_v44  ;;  %v5881_v55 = vsub.f32 1.0, %v5875_v44  ;;  %v5887_v29 = vmul.f32 %v5875_v44, %v9019_v32 }
0x4ec9   :  { %v5879_v5 = vadd.f32 %v5878_v25, %v9881_v16 }
0x4ecb   :  { %v7226_v26 = vpop.eup %7225  ;;  %7227 = vtanh.f32 %v5879_v5 }
0x4ecc   :  { %5701 = vrot.lane.b32.xlu0 %v7226_v26, %s7491_s20 }
0x4ed1   :  { %v7228_v59 = vpop.eup %7227 }
0x4ed2   :  { %5883 = vrot.lane.b32.xlu1 %v7228_v59, %s7491_s20 }
0x4f3e   :  { %v5702_v12 = vpop.permute.xlu0 %5701 }
0x4f3f   :  { %v5704_v60 = vmul.f32 %v5702_v12, %v5699_v6 }
0x4f41   :  { %v5708_v41 = vadd.f32 %v5707_v62, %v5704_v60 }
0x4f43   :  { %v5714_v8 = vsel %vm959_vm11, %v9768_v50, %v5708_v41 }
0x4f44   :  { %5765 = vrot.lane.b32.xlu2 %v5714_v8, %s7491_s20  ;;  %v5884_v53 = vpop.permute.xlu1 %5883 }
0x4f45   :  { %v5886_v21 = vmul.f32 %v5884_v53, %v5881_v55 }
0x4f47   :  { %v9890_v15 = vadd.f32 %v5887_v29, %v5886_v21 }
0x4f49   :  { %5890 = vrot.lane.b32.xlu0 %v9890_v15, %s7491_s20  ;;  %v5970_v44 = vrot.slane %v9890_v15, 6 }
0x4f9e   :  { %v5766_v33 = vpop.permute.xlu2 %5765 }
0x4f9f   :  { %6831 = vmatmul.msk.f32.gmra.mxu3 %vm278_vm8, %v5766_v33  ;;  %6833 = vmatmul.msk.f32.gmra.mxu0 %vm278_vm8, %v5766_v33 }
0x4fbb   :  { %v5891_v52 = vpop.permute.xlu0 %5890 }
0x4fbc   :  { %6837 = vmatmul.msk.f32.vlgmr.msra.gmra.mxu3 %vm278_vm8, %v5891_v52  ;;  %6838 = vmatmul.msk.f32.vlgmr.msrb.gmra.mxu0 %vm278_vm8, %v5891_v52 }
0x4fbd   :  { %6238 = vmatpush.msra.mxu3 %v9728_v22  ;;  %6258 = vmatpush.msrb.mxu0 %v9730_v3 }
0x4fbf   :  { %6239 = vmatpush.msra.mxu3 %v9732_v0  ;;  %6259 = vmatpush.msrb.mxu0 %v9736_v1 }
0x4fc1   :  { %6240 = vmatpush.msra.mxu3 %v9738_v49  ;;  %6260 = vmatpush.msrb.mxu0 %v9740_v31 }
0x4fc3   :  { %6241 = vmatpush.msra.mxu3 %v9746_v18  ;;  %6261 = vmatpush.msrb.mxu0 %v9748_v4 }
0x4fc5   :  { %6242 = vmatpush.msra.mxu3 %v9771_v2  ;;  %6262 = vmatpush.msrb.mxu0 %v9773_v37 }
0x4fc7   :  { %6243 = vmatpush.msra.mxu3 %v9775_v20  ;;  %6263 = vmatpush.msrb.mxu0 %v9779_v46 }
0x4fc9   :  { %6244 = vmatpush.msra.mxu3 %v9781_v19  ;;  %6264 = vmatpush.msrb.mxu0 %v9783_v38 }
0x4fcb   :  { %6245 = vmatpush.msra.mxu3 %v9789_v27  ;;  %6265 = vmatpush.msrb.mxu0 %v9791_v36 }
0x501c   :  { %v9917_v9 = vpop.f32.mrf.mxu0 }
0x5022   :  { %v9914_v32 = vpop.f32.mrf.mxu3 }
0x5039   :  { %v5931_v42 = vpop.f32.mrf.mxu0 }
0x503a   :  { %v5957_v51 = vadd.f32 %v9874_v61, %v5931_v42 }
0x503c   :  { %v5959_v43 = vrot.slane %v5957_v51, 6 }
0x503f   :  { %v5911_v50 = vpop.f32.mrf.mxu3 }
0x5040   :  { %v5935_v35 = vrot.slane %v5911_v50, 6 }
0x5042   :  { %v5937_v54 = vadd.f32 %v5935_v35, %v9866_v40 }
0x5044   :  { %v6839_v17 = vmul.f32 -1.442695, %v5937_v54 }
0x5046   :  { %7229 = vpow2.f32 %v6839_v17 }
0x504c   :  { %v7230_v58 = vpop.eup %7229 }
0x504d   :  { %v5941_v45 = vadd.f32 1.0, %v7230_v58 }
0x504f   :  { %7231 = vrcp.f32 %v5941_v45  ;;  %v5953_v14 = vand.u32 2147483648, %v5941_v45  ;;  %v5951_v63 = vand.u32 2147483647, %v5941_v45  ;;  %vm5947_vm13 = vweird.f32 %v5941_v45 }
0x5051   :  { %v5954_v62 = vor.u32 1.1754944e-38, %v5953_v14  ;;  %vm5952_vm14 = vcmp.eq.f32.partialorder %v5951_v63, 8.507059e+37 }
0x5055   :  { %v7232_v28 = vpop.eup %7231 }
0x5056   :  { %v5943_v7 = vmul.f32 %v7232_v28, %v5941_v45  ;;  %vm5948_vm11 = vweird.f32 %v7232_v28 }
0x5057   :  { %vm5949_vm0 = vmor %vm5947_vm13, %vm5948_vm11 }
0x5058   :  { %v5944_v24 = vsub.f32 1.0, %v5943_v7 }
0x505a   :  { %v5945_v56 = vmul.f32 %v7232_v28, %v5944_v24 }
0x505c   :  { %v5946_v34 = vadd.f32 %v7232_v28, %v5945_v56 }
0x505e   :  { %v5950_v23 = vsel %vm5949_vm0, %v7232_v28, %v5946_v34 }
0x505f   :  { %v5955_v39 = vsel %vm5952_vm14, %v5954_v62, %v5950_v23 }
0x5060   :  { %v5961_v48 = vmul.f32 %v5959_v43, %v5955_v39  ;;  %v5964_v10 = vsub.f32 1.0, %v5955_v39  ;;  %v5972_v5 = vmul.f32 %v5970_v44, %v5955_v39 }
0x5062   :  { %v5962_v11 = vadd.f32 %v5961_v48, %v9881_v16 }
0x5064   :  { %7233 = vtanh.f32 %v5962_v11 }
0x506a   :  { %v7234_v47 = vpop.eup %7233 }
0x506b   :  { %5966 = vrot.lane.b32.xlu1 %v7234_v47, %s7491_s20 }
0x50dd   :  { %v5967_v25 = vpop.permute.xlu1 %5966 }
0x50de   :  { %v5969_v26 = vmul.f32 %v5967_v25, %v5964_v10 }
0x50e0   :  { %v9923_v59 = vadd.f32 %v5972_v5, %v5969_v26 }
0x50e2   :  { %v5975_v6 = vrot.slane %v9923_v59, 2  ;;  %v6056_v34 = vrot.slane %v9923_v59, 6 }
0x50e4   :  { %5976 = vrot.lane.b32.xlu2 %v5975_v6, %s7491_s20 }
0x513e   :  { %v5977_v12 = vpop.permute.xlu2 %5976 }
0x513f   :  { %6840 = vmatmul.msk.f32.vlgmr.msra.gmra.mxu1 %vm278_vm8, %v5977_v12  ;;  %6841 = vmatmul.msk.f32.vlgmr.msrb.gmra.mxu2 %vm278_vm8, %v5977_v12 }
0x5140   :  { %6324 = vmatpush.msra.mxu1 %v9728_v22  ;;  %6344 = vmatpush.msrb.mxu2 %v9730_v3 }
0x5142   :  { %6325 = vmatpush.msra.mxu1 %v9732_v0  ;;  %6345 = vmatpush.msrb.mxu2 %v9736_v1 }
0x5144   :  { %6326 = vmatpush.msra.mxu1 %v9738_v49  ;;  %6346 = vmatpush.msrb.mxu2 %v9740_v31 }
0x5146   :  { %6327 = vmatpush.msra.mxu1 %v9746_v18  ;;  %6347 = vmatpush.msrb.mxu2 %v9748_v4 }
0x5148   :  { %6328 = vmatpush.msra.mxu1 %v9771_v2  ;;  %6348 = vmatpush.msrb.mxu2 %v9773_v37 }
0x514a   :  { %6329 = vmatpush.msra.mxu1 %v9775_v20  ;;  %6349 = vmatpush.msrb.mxu2 %v9779_v46 }
0x514c   :  { %6330 = vmatpush.msra.mxu1 %v9781_v19  ;;  %6350 = vmatpush.msrb.mxu2 %v9783_v38 }
0x514e   :  { %6331 = vmatpush.msra.mxu1 %v9789_v27  ;;  %6351 = vmatpush.msrb.mxu2 %v9791_v36 }
0x51bc   :  { %v5997_v60 = vpop.f32.mrf.mxu1 }
0x51bd   :  { %v6021_v41 = vrot.slane %v5997_v60, 4 }
0x51bf   :  { %v6023_v8 = vadd.f32 %v6021_v41, %v9866_v40 }
0x51c1   :  { %v6842_v55 = vmul.f32 -1.442695, %v6023_v8 }
0x51c2   :  { %v6017_v52 = vpop.f32.mrf.mxu2 }
0x51c3   :  { %7235 = vpow2.f32 %v6842_v55  ;;  %v6043_v58 = vadd.f32 %v9874_v61, %v6017_v52 }
0x51c5   :  { %v6045_v42 = vrot.slane %v6043_v58, 4 }
0x51c9   :  { %v7236_v53 = vpop.eup %7235 }
0x51ca   :  { %v6027_v29 = vadd.f32 1.0, %v7236_v53 }
0x51cc   :  { %7237 = vrcp.f32 %v6027_v29  ;;  %v6039_v35 = vand.u32 2147483648, %v6027_v29  ;;  %v6037_v17 = vand.u32 2147483647, %v6027_v29  ;;  %vm6033_vm2 = vweird.f32 %v6027_v29 }
0x51ce   :  { %v6040_v28 = vor.u32 1.1754944e-38, %v6039_v35  ;;  %vm6038_vm4 = vcmp.eq.f32.partialorder %v6037_v17, 8.507059e+37 }
0x51d2   :  { %v7238_v21 = vpop.eup %7237 }
0x51d3   :  { %v6029_v33 = vmul.f32 %v7238_v21, %v6027_v29  ;;  %vm6034_vm15 = vweird.f32 %v7238_v21 }
0x51d4   :  { %vm6035_vm3 = vmor %vm6033_vm2, %vm6034_vm15 }
0x51d5   :  { %v6030_v50 = vsub.f32 1.0, %v6029_v33 }
0x51d7   :  { %v6031_v54 = vmul.f32 %v7238_v21, %v6030_v50 }
0x51d9   :  { %v6032_v45 = vadd.f32 %v7238_v21, %v6031_v54 }
0x51db   :  { %v6036_v7 = vsel %vm6035_vm3, %v7238_v21, %v6032_v45 }
0x51dc   :  { %v6041_v24 = vsel %vm6038_vm4, %v6040_v28, %v6036_v7 }
0x51dd   :  { %v6047_v14 = vmul.f32 %v6045_v42, %v6041_v24  ;;  %v6050_v63 = vsub.f32 1.0, %v6041_v24  ;;  %v6058_v43 = vmul.f32 %v6056_v34, %v6041_v24 }
0x51df   :  { %v6048_v51 = vadd.f32 %v6047_v14, %v9881_v16 }
0x51e1   :  { %7239 = vtanh.f32 %v6048_v51  ;;  %v9993_v51 = vadd.f32 %v9917_v9, %v5758_v30 }
0x51e7   :  { %v7240_v56 = vpop.eup %7239 }
0x51e8   :  { %6052 = vrot.lane.b32.xlu0 %v7240_v56, %s7491_s20 }
0x525a   :  { %v6053_v62 = vpop.permute.xlu0 %6052 }
0x525b   :  { %v6055_v23 = vmul.f32 %v6053_v62, %v6050_v63 }
0x525d   :  { %v9950_v39 = vadd.f32 %v6058_v43, %v6055_v23 }
0x525f   :  { %v6061_v48 = vrot.slane %v9950_v39, 4  ;;  %v6142_v6 = vrot.slane %v9950_v39, 6 }
0x5261   :  { %6062 = vrot.lane.b32.xlu1 %v6061_v48, %s7491_s20 }
0x52d3   :  { %v6063_v11 = vpop.permute.xlu1 %6062 }
0x52d4   :  { %6843 = vmatmul.msk.f32.vlgmr.msrb.gmra.mxu3 %vm278_vm8, %v6063_v11  ;;  %6844 = vmatmul.msk.f32.vlgmr.msra.gmra.mxu0 %vm278_vm8, %v6063_v11 }
0x52d5   :  { %6410 = vmatpush.msrb.mxu3 %v9728_v22  ;;  %6430 = vmatpush.msra.mxu0 %v9730_v3 }
0x52d7   :  { %6411 = vmatpush.msrb.mxu3 %v9732_v0  ;;  %6431 = vmatpush.msra.mxu0 %v9736_v1 }
0x52d9   :  { %6412 = vmatpush.msrb.mxu3 %v9738_v49  ;;  %6432 = vmatpush.msra.mxu0 %v9740_v31 }
0x52db   :  { %6413 = vmatpush.msrb.mxu3 %v9746_v18  ;;  %6433 = vmatpush.msra.mxu0 %v9748_v4 }
0x52dd   :  { %6414 = vmatpush.msrb.mxu3 %v9771_v2  ;;  %6434 = vmatpush.msra.mxu0 %v9773_v37 }
0x52df   :  { %6415 = vmatpush.msrb.mxu3 %v9775_v20  ;;  %6435 = vmatpush.msra.mxu0 %v9779_v46 }
0x52e1   :  { %6416 = vmatpush.msrb.mxu3 %v9781_v19  ;;  %6436 = vmatpush.msra.mxu0 %v9783_v38 }
0x52e3   :  { %6417 = vmatpush.msrb.mxu3 %v9789_v27  ;;  %6437 = vmatpush.msra.mxu0 %v9791_v36 }
0x5351   :  { %v6103_v2 = vpop.f32.mrf.mxu0 }
0x5352   :  { %v6129_v46 = vadd.f32 %v9874_v61, %v6103_v2 }
0x5357   :  { %v6083_v22 = vpop.f32.mrf.mxu3 }
0x5358   :  { %v6107_v3 = vrot.slane %v6083_v22, 2 }
0x535a   :  { %v6109_v0 = vadd.f32 %v6107_v3, %v9866_v40  ;;  %v6131_v40 = vrot.slane %v6129_v46, 2 }
0x535c   :  { %v6845_v1 = vmul.f32 -1.442695, %v6109_v0 }
0x535e   :  { %7241 = vpow2.f32 %v6845_v1 }
0x5364   :  { %v7242_v49 = vpop.eup %7241 }
0x5365   :  { %v6113_v31 = vadd.f32 1.0, %v7242_v49 }
0x5367   :  { %7243 = vrcp.f32 %v6113_v31  ;;  %v6125_v20 = vand.u32 2147483648, %v6113_v31  ;;  %v6123_v38 = vand.u32 2147483647, %v6113_v31  ;;  %vm6119_vm9 = vweird.f32 %v6113_v31 }
0x5369   :  { %v6126_v36 = vor.u32 1.1754944e-38, %v6125_v20  ;;  %vm6124_vm10 = vcmp.eq.f32.partialorder %v6123_v38, 8.507059e+37 }
0x536d   :  { %v7244_v18 = vpop.eup %7243 }
0x536e   :  { %v6115_v4 = vmul.f32 %v7244_v18, %v6113_v31  ;;  %vm6120_vm6 = vweird.f32 %v7244_v18 }
0x536f   :  { %vm6121_vm5 = vmor %vm6119_vm9, %vm6120_vm6 }
0x5370   :  { %v6116_v37 = vsub.f32 1.0, %v6115_v4 }
0x5372   :  { %v6117_v19 = vmul.f32 %v7244_v18, %v6116_v37 }
0x5374   :  { %v6118_v27 = vadd.f32 %v7244_v18, %v6117_v19 }
0x5376   :  { %v6122_v47 = vsel %vm6121_vm5, %v7244_v18, %v6118_v27  ;;  %vm6502_vm5 = vcmask 519170  }
0x5377   :  { %v6127_v10 = vsel %vm6124_vm10, %v6126_v36, %v6122_v47  ;;  %vm6511_vm10 = vcmask 521220  }
0x5378   :  { %v6133_v44 = vmul.f32 %v6131_v40, %v6127_v10  ;;  %v6136_v26 = vsub.f32 1.0, %v6127_v10  ;;  %v6144_v60 = vmul.f32 %v6142_v6, %v6127_v10 }
0x537a   :  { %v6134_v25 = vadd.f32 %v6133_v44, %v9881_v16  ;;  %v9986_v16 = vadd.f32 %v9914_v32, %v5757_v13 }
0x537c   :  { %7245 = vtanh.f32 %v6134_v25 }
0x5382   :  { %v7246_v5 = vpop.eup %7245 }
0x5383   :  { %6138 = vrot.lane.b32.xlu2 %v7246_v5, %s7491_s20 }
0x53dd   :  { %v6139_v12 = vpop.permute.xlu2 %6138 }
0x53de   :  { %v6141_v41 = vmul.f32 %v6139_v12, %v6136_v26 }
0x53e0   :  { %v9977_v8 = vadd.f32 %v6144_v60, %v6141_v41 }
0x53e2   :  { %v6147_v55 = vrot.slane %v9977_v8, 6 }
0x53e4   :  { %6148 = vrot.lane.b32.xlu0 %v6147_v55, %s7491_s20 }
0x5456   :  { %v6149_v53 = vpop.permute.xlu0 %6148 }
0x5457   :  { %6846 = vmatmul.msk.f32.vlgmr.msrb.gmra.mxu1 %vm278_vm8, %v6149_v53  ;;  %6847 = vmatmul.msk.f32.vlgmr.msra.gmra.mxu2 %vm278_vm8, %v6149_v53 }
0x54d4   :  { %v6169_v29 = vpop.f32.mrf.mxu1 }
0x54d5   :  { %v6192_v21 = vadd.f32 %v6169_v29, %v9986_v16 }
0x54d7   :  { %v6848_v33 = vmul.f32 -1.442695, %v6192_v21 }
0x54d9   :  { %7247 = vpow2.f32 %v6848_v33 }
0x54da   :  { %v6189_v7 = vpop.f32.mrf.mxu2 }
0x54db   :  { %v6212_v24 = vadd.f32 %v9874_v61, %v6189_v7 }
0x54df   :  { %v7248_v52 = vpop.eup %7247 }
0x54e0   :  { %v6196_v50 = vadd.f32 1.0, %v7248_v52 }
0x54e2   :  { %7249 = vrcp.f32 %v6196_v50  ;;  %v6208_v58 = vand.u32 2147483648, %v6196_v50  ;;  %v6206_v28 = vand.u32 2147483647, %v6196_v50  ;;  %vm6202_vm7 = vweird.f32 %v6196_v50 }
0x54e4   :  { %v6209_v13 = vor.u32 1.1754944e-38, %v6208_v58  ;;  %vm6207_vm13 = vcmp.eq.f32.partialorder %v6206_v28, 8.507059e+37 }
0x54e8   :  { %v7250_v35 = vpop.eup %7249 }
0x54e9   :  { %v6198_v54 = vmul.f32 %v7250_v35, %v6196_v50  ;;  %vm6203_vm12 = vweird.f32 %v7250_v35 }
0x54ea   :  { %vm6204_vm11 = vmor %vm6202_vm7, %vm6203_vm12 }
0x54eb   :  { %v6199_v17 = vsub.f32 1.0, %v6198_v54 }
0x54ed   :  { %v6200_v45 = vmul.f32 %v7250_v35, %v6199_v17 }
0x54ef   :  { %v6201_v42 = vadd.f32 %v7250_v35, %v6200_v45 }
0x54f1   :  { %v6205_v32 = vsel %vm6204_vm11, %v7250_v35, %v6201_v42 }
0x54f2   :  { %v6210_v14 = vsel %vm6207_vm13, %v6209_v13, %v6205_v32  ;;  %vm6493_vm13 = vcmask 517120  }
0x54f3   :  { %v6213_v56 = vmul.f32 %v6212_v24, %v6210_v14  ;;  %v6216_v62 = vsub.f32 1.0, %v6210_v14  ;;  %v6223_v23 = vmul.f32 %v6210_v14, %v6147_v55 }
0x54f5   :  { %v6214_v63 = vadd.f32 %v6213_v56, %v9993_v51 }
0x54f7   :  { %7251 = vtanh.f32 %v6214_v63 }
0x54fd   :  { %v7252_v34 = vpop.eup %7251 }
0x54fe   :  { %6218 = vrot.lane.b32.xlu1 %v7252_v34, %s7491_s20 }
0x5570   :  { %v6219_v43 = vpop.permute.xlu1 %6218 }
0x5571   :  { %v6221_v48 = vmul.f32 %v6219_v43, %v6216_v62  ;;  %v6885_v43 = vld [vmem:[%s10085_s16] ss:$0 sm:$0xff]  ;;  %s7492_s16 = smov [#allocation15]  }
0x5573   :  { %v9997_v11 = vadd.f32 %v6223_v23, %v6221_v48 }
0x5575   :  { %6226 = vrot.lane.b32.xlu2 %v9997_v11, %s7491_s20  ;;  %v6306_v5 = vrot.slane %v9997_v11, 6 }
0x55cf   :  { %v6227_v57 = vpop.permute.xlu2 %6226 }
0x55d0   :  { %6849 = vmatmul.msk.f32.vlgmr.msra.gmra.mxu3 %vm278_vm8, %v6227_v57  ;;  %6850 = vmatmul.msk.f32.vlgmr.msrb.gmra.mxu0 %vm278_vm8, %v6227_v57 }
0x564d   :  { %v6267_v18 = vpop.f32.mrf.mxu0 }
0x564e   :  { %v6293_v37 = vadd.f32 %v9874_v61, %v6267_v18 }
0x5650   :  { %v6295_v27 = vrot.slane %v6293_v37, 6 }
0x5653   :  { %v6247_v30 = vpop.f32.mrf.mxu3 }
0x5654   :  { %v6271_v9 = vrot.slane %v6247_v30, 6 }
0x5656   :  { %v6273_v22 = vadd.f32 %v6271_v9, %v9986_v16 }
0x5658   :  { %v6851_v3 = vmul.f32 -1.442695, %v6273_v22 }
0x565a   :  { %7253 = vpow2.f32 %v6851_v3 }
0x5660   :  { %v7254_v0 = vpop.eup %7253 }
0x5661   :  { %v6277_v1 = vadd.f32 1.0, %v7254_v0 }
0x5663   :  { %7255 = vrcp.f32 %v6277_v1  ;;  %v6289_v2 = vand.u32 2147483648, %v6277_v1  ;;  %v6287_v46 = vand.u32 2147483647, %v6277_v1  ;;  %vm6283_vm14 = vweird.f32 %v6277_v1 }
0x5665   :  { %v6290_v38 = vor.u32 1.1754944e-38, %v6289_v2  ;;  %vm6288_vm2 = vcmp.eq.f32.partialorder %v6287_v46, 8.507059e+37 }
0x5669   :  { %v7256_v49 = vpop.eup %7255 }
0x566a   :  { %v6279_v31 = vmul.f32 %v7256_v49, %v6277_v1  ;;  %vm6284_vm0 = vweird.f32 %v7256_v49 }
0x566b   :  { %vm6285_vm15 = vmor %vm6283_vm14, %vm6284_vm0  ;;  %vm6574_vm0 = vcmask 7168   ;;  %vm6576_vm14 = vcmask 15360  }
0x566c   :  { %v6280_v4 = vsub.f32 1.0, %v6279_v31 }
0x566e   :  { %v6281_v20 = vmul.f32 %v7256_v49, %v6280_v4 }
0x5670   :  { %v6282_v19 = vadd.f32 %v7256_v49, %v6281_v20 }
0x5672   :  { %v6286_v36 = vsel %vm6285_vm15, %v7256_v49, %v6282_v19  ;;  %vm6520_vm15 = vcmask 523270  }
0x5673   :  { %v6291_v40 = vsel %vm6288_vm2, %v6290_v38, %v6286_v36  ;;  %v6886_v36 = vld [vmem:[#allocation2] ss:$0 sm:$0xff]  ;;  %vm6579_vm2 = vcmask 31744  }
0x5674   :  { %v6297_v47 = vmul.f32 %v6295_v27, %v6291_v40  ;;  %v6300_v25 = vsub.f32 1.0, %v6291_v40  ;;  %v6308_v12 = vmul.f32 %v6306_v5, %v6291_v40 }
0x5676   :  { %v6298_v10 = vadd.f32 %v6297_v47, %v9993_v51 }
0x5678   :  { %7257 = vtanh.f32 %v6298_v10 }
0x567e   :  { %v7258_v44 = vpop.eup %7257 }
0x567f   :  { %6302 = vrot.lane.b32.xlu0 %v7258_v44, %s7491_s20 }
0x56f1   :  { %v6303_v26 = vpop.permute.xlu0 %6302 }
0x56f2   :  { %v6305_v6 = vmul.f32 %v6303_v26, %v6300_v25 }
0x56f4   :  { %v10008_v60 = vadd.f32 %v6308_v12, %v6305_v6 }
0x56f6   :  { %v6311_v41 = vrot.slane %v10008_v60, 2  ;;  %v6392_v48 = vrot.slane %v10008_v60, 6 }
0x56f8   :  { %6312 = vrot.lane.b32.xlu1 %v6311_v41, %s7491_s20 }
0x576a   :  { %v6313_v55 = vpop.permute.xlu1 %6312 }
0x576b   :  { %6852 = vmatmul.msk.f32.vlgmr.msra.gmra.mxu1 %vm278_vm8, %v6313_v55  ;;  %6853 = vmatmul.msk.f32.vlgmr.msrb.gmra.mxu2 %vm278_vm8, %v6313_v55 }
0x57e8   :  { %v6333_v53 = vpop.f32.mrf.mxu1 }
0x57e9   :  { %v6357_v29 = vrot.slane %v6333_v53, 4 }
0x57eb   :  { %v6359_v21 = vadd.f32 %v6357_v29, %v9986_v16 }
0x57ed   :  { %v6854_v33 = vmul.f32 -1.442695, %v6359_v21 }
0x57ee   :  { %v6353_v17 = vpop.f32.mrf.mxu2 }
0x57ef   :  { %7259 = vpow2.f32 %v6854_v33  ;;  %v6379_v42 = vadd.f32 %v9874_v61, %v6353_v17 }
0x57f1   :  { %v6381_v14 = vrot.slane %v6379_v42, 4 }
0x57f5   :  { %v7260_v52 = vpop.eup %7259 }
0x57f6   :  { %v6363_v50 = vadd.f32 1.0, %v7260_v52 }
0x57f8   :  { %7261 = vrcp.f32 %v6363_v50  ;;  %v6375_v45 = vand.u32 2147483648, %v6363_v50  ;;  %v6373_v7 = vand.u32 2147483647, %v6363_v50  ;;  %vm6369_vm4 = vweird.f32 %v6363_v50 }
0x57fa   :  { %v6376_v32 = vor.u32 1.1754944e-38, %v6375_v45  ;;  %vm6374_vm9 = vcmp.eq.f32.partialorder %v6373_v7, 8.507059e+37 }
0x57fe   :  { %v7262_v35 = vpop.eup %7261 }
0x57ff   :  { %v6365_v54 = vmul.f32 %v7262_v35, %v6363_v50  ;;  %vm6370_vm3 = vweird.f32 %v7262_v35 }
0x5800   :  { %vm6371_vm6 = vmor %vm6369_vm4, %vm6370_vm3  ;;  %vm6581_vm3 = vcmask 39936   ;;  %vm6583_vm4 = vcmask 48128  }
0x5801   :  { %v6366_v58 = vsub.f32 1.0, %v6365_v54 }
0x5803   :  { %v6367_v28 = vmul.f32 %v7262_v35, %v6366_v58 }
0x5805   :  { %v6368_v13 = vadd.f32 %v7262_v35, %v6367_v28 }
0x5807   :  { %v6372_v24 = vsel %vm6371_vm6, %v7262_v35, %v6368_v13  ;;  %vm6585_vm6 = vcmask 56320  }
0x5808   :  { %v6377_v56 = vsel %vm6374_vm9, %v6376_v32, %v6372_v24 }
0x5809   :  { %v6383_v63 = vmul.f32 %v6381_v14, %v6377_v56  ;;  %v6386_v23 = vsub.f32 1.0, %v6377_v56  ;;  %v6394_v30 = vmul.f32 %v6392_v48, %v6377_v56 }
0x580b   :  { %v6384_v34 = vadd.f32 %v6383_v63, %v9993_v51 }
0x580d   :  { %7263 = vtanh.f32 %v6384_v34 }
0x5813   :  { %v7264_v62 = vpop.eup %7263 }
0x5814   :  { %6388 = vrot.lane.b32.xlu2 %v7264_v62, %s7491_s20 }
0x581c   :  { %6485 = vrot.lane.b32.xlu2 %v6885_v43, %s7491_s20 }
0x586e   :  { %v6389_v57 = vpop.permute.xlu2 %6388 }
0x586f   :  { %v6391_v9 = vmul.f32 %v6389_v57, %v6386_v23 }
0x5871   :  { %v10023_v22 = vadd.f32 %v6394_v30, %v6391_v9 }
0x5873   :  { %v6397_v3 = vrot.slane %v10023_v22, 4  ;;  %v6478_v21 = vrot.slane %v10023_v22, 6 }
0x5875   :  { %6398 = vrot.lane.b32.xlu0 %v6397_v3, %s7491_s20 }
0x5876   :  { %v10027_v0 = vpop.permute.xlu2 %6485 }
0x5877   :  { %v6497_v1 = vmul.f32 %v10027_v0, %v9923_v59  ;;  %v6488_v49 = vmul.f32 %v10027_v0, %v9890_v15  ;;  %v6506_v31 = vmul.f32 %v10027_v0, %v9950_v39  ;;  %v6532_v15 = vmul.f32 %v10027_v0, %v10008_v60 }
0x5878   :  { %v6515_v58 = vmul.f32 %v10027_v0, %v9977_v8  ;;  %v6540_v45 = vmul.f32 %v10027_v0, %v10023_v22  ;;  %v6524_v48 = vmul.f32 %v10027_v0, %v9997_v11 }
0x5879   :  { %6499 = vrot.lane.b32.xlu2 %v6497_v1, %s7491_s20 }
0x587d   :  { %6490 = vrot.lane.b32.xlu0 %v6488_v49, %s7491_s20 }
0x5881   :  { %6508 = vrot.lane.b32.xlu2 %v6506_v31, %s7491_s20 }
0x58d3   :  { %v6500_v18 = vpop.permute.xlu2 %6499 }
0x58d4   :  { %v6503_v4 = vsel %vm6502_vm5, %v6500_v18, 0.0 }
0x58d5   :  { %6504 = vadd.xlane.f32.xlu0 %v6503_v4 }
0x58db   :  { %v6509_v2 = vpop.permute.xlu2 %6508 }
0x58dc   :  { %v6512_v59 = vsel %vm6511_vm10, %v6509_v2, 0.0 }
0x58dd   :  { %6513 = vadd.xlane.f32.xlu2 %v6512_v59 }
0x58e7   :  { %v6399_v37 = vpop.permute.xlu0 %6398 }
0x58e8   :  { %6855 = vmatmul.msk.f32.vlgmr.msrb.gmra.mxu3 %vm278_vm8, %v6399_v37  ;;  %6856 = vmatmul.msk.f32.vlgmr.msra.gmra.mxu0 %vm278_vm8, %v6399_v37 }
0x58f5   :  { %6534 = vrot.lane.b32.xlu2 %v6532_v15, %s7491_s20 }
0x5950   :  { %v6514_v39 = vpop.xlane.xlu2 %6513 }
0x5951   :  { %v6560_v8 = vrot.slane %v6514_v39, 4 }
0x5958   :  { %v6535_v20 = vpop.permute.xlu2 %6534 }
0x5959   :  { %v6537_v46 = vsel %vm6502_vm5, %v6535_v20, 0.0 }
0x595a   :  { %6538 = vadd.xlane.f32.xlu2 %v6537_v46 }
0x5965   :  { %v6439_v5 = vpop.f32.mrf.mxu0 }
0x5966   :  { %v6465_v12 = vadd.f32 %v9874_v61, %v6439_v5  ;;  %v6491_v61 = vpop.permute.xlu0 %6490 }
0x5967   :  { %v6494_v17 = vsel %vm6493_vm13, %v6491_v61, 0.0 }
0x5968   :  { %v6467_v53 = vrot.slane %v6465_v12, 2 }
0x596b   :  { %v6419_v19 = vpop.f32.mrf.mxu3 }
0x596c   :  { %v6443_v38 = vrot.slane %v6419_v19, 2 }
0x596e   :  { %v6445_v27 = vadd.f32 %v6443_v38, %v9986_v16  ;;  %v6505_v32 = vpop.xlane.xlu0 %6504 }
0x596f   :  { %v6557_v24 = vrot.slane %v6505_v32, 2 }
0x5970   :  { %v6857_v40 = vmul.f32 -1.442695, %v6445_v27 }
0x5972   :  { %7265 = vpow2.f32 %v6857_v40  ;;  %6591 = vperm.xlu2 %6874, %v6886_v36  }
0x5978   :  { %v7266_v47 = vpop.eup %7265 }
0x5979   :  { %v6449_v10 = vadd.f32 1.0, %v7266_v47 }
0x597b   :  { %7267 = vrcp.f32 %v6449_v10  ;;  %v6461_v6 = vand.u32 2147483648, %v6449_v10  ;;  %v6459_v41 = vand.u32 2147483647, %v6449_v10  ;;  %vm6455_vm12 = vweird.f32 %v6449_v10 }
0x597d   :  { %v6462_v16 = vor.u32 1.1754944e-38, %v6461_v6  ;;  %vm6460_vm11 = vcmp.eq.f32.partialorder %v6459_v41, 8.507059e+37 }
0x5981   :  { %v7268_v44 = vpop.eup %7267 }
0x5982   :  { %v6451_v25 = vmul.f32 %v7268_v44, %v6449_v10  ;;  %vm6456_vm8 = vweird.f32 %v7268_v44 }
0x5983   :  { %vm6457_vm7 = vmor %vm6455_vm12, %vm6456_vm8 }
0x5984   :  { %v6452_v26 = vsub.f32 1.0, %v6451_v25 }
0x5986   :  { %v6453_v60 = vmul.f32 %v7268_v44, %v6452_v26 }
0x5988   :  { %v6454_v55 = vadd.f32 %v7268_v44, %v6453_v60 }
0x598a   :  { %v6458_v29 = vsel %vm6457_vm7, %v7268_v44, %v6454_v55 }
0x598b   :  { %v6463_v33 = vsel %vm6460_vm11, %v6462_v16, %v6458_v29 }
0x598c   :  { %v6469_v52 = vmul.f32 %v6467_v53, %v6463_v33  ;;  %v6480_v50 = vmul.f32 %v6478_v21, %v6463_v33 }
0x598e   :  { %v6470_v35 = vadd.f32 %v6469_v52, %v9993_v51  ;;  %v6472_v51 = vsub.f32 1.0, %v6463_v33 }
0x5990   :  { %7269 = vtanh.f32 %v6470_v35 }
0x5996   :  { %v7270_v54 = vpop.eup %7269 }
0x5997   :  { %6474 = vrot.lane.b32.xlu1 %v7270_v54, %s7491_s20 }
0x59c1   :  { %6495 = vadd.xlane.f32.xlu1 %v6494_v17 }
0x59cd   :  { %v6539_v18 = vpop.xlane.xlu2 %6538 }
0x59ce   :  { %v6566_v11 = vrot.slane %v6539_v18, 2 }
0x59d5   :  { %v6592_v20 = vpop.permute.xlu2 %6591 }
0x59da   :  { %6517 = vrot.lane.b32.xlu1 %v6515_v58, %s7491_s20 }
0x59e2   :  { %6542 = vrot.lane.b32.xlu1 %v6540_v45, %s7491_s20 }
0x5a09   :  { %v6475_v28 = vpop.permute.xlu1 %6474 }
0x5a0a   :  { %v6477_v7 = vmul.f32 %v6475_v28, %v6472_v51 }
0x5a0c   :  { %v6481_v42 = vadd.f32 %v6480_v50, %v6477_v7 }
0x5a0e   :  { %v6548_v13 = vmul.f32 %v10027_v0, %v6481_v42 }
0x5a10   :  { %6550 = vrot.lane.b32.xlu1 %v6548_v13, %s7491_s20 }
0x5a34   :  { %v6496_v14 = vpop.xlane.xlu1 %6495 }
0x5a35   :  { %v6575_v56 = vsel %vm6574_vm0, %v6496_v14, %v6557_v24 }
0x5a36   :  { %v6577_v63 = vsel %vm6576_vm14, %v6575_v56, %v6560_v8 }
0x5a4c   :  { %v6518_v34 = vpop.permute.xlu1 %6517 }
0x5a4d   :  { %v6521_v62 = vsel %vm6520_vm15, %v6518_v34, 0.0 }
0x5a4e   :  { %6522 = vadd.xlane.f32.xlu0 %v6521_v62 }
0x5a54   :  { %v6543_v43 = vpop.permute.xlu1 %6542 }
0x5a55   :  { %v6545_v23 = vsel %vm6511_vm10, %v6543_v43, 0.0 }
0x5a56   :  { %6546 = vadd.xlane.f32.xlu1 %v6545_v23 }
0x5a62   :  { %6526 = vrot.lane.b32.xlu0 %v6524_v48, %s7491_s20  ;;  %s6604_s20 = sshll.u32 %s7492_s16, 4  ;;  %s6605_s20 = int_to_ptr.vmem [resolvable:$true] %s6604_s20 }
0x5a82   :  { %v6551_v1 = vpop.permute.xlu1 %6550 }
0x5a83   :  { %v6553_v49 = vsel %vm6520_vm15, %v6551_v1, 0.0 }
0x5ac1   :  { %v6523_v57 = vpop.xlane.xlu0 %6522 }
0x5ac2   :  { %v6563_v30 = vrot.slane %v6523_v57, 6 }
0x5ac4   :  { %v6578_v9 = vsel %vm220_vm1, %v6577_v63, %v6563_v30  ;;  %vm6597_vm1 = vcmask 58368  }
0x5ac9   :  { %v6547_v0 = vpop.xlane.xlu1 %6546 }
0x5aca   :  { %v6569_v59 = vrot.slane %v6547_v0, 4 }
0x5ad4   :  { %v6527_v22 = vpop.permute.xlu0 %6526 }
0x5ad5   :  { %v6529_v3 = vsel %vm6493_vm13, %v6527_v22, 0.0 }
0x5ad6   :  { %6530 = vadd.xlane.f32.xlu0 %v6529_v3 }
0x5ade   :  { %6554 = vadd.xlane.f32.xlu0 %v6553_v49 }
0x5b49   :  { %v6531_v31 = vpop.xlane.xlu0 %6530 }
0x5b4a   :  { %v6580_v4 = vsel %vm6579_vm2, %v6578_v9, %v6531_v31 }
0x5b4b   :  { %v6582_v2 = vsel %vm6581_vm3, %v6580_v4, %v6566_v11 }
0x5b4c   :  { %v6584_v39 = vsel %vm6583_vm4, %v6582_v2, %v6569_v59 }
0x5b51   :  { %v6555_v37 = vpop.xlane.xlu0 %6554 }
0x5b52   :  { %v6572_v15 = vrot.slane %v6555_v37, 6 }
0x5b54   :  { %v6586_v46 = vsel %vm6585_vm6, %v6584_v39, %v6572_v15 }
0x5b55   :  { %v6594_v19 = vadd.f32 %v6592_v20, %v6586_v46 }
0x5b57   :  { %v6595_v38 = vmul.f32 1.442695, %v6594_v19 }
0x5b59   :  { %7271 = vpow2.f32 %v6595_v38 }
0x5b5f   :  { %v7272_v27 = vpop.eup %7271 }
0x5b60   :  { %6598 = vst.msk [vmem:[#allocation15] sm:$0x3] %vm6597_vm1, %v7272_v27 }
0x5b61   :  { %6609 = dma.vmem_to_hbm [thread:$0]  %s6605_s20, 32, %s6607_s27, [#allocation5]  }
0x5b62   :  { %7476 = dma.done.wait [#allocation5], 32  }
0x5b63   :  { %7477 = vsyncadd [#allocation5], 4294967264 }
0x5b64   :  { %6618 = vsyncpa [#allocation4], 1 }
0x5b65   :  { %6619 = vsyncpa [#allocation7], 1 }
0x5b66   :  { %6620 = vsyncpa [#allocation10], 1 }
0x5b67   :  { %6621 = vsyncpa [#allocation13], 1 }
0x5b68   :  { %6622 = vsyncpa [#allocation5], 1 }

</bundles_post_ra>
